<compile_context>
chip_gen: v5e
topology: v5e:2x2
jax: 0.10.0
libtpu: 0.0.40
codegen_flags: <defaults>
</compile_context>

<pallas_src>
from functools import partial

import jax
import jax.numpy as jnp
from jax import lax
from jax.experimental import pallas as pl
from jax.experimental.pallas import tpu as pltpu

# ----------------------------- hyper-params ----------------------------------
DIM = 128       # feature dimension (PyTorch default, 128-lane aligned)
HIDDEN = 128    # encoder hidden width (128-lane aligned)
M_MOM = 0.999   # MoCo momentum
TEMP = 0.07     # softmax temperature


def _bf16_eup_ok():
    """Use bf16 exp only on chips with a bf16 EUP (v6e / v7x); not v5e/v4."""
    try:
        kind = jax.devices()[0].device_kind.lower()
    except Exception:
        return False
    return ("v6" in kind) or ("v7" in kind)


def _pick_tile(n):
    """Largest square tile (<=512) dividing N while keeping >=2 row tiles
    (so the v7x 2-TC 'parallel' row axis never idles a core)."""
    for t in (512, 256, 128):
        if n % t == 0 and n // t >= 2:
            return t
    assert n % 128 == 0, "B + K must be a multiple of 128"
    return 128


# =============================================================================
# Kernel 1: momentum update + query/key encoders + in-place enqueue into bank
# =============================================================================
def _encode_update_enqueue_kernel(ptr_ref, xq_ref, xk_ref,
                                  wq1_ref, bq1_ref, wq2_ref, bq2_ref,
                                  wk1_ref, bk1_ref, wk2_ref, bk2_ref,
                                  bank_in_ref,
                                  bank_out_ref, wk1o_ref, bk1o_ref, wk2o_ref, bk2o_ref,
                                  q_stage, k_stage, dma_sem,
                                  *, momentum, batch):
    del bank_in_ref  # same HBM buffer as bank_out_ref (input_output_aliases)

    # ---- momentum update of key-encoder params (fused, reused below) --------
    m = jnp.float32(momentum)
    wk1 = wk1_ref[...] * m + wq1_ref[...] * (1.0 - m)
    bk1 = bk1_ref[...] * m + bq1_ref[...] * (1.0 - m)
    wk2 = wk2_ref[...] * m + wq2_ref[...] * (1.0 - m)
    bk2 = bk2_ref[...] * m + bq2_ref[...] * (1.0 - m)
    wk1o_ref[...] = wk1
    bk1o_ref[...] = bk1
    wk2o_ref[...] = wk2
    bk2o_ref[...] = bk2

    # ---- 2-layer MLP encoder: bf16 MXU inputs, f32 accumulation -------------
    # NOTE(perf): at B=16 the MXU passes are tiny (HBM-bound on the weights);
    # if B or the backbone grows, stack xq/xk and tile the F axis instead.
    def encode(x, w1, b1, w2, b2):
        h = jnp.dot(x.astype(jnp.bfloat16), w1.astype(jnp.bfloat16),
                    preferred_element_type=jnp.float32) + b1
        h = jnp.maximum(h, 0.0)
        z = jnp.dot(h.astype(jnp.bfloat16), w2.astype(jnp.bfloat16),
                    preferred_element_type=jnp.float32) + b2
        # F.normalize(z, dim=1) via EUP rsqrt (no VALU divide)
        ssq = jnp.sum(z * z, axis=1, keepdims=True)
        return z * lax.rsqrt(jnp.maximum(ssq, 1e-24))

    q_stage[...] = encode(xq_ref[...], wq1_ref[...], bq1_ref[...],
                          wq2_ref[...], bq2_ref[...]).astype(q_stage.dtype)
    k_stage[...] = encode(xk_ref[...], wk1, bk1, wk2, bk2).astype(k_stage.dtype)

    # ---- enqueue: write only 2*B rows of the HBM bank, in place -------------
    #   bank[0:B]            <- q   (fresh query features each step)
    #   bank[B+ptr:B+ptr+B]  <- k   (circular queue slot)
    # Module invariant (PyTorch asserts K % B == 0) => ptr is a multiple of B.
    ptr = pl.multiple_of(ptr_ref[0], batch)
    cp_q = pltpu.make_async_copy(q_stage, bank_out_ref.at[pl.ds(0, batch)],
                                 dma_sem.at[0])
    cp_k = pltpu.make_async_copy(k_stage, bank_out_ref.at[pl.ds(batch + ptr, batch)],
                                 dma_sem.at[1])
    cp_q.start()
    cp_k.start()
    cp_q.wait()
    cp_k.wait()


def encode_update_enqueue(params_q, params_k, bank, ptr, im_q, im_k,
                          *, momentum=M_MOM):
    b = im_q.shape[0]
    xq = im_q.reshape(b, -1).astype(jnp.float32)
    xk = im_k.reshape(b, -1).astype(jnp.float32)
    f = xq.shape[1]
    n, d = bank.shape
    h = params_q["w1"].shape[1]
    ptr_arr = jnp.reshape(ptr, (1,)).astype(jnp.int32)

    def full(shape):
        return pl.BlockSpec(shape, lambda i: (0,) * len(shape))

    outs = pl.pallas_call(
        partial(_encode_update_enqueue_kernel, momentum=momentum, batch=b),
        grid=(1,),
        in_specs=[
            pl.BlockSpec(memory_space=pltpu.MemorySpace.SMEM),      # queue ptr
            full((b, f)), full((b, f)),                             # im_q, im_k (flat)
            full((f, h)), full((1, h)), full((h, d)), full((1, d)), # params_q
            full((f, h)), full((1, h)), full((h, d)), full((1, d)), # params_k (old)
            pl.BlockSpec(memory_space=pl.ANY),                      # bank stays in HBM
        ],
        out_specs=[
            pl.BlockSpec(memory_space=pl.ANY),                      # bank (aliased)
            full((f, h)), full((1, h)), full((h, d)), full((1, d)), # params_k (new)
        ],
        out_shape=[
            jax.ShapeDtypeStruct((n, d), bank.dtype),
            jax.ShapeDtypeStruct((f, h), jnp.float32),
            jax.ShapeDtypeStruct((1, h), jnp.float32),
            jax.ShapeDtypeStruct((h, d), jnp.float32),
            jax.ShapeDtypeStruct((1, d), jnp.float32),
        ],
        scratch_shapes=[
            pltpu.VMEM((b, d), bank.dtype),      # q rows staged for DMA
            pltpu.VMEM((b, d), bank.dtype),      # k rows staged for DMA
            pltpu.SemaphoreType.DMA((2,)),
        ],
        input_output_aliases={11: 0},            # P8: bank updated in place
        compiler_params=pltpu.CompilerParams(
            dimension_semantics=("arbitrary",),
            vmem_limit_bytes=32 * 1024 * 1024),
    )(ptr_arr, xq, xk,
      params_q["w1"], params_q["b1"], params_q["w2"], params_q["b2"],
      params_k["w1"], params_k["b1"], params_k["w2"], params_k["b2"],
      bank)

    bank_new = outs[0]
    params_k_new = {"w1": outs[1], "b1": outs[2], "w2": outs[3], "b2": outs[4]}
    return bank_new, params_k_new


# =============================================================================
# Kernel 2: SupCon / MoCo loss, flash-style tiled online log-sum-exp
# =============================================================================
def _supcon_loss_kernel(fr_ref, fc_ref, lc_ref, lr_ref, npinv_ref, out_ref,
                        m_scr, l_scr, s_scr, frs_scr,
                        *, inv_temp, use_bf16_exp):
    ki = pl.program_id(1)
    nk = pl.num_programs(1)
    tr = fr_ref.shape[0]
    tc = fc_ref.shape[0]

    @pl.when(ki == 0)
    def _init():
        m_scr[...] = jnp.full(m_scr.shape, -jnp.inf, dtype=m_scr.dtype)
        l_scr[...] = jnp.zeros(l_scr.shape, dtype=l_scr.dtype)
        s_scr[...] = jnp.zeros(s_scr.shape, dtype=s_scr.dtype)
        # 1/T folded ONCE into the resident row block (bf16 for the MXU),
        # instead of a full (tr, tc) f32 multiply every column step.
        frs_scr[...] = (fr_ref[...].astype(jnp.float32) * inv_temp
                        ).astype(frs_scr.dtype)

    # scaled similarity tile: bf16 MXU inputs, f32 accumulation
    sim = lax.dot_general(frs_scr[...], fc_ref[...],
                          (((1,), (1,)), ((), ())),
                          preferred_element_type=jnp.float32)

    # online log-sum-exp over the column (reduction) axis.
    # NB: the row max includes the diagonal (like the PyTorch reference);
    #     the sum-exp excludes it (logits_mask), but only block-diagonal
    #     tiles ever contain diagonal elements.
    m_prev = m_scr[...]
    m_new = jnp.maximum(m_prev, jnp.max(sim, axis=1, keepdims=True))
    alpha = jnp.exp(m_prev - m_new)

    if use_bf16_exp:  # v6e / v7x: bf16 EUP ~2x exp throughput
        exp_s = jnp.exp((sim - m_new).astype(jnp.bfloat16)).astype(jnp.float32)
    else:             # v5e: no bf16 EUP, stay in f32
        exp_s = jnp.exp(sim - m_new)

    pos_raw = lc_ref[...] == lr_ref[...]          # (tr, tc) same-label mask

    # row_tile == col_tile and both grids are aligned, so the only tiles that
    # touch the diagonal are qi == ki.
    is_diag = pl.program_id(0) == ki

    @pl.when(is_diag)
    def _accum_diag():
        ii = lax.broadcasted_iota(jnp.int32, (tr, tc), 0)
        jj = lax.broadcasted_iota(jnp.int32, (tr, tc), 1)
        off = ii != jj
        l_scr[...] = alpha * l_scr[...] + jnp.sum(
            jnp.where(off, exp_s, 0.0), axis=1, keepdims=True)
        s_scr[...] = s_scr[...] + jnp.sum(
            jnp.where(jnp.logical_and(off, pos_raw), sim, 0.0),
            axis=1, keepdims=True)

    @pl.when(jnp.logical_not(is_diag))
    def _accum_off():
        # mask-free hot path: no iota / compare-with-diagonal / extra selects
        l_scr[...] = alpha * l_scr[...] + jnp.sum(exp_s, axis=1, keepdims=True)
        s_scr[...] = s_scr[...] + jnp.sum(
            jnp.where(pos_raw, sim, 0.0), axis=1, keepdims=True)

    m_scr[...] = m_new

    @pl.when(ki == nk - 1)
    def _finalize():
        # per-row loss:  m + log(sum exp) - sum(pos*sim) / n_pos
        # (1/n_pos precomputed in the wrapper; rows with zero positives use
        #  n_pos=1 instead of the reference's NaN — documented divergence)
        per_row = m_scr[...] + jnp.log(l_scr[...]) - s_scr[...] * npinv_ref[...]
        # one partial sum per row tile, written as a single lane-dense block
        tile_sum = jnp.sum(per_row, axis=0, keepdims=True)        # (1, 1)
        out_ref[0] = jnp.broadcast_to(tile_sum, out_ref.shape[1:])  # (8, 128)


def supcon_loss(bank, label_bank, n_pos_inv, *, temperature=TEMP, tile=None):
    n, d = bank.shape
    if tile is None:
        tile = _pick_tile(n)
    assert n % tile == 0, "B + K must be a multiple of the tile size"
    nt = n // tile

    lab_col = label_bank.reshape(n, 1).astype(jnp.int32)
    lab_row = label_bank.reshape(1, n).astype(jnp.int32)
    npinv = n_pos_inv.reshape(n, 1).astype(jnp.float32)

    # TODO(synk): on v5e, if wall > compute at large column tiles, add
    # pipeline_mode=pl.Buffered(3) on the streamed fc BlockSpec.
    per_tile = pl.pallas_call(
        partial(_supcon_loss_kernel, inv_temp=1.0 / temperature,
                use_bf16_exp=_bf16_eup_ok()),
        grid=(nt, nt),                            # (parallel rows, reduction cols)
        in_specs=[
            pl.BlockSpec((tile, d), lambda qi, ki: (qi, 0)),   # resident row block
            pl.BlockSpec((tile, d), lambda qi, ki: (ki, 0)),   # streamed col tiles
            pl.BlockSpec((tile, 1), lambda qi, ki: (qi, 0)),   # row labels
            pl.BlockSpec((1, tile), lambda qi, ki: (0, ki)),   # col labels
            pl.BlockSpec((tile, 1), lambda qi, ki: (qi, 0)),   # 1 / n_pos per row
        ],
        out_specs=pl.BlockSpec((1, 8, 128), lambda qi, ki: (qi, 0, 0)),
        out_shape=jax.ShapeDtypeStruct((nt, 8, 128), jnp.float32),
        scratch_shapes=[pltpu.VMEM((tile, 1), jnp.float32)] * 3   # m, l, s
                     + [pltpu.VMEM((tile, d), bank.dtype)],       # scaled rows
        compiler_params=pltpu.CompilerParams(
            dimension_semantics=("parallel", "arbitrary"),
            vmem_limit_bytes=32 * 1024 * 1024),   # stay within v7x's 64 MiB VMEM
    )(bank, bank, lab_col, lab_row, npinv)

    # tiny final reduce: one partial sum per row tile -> mean over N rows
    return jnp.sum(per_tile[:, 0, 0]) / n


# =============================================================================
# Full forward (functional state: key params, feature bank, label bank, ptr)
# =============================================================================
def sup_moco_forward(params_q, params_k, bank, label_bank, ptr, im_q, im_k,
                     targets, *, num_classes=2):
    b = im_q.shape[0]
    n = bank.shape[0]
    k_sz = n - b

    # fused: momentum update + encoder_q + encoder_k + in-place enqueue
    bank, params_k = encode_update_enqueue(params_q, params_k, bank, ptr, im_q, im_k)

    # label bank update (tiny (N,) int32 buffer; plain-JAX glue)
    tgt = targets.astype(label_bank.dtype)
    label_bank = lax.dynamic_update_slice(label_bank, tgt, (0,))
    label_bank = lax.dynamic_update_slice(label_bank, tgt, (b + ptr,))

    # per-row positive counts (excluding self), O(N) scatter-add in plain JAX
    counts = jnp.zeros((num_classes,), jnp.int32).at[label_bank].add(1)
    n_pos = jnp.maximum(counts[label_bank] - 1, 1)       # guard: no-positive rows
    n_pos_inv = 1.0 / n_pos.astype(jnp.float32)

    loss = supcon_loss(bank, label_bank, n_pos_inv)
    new_ptr = (ptr + b) % k_sz
    return loss, (params_k, bank, label_bank, new_ptr)


# ----------------------------- driver -----------------------------------------
if __name__ == "__main__":
    key = jax.random.PRNGKey(0)
    k_imq, k_imk, k_w1, k_w2, k_queue, k_lab, k_tgt = jax.random.split(key, 7)

    B, C, IMG = 16, 4, 16                 # small shapes; K % B == 0 as in reference
    F = C * IMG * IMG                     # 1024
    K = 496                               # queue size -> N = B + K = 512
    N = B + K

    im_q = jax.random.normal(k_imq, (B, C, IMG, IMG), jnp.float32)
    im_k = jax.random.normal(k_imk, (B, C, IMG, IMG), jnp.float32)
    targets = jax.random.randint(k_tgt, (B,), 0, 2, jnp.int32)

    # deterministic 2-layer MLP encoder params (the PyTorch `network` is
    # unspecified); key encoder perturbed so the momentum-update check is
    # non-trivial (forward semantics hold for any key-encoder params).
    params_q = {
        "w1": 0.05 * jax.random.normal(k_w1, (F, HIDDEN), jnp.float32),
        "b1": jnp.zeros((1, HIDDEN), jnp.float32),
        "w2": 0.05 * jax.random.normal(k_w2, (HIDDEN, DIM), jnp.float32),
        "b2": jnp.zeros((1, DIM), jnp.float32),
    }
    params_k0 = {
        "w1": params_q["w1"] * 0.98 + 0.003,
        "b1": params_q["b1"] + 0.01,
        "w2": params_q["w2"] * 1.02 - 0.002,
        "b2": params_q["b2"] - 0.01,
    }

    # queue buffer, row-major (K, DIM), each key L2-normalized (== PyTorch
    # normalize(queue, dim=0) on the (dim, K) layout); stored in bf16.
    queue = jax.random.normal(k_queue, (K, DIM), jnp.float32)
    queue = queue * lax.rsqrt(jnp.maximum(jnp.sum(queue * queue, axis=1,
                                                  keepdims=True), 1e-24))
    bank0 = jnp.concatenate([jnp.zeros((B, DIM), jnp.float32), queue],
                            axis=0).astype(jnp.bfloat16)
    queue_label = jax.random.randint(k_lab, (K,), 0, 2, jnp.int32)
    label_bank0 = jnp.concatenate([jnp.zeros((B,), jnp.int32), queue_label], axis=0)
    ptr0 = jnp.int32(0)

    # ---------------- references computed BEFORE the donating call -----------
    hi = jax.lax.Precision.HIGHEST

    def ref_encode(x, p):
        xf = x.reshape(x.shape[0], -1)
        h = jnp.maximum(jnp.dot(xf, p["w1"], precision=hi) + p["b1"], 0.0)
        z = jnp.dot(h, p["w2"], precision=hi) + p["b2"]
        return z / jnp.maximum(jnp.linalg.norm(z, axis=1, keepdims=True), 1e-12)

    ref_pk = jax.tree_util.tree_map(
        lambda pk, pq: pk * M_MOM + pq * (1.0 - M_MOM), params_k0, params_q)
    ref_q = ref_encode(im_q, params_q)
    ref_k = ref_encode(im_k, ref_pk)
    queue_tail_bf16 = queue.astype(jnp.bfloat16)[B:]   # rows untouched by enqueue

    # donate the mutable state (params_k, bank, label_bank, ptr) so XLA honors
    # the in-kernel input_output_aliases and skips the defensive bank copy.
    fwd = jax.jit(sup_moco_forward, donate_argnums=(1, 2, 3, 4),
                  static_argnames=("num_classes",))
    loss, (params_k_new, bank_new, label_bank_new, ptr_new) = fwd(
        params_q, params_k0, bank0, label_bank0, ptr0, im_q, im_k, targets,
        num_classes=2)
    loss = jax.block_until_ready(loss)

    # ---------------- lightweight correctness checks (pure-JAX reference) ----
    for name in ("w1", "b1", "w2", "b2"):
        assert jnp.allclose(params_k_new[name], ref_pk[name], rtol=1e-5, atol=1e-5)

    bank_f32 = bank_new.astype(jnp.float32)
    assert jnp.allclose(bank_f32[:B], ref_q, rtol=5e-2, atol=2e-2)
    assert jnp.allclose(bank_f32[B:2 * B], ref_k, rtol=5e-2, atol=2e-2)
    # untouched queue rows must be preserved by the in-place (aliased) enqueue
    assert jnp.array_equal(bank_new[2 * B:], queue_tail_bf16)

    def ref_loss(feat, lab, t):
        sim = jnp.dot(feat, feat.T, precision=hi) / t
        sim = sim - jnp.max(sim, axis=1, keepdims=True)
        nn = feat.shape[0]
        lmask = 1.0 - jnp.eye(nn, dtype=jnp.float32)
        pmask = (lab[:, None] == lab[None, :]).astype(jnp.float32) * lmask
        logz = jnp.log(jnp.sum(jnp.exp(sim) * lmask, axis=1, keepdims=True))
        mlpp = jnp.sum(pmask * (sim - logz), axis=1) / jnp.sum(pmask, axis=1)
        return -jnp.mean(mlpp)

    ref = ref_loss(bank_f32, label_bank_new, TEMP)
    assert loss.shape == () and bool(jnp.isfinite(loss))
    # tolerance absorbs bf16 MXU inputs, 1/T folded into bf16 rows, bf16 exp
    assert jnp.allclose(loss, ref, rtol=2e-2, atol=2e-2)
    assert int(ptr_new) == B % K

    print("KERNEL_OK")
</pallas_src>

<mosaic_0001>
module attributes {stable_mosaic.version = 11 : i64} {
  func.func @_encode_update_enqueue_kernel(%arg0: i32, %arg1: memref<1xi32, #tpu.memory_space<smem>>, %arg2: memref<16x1024xf32, #tpu.memory_space<vmem>>, %arg3: memref<16x1024xf32, #tpu.memory_space<vmem>>, %arg4: memref<1024x128xf32, #tpu.memory_space<vmem>>, %arg5: memref<1x128xf32, #tpu.memory_space<vmem>>, %arg6: memref<128x128xf32, #tpu.memory_space<vmem>>, %arg7: memref<1x128xf32, #tpu.memory_space<vmem>>, %arg8: memref<1024x128xf32, #tpu.memory_space<vmem>>, %arg9: memref<1x128xf32, #tpu.memory_space<vmem>>, %arg10: memref<128x128xf32, #tpu.memory_space<vmem>>, %arg11: memref<1x128xf32, #tpu.memory_space<vmem>>, %arg12: memref<512x128xbf16, #tpu.memory_space<any>>, %arg13: memref<512x128xbf16, #tpu.memory_space<any>>, %arg14: memref<1024x128xf32, #tpu.memory_space<vmem>>, %arg15: memref<1x128xf32, #tpu.memory_space<vmem>>, %arg16: memref<128x128xf32, #tpu.memory_space<vmem>>, %arg17: memref<1x128xf32, #tpu.memory_space<vmem>>, %arg18: memref<16x128xbf16, #tpu.memory_space<vmem>>, %arg19: memref<16x128xbf16, #tpu.memory_space<vmem>>, %arg20: memref<2x!tpu.dma_semaphore, #tpu.memory_space<semaphore_mem>>) attributes {dimension_semantics = [#tpu.dimension_semantics<arbitrary>], iteration_bounds = array<i64: 1>, scalar_prefetch = 0 : i64, scratch_operands = 3 : i64, tpu.core_type = #tpu.core_type<tc>, window_params = [{transform_indices = @transform_0, window_bounds = array<i64: 1>}, {pipeline_mode = #tpu.pipeline_mode<synchronous>, transform_indices = @transform_1, window_bounds = array<i64: 16, 1024>}, {pipeline_mode = #tpu.pipeline_mode<synchronous>, transform_indices = @transform_2, window_bounds = array<i64: 16, 1024>}, {pipeline_mode = #tpu.pipeline_mode<synchronous>, transform_indices = @transform_3, window_bounds = array<i64: 1024, 128>}, {pipeline_mode = #tpu.pipeline_mode<synchronous>, transform_indices = @transform_4, window_bounds = array<i64: 1, 128>}, {pipeline_mode = #tpu.pipeline_mode<synchronous>, transform_indices = @transform_5, window_bounds = array<i64: 128, 128>}, {pipeline_mode = #tpu.pipeline_mode<synchronous>, transform_indices = @transform_6, window_bounds = array<i64: 1, 128>}, {pipeline_mode = #tpu.pipeline_mode<synchronous>, transform_indices = @transform_7, window_bounds = array<i64: 1024, 128>}, {pipeline_mode = #tpu.pipeline_mode<synchronous>, transform_indices = @transform_8, window_bounds = array<i64: 1, 128>}, {pipeline_mode = #tpu.pipeline_mode<synchronous>, transform_indices = @transform_9, window_bounds = array<i64: 128, 128>}, {pipeline_mode = #tpu.pipeline_mode<synchronous>, transform_indices = @transform_10, window_bounds = array<i64: 1, 128>}, {}, {}, {pipeline_mode = #tpu.pipeline_mode<synchronous>, transform_indices = @transform_13, window_bounds = array<i64: 1024, 128>}, {pipeline_mode = #tpu.pipeline_mode<synchronous>, transform_indices = @transform_14, window_bounds = array<i64: 1, 128>}, {pipeline_mode = #tpu.pipeline_mode<synchronous>, transform_indices = @transform_15, window_bounds = array<i64: 128, 128>}, {pipeline_mode = #tpu.pipeline_mode<synchronous>, transform_indices = @transform_16, window_bounds = array<i64: 1, 128>}]} {
    %c0 = arith.constant 0 : index
    %c0_0 = arith.constant 0 : index
    %0 = vector.load %arg8[%c0, %c0_0] : memref<1024x128xf32, #tpu.memory_space<vmem>>, vector<1024x128xf32>
    %cst = arith.constant 9.990000e-01 : f32
    %1 = vector.broadcast %cst : f32 to vector<1024x128xf32>
    %2 = arith.mulf %0, %1 : vector<1024x128xf32>
    %c0_1 = arith.constant 0 : index
    %c0_2 = arith.constant 0 : index
    %3 = vector.load %arg4[%c0_1, %c0_2] : memref<1024x128xf32, #tpu.memory_space<vmem>>, vector<1024x128xf32>
    %cst_3 = arith.constant 1.000000e+00 : f32
    %cst_4 = arith.constant 9.990000e-01 : f32
    %4 = arith.subf %cst_3, %cst_4 : f32
    %5 = vector.broadcast %4 : f32 to vector<1024x128xf32>
    %6 = arith.mulf %3, %5 : vector<1024x128xf32>
    %7 = arith.addf %2, %6 : vector<1024x128xf32>
    %c0_5 = arith.constant 0 : index
    %c0_6 = arith.constant 0 : index
    %8 = vector.load %arg9[%c0_5, %c0_6] : memref<1x128xf32, #tpu.memory_space<vmem>>, vector<1x128xf32>
    %cst_7 = arith.constant 9.990000e-01 : f32
    %9 = vector.broadcast %cst_7 : f32 to vector<1x128xf32>
    %10 = arith.mulf %8, %9 : vector<1x128xf32>
    %c0_8 = arith.constant 0 : index
    %c0_9 = arith.constant 0 : index
    %11 = vector.load %arg5[%c0_8, %c0_9] : memref<1x128xf32, #tpu.memory_space<vmem>>, vector<1x128xf32>
    %cst_10 = arith.constant 1.000000e+00 : f32
    %cst_11 = arith.constant 9.990000e-01 : f32
    %12 = arith.subf %cst_10, %cst_11 : f32
    %13 = vector.broadcast %12 : f32 to vector<1x128xf32>
    %14 = arith.mulf %11, %13 : vector<1x128xf32>
    %15 = arith.addf %10, %14 : vector<1x128xf32>
    %c0_12 = arith.constant 0 : index
    %c0_13 = arith.constant 0 : index
    %16 = vector.load %arg10[%c0_12, %c0_13] : memref<128x128xf32, #tpu.memory_space<vmem>>, vector<128x128xf32>
    %cst_14 = arith.constant 9.990000e-01 : f32
    %17 = vector.broadcast %cst_14 : f32 to vector<128x128xf32>
    %18 = arith.mulf %16, %17 : vector<128x128xf32>
    %c0_15 = arith.constant 0 : index
    %c0_16 = arith.constant 0 : index
    %19 = vector.load %arg6[%c0_15, %c0_16] : memref<128x128xf32, #tpu.memory_space<vmem>>, vector<128x128xf32>
    %cst_17 = arith.constant 1.000000e+00 : f32
    %cst_18 = arith.constant 9.990000e-01 : f32
    %20 = arith.subf %cst_17, %cst_18 : f32
    %21 = vector.broadcast %20 : f32 to vector<128x128xf32>
    %22 = arith.mulf %19, %21 : vector<128x128xf32>
    %23 = arith.addf %18, %22 : vector<128x128xf32>
    %c0_19 = arith.constant 0 : index
    %c0_20 = arith.constant 0 : index
    %24 = vector.load %arg11[%c0_19, %c0_20] : memref<1x128xf32, #tpu.memory_space<vmem>>, vector<1x128xf32>
    %cst_21 = arith.constant 9.990000e-01 : f32
    %25 = vector.broadcast %cst_21 : f32 to vector<1x128xf32>
    %26 = arith.mulf %24, %25 : vector<1x128xf32>
    %c0_22 = arith.constant 0 : index
    %c0_23 = arith.constant 0 : index
    %27 = vector.load %arg7[%c0_22, %c0_23] : memref<1x128xf32, #tpu.memory_space<vmem>>, vector<1x128xf32>
    %cst_24 = arith.constant 1.000000e+00 : f32
    %cst_25 = arith.constant 9.990000e-01 : f32
    %28 = arith.subf %cst_24, %cst_25 : f32
    %29 = vector.broadcast %28 : f32 to vector<1x128xf32>
    %30 = arith.mulf %27, %29 : vector<1x128xf32>
    %31 = arith.addf %26, %30 : vector<1x128xf32>
    %c0_26 = arith.constant 0 : index
    %c0_27 = arith.constant 0 : index
    %32 = vector.load %arg14[%c0_26, %c0_27] : memref<1024x128xf32, #tpu.memory_space<vmem>>, vector<1024x128xf32>
    tpu.vector_store %arg14[%c0_26, %c0_27], %7 {strides = array<i32>} : memref<1024x128xf32, #tpu.memory_space<vmem>>, vector<1024x128xf32>,
    %c0_28 = arith.constant 0 : index
    %c0_29 = arith.constant 0 : index
    %33 = vector.load %arg15[%c0_28, %c0_29] : memref<1x128xf32, #tpu.memory_space<vmem>>, vector<1x128xf32>
    tpu.vector_store %arg15[%c0_28, %c0_29], %15 {strides = array<i32>} : memref<1x128xf32, #tpu.memory_space<vmem>>, vector<1x128xf32>,
    %c0_30 = arith.constant 0 : index
    %c0_31 = arith.constant 0 : index
    %34 = vector.load %arg16[%c0_30, %c0_31] : memref<128x128xf32, #tpu.memory_space<vmem>>, vector<128x128xf32>
    tpu.vector_store %arg16[%c0_30, %c0_31], %23 {strides = array<i32>} : memref<128x128xf32, #tpu.memory_space<vmem>>, vector<128x128xf32>,
    %c0_32 = arith.constant 0 : index
    %c0_33 = arith.constant 0 : index
    %35 = vector.load %arg17[%c0_32, %c0_33] : memref<1x128xf32, #tpu.memory_space<vmem>>, vector<1x128xf32>
    tpu.vector_store %arg17[%c0_32, %c0_33], %31 {strides = array<i32>} : memref<1x128xf32, #tpu.memory_space<vmem>>, vector<1x128xf32>,
    %c0_34 = arith.constant 0 : index
    %c0_35 = arith.constant 0 : index
    %36 = vector.load %arg2[%c0_34, %c0_35] : memref<16x1024xf32, #tpu.memory_space<vmem>>, vector<16x1024xf32>
    %c0_36 = arith.constant 0 : index
    %c0_37 = arith.constant 0 : index
    %37 = vector.load %arg4[%c0_36, %c0_37] : memref<1024x128xf32, #tpu.memory_space<vmem>>, vector<1024x128xf32>
    %c0_38 = arith.constant 0 : index
    %c0_39 = arith.constant 0 : index
    %38 = vector.load %arg5[%c0_38, %c0_39] : memref<1x128xf32, #tpu.memory_space<vmem>>, vector<1x128xf32>
    %c0_40 = arith.constant 0 : index
    %c0_41 = arith.constant 0 : index
    %39 = vector.load %arg6[%c0_40, %c0_41] : memref<128x128xf32, #tpu.memory_space<vmem>>, vector<128x128xf32>
    %c0_42 = arith.constant 0 : index
    %c0_43 = arith.constant 0 : index
    %40 = vector.load %arg7[%c0_42, %c0_43] : memref<1x128xf32, #tpu.memory_space<vmem>>, vector<1x128xf32>
    %41 = arith.truncf %36 : vector<16x1024xf32> to vector<16x1024xbf16>
    %42 = arith.truncf %37 : vector<1024x128xf32> to vector<1024x128xbf16>
    %cst_44 = arith.constant dense<0.000000e+00> : vector<16x128xf32>
    %43 = tpu.matmul %41, %42, %cst_44 {dimension_numbers = #tpu.dot_dimension_numbers<[1], [0], [0], [1], [0, 0, 1, 1], [], []>} : vector<16x1024xbf16>, vector<1024x128xbf16>, vector<16x128xf32> -> vector<16x128xf32>
    %44 = vector.broadcast %38 : vector<1x128xf32> to vector<16x128xf32>
    %45 = arith.addf %43, %44 : vector<16x128xf32>
    %cst_45 = arith.constant 0.000000e+00 : f32
    %46 = vector.broadcast %cst_45 : f32 to vector<16x128xf32>
    %47 = arith.maximumf %45, %46 : vector<16x128xf32>
    %48 = arith.truncf %47 : vector<16x128xf32> to vector<16x128xbf16>
    %49 = arith.truncf %39 : vector<128x128xf32> to vector<128x128xbf16>
    %cst_46 = arith.constant dense<0.000000e+00> : vector<16x128xf32>
    %50 = tpu.matmul %48, %49, %cst_46 {dimension_numbers = #tpu.dot_dimension_numbers<[1], [0], [0], [1], [0, 0, 1, 1], [], []>} : vector<16x128xbf16>, vector<128x128xbf16>, vector<16x128xf32> -> vector<16x128xf32>
    %51 = vector.broadcast %40 : vector<1x128xf32> to vector<16x128xf32>
    %52 = arith.addf %50, %51 : vector<16x128xf32>
    %53 = arith.mulf %52, %52 : vector<16x128xf32>
    %cst_47 = arith.constant dense<0.000000e+00> : vector<16xf32>
    %54 = vector.multi_reduction <add>, %53, %cst_47 [1] : vector<16x128xf32> to vector<16xf32>
    %55 = vector.shape_cast %54 : vector<16xf32> to vector<16x1xf32>
    %cst_48 = arith.constant 1.000000e-24 : f32
    %56 = vector.broadcast %cst_48 : f32 to vector<16x1xf32>
    %57 = arith.maximumf %55, %56 : vector<16x1xf32>
    %58 = math.rsqrt %57 : vector<16x1xf32>
    %59 = vector.broadcast %58 : vector<16x1xf32> to vector<16x128xf32>
    %60 = arith.mulf %52, %59 : vector<16x128xf32>
    %61 = arith.truncf %60 : vector<16x128xf32> to vector<16x128xbf16>
    %c0_49 = arith.constant 0 : index
    %c0_50 = arith.constant 0 : index
    %62 = vector.load %arg18[%c0_49, %c0_50] : memref<16x128xbf16, #tpu.memory_space<vmem>>, vector<16x128xbf16>
    tpu.vector_store %arg18[%c0_49, %c0_50], %61 {strides = array<i32>} : memref<16x128xbf16, #tpu.memory_space<vmem>>, vector<16x128xbf16>,
    %c0_51 = arith.constant 0 : index
    %c0_52 = arith.constant 0 : index
    %63 = vector.load %arg3[%c0_51, %c0_52] : memref<16x1024xf32, #tpu.memory_space<vmem>>, vector<16x1024xf32>
    %64 = arith.truncf %63 : vector<16x1024xf32> to vector<16x1024xbf16>
    %65 = arith.truncf %7 : vector<1024x128xf32> to vector<1024x128xbf16>
    %cst_53 = arith.constant dense<0.000000e+00> : vector<16x128xf32>
    %66 = tpu.matmul %64, %65, %cst_53 {dimension_numbers = #tpu.dot_dimension_numbers<[1], [0], [0], [1], [0, 0, 1, 1], [], []>} : vector<16x1024xbf16>, vector<1024x128xbf16>, vector<16x128xf32> -> vector<16x128xf32>
    %67 = vector.broadcast %15 : vector<1x128xf32> to vector<16x128xf32>
    %68 = arith.addf %66, %67 : vector<16x128xf32>
    %cst_54 = arith.constant 0.000000e+00 : f32
    %69 = vector.broadcast %cst_54 : f32 to vector<16x128xf32>
    %70 = arith.maximumf %68, %69 : vector<16x128xf32>
    %71 = arith.truncf %70 : vector<16x128xf32> to vector<16x128xbf16>
    %72 = arith.truncf %23 : vector<128x128xf32> to vector<128x128xbf16>
    %cst_55 = arith.constant dense<0.000000e+00> : vector<16x128xf32>
    %73 = tpu.matmul %71, %72, %cst_55 {dimension_numbers = #tpu.dot_dimension_numbers<[1], [0], [0], [1], [0, 0, 1, 1], [], []>} : vector<16x128xbf16>, vector<128x128xbf16>, vector<16x128xf32> -> vector<16x128xf32>
    %74 = vector.broadcast %31 : vector<1x128xf32> to vector<16x128xf32>
    %75 = arith.addf %73, %74 : vector<16x128xf32>
    %76 = arith.mulf %75, %75 : vector<16x128xf32>
    %cst_56 = arith.constant dense<0.000000e+00> : vector<16xf32>
    %77 = vector.multi_reduction <add>, %76, %cst_56 [1] : vector<16x128xf32> to vector<16xf32>
    %78 = vector.shape_cast %77 : vector<16xf32> to vector<16x1xf32>
    %cst_57 = arith.constant 1.000000e-24 : f32
    %79 = vector.broadcast %cst_57 : f32 to vector<16x1xf32>
    %80 = arith.maximumf %78, %79 : vector<16x1xf32>
    %81 = math.rsqrt %80 : vector<16x1xf32>
    %82 = vector.broadcast %81 : vector<16x1xf32> to vector<16x128xf32>
    %83 = arith.mulf %75, %82 : vector<16x128xf32>
    %84 = arith.truncf %83 : vector<16x128xf32> to vector<16x128xbf16>
    %c0_58 = arith.constant 0 : index
    %c0_59 = arith.constant 0 : index
    %85 = vector.load %arg19[%c0_58, %c0_59] : memref<16x128xbf16, #tpu.memory_space<vmem>>, vector<16x128xbf16>
    tpu.vector_store %arg19[%c0_58, %c0_59], %84 {strides = array<i32>} : memref<16x128xbf16, #tpu.memory_space<vmem>>, vector<16x128xbf16>,
    %c0_60 = arith.constant 0 : index
    %86 = memref.load %arg1[%c0_60] : memref<1xi32, #tpu.memory_space<smem>>
    %87 = tpu.assume_multiple %86, 16 : i32
    %c16_i32 = arith.constant 16 : i32
    %88 = arith.addi %c16_i32, %87 : i32
    %c0_i32 = arith.constant 0 : i32
    %c0_i32_61 = arith.constant 0 : i32
    %c0_i32_62 = arith.constant 0 : i32
    %89 = tpu.memref_slice %arg13[%c0_i32_61, %c0_i32_62] : memref<512x128xbf16, #tpu.memory_space<any>> -> memref<16x128xbf16, #tpu.memory_space<any>>
    %90 = tpu.memref_slice %arg20[%c0_i32] : memref<2x!tpu.dma_semaphore, #tpu.memory_space<semaphore_mem>> -> memref<1x!tpu.dma_semaphore, #tpu.memory_space<semaphore_mem>>
    %91 = tpu.memref_squeeze %90 : memref<1x!tpu.dma_semaphore, #tpu.memory_space<semaphore_mem>> -> memref<!tpu.dma_semaphore, #tpu.memory_space<semaphore_mem>>
    tpu.enqueue_dma source(%arg18 : memref<16x128xbf16, #tpu.memory_space<vmem>>) target(%89 : memref<16x128xbf16, #tpu.memory_space<any>>) target_semaphore(%91 : memref<!tpu.dma_semaphore, #tpu.memory_space<semaphore_mem>>)
    %c1_i32 = arith.constant 1 : i32
    %c0_i32_63 = arith.constant 0 : i32
    %92 = tpu.memref_slice %arg13[%88, %c0_i32_63] : memref<512x128xbf16, #tpu.memory_space<any>> -> memref<16x128xbf16, #tpu.memory_space<any>>
    %93 = tpu.memref_slice %arg20[%c1_i32] : memref<2x!tpu.dma_semaphore, #tpu.memory_space<semaphore_mem>> -> memref<1x!tpu.dma_semaphore, #tpu.memory_space<semaphore_mem>>
    %94 = tpu.memref_squeeze %93 : memref<1x!tpu.dma_semaphore, #tpu.memory_space<semaphore_mem>> -> memref<!tpu.dma_semaphore, #tpu.memory_space<semaphore_mem>>
    tpu.enqueue_dma source(%arg19 : memref<16x128xbf16, #tpu.memory_space<vmem>>) target(%92 : memref<16x128xbf16, #tpu.memory_space<any>>) target_semaphore(%94 : memref<!tpu.dma_semaphore, #tpu.memory_space<semaphore_mem>>)
    %c0_i32_64 = arith.constant 0 : i32
    %c0_i32_65 = arith.constant 0 : i32
    %c0_i32_66 = arith.constant 0 : i32
    %95 = tpu.memref_slice %arg13[%c0_i32_65, %c0_i32_66] : memref<512x128xbf16, #tpu.memory_space<any>> -> memref<16x128xbf16, #tpu.memory_space<any>>
    %96 = tpu.memref_slice %arg20[%c0_i32_64] : memref<2x!tpu.dma_semaphore, #tpu.memory_space<semaphore_mem>> -> memref<1x!tpu.dma_semaphore, #tpu.memory_space<semaphore_mem>>
    %97 = tpu.memref_squeeze %96 : memref<1x!tpu.dma_semaphore, #tpu.memory_space<semaphore_mem>> -> memref<!tpu.dma_semaphore, #tpu.memory_space<semaphore_mem>>
    tpu.wait_dma2 semaphore(%97 : memref<!tpu.dma_semaphore, #tpu.memory_space<semaphore_mem>>) src(%arg18 : memref<16x128xbf16, #tpu.memory_space<vmem>>) dst(%95 : memref<16x128xbf16, #tpu.memory_space<any>>)
    %c1_i32_67 = arith.constant 1 : i32
    %c0_i32_68 = arith.constant 0 : i32
    %98 = tpu.memref_slice %arg13[%88, %c0_i32_68] : memref<512x128xbf16, #tpu.memory_space<any>> -> memref<16x128xbf16, #tpu.memory_space<any>>
    %99 = tpu.memref_slice %arg20[%c1_i32_67] : memref<2x!tpu.dma_semaphore, #tpu.memory_space<semaphore_mem>> -> memref<1x!tpu.dma_semaphore, #tpu.memory_space<semaphore_mem>>
    %100 = tpu.memref_squeeze %99 : memref<1x!tpu.dma_semaphore, #tpu.memory_space<semaphore_mem>> -> memref<!tpu.dma_semaphore, #tpu.memory_space<semaphore_mem>>
    tpu.wait_dma2 semaphore(%100 : memref<!tpu.dma_semaphore, #tpu.memory_space<semaphore_mem>>) src(%arg19 : memref<16x128xbf16, #tpu.memory_space<vmem>>) dst(%98 : memref<16x128xbf16, #tpu.memory_space<any>>)
    return
  }
  func.func @transform_0(%arg0: i32) -> i32 {
    %c0_i32 = arith.constant 0 : i32
    %c0_i32_0 = arith.constant 0 : i32
    return %c0_i32 : i32
  }
  func.func @transform_1(%arg0: i32) -> (i32, i32) {
    %c0_i32 = arith.constant 0 : i32
    %c0_i32_0 = arith.constant 0 : i32
    %c0_i32_1 = arith.constant 0 : i32
    return %c0_i32, %c0_i32_0 : i32, i32
  }
  func.func @transform_2(%arg0: i32) -> (i32, i32) {
    %c0_i32 = arith.constant 0 : i32
    %c0_i32_0 = arith.constant 0 : i32
    %c0_i32_1 = arith.constant 0 : i32
    return %c0_i32, %c0_i32_0 : i32, i32
  }
  func.func @transform_3(%arg0: i32) -> (i32, i32) {
    %c0_i32 = arith.constant 0 : i32
    %c0_i32_0 = arith.constant 0 : i32
    %c0_i32_1 = arith.constant 0 : i32
    return %c0_i32, %c0_i32_0 : i32, i32
  }
  func.func @transform_4(%arg0: i32) -> (i32, i32) {
    %c0_i32 = arith.constant 0 : i32
    %c0_i32_0 = arith.constant 0 : i32
    %c0_i32_1 = arith.constant 0 : i32
    return %c0_i32, %c0_i32_0 : i32, i32
  }
  func.func @transform_5(%arg0: i32) -> (i32, i32) {
    %c0_i32 = arith.constant 0 : i32
    %c0_i32_0 = arith.constant 0 : i32
    %c0_i32_1 = arith.constant 0 : i32
    return %c0_i32, %c0_i32_0 : i32, i32
  }
  func.func @transform_6(%arg0: i32) -> (i32, i32) {
    %c0_i32 = arith.constant 0 : i32
    %c0_i32_0 = arith.constant 0 : i32
    %c0_i32_1 = arith.constant 0 : i32
    return %c0_i32, %c0_i32_0 : i32, i32
  }
  func.func @transform_7(%arg0: i32) -> (i32, i32) {
    %c0_i32 = arith.constant 0 : i32
    %c0_i32_0 = arith.constant 0 : i32
    %c0_i32_1 = arith.constant 0 : i32
    return %c0_i32, %c0_i32_0 : i32, i32
  }
  func.func @transform_8(%arg0: i32) -> (i32, i32) {
    %c0_i32 = arith.constant 0 : i32
    %c0_i32_0 = arith.constant 0 : i32
    %c0_i32_1 = arith.constant 0 : i32
    return %c0_i32, %c0_i32_0 : i32, i32
  }
  func.func @transform_9(%arg0: i32) -> (i32, i32) {
    %c0_i32 = arith.constant 0 : i32
    %c0_i32_0 = arith.constant 0 : i32
    %c0_i32_1 = arith.constant 0 : i32
    return %c0_i32, %c0_i32_0 : i32, i32
  }
  func.func @transform_10(%arg0: i32) -> (i32, i32) {
    %c0_i32 = arith.constant 0 : i32
    %c0_i32_0 = arith.constant 0 : i32
    %c0_i32_1 = arith.constant 0 : i32
    return %c0_i32, %c0_i32_0 : i32, i32
  }
  func.func @transform_13(%arg0: i32) -> (i32, i32) {
    %c0_i32 = arith.constant 0 : i32
    %c0_i32_0 = arith.constant 0 : i32
    %c0_i32_1 = arith.constant 0 : i32
    return %c0_i32, %c0_i32_0 : i32, i32
  }
  func.func @transform_14(%arg0: i32) -> (i32, i32) {
    %c0_i32 = arith.constant 0 : i32
    %c0_i32_0 = arith.constant 0 : i32
    %c0_i32_1 = arith.constant 0 : i32
    return %c0_i32, %c0_i32_0 : i32, i32
  }
  func.func @transform_15(%arg0: i32) -> (i32, i32) {
    %c0_i32 = arith.constant 0 : i32
    %c0_i32_0 = arith.constant 0 : i32
    %c0_i32_1 = arith.constant 0 : i32
    return %c0_i32, %c0_i32_0 : i32, i32
  }
  func.func @transform_16(%arg0: i32) -> (i32, i32) {
    %c0_i32 = arith.constant 0 : i32
    %c0_i32_0 = arith.constant 0 : i32
    %c0_i32_1 = arith.constant 0 : i32
    return %c0_i32, %c0_i32_0 : i32, i32
  }
}

module attributes {stable_mosaic.version = 11 : i64} {
  func.func @_supcon_loss_kernel(%arg0: i32, %arg1: i32, %arg2: memref<256x128xbf16, #tpu.memory_space<vmem>>, %arg3: memref<256x128xbf16, #tpu.memory_space<vmem>>, %arg4: memref<256x1xi32, #tpu.memory_space<vmem>>, %arg5: memref<1x256xi32, #tpu.memory_space<vmem>>, %arg6: memref<256x1xf32, #tpu.memory_space<vmem>>, %arg7: memref<1x8x128xf32, #tpu.memory_space<vmem>>, %arg8: memref<256x1xf32, #tpu.memory_space<vmem>>, %arg9: memref<256x1xf32, #tpu.memory_space<vmem>>, %arg10: memref<256x1xf32, #tpu.memory_space<vmem>>, %arg11: memref<256x128xbf16, #tpu.memory_space<vmem>>) attributes {dimension_semantics = [#tpu.dimension_semantics<parallel>, #tpu.dimension_semantics<arbitrary>], iteration_bounds = array<i64: 2, 2>, scalar_prefetch = 0 : i64, scratch_operands = 4 : i64, tpu.core_type = #tpu.core_type<tc>, window_params = [{transform_indices = @transform_0, window_bounds = array<i64: 256, 128>}, {transform_indices = @transform_1, window_bounds = array<i64: 256, 128>}, {transform_indices = @transform_2, window_bounds = array<i64: 256, 1>}, {transform_indices = @transform_3, window_bounds = array<i64: 1, 256>}, {transform_indices = @transform_4, window_bounds = array<i64: 256, 1>}, {transform_indices = @transform_5, window_bounds = array<i64: 1, 8, 128>}]} {
    %c0_i32 = arith.constant 0 : i32
    %0 = arith.cmpi eq, %arg1, %c0_i32 : i32
    %1 = arith.extui %0 : i1 to i32
    %c0_i32_0 = arith.constant 0 : i32
    %2 = arith.cmpi ne, %1, %c0_i32_0 : i32
    scf.if %2 {
      %cst_16 = arith.constant 0xFF800000 : f32
      %30 = vector.broadcast %cst_16 : f32 to vector<256x1xf32>
      %c0_17 = arith.constant 0 : index
      %c0_18 = arith.constant 0 : index
      %31 = vector.load %arg8[%c0_17, %c0_18] : memref<256x1xf32, #tpu.memory_space<vmem>>, vector<256x1xf32>
      tpu.vector_store %arg8[%c0_17, %c0_18], %30 {strides = array<i32>} : memref<256x1xf32, #tpu.memory_space<vmem>>, vector<256x1xf32>,
      %cst_19 = arith.constant 0.000000e+00 : f32
      %32 = vector.broadcast %cst_19 : f32 to vector<256x1xf32>
      %c0_20 = arith.constant 0 : index
      %c0_21 = arith.constant 0 : index
      %33 = vector.load %arg9[%c0_20, %c0_21] : memref<256x1xf32, #tpu.memory_space<vmem>>, vector<256x1xf32>
      tpu.vector_store %arg9[%c0_20, %c0_21], %32 {strides = array<i32>} : memref<256x1xf32, #tpu.memory_space<vmem>>, vector<256x1xf32>,
      %cst_22 = arith.constant 0.000000e+00 : f32
      %34 = vector.broadcast %cst_22 : f32 to vector<256x1xf32>
      %c0_23 = arith.constant 0 : index
      %c0_24 = arith.constant 0 : index
      %35 = vector.load %arg10[%c0_23, %c0_24] : memref<256x1xf32, #tpu.memory_space<vmem>>, vector<256x1xf32>
      tpu.vector_store %arg10[%c0_23, %c0_24], %34 {strides = array<i32>} : memref<256x1xf32, #tpu.memory_space<vmem>>, vector<256x1xf32>,
      %c0_25 = arith.constant 0 : index
      %c0_26 = arith.constant 0 : index
      %36 = vector.load %arg2[%c0_25, %c0_26] : memref<256x128xbf16, #tpu.memory_space<vmem>>, vector<256x128xbf16>
      %37 = arith.extf %36 : vector<256x128xbf16> to vector<256x128xf32>
      %cst_27 = arith.constant 14.2857141 : f32
      %38 = vector.broadcast %cst_27 : f32 to vector<256x128xf32>
      %39 = arith.mulf %37, %38 : vector<256x128xf32>
      %40 = arith.truncf %39 : vector<256x128xf32> to vector<256x128xbf16>
      %c0_28 = arith.constant 0 : index
      %c0_29 = arith.constant 0 : index
      %41 = vector.load %arg11[%c0_28, %c0_29] : memref<256x128xbf16, #tpu.memory_space<vmem>>, vector<256x128xbf16>
      tpu.vector_store %arg11[%c0_28, %c0_29], %40 {strides = array<i32>} : memref<256x128xbf16, #tpu.memory_space<vmem>>, vector<256x128xbf16>,
    } else {
    }
    %c0 = arith.constant 0 : index
    %c0_1 = arith.constant 0 : index
    %3 = vector.load %arg11[%c0, %c0_1] : memref<256x128xbf16, #tpu.memory_space<vmem>>, vector<256x128xbf16>
    %c0_2 = arith.constant 0 : index
    %c0_3 = arith.constant 0 : index
    %4 = vector.load %arg3[%c0_2, %c0_3] : memref<256x128xbf16, #tpu.memory_space<vmem>>, vector<256x128xbf16>
    %cst = arith.constant dense<0.000000e+00> : vector<256x256xf32>
    %5 = tpu.matmul %3, %4, %cst {dimension_numbers = #tpu.dot_dimension_numbers<[1], [1], [0], [0], [0, 0, 1, 0], [], []>} : vector<256x128xbf16>, vector<256x128xbf16>, vector<256x256xf32> -> vector<256x256xf32>
    %c0_4 = arith.constant 0 : index
    %c0_5 = arith.constant 0 : index
    %6 = vector.load %arg8[%c0_4, %c0_5] : memref<256x1xf32, #tpu.memory_space<vmem>>, vector<256x1xf32>
    %cst_6 = arith.constant dense<0xFF800000> : vector<256xf32>
    %7 = vector.multi_reduction <maximumf>, %5, %cst_6 [1] : vector<256x256xf32> to vector<256xf32>
    %8 = vector.shape_cast %7 : vector<256xf32> to vector<256x1xf32>
    %9 = arith.maximumf %6, %8 : vector<256x1xf32>
    %10 = arith.subf %6, %9 : vector<256x1xf32>
    %11 = math.exp %10 : vector<256x1xf32>
    %12 = vector.broadcast %9 : vector<256x1xf32> to vector<256x256xf32>
    %13 = arith.subf %5, %12 : vector<256x256xf32>
    %14 = math.exp %13 : vector<256x256xf32>
    %c0_7 = arith.constant 0 : index
    %c0_8 = arith.constant 0 : index
    %15 = vector.load %arg4[%c0_7, %c0_8] : memref<256x1xi32, #tpu.memory_space<vmem>>, vector<256x1xi32>
    %c0_9 = arith.constant 0 : index
    %c0_10 = arith.constant 0 : index
    %16 = vector.load %arg5[%c0_9, %c0_10] : memref<1x256xi32, #tpu.memory_space<vmem>>, vector<1x256xi32>
    %17 = vector.broadcast %15 : vector<256x1xi32> to vector<256x256xi32>
    %18 = vector.broadcast %16 : vector<1x256xi32> to vector<256x256xi32>
    %19 = arith.cmpi eq, %17, %18 : vector<256x256xi32>
    %20 = arith.cmpi eq, %arg0, %arg1 : i32
    %21 = arith.extui %20 : i1 to i32
    %c0_i32_11 = arith.constant 0 : i32
    %22 = arith.cmpi ne, %21, %c0_i32_11 : i32
    scf.if %22 {
      %30 = tpu.iota {dimensions = array<i32: 0>} : vector<256x256xi32>
      %31 = tpu.iota {dimensions = array<i32: 1>} : vector<256x256xi32>
      %32 = arith.cmpi ne, %30, %31 : vector<256x256xi32>
      %c0_16 = arith.constant 0 : index
      %c0_17 = arith.constant 0 : index
      %33 = vector.load %arg9[%c0_16, %c0_17] : memref<256x1xf32, #tpu.memory_space<vmem>>, vector<256x1xf32>
      %34 = arith.mulf %11, %33 : vector<256x1xf32>
      %cst_18 = arith.constant 0.000000e+00 : f32
      %35 = vector.broadcast %cst_18 : f32 to vector<256x256xf32>
      %36 = arith.select %32, %14, %35 : vector<256x256xi1>, vector<256x256xf32>
      %cst_19 = arith.constant dense<0.000000e+00> : vector<256xf32>
      %37 = vector.multi_reduction <add>, %36, %cst_19 [1] : vector<256x256xf32> to vector<256xf32>
      %38 = vector.shape_cast %37 : vector<256xf32> to vector<256x1xf32>
      %39 = arith.addf %34, %38 : vector<256x1xf32>
      %c0_20 = arith.constant 0 : index
      %c0_21 = arith.constant 0 : index
      %40 = vector.load %arg9[%c0_20, %c0_21] : memref<256x1xf32, #tpu.memory_space<vmem>>, vector<256x1xf32>
      tpu.vector_store %arg9[%c0_20, %c0_21], %39 {strides = array<i32>} : memref<256x1xf32, #tpu.memory_space<vmem>>, vector<256x1xf32>,
      %c0_22 = arith.constant 0 : index
      %c0_23 = arith.constant 0 : index
      %41 = vector.load %arg10[%c0_22, %c0_23] : memref<256x1xf32, #tpu.memory_space<vmem>>, vector<256x1xf32>
      %42 = arith.andi %32, %19 : vector<256x256xi1>
      %cst_24 = arith.constant 0.000000e+00 : f32
      %43 = vector.broadcast %cst_24 : f32 to vector<256x256xf32>
      %44 = arith.select %42, %5, %43 : vector<256x256xi1>, vector<256x256xf32>
      %cst_25 = arith.constant dense<0.000000e+00> : vector<256xf32>
      %45 = vector.multi_reduction <add>, %44, %cst_25 [1] : vector<256x256xf32> to vector<256xf32>
      %46 = vector.shape_cast %45 : vector<256xf32> to vector<256x1xf32>
      %47 = arith.addf %41, %46 : vector<256x1xf32>
      %c0_26 = arith.constant 0 : index
      %c0_27 = arith.constant 0 : index
      %48 = vector.load %arg10[%c0_26, %c0_27] : memref<256x1xf32, #tpu.memory_space<vmem>>, vector<256x1xf32>
      tpu.vector_store %arg10[%c0_26, %c0_27], %47 {strides = array<i32>} : memref<256x1xf32, #tpu.memory_space<vmem>>, vector<256x1xf32>,
    } else {
    }
    %true = arith.constant true
    %23 = arith.xori %20, %true : i1
    %24 = arith.extui %23 : i1 to i32
    %c0_i32_12 = arith.constant 0 : i32
    %25 = arith.cmpi ne, %24, %c0_i32_12 : i32
    scf.if %25 {
      %c0_16 = arith.constant 0 : index
      %c0_17 = arith.constant 0 : index
      %30 = vector.load %arg9[%c0_16, %c0_17] : memref<256x1xf32, #tpu.memory_space<vmem>>, vector<256x1xf32>
      %31 = arith.mulf %11, %30 : vector<256x1xf32>
      %cst_18 = arith.constant dense<0.000000e+00> : vector<256xf32>
      %32 = vector.multi_reduction <add>, %14, %cst_18 [1] : vector<256x256xf32> to vector<256xf32>
      %33 = vector.shape_cast %32 : vector<256xf32> to vector<256x1xf32>
      %34 = arith.addf %31, %33 : vector<256x1xf32>
      %c0_19 = arith.constant 0 : index
      %c0_20 = arith.constant 0 : index
      %35 = vector.load %arg9[%c0_19, %c0_20] : memref<256x1xf32, #tpu.memory_space<vmem>>, vector<256x1xf32>
      tpu.vector_store %arg9[%c0_19, %c0_20], %34 {strides = array<i32>} : memref<256x1xf32, #tpu.memory_space<vmem>>, vector<256x1xf32>,
      %c0_21 = arith.constant 0 : index
      %c0_22 = arith.constant 0 : index
      %36 = vector.load %arg10[%c0_21, %c0_22] : memref<256x1xf32, #tpu.memory_space<vmem>>, vector<256x1xf32>
      %cst_23 = arith.constant 0.000000e+00 : f32
      %37 = vector.broadcast %cst_23 : f32 to vector<256x256xf32>
      %38 = arith.select %19, %5, %37 : vector<256x256xi1>, vector<256x256xf32>
      %cst_24 = arith.constant dense<0.000000e+00> : vector<256xf32>
      %39 = vector.multi_reduction <add>, %38, %cst_24 [1] : vector<256x256xf32> to vector<256xf32>
      %40 = vector.shape_cast %39 : vector<256xf32> to vector<256x1xf32>
      %41 = arith.addf %36, %40 : vector<256x1xf32>
      %c0_25 = arith.constant 0 : index
      %c0_26 = arith.constant 0 : index
      %42 = vector.load %arg10[%c0_25, %c0_26] : memref<256x1xf32, #tpu.memory_space<vmem>>, vector<256x1xf32>
      tpu.vector_store %arg10[%c0_25, %c0_26], %41 {strides = array<i32>} : memref<256x1xf32, #tpu.memory_space<vmem>>, vector<256x1xf32>,
    } else {
    }
    %c0_13 = arith.constant 0 : index
    %c0_14 = arith.constant 0 : index
    %26 = vector.load %arg8[%c0_13, %c0_14] : memref<256x1xf32, #tpu.memory_space<vmem>>, vector<256x1xf32>
    tpu.vector_store %arg8[%c0_13, %c0_14], %9 {strides = array<i32>} : memref<256x1xf32, #tpu.memory_space<vmem>>, vector<256x1xf32>,
    %c1_i32 = arith.constant 1 : i32
    %27 = arith.cmpi eq, %arg1, %c1_i32 : i32
    %28 = arith.extui %27 : i1 to i32
    %c0_i32_15 = arith.constant 0 : i32
    %29 = arith.cmpi ne, %28, %c0_i32_15 : i32
    scf.if %29 {
      %c0_16 = arith.constant 0 : index
      %c0_17 = arith.constant 0 : index
      %30 = vector.load %arg8[%c0_16, %c0_17] : memref<256x1xf32, #tpu.memory_space<vmem>>, vector<256x1xf32>
      %c0_18 = arith.constant 0 : index
      %c0_19 = arith.constant 0 : index
      %31 = vector.load %arg9[%c0_18, %c0_19] : memref<256x1xf32, #tpu.memory_space<vmem>>, vector<256x1xf32>
      %32 = math.log %31 : vector<256x1xf32>
      %33 = arith.addf %30, %32 : vector<256x1xf32>
      %c0_20 = arith.constant 0 : index
      %c0_21 = arith.constant 0 : index
      %34 = vector.load %arg10[%c0_20, %c0_21] : memref<256x1xf32, #tpu.memory_space<vmem>>, vector<256x1xf32>
      %c0_22 = arith.constant 0 : index
      %c0_23 = arith.constant 0 : index
      %35 = vector.load %arg6[%c0_22, %c0_23] : memref<256x1xf32, #tpu.memory_space<vmem>>, vector<256x1xf32>
      %36 = arith.mulf %34, %35 : vector<256x1xf32>
      %37 = arith.subf %33, %36 : vector<256x1xf32>
      %cst_24 = arith.constant dense<0.000000e+00> : vector<1xf32>
      %38 = vector.multi_reduction <add>, %37, %cst_24 [0] : vector<256x1xf32> to vector<1xf32>
      %39 = vector.shape_cast %38 : vector<1xf32> to vector<1x1xf32>
      %40 = vector.shape_cast %39 : vector<1x1xf32> to vector<1x1xf32>
      %41 = vector.broadcast %40 : vector<1x1xf32> to vector<8x128xf32>
      %c0_25 = arith.constant 0 : index
      %c0_26 = arith.constant 0 : index
      %c0_27 = arith.constant 0 : index
      %42 = vector.load %arg7[%c0_25, %c0_26, %c0_27] : memref<1x8x128xf32, #tpu.memory_space<vmem>>, vector<1x8x128xf32>
      %43 = vector.shape_cast %42 : vector<1x8x128xf32> to vector<8x128xf32>
      %44 = vector.shape_cast %41 : vector<8x128xf32> to vector<1x8x128xf32>
      tpu.vector_store %arg7[%c0_25, %c0_26, %c0_27], %44 {strides = array<i32>} : memref<1x8x128xf32, #tpu.memory_space<vmem>>, vector<1x8x128xf32>,
    } else {
    }
    return
  }
  func.func @transform_0(%arg0: i32, %arg1: i32) -> (i32, i32) {
    %c0_i32 = arith.constant 0 : i32
    %c0_i32_0 = arith.constant 0 : i32
    return %arg0, %c0_i32 : i32, i32
  }
  func.func @transform_1(%arg0: i32, %arg1: i32) -> (i32, i32) {
    %c0_i32 = arith.constant 0 : i32
    %c0_i32_0 = arith.constant 0 : i32
    return %arg1, %c0_i32 : i32, i32
  }
  func.func @transform_2(%arg0: i32, %arg1: i32) -> (i32, i32) {
    %c0_i32 = arith.constant 0 : i32
    %c0_i32_0 = arith.constant 0 : i32
    return %arg0, %c0_i32 : i32, i32
  }
  func.func @transform_3(%arg0: i32, %arg1: i32) -> (i32, i32) {
    %c0_i32 = arith.constant 0 : i32
    %c0_i32_0 = arith.constant 0 : i32
    return %c0_i32, %arg1 : i32, i32
  }
  func.func @transform_4(%arg0: i32, %arg1: i32) -> (i32, i32) {
    %c0_i32 = arith.constant 0 : i32
    %c0_i32_0 = arith.constant 0 : i32
    return %arg0, %c0_i32 : i32, i32
  }
  func.func @transform_5(%arg0: i32, %arg1: i32) -> (i32, i32, i32) {
    %c0_i32 = arith.constant 0 : i32
    %c0_i32_0 = arith.constant 0 : i32
    %c0_i32_1 = arith.constant 0 : i32
    return %arg0, %c0_i32, %c0_i32_0 : i32, i32, i32
  }
}

</mosaic_0001>

<bundles_post_ra>
// kernel: sup_moco_forward.2
= control target key start
LH: loop header
LB: loop body
LE: loop exit
PB: predicated region body
PF: predicated region fallthrough
CT: control target
= control target key end

     0   :  { %s3567_s0 = inlined_call_operand.<no memory space> [shape: s32[1], index: 0, kind: input, shape index: {}]   ;;  %s3568_s1 = inlined_call_operand.vmem [shape: f32[16,1024], index: 1, kind: input, shape index: {}]   ;;  %s3569_s2 = inlined_call_operand.vmem [shape: f32[16,1024], index: 2, kind: input, shape index: {}]   ;;  %s3570_s3 = inlined_call_operand.vmem [shape: f32[1024,128], index: 3, kind: input, shape index: {}]   ;;  %s3571_s4 = inlined_call_operand.hbm [shape: f32[1,128], index: 4, kind: input, shape index: {}]   ;;  %s3572_s5 = inlined_call_operand.vmem [shape: f32[128,128], index: 5, kind: input, shape index: {}]   ;;  %s3573_s6 = inlined_call_operand.hbm [shape: f32[1,128], index: 6, kind: input, shape index: {}]   ;;  %s3574_s7 = inlined_call_operand.vmem [shape: f32[1024,128], index: 7, kind: input, shape index: {}]   ;;  %s3575_s8 = inlined_call_operand.vmem [shape: f32[1,128], index: 8, kind: input, shape index: {}]   ;;  %s3576_s9 = inlined_call_operand.vmem [shape: f32[128,128], index: 9, kind: input, shape index: {}]   ;;  %s3577_s10 = inlined_call_operand.vmem [shape: f32[1,128], index: 10, kind: input, shape index: {}]   ;;  %s3578_s11 = inlined_call_operand.vmem [shape: bf16[512,128], index: 11, kind: input, shape index: {}, may-alias: {11,12}]   ;;  %s3579_s12 = inlined_call_operand.vmem [shape: bf16[512,128], index: 12, kind: output, shape index: {0}, may-alias: {11,12}]   ;;  %s3580_s13 = inlined_call_operand.hbm [shape: f32[1024,128], index: 13, kind: output, shape index: {1}]   ;;  %s3581_s14 = inlined_call_operand.hbm [shape: f32[1,128], index: 14, kind: output, shape index: {2}]   ;;  %s3582_s15 = inlined_call_operand.hbm [shape: f32[128,128], index: 15, kind: output, shape index: {3}]   ;;  %s3583_s16 = inlined_call_operand.hbm [shape: f32[1,128], index: 16, kind: output, shape index: {4}]  }
   0x1   :  { %3585 = sst [smem:[#allocation26_spill]] %s3567_s0 }
   0x2   :  { %23 = vsyncpa [#allocation7], 0 }
   0x3   :  { %24 = vsyncpa [#allocation10], 0 }
   0x4   :  { %25 = vsyncpa [#allocation8], 0 }
   0x5   :  { %26 = vsyncpa [#allocation13], 0 }
   0x6   :  { %27 = vsyncpa [#allocation16], 0  ;;  %s41_s22 = sshll.u32 %s3571_s4, 4  ;;  %s1990_s23 = smov [#allocation6]   ;;  %s42_s22 = int_to_ptr.hbm [resolvable:$true] %s41_s22 }
   0x7   :  { %s43_s24 = sshll.u32 %s1990_s23, 4  ;;  %s54_s27 = sshll.u32 %s3573_s6, 4  ;;  %s44_s24 = int_to_ptr.vmem [resolvable:$true] %s43_s24  ;;  %s55_s27 = int_to_ptr.hbm [resolvable:$true] %s54_s27 }
   0x8   :  { %46 = dma.hbm_to_vmem [thread:$0]  %s42_s22, 16, %s44_s24, [#allocation7]  }
   0x9   :  { %s1991_s28 = smov [#allocation9]  }
   0xa   :  { %s56_s29 = sshll.u32 %s1991_s28, 4  ;;  %s57_s29 = int_to_ptr.vmem [resolvable:$true] %s56_s29 }
   0xb   :  { %59 = dma.hbm_to_vmem [thread:$0]  %s55_s27, 16, %s57_s29, [#allocation10]  }
   0xc   :  { %1976 = dma.done.wait [#allocation7], 16  }
   0xd   :  { %1977 = vsyncadd [#allocation7], 4294967280 }
   0xe   :  { %1978 = dma.done.wait [#allocation10], 16  }
   0xf   :  { %1979 = vsyncadd [#allocation10], 4294967280  ;;  %v2092_v0 = vld [vmem:[%s3570_s3 + $0x70] sm:$0xff]  ;;  %v2097_v1 = vld [vmem:[%s3570_s3 + $0x78] sm:$0xff] }
  0x10   :  { %v2102_v2 = vld [vmem:[%s3570_s3 + $0xf0] sm:$0xff]  ;;  %v1129_v3 = vpack.c.bf16 %v2097_v1, %v2092_v0  ;;  %v2109_v4 = vld [vmem:[%s3570_s3 + $0xf8] sm:$0xff]  ;;  %v2134_v11 = vld [vmem:[%s3570_s3 + $0x60] sm:$0xff] }
  0x11   :  { %v2114_v5 = vld [vmem:[%s3570_s3 + $0x170] sm:$0xff]  ;;  %v2119_v6 = vld [vmem:[%s3570_s3 + $0x178] sm:$0xff]  ;;  %v1137_v7 = vpack.c.bf16 %v2109_v4, %v2102_v2  ;;  %v2139_v13 = vld [vmem:[%s3570_s3 + $0x68] sm:$0xff] }
  0x12   :  { %v1145_v8 = vpack.c.bf16 %v2119_v6, %v2114_v5  ;;  %v1030_v9 = vld [vmem:[%s3570_s3 + $0x1f0] sm:$0xff]  ;;  %v1031_v10 = vld [vmem:[%s3570_s3 + $0x1f8] sm:$0xff]  ;;  %1189 = vmatpush.bf16.msra.mxu0 %v1129_v3  ;;  %v2144_v14 = vld [vmem:[%s3570_s3 + $0xe0] sm:$0xff]  ;;  %v1128_v16 = vpack.c.bf16 %v2139_v13, %v2134_v11 }
  0x13   :  { %v1153_v12 = vpack.c.bf16 %v1031_v10, %v1030_v9  ;;  %v2149_v15 = vld [vmem:[%s3570_s3 + $0xe8] sm:$0xff]  ;;  %1203 = vmatpush.bf16.msra.mxu1 %v1137_v7  ;;  %v2158_v18 = vld [vmem:[%s3570_s3 + $0x160] sm:$0xff]  ;;  %v2176_v23 = vld [vmem:[%s3570_s3 + $0x50] sm:$0xff] }
  0x14   :  { %1217 = vmatpush.bf16.msra.mxu2 %v1145_v8  ;;  %v1136_v17 = vpack.c.bf16 %v2149_v15, %v2144_v14  ;;  %v2163_v19 = vld [vmem:[%s3570_s3 + $0x168] sm:$0xff]  ;;  %v1028_v20 = vld [vmem:[%s3570_s3 + $0x1e0] sm:$0xff]  ;;  %v2181_v24 = vld [vmem:[%s3570_s3 + $0x58] sm:$0xff] }
  0x15   :  { %1231 = vmatpush.bf16.msra.mxu3 %v1153_v12  ;;  %v1144_v21 = vpack.c.bf16 %v2163_v19, %v2158_v18  ;;  %v1029_v22 = vld [vmem:[%s3570_s3 + $0x1e8] sm:$0xff]  ;;  %v2186_v26 = vld [vmem:[%s3570_s3 + $0xd0] sm:$0xff]  ;;  %v2191_v27 = vld [vmem:[%s3570_s3 + $0xd8] sm:$0xff]  ;;  %v1127_v29 = vpack.c.bf16 %v2181_v24, %v2176_v23 }
  0x16   :  { %v1152_v25 = vpack.c.bf16 %v1029_v22, %v1028_v20  ;;  %v2196_v28 = vld [vmem:[%s3570_s3 + $0x150] sm:$0xff]  ;;  %1190 = vmatpush.bf16.msra.mxu0 %v1128_v16  ;;  %v2203_v30 = vld [vmem:[%s3570_s3 + $0x158] sm:$0xff]  ;;  %v1135_v33 = vpack.c.bf16 %v2191_v27, %v2186_v26  ;;  %v2218_v35 = vld [vmem:[%s3570_s3 + $0x40] sm:$0xff] }
  0x17   :  { %v1026_v31 = vld [vmem:[%s3570_s3 + $0x1d0] sm:$0xff]  ;;  %v1027_v32 = vld [vmem:[%s3570_s3 + $0x1d8] sm:$0xff]  ;;  %1204 = vmatpush.bf16.msra.mxu1 %v1136_v17  ;;  %v1143_v34 = vpack.c.bf16 %v2203_v30, %v2196_v28  ;;  %v2223_v36 = vld [vmem:[%s3570_s3 + $0x48] sm:$0xff] }
  0x18   :  { %1218 = vmatpush.bf16.msra.mxu2 %v1144_v21  ;;  %v2228_v37 = vld [vmem:[%s3570_s3 + $0xc0] sm:$0xff]  ;;  %v1151_v38 = vpack.c.bf16 %v1027_v32, %v1026_v31  ;;  %v2233_v39 = vld [vmem:[%s3570_s3 + $0xc8] sm:$0xff]  ;;  %v1126_v44 = vpack.c.bf16 %v2223_v36, %v2218_v35  ;;  %v2260_v47 = vld [vmem:[%s3570_s3 + $0x30] sm:$0xff] }
  0x19   :  { %1232 = vmatpush.bf16.msra.mxu3 %v1152_v25  ;;  %v2238_v40 = vld [vmem:[%s3570_s3 + $0x140] sm:$0xff]  ;;  %v2243_v41 = vld [vmem:[%s3570_s3 + $0x148] sm:$0xff]  ;;  %v1134_v45 = vpack.c.bf16 %v2233_v39, %v2228_v37  ;;  %v2265_v48 = vld [vmem:[%s3570_s3 + $0x38] sm:$0xff] }
  0x1a   :  { %v1024_v42 = vld [vmem:[%s3570_s3 + $0x1c0] sm:$0xff]  ;;  %v1025_v43 = vld [vmem:[%s3570_s3 + $0x1c8] sm:$0xff]  ;;  %1191 = vmatpush.bf16.msra.mxu0 %v1127_v29  ;;  %v1142_v46 = vpack.c.bf16 %v2243_v41, %v2238_v40  ;;  %v2270_v49 = vld [vmem:[%s3570_s3 + $0xb0] sm:$0xff]  ;;  %v1125_v56 = vpack.c.bf16 %v2265_v48, %v2260_v47 }
  0x1b   :  { %1205 = vmatpush.bf16.msra.mxu1 %v1135_v33  ;;  %v1150_v50 = vpack.c.bf16 %v1025_v43, %v1024_v42  ;;  %v2275_v51 = vld [vmem:[%s3570_s3 + $0xb8] sm:$0xff]  ;;  %v2280_v52 = vld [vmem:[%s3570_s3 + $0x130] sm:$0xff]  ;;  %v972_v59 = vld [vmem:[%s3570_s3 + $0x20] sm:$0xff] }
  0x1c   :  { %1219 = vmatpush.bf16.msra.mxu2 %v1143_v34  ;;  %v2285_v53 = vld [vmem:[%s3570_s3 + $0x138] sm:$0xff]  ;;  %v1022_v54 = vld [vmem:[%s3570_s3 + $0x1b0] sm:$0xff]  ;;  %v1133_v57 = vpack.c.bf16 %v2275_v51, %v2270_v49  ;;  %v973_v60 = vld [vmem:[%s3570_s3 + $0x28] sm:$0xff] }
  0x1d   :  { %1233 = vmatpush.bf16.msra.mxu3 %v1151_v38  ;;  %v1023_v55 = vld [vmem:[%s3570_s3 + $0x1b8] sm:$0xff]  ;;  %v1141_v58 = vpack.c.bf16 %v2285_v53, %v2280_v52  ;;  %v2308_v61 = vld [vmem:[%s3570_s3 + $0xa0] sm:$0xff]  ;;  %v2313_v63 = vld [vmem:[%s3570_s3 + $0xa8] sm:$0xff]  ;;  %v1124_v10 = vpack.c.bf16 %v973_v60, %v972_v59 }
  0x1e   :  { %1192 = vmatpush.bf16.msra.mxu0 %v1126_v44  ;;  %v1149_v62 = vpack.c.bf16 %v1023_v55, %v1022_v54  ;;  %v2318_v3 = vld [vmem:[%s3570_s3 + $0x120] sm:$0xff]  ;;  %v2323_v7 = vld [vmem:[%s3570_s3 + $0x128] sm:$0xff]  ;;  %v1132_v12 = vpack.c.bf16 %v2313_v63, %v2308_v61  ;;  %v970_v17 = vld [vmem:[%s3570_s3 + $0x10] sm:$0xff] }
  0x1f   :  { %1206 = vmatpush.bf16.msra.mxu1 %v1134_v45  ;;  %v1020_v8 = vld [vmem:[%s3570_s3 + $0x1a0] sm:$0xff]  ;;  %v1021_v9 = vld [vmem:[%s3570_s3 + $0x1a8] sm:$0xff]  ;;  %v1140_v16 = vpack.c.bf16 %v2323_v7, %v2318_v3  ;;  %v971_v20 = vld [vmem:[%s3570_s3 + $0x18] sm:$0xff] }
  0x20   :  { %1220 = vmatpush.bf16.msra.mxu2 %v1142_v46  ;;  %v986_v21 = vld [vmem:[%s3570_s3 + $0x90] sm:$0xff]  ;;  %v1148_v22 = vpack.c.bf16 %v1021_v9, %v1020_v8  ;;  %v987_v25 = vld [vmem:[%s3570_s3 + $0x98] sm:$0xff]  ;;  %v968_v34 = vld [vmem:[%s3570_s3] sm:$0xff]  ;;  %v1123_v38 = vpack.c.bf16 %v971_v20, %v970_v17 }
  0x21   :  { %1234 = vmatpush.bf16.msra.mxu3 %v1150_v50  ;;  %v1002_v29 = vld [vmem:[%s3570_s3 + $0x110] sm:$0xff]  ;;  %v1003_v31 = vld [vmem:[%s3570_s3 + $0x118] sm:$0xff]  ;;  %v969_v42 = vld [vmem:[%s3570_s3 + $0x8] sm:$0xff]  ;;  %v1131_v45 = vpack.c.bf16 %v987_v25, %v986_v21 }
  0x22   :  { %1193 = vmatpush.bf16.msra.mxu0 %v1125_v56  ;;  %v1018_v32 = vld [vmem:[%s3570_s3 + $0x190] sm:$0xff]  ;;  %v1019_v33 = vld [vmem:[%s3570_s3 + $0x198] sm:$0xff]  ;;  %v984_v43 = vld [vmem:[%s3570_s3 + $0x80] sm:$0xff]  ;;  %v1139_v46 = vpack.c.bf16 %v1003_v31, %v1002_v29  ;;  %v1122_v9 = vpack.c.bf16 %v969_v42, %v968_v34 }
  0x23   :  { %1207 = vmatpush.bf16.msra.mxu1 %v1133_v57  ;;  %v985_v44 = vld [vmem:[%s3570_s3 + $0x88] sm:$0xff]  ;;  %v1000_v50 = vld [vmem:[%s3570_s3 + $0x100] sm:$0xff]  ;;  %v1147_v56 = vpack.c.bf16 %v1019_v33, %v1018_v32  ;;  %v1047_v59 = vld [vmem:[%s3570_s3 + $0x278] sm:$0xff] }
  0x24   :  { %1221 = vmatpush.bf16.msra.mxu2 %v1141_v58  ;;  %v1001_v54 = vld [vmem:[%s3570_s3 + $0x108] sm:$0xff]  ;;  %v1016_v55 = vld [vmem:[%s3570_s3 + $0x180] sm:$0xff]  ;;  %v1046_v58 = vld [vmem:[%s3570_s3 + $0x270] sm:$0xff]  ;;  %v1130_v17 = vpack.c.bf16 %v985_v44, %v984_v43 }
  0x25   :  { %1235 = vmatpush.bf16.msra.mxu3 %v1149_v62  ;;  %v1017_v57 = vld [vmem:[%s3570_s3 + $0x188] sm:$0xff]  ;;  %v1062_v60 = vld [vmem:[%s3570_s3 + $0x2f0] sm:$0xff]  ;;  %v1063_v62 = vld [vmem:[%s3570_s3 + $0x2f8] sm:$0xff]  ;;  %v1138_v20 = vpack.c.bf16 %v1001_v54, %v1000_v50  ;;  %v1161_v32 = vpack.c.bf16 %v1047_v59, %v1046_v58 }
  0x26   :  { %1194 = vmatpush.bf16.msra.mxu0 %v1124_v10  ;;  %v1078_v8 = vld [vmem:[%s3570_s3 + $0x370] sm:$0xff]  ;;  %v1079_v10 = vld [vmem:[%s3570_s3 + $0x378] sm:$0xff]  ;;  %v1044_v21 = vld [vmem:[%s3570_s3 + $0x260] sm:$0xff]  ;;  %v1146_v31 = vpack.c.bf16 %v1017_v57, %v1016_v55  ;;  %v1169_v43 = vpack.c.bf16 %v1063_v62, %v1062_v60 }
  0x27   :  { %1208 = vmatpush.bf16.msra.mxu1 %v1132_v12  ;;  %v1094_v12 = vld [vmem:[%s3570_s3 + $0x3f0] sm:$0xff]  ;;  %v1060_v33 = vld [vmem:[%s3570_s3 + $0x2e0] sm:$0xff]  ;;  %v1061_v34 = vld [vmem:[%s3570_s3 + $0x2e8] sm:$0xff]  ;;  %v1177_v44 = vpack.c.bf16 %v1079_v10, %v1078_v8 }
  0x28   :  { %1222 = vmatpush.bf16.msra.mxu2 %v1140_v16  ;;  %v1095_v16 = vld [vmem:[%s3570_s3 + $0x3f8] sm:$0xff]  ;;  %v954_v25 = vld [vmem:[%s3568_s1 + $0x10] sm:$0xff]  ;;  %v1077_v42 = vld [vmem:[%s3570_s3 + $0x368] sm:$0xff] }
  0x29   :  { %1236 = vmatpush.bf16.msra.mxu3 %v1148_v22  ;;  %v1045_v22 = vld [vmem:[%s3570_s3 + $0x268] sm:$0xff]  ;;  %v962_v29 = vld [vmem:[%s3568_s1 + $0x50] sm:$0xff]  ;;  %v955_v50 = vld [vmem:[%s3568_s1 + $0x18] sm:$0xff]  ;;  %v1185_v54 = vpack.c.bf16 %v1095_v16, %v1094_v12  ;;  %v1168_v12 = vpack.c.bf16 %v1061_v34, %v1060_v33 }
  0x2a   :  { %1195 = vmatpush.bf16.msra.mxu0 %v1123_v38  ;;  %v1076_v38 = vld [vmem:[%s3570_s3 + $0x360] sm:$0xff]  ;;  %v1116_v55 = vpack.c.bf16 %v962_v29, %v954_v25  ;;  %v953_v57 = vld [vmem:[%s3568_s1 + $0x8] sm:$0xff]  ;;  %v1058_v25 = vld [vmem:[%s3570_s3 + $0x2d0] sm:$0xff] }
  0x2b   :  { %1209 = vmatpush.bf16.msra.mxu1 %v1131_v45  ;;  %v952_v45 = vld [vmem:[%s3568_s1] sm:$0xff]  ;;  %v961_v58 = vld [vmem:[%s3568_s1 + $0x48] sm:$0xff]  ;;  %v1176_v16 = vpack.c.bf16 %v1077_v42, %v1076_v38  ;;  %v1091_v33 = vld [vmem:[%s3570_s3 + $0x3d8] sm:$0xff] }
  0x2c   :  { %1223 = vmatpush.bf16.msra.mxu2 %v1139_v46  ;;  %v960_v46 = vld [vmem:[%s3568_s1 + $0x40] sm:$0xff]  ;;  %v1093_v60 = vld [vmem:[%s3570_s3 + $0x3e8] sm:$0xff]  ;;  %v1115_v10 = vpack.c.bf16 %v961_v58, %v953_v57 }
  0x2d   :  { %1237 = vmatpush.bf16.msra.mxu3 %v1147_v56  ;;  %v963_v56 = vld [vmem:[%s3568_s1 + $0x58] sm:$0xff]  ;;  %v1092_v59 = vld [vmem:[%s3570_s3 + $0x3e0] sm:$0xff]  ;;  %v1114_v62 = vpack.c.bf16 %v960_v46, %v952_v45  ;;  %v1089_v57 = vld [vmem:[%s3570_s3 + $0x3c8] sm:$0xff] }
  0x2e   :  { %1196 = vmatpush.bf16.msra.mxu0 %v1122_v9  ;;  %v1117_v8 = vpack.c.bf16 %v963_v56, %v955_v50  ;;  %v1160_v9 = vpack.c.bf16 %v1045_v22, %v1044_v21  ;;  %v1184_v29 = vpack.c.bf16 %v1093_v60, %v1092_v59  ;;  %v1059_v21 = vld [vmem:[%s3570_s3 + $0x2d8] sm:$0xff]  ;;  %v1074_v22 = vld [vmem:[%s3570_s3 + $0x350] sm:$0xff]  ;;  %v1056_v45 = vld [vmem:[%s3570_s3 + $0x2c0] sm:$0xff] }
  0x2f   :  { %1210 = vmatpush.bf16.msra.mxu1 %v1130_v17  ;;  %v1042_v17 = vld [vmem:[%s3570_s3 + $0x250] sm:$0xff]  ;;  %v1167_v38 = vpack.c.bf16 %v1059_v21, %v1058_v25  ;;  %v1057_v50 = vld [vmem:[%s3570_s3 + $0x2c8] sm:$0xff]  ;;  %v1088_v56 = vld [vmem:[%s3570_s3 + $0x3c0] sm:$0xff] }
  0x30   :  { %1224 = vmatpush.bf16.msra.mxu2 %v1138_v20  ;;  %v1043_v20 = vld [vmem:[%s3570_s3 + $0x258] sm:$0xff]  ;;  %v1166_v59 = vpack.c.bf16 %v1057_v50, %v1056_v45  ;;  %v1085_v45 = vld [vmem:[%s3570_s3 + $0x3a8] sm:$0xff] }
  0x31   :  { %1238 = vmatpush.bf16.msra.mxu3 %v1146_v31  ;;  %v1075_v31 = vld [vmem:[%s3570_s3 + $0x358] sm:$0xff]  ;;  %1197 = vmatmul.bf16.vlgmr.msra.gmra.mxu0 %v1114_v62  ;;  %v1159_v34 = vpack.c.bf16 %v1043_v20, %v1042_v17  ;;  %v1038_v62 = vld [vmem:[%s3570_s3 + $0x230] sm:$0xff] }
  0x32   :  { %1245 = vmatpush.bf16.msrb.mxu0 %v1161_v32  ;;  %v1090_v32 = vld [vmem:[%s3570_s3 + $0x3d0] sm:$0xff]  ;;  %1211 = vmatmul.bf16.vlgmr.msra.gmra.mxu1 %v1115_v10  ;;  %v1175_v42 = vpack.c.bf16 %v1075_v31, %v1074_v22  ;;  %v1182_v10 = vpack.c.bf16 %v1089_v57, %v1088_v56  ;;  %v1071_v17 = vld [vmem:[%s3570_s3 + $0x338] sm:$0xff]  ;;  %v1036_v31 = vld [vmem:[%s3570_s3 + $0x220] sm:$0xff]  ;;  %v490_v57 = vmul.f32 0.0009999871, %v2102_v2 }
  0x33   :  { %1259 = vmatpush.bf16.msrb.mxu1 %v1169_v43  ;;  %1225 = vmatmul.bf16.vlgmr.msra.gmra.mxu2 %v1116_v55  ;;  %v1040_v43 = vld [vmem:[%s3570_s3 + $0x240] sm:$0xff]  ;;  %v1183_v46 = vpack.c.bf16 %v1091_v33, %v1090_v32  ;;  %v1073_v55 = vld [vmem:[%s3570_s3 + $0x348] sm:$0xff]  ;;  %v1086_v20 = vld [vmem:[%s3570_s3 + $0x3b0] sm:$0xff] }
  0x34   :  { %1273 = vmatpush.bf16.msrb.mxu2 %v1177_v44  ;;  %1239 = vmatmul.bf16.vlgmr.msra.gmra.mxu3 %v1117_v8  ;;  %v1041_v44 = vld [vmem:[%s3570_s3 + $0x248] sm:$0xff]  ;;  %v1039_v8 = vld [vmem:[%s3570_s3 + $0x238] sm:$0xff]  ;;  %v1052_v33 = vld [vmem:[%s3570_s3 + $0x2a0] sm:$0xff] }
  0x35   :  { %1287 = vmatpush.bf16.msrb.mxu3 %v1185_v54  ;;  %v1072_v54 = vld [vmem:[%s3570_s3 + $0x340] sm:$0xff]  ;;  %v1158_v58 = vpack.c.bf16 %v1041_v44, %v1040_v43  ;;  %v1087_v25 = vld [vmem:[%s3570_s3 + $0x3b8] sm:$0xff]  ;;  %v1037_v32 = vld [vmem:[%s3570_s3 + $0x228] sm:$0xff] }
  0x36   :  { %1246 = vmatpush.bf16.msrb.mxu0 %v1160_v9  ;;  %v1174_v60 = vpack.c.bf16 %v1073_v55, %v1072_v54  ;;  %v1054_v9 = vld [vmem:[%s3570_s3 + $0x2b0] sm:$0xff]  ;;  %v1069_v43 = vld [vmem:[%s3570_s3 + $0x328] sm:$0xff]  ;;  %v1084_v44 = vld [vmem:[%s3570_s3 + $0x3a0] sm:$0xff]  ;;  %v1156_v50 = vpack.c.bf16 %v1037_v32, %v1036_v31 }
  0x37   :  { %1260 = vmatpush.bf16.msrb.mxu1 %v1168_v12  ;;  %v1055_v12 = vld [vmem:[%s3570_s3 + $0x2b8] sm:$0xff]  ;;  %v1050_v55 = vld [vmem:[%s3570_s3 + $0x290] sm:$0xff]  ;;  %v1033_v31 = vld [vmem:[%s3570_s3 + $0x208] sm:$0xff] }
  0x38   :  { %1274 = vmatpush.bf16.msrb.mxu2 %v1176_v16  ;;  %v1070_v16 = vld [vmem:[%s3570_s3 + $0x330] sm:$0xff]  ;;  %v1165_v21 = vpack.c.bf16 %v1055_v12, %v1054_v9  ;;  %v1035_v54 = vld [vmem:[%s3570_s3 + $0x218] sm:$0xff]  ;;  %v1180_v9 = vpack.c.bf16 %v1085_v45, %v1084_v44  ;;  %v1048_v32 = vld [vmem:[%s3570_s3 + $0x280] sm:$0xff] }
  0x39   :  { %1288 = vmatpush.bf16.msrb.mxu3 %v1184_v29  ;;  %v1157_v29 = vpack.c.bf16 %v1039_v8, %v1038_v62  ;;  %v1173_v22 = vpack.c.bf16 %v1071_v17, %v1070_v16  ;;  %v1051_v56 = vld [vmem:[%s3570_s3 + $0x298] sm:$0xff]  ;;  %v491_v8 = vmul.f32 0.0009999871, %v2109_v4  ;;  %v1066_v2 = vld [vmem:[%s3570_s3 + $0x310] sm:$0xff]  ;;  %v1080_v44 = vld [vmem:[%s3570_s3 + $0x380] sm:$0xff] }
  0x3a   :  { %1247 = vmatpush.bf16.msrb.mxu0 %v1159_v34  ;;  %v1181_v34 = vpack.c.bf16 %v1087_v25, %v1086_v20  ;;  %v107_v62 = vld [vmem:[%s3574_s7 + $0xf8] sm:$0xff]  ;;  %v1082_v17 = vld [vmem:[%s3570_s3 + $0x390] sm:$0xff]  ;;  %v1032_v25 = vld [vmem:[%s3570_s3 + $0x200] sm:$0xff] }
  0x3b   :  { %1261 = vmatpush.bf16.msrb.mxu1 %v1167_v38  ;;  %v1053_v38 = vld [vmem:[%s3570_s3 + $0x2a8] sm:$0xff]  ;;  %v235_v16 = vmul.f32 0.999, %v107_v62  ;;  %v1083_v4 = vld [vmem:[%s3570_s3 + $0x398] sm:$0xff]  ;;  %v958_v62 = vld [vmem:[%s3568_s1 + $0x30] sm:$0xff] }
  0x3c   :  { %1275 = vmatpush.bf16.msrb.mxu2 %v1175_v42  ;;  %v1068_v42 = vld [vmem:[%s3570_s3 + $0x320] sm:$0xff]  ;;  %v1081_v45 = vld [vmem:[%s3570_s3 + $0x388] sm:$0xff] }
  0x3d   :  { %1289 = vmatpush.bf16.msrb.mxu3 %v1183_v46  ;;  %v1034_v46 = vld [vmem:[%s3570_s3 + $0x210] sm:$0xff] }
  0x3e   :  { %1248 = vmatpush.bf16.msrb.mxu0 %v1158_v58  ;;  %v1164_v58 = vpack.c.bf16 %v1053_v38, %v1052_v33  ;;  %v1155_v20 = vpack.c.bf16 %v1035_v54, %v1034_v46  ;;  %v1049_v33 = vld [vmem:[%s3570_s3 + $0x288] sm:$0xff]  ;;  %v1179_v38 = vpack.c.bf16 %v1083_v4, %v1082_v17  ;;  %v1111_v46 = vld [vmem:[%s3572_s5 + $0x70] sm:$0xff]  ;;  %v1154_v54 = vpack.c.bf16 %v1033_v31, %v1032_v25  ;;  %v1109_v17 = vld [vmem:[%s3572_s5 + $0x60] sm:$0xff] }
  0x3f   :  { %1262 = vmatpush.bf16.msrb.mxu1 %v1166_v59  ;;  %v1172_v59 = vpack.c.bf16 %v1069_v43, %v1068_v42  ;;  %v1064_v42 = vld [vmem:[%s3570_s3 + $0x300] sm:$0xff]  ;;  %v1065_v43 = vld [vmem:[%s3570_s3 + $0x308] sm:$0xff] }
  0x40   :  { %1276 = vmatpush.bf16.msrb.mxu2 %v1174_v60  ;;  %v106_v60 = vld [vmem:[%s3574_s7 + $0xf0] sm:$0xff]  ;;  %v1110_v4 = vld [vmem:[%s3572_s5 + $0x68] sm:$0xff] }
  0x41   :  { %1290 = vmatpush.bf16.msrb.mxu3 %v1182_v10  ;;  %v1067_v10 = vld [vmem:[%s3570_s3 + $0x318] sm:$0xff]  ;;  %v234_v12 = vmul.f32 0.999, %v106_v60  ;;  %v965_v60 = vld [vmem:[%s3568_s1 + $0x68] sm:$0xff]  ;;  %v1310_v31 = vpack.c.bf16 %v1110_v4, %v1109_v17 }
  0x42   :  { %1249 = vmatpush.bf16.msrb.mxu0 %v1157_v29  ;;  %v1104_v4 = vld [vmem:[%s3572_s5 + $0x38] sm:$0xff] }
  0x43   :  { %1263 = vmatpush.bf16.msrb.mxu1 %v1165_v21  ;;  %v618_v29 = vadd.f32 %v490_v57, %v234_v12  ;;  %v1163_v21 = vpack.c.bf16 %v1051_v56, %v1050_v55  ;;  %v956_v55 = vld [vmem:[%s3568_s1 + $0x20] sm:$0xff]  ;;  %v957_v57 = vld [vmem:[%s3568_s1 + $0x28] sm:$0xff] }
  0x44   :  { %1277 = vmatpush.bf16.msrb.mxu2 %v1173_v22  ;;  %v1171_v22 = vpack.c.bf16 %v1067_v10, %v1066_v2  ;;  %v964_v56 = vld [vmem:[%s3568_s1 + $0x60] sm:$0xff]  ;;  %v959_v2 = vld [vmem:[%s3568_s1 + $0x38] sm:$0xff]  ;;  %v1119_v25 = vpack.c.bf16 %v965_v60, %v957_v57  ;;  %v474_v57 = vmul.f32 0.0009999871, %v2092_v0  ;;  %v475_v60 = vmul.f32 0.0009999871, %v2097_v1 }
  0x45   :  { %1291 = vmatpush.bf16.msrb.mxu3 %v1181_v34  ;;  %v619_v34 = vadd.f32 %v491_v8, %v235_v16  ;;  %836 = vst [vmem:[#allocation11 + $0xf0] sm:$0xff] %v618_v29  ;;  %v966_v8 = vld [vmem:[%s3568_s1 + $0x70] sm:$0xff]  ;;  %v967_v10 = vld [vmem:[%s3568_s1 + $0x78] sm:$0xff]  ;;  %v1118_v16 = vpack.c.bf16 %v964_v56, %v956_v55  ;;  %s3586_s1 = sld [smem:[#allocation26_spill]] }
  0x46   :  { %1250 = vmatpush.bf16.msrb.mxu0 %v1156_v50  ;;  %v1112_v50 = vld [vmem:[%s3572_s5 + $0x78] sm:$0xff]  ;;  %v90_v55 = vld [vmem:[%s3574_s7 + $0x70] sm:$0xff] }
  0x47   :  { %1264 = vmatpush.bf16.msrb.mxu1 %v1164_v58  ;;  %837 = vst [vmem:[#allocation11 + $0xf8] sm:$0xff] %v619_v34  ;;  %v1162_v58 = vpack.c.bf16 %v1049_v33, %v1048_v32  ;;  %v1311_v12 = vpack.c.bf16 %v1112_v50, %v1111_v46  ;;  %v1107_v32 = vld [vmem:[%s3572_s5 + $0x50] sm:$0xff]  ;;  %v1108_v33 = vld [vmem:[%s3572_s5 + $0x58] sm:$0xff]  ;;  %v507_v50 = vmul.f32 0.0009999871, %v2119_v6  ;;  %v104_v6 = vld [vmem:[%s3574_s7 + $0xe0] sm:$0xff] }
  0x48   :  { %1278 = vmatpush.bf16.msrb.mxu2 %v1172_v59  ;;  %v1170_v59 = vpack.c.bf16 %v1065_v43, %v1064_v42  ;;  %v122_v42 = vld [vmem:[%s3574_s7 + $0x170] sm:$0xff]  ;;  %v506_v43 = vmul.f32 0.0009999871, %v2114_v5  ;;  %v91_v56 = vld [vmem:[%s3574_s7 + $0x78] sm:$0xff] }
  0x49   :  { %1292 = vmatpush.bf16.msrb.mxu3 %v1180_v9  ;;  %v1178_v9 = vpack.c.bf16 %v1081_v45, %v1080_v44  ;;  %v123_v45 = vld [vmem:[%s3574_s7 + $0x178] sm:$0xff]  ;;  %v250_v46 = vmul.f32 0.999, %v122_v42  ;;  %v1103_v1 = vld [vmem:[%s3572_s5 + $0x30] sm:$0xff] }
  0x4a   :  { %1251 = vmatpush.bf16.msrb.mxu0 %v1155_v20  ;;  %v1402_v20 = vpack.c.bf16 %v619_v34, %v618_v29  ;;  %v1309_v29 = vpack.c.bf16 %v1108_v33, %v1107_v32  ;;  %v1105_v34 = vld [vmem:[%s3572_s5 + $0x40] sm:$0xff]  ;;  %v89_v33 = vld [vmem:[%s3574_s7 + $0x68] sm:$0xff] }
  0x4b   :  { %1265 = vmatpush.bf16.msrb.mxu1 %v1163_v21  ;;  %v1120_v21 = vpack.c.bf16 %v966_v8, %v958_v62  ;;  %v634_v5 = vadd.f32 %v506_v43, %v250_v46  ;;  %v105_v8 = vld [vmem:[%s3574_s7 + $0xe8] sm:$0xff]  ;;  %v88_v32 = vld [vmem:[%s3574_s7 + $0x60] sm:$0xff]  ;;  %v505_v43 = vmul.f32 0.0009999871, %v2163_v19  ;;  %s1629_s24 = sadd.s32 16, %s3586_s1 }
  0x4c   :  { %1279 = vmatpush.bf16.msrb.mxu2 %v1171_v22  ;;  %v1121_v22 = vpack.c.bf16 %v967_v10, %v959_v2  ;;  %v489_v2 = vmul.f32 0.0009999871, %v2149_v15  ;;  %v121_v15 = vld [vmem:[%s3574_s7 + $0x168] sm:$0xff] }
  0x4d   :  { %1293 = vmatpush.bf16.msrb.mxu3 %v1179_v38  ;;  %v1106_v38 = vld [vmem:[%s3572_s5 + $0x48] sm:$0xff]  ;;  %852 = vst [vmem:[#allocation11 + $0x170] sm:$0xff] %v634_v5 }
  0x4e   :  { %1252 = vmatpush.bf16.msrb.mxu0 %v1154_v54  ;;  %v1308_v44 = vpack.c.bf16 %v1106_v38, %v1105_v34  ;;  %v251_v54 = vmul.f32 0.999, %v123_v45  ;;  %v249_v34 = vmul.f32 0.999, %v121_v15  ;;  %v103_v38 = vld [vmem:[%s3574_s7 + $0xd8] sm:$0xff]  ;;  %v1101_v45 = vld [vmem:[%s3572_s5 + $0x20] sm:$0xff] }
  0x4f   :  { %1266 = vmatpush.bf16.msrb.mxu1 %v1162_v58  ;;  %v218_v58 = vmul.f32 0.999, %v90_v55  ;;  %v1102_v55 = vld [vmem:[%s3572_s5 + $0x28] sm:$0xff]  ;;  %v231_v19 = vmul.f32 0.999, %v103_v38  ;;  %v1100_v38 = vld [vmem:[%s3572_s5 + $0x18] sm:$0xff] }
  0x50   :  { %1280 = vmatpush.bf16.msrb.mxu2 %v1170_v59  ;;  %v219_v59 = vmul.f32 0.999, %v91_v56  ;;  %v635_v62 = vadd.f32 %v507_v50, %v251_v54  ;;  %v217_v50 = vmul.f32 0.999, %v89_v33  ;;  %v472_v54 = vmul.f32 0.0009999871, %v2134_v11 }
  0x51   :  { %1294 = vmatpush.bf16.msrb.mxu3 %v1178_v9  ;;  %1253 = vmatmul.bf16.vlgmr.msrb.gmra.mxu0 %v1118_v16  ;;  %v488_v9 = vmul.f32 0.0009999871, %v2144_v14  ;;  %v602_v0 = vadd.f32 %v474_v57, %v218_v58  ;;  %v233_v16 = vmul.f32 0.999, %v105_v8  ;;  %v120_v14 = vld [vmem:[%s3574_s7 + $0x160] sm:$0xff]  ;;  %v633_v56 = vadd.f32 %v505_v43, %v249_v34  ;;  %v118_v11 = vld [vmem:[%s3574_s7 + $0x150] sm:$0xff] }
  0x52   :  { %1315 = vmatpush.bf16.msra.mxu0 %v1311_v12  ;;  %1267 = vmatmul.bf16.vlgmr.msrb.gmra.mxu1 %v1119_v25  ;;  %v603_v10 = vadd.f32 %v475_v60, %v219_v59  ;;  %v232_v12 = vmul.f32 0.999, %v104_v6  ;;  %853 = vst [vmem:[#allocation11 + $0x178] sm:$0xff] %v635_v62  ;;  %v1410_v17 = vpack.c.bf16 %v635_v62, %v634_v5  ;;  %v473_v57 = vmul.f32 0.0009999871, %v2139_v13  ;;  %v119_v13 = vld [vmem:[%s3574_s7 + $0x158] sm:$0xff] }
  0x53   :  { %1281 = vmatmul.bf16.vlgmr.msrb.gmra.mxu2 %v1120_v21  ;;  %820 = vst [vmem:[#allocation11 + $0x70] sm:$0xff] %v602_v0  ;;  %v486_v59 = vmul.f32 0.0009999871, %v2186_v26  ;;  %v487_v60 = vmul.f32 0.0009999871, %v2191_v27  ;;  %v1306_v62 = vpack.c.bf16 %v1102_v55, %v1101_v45  ;;  %v98_v55 = vld [vmem:[%s3574_s7 + $0xb0] sm:$0xff] }
  0x54   :  { %1468 = vmatpush.bf16.msra.mxu2 %v1402_v20  ;;  %1295 = vmatmul.bf16.vlgmr.msrb.gmra.mxu3 %v1121_v22  ;;  %v504_v20 = vmul.f32 0.0009999871, %v2158_v18  ;;  %v1394_v25 = vpack.c.bf16 %v603_v10, %v602_v0  ;;  %v616_v21 = vadd.f32 %v488_v9, %v232_v12  ;;  %v617_v22 = vadd.f32 %v489_v2, %v233_v16  ;;  %v86_v12 = vld [vmem:[%s3574_s7 + $0x50] sm:$0xff] }
  0x55   :  { %1482 = vmatpush.bf16.msra.mxu3 %v1410_v17  ;;  %821 = vst [vmem:[#allocation11 + $0x78] sm:$0xff] %v603_v10  ;;  %v248_v18 = vmul.f32 0.999, %v120_v14  ;;  %v601_v8 = vadd.f32 %v473_v57, %v217_v50  ;;  %v246_v9 = vmul.f32 0.999, %v118_v11  ;;  %v615_v26 = vadd.f32 %v487_v60, %v231_v19  ;;  %v87_v17 = vld [vmem:[%s3574_s7 + $0x58] sm:$0xff] }
  0x56   :  { %1316 = vmatpush.bf16.msra.mxu0 %v1310_v31  ;;  %v1307_v31 = vpack.c.bf16 %v1104_v4, %v1103_v1  ;;  %1454 = vmatpush.bf16.msra.mxu1 %v1394_v25  ;;  %834 = vst [vmem:[#allocation11 + $0xe0] sm:$0xff] %v616_v21  ;;  %v1401_v42 = vpack.c.bf16 %v617_v22, %v616_v21  ;;  %v502_v2 = vmul.f32 0.0009999871, %v2196_v28  ;;  %v247_v27 = vmul.f32 0.999, %v119_v13  ;;  %v100_v25 = vld [vmem:[%s3574_s7 + $0xc0] sm:$0xff] }
  0x57   :  { %835 = vst [vmem:[#allocation11 + $0xe8] sm:$0xff] %v617_v22  ;;  %v632_v46 = vadd.f32 %v504_v20, %v248_v18  ;;  %v503_v10 = vmul.f32 0.0009999871, %v2203_v30  ;;  %v214_v28 = vmul.f32 0.999, %v86_v12  ;;  %v101_v22 = vld [vmem:[%s3574_s7 + $0xc8] sm:$0xff] }
  0x58   :  { %1469 = vmatpush.bf16.msra.mxu2 %v1401_v42  ;;  %851 = vst [vmem:[#allocation11 + $0x168] sm:$0xff] %v633_v56  ;;  %v630_v1 = vadd.f32 %v502_v2, %v246_v9  ;;  %v470_v4 = vmul.f32 0.0009999871, %v2176_v23  ;;  %v215_v20 = vmul.f32 0.999, %v87_v17  ;;  %v1099_v18 = vld [vmem:[%s3572_s5 + $0x10] sm:$0xff] }
  0x59   :  { %850 = vst [vmem:[#allocation11 + $0x160] sm:$0xff] %v632_v46  ;;  %v1409_v6 = vpack.c.bf16 %v633_v56, %v632_v46  ;;  %v631_v15 = vadd.f32 %v503_v10, %v247_v27  ;;  %v471_v30 = vmul.f32 0.0009999871, %v2181_v24  ;;  %v484_v23 = vmul.f32 0.0009999871, %v2228_v37  ;;  %v116_v37 = vld [vmem:[%s3574_s7 + $0x140] sm:$0xff] }
  0x5a   :  { %1317 = vmatpush.bf16.msra.mxu0 %v1309_v29  ;;  %v102_v29 = vld [vmem:[%s3574_s7 + $0xd0] sm:$0xff]  ;;  %819 = vst [vmem:[#allocation11 + $0x68] sm:$0xff] %v601_v8  ;;  %v598_v21 = vadd.f32 %v470_v4, %v214_v28  ;;  %v485_v24 = vmul.f32 0.0009999871, %v2233_v39  ;;  %v117_v42 = vld [vmem:[%s3574_s7 + $0x148] sm:$0xff]  ;;  %v1305_v45 = vpack.c.bf16 %v1100_v38, %v1099_v18  ;;  %v84_v50 = vld [vmem:[%s3574_s7 + $0x40] sm:$0xff] }
  0x5b   :  { %v230_v5 = vmul.f32 0.999, %v102_v29  ;;  %1483 = vmatpush.bf16.msra.mxu3 %v1409_v6  ;;  %833 = vst [vmem:[#allocation11 + $0xd8] sm:$0xff] %v615_v26  ;;  %v599_v33 = vadd.f32 %v471_v30, %v215_v20  ;;  %v229_v29 = vmul.f32 0.999, %v101_v22  ;;  %v99_v57 = vld [vmem:[%s3574_s7 + $0xb8] sm:$0xff] }
  0x5c   :  { %848 = vst [vmem:[#allocation11 + $0x150] sm:$0xff] %v630_v1  ;;  %v500_v39 = vmul.f32 0.0009999871, %v2238_v40  ;;  %v244_v46 = vmul.f32 0.999, %v116_v37  ;;  %v1097_v60 = vld [vmem:[%s3572_s5] sm:$0xff] }
  0x5d   :  { %v614_v0 = vadd.f32 %v486_v59, %v230_v5  ;;  %849 = vst [vmem:[#allocation11 + $0x158] sm:$0xff] %v631_v15  ;;  %v1392_v43 = vpack.c.bf16 %v599_v33, %v598_v21  ;;  %v245_v40 = vmul.f32 0.999, %v117_v42  ;;  %v501_v56 = vmul.f32 0.0009999871, %v2243_v41  ;;  %v1098_v6 = vld [vmem:[%s3572_s5 + $0x8] sm:$0xff] }
  0x5e   :  { %1318 = vmatpush.bf16.msra.mxu0 %v1308_v44  ;;  %v216_v44 = vmul.f32 0.999, %v88_v32  ;;  %v1408_v32 = vpack.c.bf16 %v631_v15, %v630_v1  ;;  %816 = vst [vmem:[#allocation11 + $0x50] sm:$0xff] %v598_v21  ;;  %v628_v19 = vadd.f32 %v500_v39, %v244_v46  ;;  %v468_v11 = vmul.f32 0.0009999871, %v2218_v35  ;;  %v114_v2 = vld [vmem:[%s3574_s7 + $0x130] sm:$0xff] }
  0x5f   :  { %832 = vst [vmem:[#allocation11 + $0xd0] sm:$0xff] %v614_v0  ;;  %v1400_v14 = vpack.c.bf16 %v615_v26, %v614_v0  ;;  %v469_v41 = vmul.f32 0.0009999871, %v2223_v36  ;;  %v227_v13 = vmul.f32 0.999, %v99_v57  ;;  %v1304_v9 = vpack.c.bf16 %v1098_v6, %v1097_v60  ;;  %v115_v36 = vld [vmem:[%s3574_s7 + $0x138] sm:$0xff] }
  0x60   :  { %v600_v58 = vadd.f32 %v472_v54, %v216_v44  ;;  %1484 = vmatpush.bf16.msra.mxu3 %v1408_v32  ;;  %v613_v44 = vadd.f32 %v485_v24, %v229_v29  ;;  %v85_v54 = vld [vmem:[%s3574_s7 + $0x48] sm:$0xff]  ;;  %817 = vst [vmem:[#allocation11 + $0x58] sm:$0xff] %v599_v33  ;;  %v482_v35 = vmul.f32 0.0009999871, %v2270_v49  ;;  %v138_v10 = vld [vmem:[%s3574_s7 + $0x1f0] sm:$0xff]  ;;  %v139_v12 = vld [vmem:[%s3574_s7 + $0x1f8] sm:$0xff] }
  0x61   :  { %1470 = vmatpush.bf16.msra.mxu2 %v1400_v14  ;;  %v213_v59 = vmul.f32 0.999, %v85_v54  ;;  %846 = vst [vmem:[#allocation11 + $0x140] sm:$0xff] %v628_v19  ;;  %v242_v1 = vmul.f32 0.999, %v114_v2  ;;  %v394_v15 = vld [vmem:[%s3570_s3 + $0x1f0] sm:$0xff] }
  0x62   :  { %1319 = vmatpush.bf16.msra.mxu0 %v1307_v31  ;;  %818 = vst [vmem:[#allocation11 + $0x60] sm:$0xff] %v600_v58  ;;  %v1393_v16 = vpack.c.bf16 %v601_v8, %v600_v58  ;;  %v228_v31 = vmul.f32 0.999, %v100_v25  ;;  %v212_v58 = vmul.f32 0.999, %v84_v50  ;;  %v83_v32 = vld [vmem:[%s3574_s7 + $0x38] sm:$0xff] }
  0x63   :  { %831 = vst [vmem:[#allocation11 + $0xc8] sm:$0xff] %v613_v44  ;;  %v226_v8 = vmul.f32 0.999, %v98_v55  ;;  %v597_v27 = vadd.f32 %v469_v41, %v213_v59  ;;  %v243_v17 = vmul.f32 0.999, %v115_v36  ;;  %v96_v37 = vld [vmem:[%s3574_s7 + $0xa0] sm:$0xff] }
  0x64   :  { %1455 = vmatpush.bf16.msra.mxu1 %v1393_v16  ;;  %v612_v34 = vadd.f32 %v484_v23, %v228_v31  ;;  %v596_v26 = vadd.f32 %v468_v11, %v212_v58  ;;  %v483_v16 = vmul.f32 0.0009999871, %v2275_v51  ;;  %v498_v4 = vmul.f32 0.0009999871, %v2280_v52  ;;  %v395_v51 = vld [vmem:[%s3570_s3 + $0x1f8] sm:$0xff]  ;;  %v97_v42 = vld [vmem:[%s3574_s7 + $0xa8] sm:$0xff] }
  0x65   :  { %v610_v28 = vadd.f32 %v482_v35, %v226_v8  ;;  %v499_v14 = vmul.f32 0.0009999871, %v2285_v53  ;;  %815 = vst [vmem:[#allocation11 + $0x48] sm:$0xff] %v597_v27  ;;  %v266_v30 = vmul.f32 0.999, %v138_v10  ;;  %v82_v53 = vld [vmem:[%s3574_s7 + $0x30] sm:$0xff] }
  0x66   :  { %1320 = vmatpush.bf16.msra.mxu0 %v1306_v62  ;;  %830 = vst [vmem:[#allocation11 + $0xc0] sm:$0xff] %v612_v34  ;;  %v1399_v5 = vpack.c.bf16 %v613_v44, %v612_v34  ;;  %v629_v62 = vadd.f32 %v501_v56, %v245_v40  ;;  %v1391_v49 = vpack.c.bf16 %v597_v27, %v596_v26  ;;  %v267_v25 = vmul.f32 0.999, %v139_v12  ;;  %v112_v39 = vld [vmem:[%s3574_s7 + $0x120] sm:$0xff]  ;;  %v137_v57 = vld [vmem:[%s3574_s7 + $0x1e8] sm:$0xff]  ;;  %v94_v12 = vld [vmem:[%s3574_s7 + $0x90] sm:$0xff] }
  0x67   :  { %814 = vst [vmem:[#allocation11 + $0x40] sm:$0xff] %v596_v26  ;;  %v611_v20 = vadd.f32 %v483_v16, %v227_v13  ;;  %v626_v21 = vadd.f32 %v498_v4, %v242_v1  ;;  %v627_v22 = vadd.f32 %v499_v14, %v243_v17  ;;  %v522_v31 = vmul.f32 0.0009999871, %v394_v15  ;;  %v136_v55 = vld [vmem:[%s3574_s7 + $0x1e0] sm:$0xff]  ;;  %v393_v11 = vld [vmem:[%s3570_s3 + $0x1e8] sm:$0xff]  ;;  %v350_v4 = vld [vmem:[%s3570_s3 + $0x90] sm:$0xff] }
  0x68   :  { %1456 = vmatpush.bf16.msra.mxu1 %v1392_v43  ;;  %1471 = vmatpush.bf16.msra.mxu2 %v1399_v5  ;;  %847 = vst [vmem:[#allocation11 + $0x148] sm:$0xff] %v629_v62  ;;  %v1407_v0 = vpack.c.bf16 %v629_v62, %v628_v19  ;;  %v523_v52 = vmul.f32 0.0009999871, %v395_v51  ;;  %v210_v33 = vmul.f32 0.999, %v82_v53  ;;  %v336_v36 = vld [vmem:[%s3570_s3 + $0x20] sm:$0xff] }
  0x69   :  { %828 = vst [vmem:[#allocation11 + $0xb0] sm:$0xff] %v610_v28  ;;  %v1398_v23 = vpack.c.bf16 %v611_v20, %v610_v28  ;;  %v466_v29 = vmul.f32 0.0009999871, %v2260_v47  ;;  %v1406_v24 = vpack.c.bf16 %v627_v22, %v626_v21  ;;  %v650_v18 = vadd.f32 %v522_v31, %v266_v30  ;;  %v2834_v13 = vld [vmem:[#allocation6] ss:$0 sm:$0xff]  ;;  %v337_v10 = vld [vmem:[%s3570_s3 + $0x28] sm:$0xff] }
  0x6a   :  { %1321 = vmatpush.bf16.msra.mxu0 %v1305_v45  ;;  %1485 = vmatpush.bf16.msra.mxu3 %v1407_v0  ;;  %829 = vst [vmem:[#allocation11 + $0xb8] sm:$0xff] %v611_v20  ;;  %v651_v34 = vadd.f32 %v523_v52, %v267_v25  ;;  %v211_v38 = vmul.f32 0.999, %v83_v32  ;;  %v467_v47 = vmul.f32 0.0009999871, %v2265_v48  ;;  %v113_v45 = vld [vmem:[%s3574_s7 + $0x128] sm:$0xff] }
  0x6b   :  { %844 = vst [vmem:[#allocation11 + $0x130] sm:$0xff] %v626_v21  ;;  %v594_v43 = vadd.f32 %v466_v29, %v210_v33  ;;  %v224_v44 = vmul.f32 0.999, %v96_v37  ;;  %v225_v50 = vmul.f32 0.999, %v97_v42  ;;  %v81_v0 = vld [vmem:[%s3574_s7 + $0x28] sm:$0xff] }
  0x6c   :  { %1457 = vmatpush.bf16.msra.mxu1 %v1391_v49  ;;  %1472 = vmatpush.bf16.msra.mxu2 %v1398_v23  ;;  %845 = vst [vmem:[#allocation11 + $0x138] sm:$0xff] %v627_v22  ;;  %v1418_v46 = vpack.c.bf16 %v651_v34, %v650_v18  ;;  %v480_v54 = vmul.f32 0.0009999871, %v2308_v61  ;;  %v595_v40 = vadd.f32 %v467_v47, %v211_v38  ;;  %v481_v48 = vmul.f32 0.0009999871, %v2313_v63  ;;  %v392_v61 = vld [vmem:[%s3570_s3 + $0x1e0] sm:$0xff] }
  0x6d   :  { %868 = vst [vmem:[#allocation11 + $0x1f0] sm:$0xff] %v650_v18  ;;  %v240_v56 = vmul.f32 0.999, %v112_v39  ;;  %v241_v19 = vmul.f32 0.999, %v113_v45  ;;  %v95_v28 = vld [vmem:[%s3574_s7 + $0x98] sm:$0xff] }
  0x6e   :  { %1322 = vmatpush.bf16.msra.mxu0 %v1304_v9  ;;  %1486 = vmatpush.bf16.msra.mxu3 %v1406_v24  ;;  %869 = vst [vmem:[#allocation11 + $0x1f8] sm:$0xff] %v651_v34  ;;  %v608_v5 = vadd.f32 %v480_v54, %v224_v44  ;;  %v496_v58 = vmul.f32 0.0009999871, %v2318_v3  ;;  %v1390_v59 = vpack.c.bf16 %v595_v40, %v594_v43  ;;  %v497_v63 = vmul.f32 0.0009999871, %v2323_v7  ;;  %v80_v3 = vld [vmem:[%s3574_s7 + $0x20] sm:$0xff] }
  0x6f   :  { %812 = vst [vmem:[#allocation11 + $0x30] sm:$0xff] %v594_v43  ;;  %v609_v60 = vadd.f32 %v481_v48, %v225_v50  ;;  %v264_v62 = vmul.f32 0.999, %v136_v55  ;;  %v265_v6 = vmul.f32 0.999, %v137_v57  ;;  %v351_v14 = vld [vmem:[%s3570_s3 + $0x98] sm:$0xff] }
  0x70   :  { %813 = vst [vmem:[#allocation11 + $0x38] sm:$0xff] %v595_v40  ;;  %v624_v41 = vadd.f32 %v496_v58, %v240_v56  ;;  %v520_v8 = vmul.f32 0.0009999871, %v392_v61  ;;  %1458 = vmatpush.bf16.msra.mxu1 %v1390_v59  ;;  %v625_v2 = vadd.f32 %v497_v63, %v241_v19  ;;  %v521_v7 = vmul.f32 0.0009999871, %v393_v11  ;;  %v110_v30 = vld [vmem:[%s3574_s7 + $0x110] sm:$0xff] }
  0x71   :  { %826 = vst [vmem:[#allocation11 + $0xa0] sm:$0xff] %v608_v5  ;;  %v1397_v9 = vpack.c.bf16 %v609_v60, %v608_v5  ;;  %v208_v26 = vmul.f32 0.999, %v80_v3  ;;  %v209_v35 = vmul.f32 0.999, %v81_v0  ;;  %v111_v22 = vld [vmem:[%s3574_s7 + $0x118] sm:$0xff] }
  0x72   :  { %1496 = vmatpush.bf16.msrb.mxu0 %v1418_v46  ;;  %827 = vst [vmem:[#allocation11 + $0xa8] sm:$0xff] %v609_v60  ;;  %v648_v27 = vadd.f32 %v520_v8, %v264_v62  ;;  %v1405_v1 = vpack.c.bf16 %v625_v2, %v624_v41  ;;  %v649_v17 = vadd.f32 %v521_v7, %v265_v6  ;;  %v464_v49 = vmul.f32 0.0009999871, %v336_v36  ;;  %v366_v31 = vld [vmem:[%s3570_s3 + $0x110] sm:$0xff]  ;;  %v367_v52 = vld [vmem:[%s3570_s3 + $0x118] sm:$0xff]  ;;  %v92_v8 = vld [vmem:[%s3574_s7 + $0x80] sm:$0xff] }
  0x73   :  { %842 = vst [vmem:[#allocation11 + $0x120] sm:$0xff] %v624_v41  ;;  %1473 = vmatpush.bf16.msra.mxu2 %v1397_v9  ;;  %v465_v15 = vmul.f32 0.0009999871, %v337_v10  ;;  %v222_v20 = vmul.f32 0.999, %v94_v12  ;;  %v134_v38 = vld [vmem:[%s3574_s7 + $0x1d0] sm:$0xff] }
  0x74   :  { %843 = vst [vmem:[#allocation11 + $0x128] sm:$0xff] %v625_v2  ;;  %1487 = vmatpush.bf16.msra.mxu3 %v1405_v1  ;;  %v1417_v25 = vpack.c.bf16 %v649_v17, %v648_v27  ;;  %v592_v51 = vadd.f32 %v464_v49, %v208_v26  ;;  %v223_v21 = vmul.f32 0.999, %v95_v28  ;;  %v478_v23 = vmul.f32 0.0009999871, %v350_v4  ;;  %v135_v47 = vld [vmem:[%s3574_s7 + $0x1d8] sm:$0xff] }
  0x75   :  { %866 = vst [vmem:[#allocation11 + $0x1e0] sm:$0xff] %v648_v27  ;;  %v593_v53 = vadd.f32 %v465_v15, %v209_v35  ;;  %v479_v32 = vmul.f32 0.0009999871, %v351_v14  ;;  %v238_v33 = vmul.f32 0.999, %v110_v30  ;;  %v390_v43 = vld [vmem:[%s3570_s3 + $0x1d0] sm:$0xff] }
  0x76   :  { %867 = vst [vmem:[#allocation11 + $0x1e8] sm:$0xff] %v649_v17  ;;  %1497 = vmatpush.bf16.msrb.mxu0 %v1417_v25  ;;  %v239_v18 = vmul.f32 0.999, %v111_v22  ;;  %v494_v34 = vmul.f32 0.0009999871, %v366_v31  ;;  %v606_v42 = vadd.f32 %v478_v23, %v222_v20  ;;  %v391_v44 = vld [vmem:[%s3570_s3 + $0x1d8] sm:$0xff] }
  0x77   :  { %810 = vst [vmem:[#allocation11 + $0x20] sm:$0xff] %v592_v51  ;;  %v1389_v37 = vpack.c.bf16 %v593_v53, %v592_v51  ;;  %v607_v39 = vadd.f32 %v479_v32, %v223_v21  ;;  %v495_v45 = vmul.f32 0.0009999871, %v367_v52  ;;  %v262_v50 = vmul.f32 0.999, %v134_v38  ;;  %v78_v56 = vld [vmem:[%s3574_s7 + $0x10] sm:$0xff] }
  0x78   :  { %811 = vst [vmem:[#allocation11 + $0x28] sm:$0xff] %v593_v53  ;;  %v622_v46 = vadd.f32 %v494_v34, %v238_v33  ;;  %v263_v54 = vmul.f32 0.999, %v135_v47  ;;  %v518_v40 = vmul.f32 0.0009999871, %v390_v43  ;;  %v79_v58 = vld [vmem:[%s3574_s7 + $0x18] sm:$0xff] }
  0x79   :  { %1459 = vmatpush.bf16.msra.mxu1 %v1389_v37  ;;  %824 = vst [vmem:[#allocation11 + $0x90] sm:$0xff] %v606_v42  ;;  %v1396_v55 = vpack.c.bf16 %v607_v39, %v606_v42  ;;  %v519_v48 = vmul.f32 0.0009999871, %v391_v44  ;;  %v623_v19 = vadd.f32 %v495_v45, %v239_v18  ;;  %v206_v61 = vmul.f32 0.999, %v78_v56  ;;  %v334_v59 = vld [vmem:[%s3570_s3 + $0x10] sm:$0xff] }
  0x7a   :  { %825 = vst [vmem:[#allocation11 + $0x98] sm:$0xff] %v607_v39  ;;  %v335_v60 = vld [vmem:[%s3570_s3 + $0x18] sm:$0xff]  ;;  %v646_v62 = vadd.f32 %v518_v40, %v262_v50  ;;  %v207_v41 = vmul.f32 0.999, %v79_v58  ;;  %v462_v6 = vmul.f32 0.0009999871, %v334_v59 }
  0x7b   :  { %1474 = vmatpush.bf16.msra.mxu2 %v1396_v55  ;;  %840 = vst [vmem:[#allocation11 + $0x110] sm:$0xff] %v622_v46  ;;  %v647_v11 = vadd.f32 %v519_v48, %v263_v54  ;;  %v1404_v9 = vpack.c.bf16 %v623_v19, %v622_v46  ;;  %v463_v2 = vmul.f32 0.0009999871, %v335_v60  ;;  %v93_v7 = vld [vmem:[%s3574_s7 + $0x88] sm:$0xff]  ;;  %v220_v0 = vmul.f32 0.999, %v92_v8 }
  0x7c   :  { %841 = vst [vmem:[#allocation11 + $0x118] sm:$0xff] %v623_v19  ;;  %v590_v27 = vadd.f32 %v462_v6, %v206_v61  ;;  %v221_v35 = vmul.f32 0.999, %v93_v7  ;;  %v348_v36 = vld [vmem:[%s3570_s3 + $0x80] sm:$0xff]  ;;  %v349_v10 = vld [vmem:[%s3570_s3 + $0x88] sm:$0xff]  ;;  %v170_v12 = vld [vmem:[%s3574_s7 + $0x2f0] sm:$0xff] }
  0x7d   :  { %864 = vst [vmem:[#allocation11 + $0x1d0] sm:$0xff] %v646_v62  ;;  %v1416_v26 = vpack.c.bf16 %v647_v11, %v646_v62  ;;  %1488 = vmatpush.bf16.msra.mxu3 %v1404_v9  ;;  %v476_v1 = vmul.f32 0.0009999871, %v348_v36  ;;  %v477_v17 = vmul.f32 0.0009999871, %v349_v10  ;;  %v171_v49 = vld [vmem:[%s3574_s7 + $0x2f8] sm:$0xff] }
  0x7e   :  { %865 = vst [vmem:[#allocation11 + $0x1d8] sm:$0xff] %v647_v11  ;;  %v298_v14 = vmul.f32 0.999, %v170_v12  ;;  %v299_v15 = vmul.f32 0.999, %v171_v49  ;;  %v426_v20 = vld [vmem:[%s3570_s3 + $0x2f0] sm:$0xff] }
  0x7f   :  { %1498 = vmatpush.bf16.msrb.mxu0 %v1416_v26  ;;  %808 = vst [vmem:[#allocation11 + $0x10] sm:$0xff] %v590_v27  ;;  %v604_v51 = vadd.f32 %v476_v1, %v220_v0  ;;  %v605_v21 = vadd.f32 %v477_v17, %v221_v35  ;;  %v427_v22 = vld [vmem:[%s3570_s3 + $0x2f8] sm:$0xff]  ;;  %v554_v31 = vmul.f32 0.0009999871, %v426_v20  ;;  %v109_v52 = vld [vmem:[%s3574_s7 + $0x108] sm:$0xff]  ;;  %v132_v34 = vld [vmem:[%s3574_s7 + $0x1c0] sm:$0xff] }
  0x80   :  { %v555_v53 = vmul.f32 0.0009999871, %v427_v22  ;;  %v237_v32 = vmul.f32 0.999, %v109_v52  ;;  %v365_v18 = vld [vmem:[%s3570_s3 + $0x108] sm:$0xff]  ;;  %v388_v50 = vld [vmem:[%s3570_s3 + $0x1c0] sm:$0xff] }
  0x81   :  { %822 = vst [vmem:[#allocation11 + $0x80] sm:$0xff] %v604_v51  ;;  %v1395_v33 = vpack.c.bf16 %v605_v21, %v604_v51  ;;  %v493_v42 = vmul.f32 0.0009999871, %v365_v18  ;;  %v133_v39 = vld [vmem:[%s3574_s7 + $0x1c8] sm:$0xff]  ;;  %v260_v45 = vmul.f32 0.999, %v132_v34 }
  0x82   :  { %823 = vst [vmem:[#allocation11 + $0x88] sm:$0xff] %v605_v21  ;;  %v683_v38 = vadd.f32 %v555_v53, %v299_v15  ;;  %v261_v46 = vmul.f32 0.999, %v133_v39  ;;  %v186_v19 = vld [vmem:[%s3574_s7 + $0x370] sm:$0xff]  ;;  %v187_v58 = vld [vmem:[%s3574_s7 + $0x378] sm:$0xff]  ;;  %v76_v8 = vld [vmem:[%s3574_s7] sm:$0xff] }
  0x83   :  { %1475 = vmatpush.bf16.msra.mxu2 %v1395_v33  ;;  %v621_v56 = vadd.f32 %v493_v42, %v237_v32  ;;  %v314_v59 = vmul.f32 0.999, %v186_v19  ;;  %v315_v60 = vmul.f32 0.999, %v187_v58  ;;  %v443_v6 = vld [vmem:[%s3570_s3 + $0x378] sm:$0xff]  ;;  %v77_v26 = vld [vmem:[%s3574_s7 + $0x8] sm:$0xff] }
  0x84   :  { %901 = vst [vmem:[#allocation11 + $0x2f8] sm:$0xff] %v683_v38  ;;  %v571_v0 = vmul.f32 0.0009999871, %v443_v6  ;;  %v205_v35 = vmul.f32 0.999, %v77_v26  ;;  %v332_v36 = vld [vmem:[%s3570_s3] sm:$0xff] }
  0x85   :  { %839 = vst [vmem:[#allocation11 + $0x108] sm:$0xff] %v621_v56  ;;  %v333_v1 = vld [vmem:[%s3570_s3 + $0x8] sm:$0xff]  ;;  %v460_v17 = vmul.f32 0.0009999871, %v332_v36  ;;  %v154_v49 = vld [vmem:[%s3574_s7 + $0x270] sm:$0xff]  ;;  %v440_v6 = vld [vmem:[%s3570_s3 + $0x360] sm:$0xff] }
  0x86   :  { %v282_v15 = vmul.f32 0.999, %v154_v49  ;;  %v410_v22 = vld [vmem:[%s3570_s3 + $0x270] sm:$0xff]  ;;  %v152_v26 = vld [vmem:[%s3574_s7 + $0x260] sm:$0xff]  ;;  %v568_v36 = vmul.f32 0.0009999871, %v440_v6 }
  0x87   :  { %v538_v33 = vmul.f32 0.0009999871, %v410_v22  ;;  %v280_v49 = vmul.f32 0.999, %v152_v26 }
  0xae   :  { %v1198_v16 = vpop.f32.mrf.mxu0 }
  0xaf   :  { %v1199_v29 = vadd.f32 %v2834_v13, %v1198_v16  ;;  %v1212_v24 = vpop.f32.mrf.mxu1  ;;  %v591_v16 = vadd.f32 %v463_v2, %v207_v41  ;;  %v442_v41 = vld [vmem:[%s3570_s3 + $0x370] sm:$0xff] }
  0xb0   :  { %v570_v7 = vmul.f32 0.0009999871, %v442_v41 }
  0xb1   :  { %v1213_v57 = vadd.f32 %v1212_v24, %v1199_v29  ;;  %809 = vst [vmem:[#allocation11 + $0x18] sm:$0xff] %v591_v16  ;;  %v1388_v25 = vpack.c.bf16 %v591_v16, %v590_v27  ;;  %v682_v29 = vadd.f32 %v554_v31, %v298_v14  ;;  %v364_v24 = vld [vmem:[%s3570_s3 + $0x100] sm:$0xff]  ;;  %v204_v27 = vmul.f32 0.999, %v76_v8  ;;  %v411_v31 = vld [vmem:[%s3570_s3 + $0x278] sm:$0xff]  ;;  %v441_v8 = vld [vmem:[%s3570_s3 + $0x368] sm:$0xff] }
  0xb2   :  { %v492_v37 = vmul.f32 0.0009999871, %v364_v24  ;;  %v698_v12 = vadd.f32 %v570_v7, %v314_v59  ;;  %v699_v16 = vadd.f32 %v571_v0, %v315_v60  ;;  %v461_v14 = vmul.f32 0.0009999871, %v333_v1  ;;  %v169_v24 = vld [vmem:[%s3574_s7 + $0x2e8] sm:$0xff]  ;;  %v184_v60 = vld [vmem:[%s3574_s7 + $0x360] sm:$0xff] }
  0xb3   :  { %1460 = vmatpush.bf16.msra.mxu1 %v1388_v25  ;;  %900 = vst [vmem:[#allocation11 + $0x2f0] sm:$0xff] %v682_v29  ;;  %v1434_v40 = vpack.c.bf16 %v683_v38, %v682_v29  ;;  %v588_v21 = vadd.f32 %v460_v17, %v204_v27  ;;  %v539_v29 = vmul.f32 0.0009999871, %v411_v31  ;;  %v297_v38 = vmul.f32 0.999, %v169_v24  ;;  %v153_v27 = vld [vmem:[%s3574_s7 + $0x268] sm:$0xff] }
  0xb4   :  { %916 = vst [vmem:[#allocation11 + $0x370] sm:$0xff] %v698_v12  ;;  %v1442_v51 = vpack.c.bf16 %v699_v16, %v698_v12  ;;  %v589_v32 = vadd.f32 %v461_v14, %v205_v35  ;;  %v312_v41 = vmul.f32 0.999, %v184_v60  ;;  %v408_v35 = vld [vmem:[%s3570_s3 + $0x260] sm:$0xff]  ;;  %v151_v60 = vld [vmem:[%s3574_s7 + $0x258] sm:$0xff] }
  0xb5   :  { %1524 = vmatpush.bf16.msrb.mxu2 %v1434_v40  ;;  %917 = vst [vmem:[#allocation11 + $0x378] sm:$0xff] %v699_v16  ;;  %v409_v16 = vld [vmem:[%s3570_s3 + $0x268] sm:$0xff] }
  0xb6   :  { %v1226_v5 = vpop.f32.mrf.mxu2  ;;  %v1200_v3 = vpop.f32.mrf.mxu0  ;;  %806 = vst [vmem:[#allocation11] sm:$0xff] %v588_v21  ;;  %v1387_v39 = vpack.c.bf16 %v589_v32, %v588_v21  ;;  %v696_v14 = vadd.f32 %v568_v36, %v312_v41  ;;  %v423_v21 = vld [vmem:[%s3570_s3 + $0x2d8] sm:$0xff]  ;;  %v537_v22 = vmul.f32 0.0009999871, %v409_v16 }
  0xb7   :  { %v1240_v63 = vpop.f32.mrf.mxu3  ;;  %v1227_v28 = vadd.f32 %v1226_v5, %v1213_v57  ;;  %v1201_v4 = vadd.f32 %v2834_v13, %v1200_v3  ;;  %v1214_v30 = vpop.f32.mrf.mxu1  ;;  %v108_v13 = vld [vmem:[%s3574_s7 + $0x100] sm:$0xff]  ;;  %v389_v57 = vld [vmem:[%s3570_s3 + $0x1c8] sm:$0xff]  ;;  %v516_v5 = vmul.f32 0.0009999871, %v388_v50  ;;  %807 = vst [vmem:[#allocation11 + $0x8] sm:$0xff] %v589_v32 }
  0xb8   :  { %v236_v23 = vmul.f32 0.999, %v108_v13  ;;  %v517_v61 = vmul.f32 0.0009999871, %v389_v57  ;;  %v168_v13 = vld [vmem:[%s3574_s7 + $0x2e0] sm:$0xff]  ;;  %1461 = vmatpush.bf16.msra.mxu1 %v1387_v39  ;;  %v387_v57 = vld [vmem:[%s3570_s3 + $0x1b8] sm:$0xff] }
  0xb9   :  { %v1241_v47 = vadd.f32 %v1240_v63, %v1227_v28  ;;  %v1215_v43 = vadd.f32 %v1214_v30, %v1201_v4  ;;  %v644_v11 = vadd.f32 %v516_v5, %v260_v45  ;;  %v155_v28 = vld [vmem:[%s3574_s7 + $0x278] sm:$0xff]  ;;  %v296_v34 = vmul.f32 0.999, %v168_v13  ;;  %v130_v45 = vld [vmem:[%s3574_s7 + $0x1b0] sm:$0xff]  ;;  %914 = vst [vmem:[#allocation11 + $0x360] sm:$0xff] %v696_v14 }
  0xba   :  { %v620_v48 = vadd.f32 %v492_v37, %v236_v23  ;;  %v645_v2 = vadd.f32 %v517_v61, %v261_v46  ;;  %v283_v20 = vmul.f32 0.999, %v155_v28  ;;  %v424_v37 = vld [vmem:[%s3570_s3 + $0x2e0] sm:$0xff]  ;;  %v131_v46 = vld [vmem:[%s3574_s7 + $0x1b8] sm:$0xff]  ;;  %v515_v59 = vmul.f32 0.0009999871, %v387_v57 }
  0xbb   :  { %862 = vst [vmem:[#allocation11 + $0x1c0] sm:$0xff] %v644_v11  ;;  %v552_v50 = vmul.f32 0.0009999871, %v424_v37  ;;  %v281_v28 = vmul.f32 0.999, %v153_v27  ;;  %v439_v57 = vld [vmem:[%s3570_s3 + $0x358] sm:$0xff] }
  0xbc   :  { %838 = vst [vmem:[#allocation11 + $0x100] sm:$0xff] %v620_v48  ;;  %v1403_v62 = vpack.c.bf16 %v621_v56, %v620_v48  ;;  %v1415_v10 = vpack.c.bf16 %v645_v2, %v644_v11  ;;  %v259_v48 = vmul.f32 0.999, %v131_v46  ;;  %v386_v56 = vld [vmem:[%s3570_s3 + $0x1b0] sm:$0xff]  ;;  %v185_v11 = vld [vmem:[%s3574_s7 + $0x368] sm:$0xff] }
  0xbd   :  { %863 = vst [vmem:[#allocation11 + $0x1c8] sm:$0xff] %v645_v2  ;;  %v680_v19 = vadd.f32 %v552_v50, %v296_v34  ;;  %v514_v61 = vmul.f32 0.0009999871, %v386_v56  ;;  %v313_v7 = vmul.f32 0.999, %v185_v11  ;;  %v665_v24 = vadd.f32 %v537_v22, %v281_v28  ;;  %v182_v50 = vld [vmem:[%s3574_s7 + $0x350] sm:$0xff] }
  0xbe   :  { %v1228_v44 = vpop.f32.mrf.mxu2  ;;  %1489 = vmatpush.bf16.msra.mxu3 %v1403_v62  ;;  %1499 = vmatpush.bf16.msrb.mxu0 %v1415_v10  ;;  %v643_v2 = vadd.f32 %v515_v59, %v259_v48  ;;  %v569_v10 = vmul.f32 0.0009999871, %v441_v8  ;;  %v310_v48 = vmul.f32 0.999, %v182_v50  ;;  %v150_v59 = vld [vmem:[%s3574_s7 + $0x250] sm:$0xff]  ;;  %v407_v11 = vld [vmem:[%s3570_s3 + $0x258] sm:$0xff] }
  0xbf   :  { %v1242_v54 = vpop.f32.mrf.mxu3  ;;  %v1229_v3 = vadd.f32 %v1228_v44, %v1215_v43  ;;  %v667_v43 = vadd.f32 %v539_v29, %v283_v20  ;;  %v425_v44 = vld [vmem:[%s3570_s3 + $0x2e8] sm:$0xff]  ;;  %898 = vst [vmem:[#allocation11 + $0x2e0] sm:$0xff] %v680_v19  ;;  %v535_v26 = vmul.f32 0.0009999871, %v407_v11  ;;  %v127_v28 = vld [vmem:[%s3574_s7 + $0x198] sm:$0xff]  ;;  %v1373_v11 = vld [vmem:[%s3569_s2 + $0x50] sm:$0xff] }
  0xc0   :  { %861 = vst [vmem:[#allocation11 + $0x1b8] sm:$0xff] %v643_v2  ;;  %v129_v29 = vld [vmem:[%s3574_s7 + $0x1a8] sm:$0xff] }
  0xc1   :  { %v1243_v30 = vadd.f32 %v1242_v54, %v1229_v3  ;;  %v553_v54 = vmul.f32 0.0009999871, %v425_v44  ;;  %885 = vst [vmem:[#allocation11 + $0x278] sm:$0xff] %v667_v43  ;;  %v257_v39 = vmul.f32 0.999, %v129_v29 }
  0xc2   :  { %1538 = vmatpush.bf16.msrb.mxu3 %v1442_v51  ;;  %v422_v51 = vld [vmem:[%s3570_s3 + $0x2d0] sm:$0xff]  ;;  %883 = vst [vmem:[#allocation11 + $0x268] sm:$0xff] %v665_v24 }
  0xc3   :  { %v681_v58 = vadd.f32 %v553_v54, %v297_v38  ;;  %v550_v32 = vmul.f32 0.0009999871, %v422_v51  ;;  %v384_v38 = vld [vmem:[%s3570_s3 + $0x1a0] sm:$0xff]  ;;  %v183_v54 = vld [vmem:[%s3574_s7 + $0x358] sm:$0xff] }
  0xc4   :  { %v311_v56 = vmul.f32 0.999, %v183_v54  ;;  %v405_v54 = vld [vmem:[%s3570_s3 + $0x248] sm:$0xff] }
  0xc5   :  { %v1433_v3 = vpack.c.bf16 %v681_v58, %v680_v19  ;;  %899 = vst [vmem:[#allocation11 + $0x2e8] sm:$0xff] %v681_v58 }
  0xc7   :  { %1525 = vmatpush.bf16.msrb.mxu2 %v1433_v3  ;;  %v279_v3 = vmul.f32 0.999, %v151_v60 }
  0xce   :  { %v1254_v55 = vpop.f32.mrf.mxu0 }
  0xcf   :  { %v1255_v63 = vadd.f32 %v1254_v55, %v1241_v47  ;;  %v1268_v9 = vpop.f32.mrf.mxu1  ;;  %v666_v47 = vadd.f32 %v538_v33, %v282_v15  ;;  %v258_v55 = vmul.f32 0.999, %v130_v45  ;;  %v697_v15 = vadd.f32 %v569_v10, %v313_v7  ;;  %v128_v33 = vld [vmem:[%s3574_s7 + $0x1a0] sm:$0xff]  ;;  %v421_v10 = vld [vmem:[%s3570_s3 + $0x2c8] sm:$0xff] }
  0xd0   :  { %v256_v34 = vmul.f32 0.999, %v128_v33  ;;  %v420_v7 = vld [vmem:[%s3570_s3 + $0x2c0] sm:$0xff] }
  0xd1   :  { %v1269_v4 = vadd.f32 %v1268_v9, %v1255_v63  ;;  %884 = vst [vmem:[#allocation11 + $0x270] sm:$0xff] %v666_v47  ;;  %v1426_v40 = vpack.c.bf16 %v667_v43, %v666_v47  ;;  %v642_v9 = vadd.f32 %v514_v61, %v258_v55  ;;  %v385_v47 = vld [vmem:[%s3570_s3 + $0x1a8] sm:$0xff]  ;;  %v512_v43 = vmul.f32 0.0009999871, %v384_v38  ;;  %v438_v55 = vld [vmem:[%s3570_s3 + $0x350] sm:$0xff] }
  0xd2   :  { %915 = vst [vmem:[#allocation11 + $0x368] sm:$0xff] %v697_v15  ;;  %v513_v46 = vmul.f32 0.0009999871, %v385_v47  ;;  %v566_v58 = vmul.f32 0.0009999871, %v438_v55  ;;  %v1372_v38 = vld [vmem:[%s3569_s2 + $0x48] sm:$0xff] }
  0xd3   :  { %1510 = vmatpush.bf16.msrb.mxu1 %v1426_v40  ;;  %860 = vst [vmem:[#allocation11 + $0x1b0] sm:$0xff] %v642_v9  ;;  %v1414_v1 = vpack.c.bf16 %v643_v2, %v642_v9  ;;  %v640_v40 = vadd.f32 %v512_v43, %v256_v34  ;;  %v567_v61 = vmul.f32 0.0009999871, %v439_v57  ;;  %v164_v9 = vld [vmem:[%s3574_s7 + $0x2c0] sm:$0xff]  ;;  %v165_v2 = vld [vmem:[%s3574_s7 + $0x2c8] sm:$0xff]  ;;  %v163_v57 = vld [vmem:[%s3574_s7 + $0x2b8] sm:$0xff] }
  0xd4   :  { %v641_v19 = vadd.f32 %v513_v46, %v257_v39  ;;  %v694_v6 = vadd.f32 %v566_v58, %v310_v48  ;;  %v292_v27 = vmul.f32 0.999, %v164_v9  ;;  %v293_v36 = vmul.f32 0.999, %v165_v2  ;;  %v1364_v34 = vld [vmem:[%s3569_s2 + $0x8] sm:$0xff]  ;;  %v148_v39 = vld [vmem:[%s3574_s7 + $0x240] sm:$0xff] }
  0xd5   :  { %1500 = vmatpush.bf16.msrb.mxu0 %v1414_v1  ;;  %858 = vst [vmem:[#allocation11 + $0x1a0] sm:$0xff] %v640_v40  ;;  %v695_v8 = vadd.f32 %v567_v61, %v311_v56  ;;  %v663_v1 = vadd.f32 %v535_v26, %v279_v3  ;;  %v149_v47 = vld [vmem:[%s3574_s7 + $0x248] sm:$0xff]  ;;  %v404_v43 = vld [vmem:[%s3570_s3 + $0x240] sm:$0xff]  ;;  %v276_v46 = vmul.f32 0.999, %v148_v39  ;;  %v162_v56 = vld [vmem:[%s3574_s7 + $0x2b0] sm:$0xff] }
  0xd6   :  { %v1282_v25 = vpop.f32.mrf.mxu2  ;;  %v1256_v23 = vpop.f32.mrf.mxu0  ;;  %859 = vst [vmem:[#allocation11 + $0x1a8] sm:$0xff] %v641_v19  ;;  %v1413_v41 = vpack.c.bf16 %v641_v19, %v640_v40  ;;  %v277_v50 = vmul.f32 0.999, %v149_v47  ;;  %v532_v40 = vmul.f32 0.0009999871, %v404_v43  ;;  %v418_v19 = vld [vmem:[%s3570_s3 + $0x2b0] sm:$0xff] }
  0xd7   :  { %v1283_v52 = vadd.f32 %v1282_v25, %v1269_v4  ;;  %v1296_v53 = vpop.f32.mrf.mxu3  ;;  %v1257_v18 = vadd.f32 %v1256_v23, %v1243_v30  ;;  %v1270_v5 = vpop.f32.mrf.mxu1  ;;  %v166_v4 = vld [vmem:[%s3574_s7 + $0x2d0] sm:$0xff]  ;;  %v536_v30 = vmul.f32 0.0009999871, %v408_v35  ;;  %v167_v25 = vld [vmem:[%s3574_s7 + $0x2d8] sm:$0xff]  ;;  %912 = vst [vmem:[#allocation11 + $0x350] sm:$0xff] %v694_v6  ;;  %v1440_v35 = vpack.c.bf16 %v695_v8, %v694_v6  ;;  %v125_v9 = vld [vmem:[%s3574_s7 + $0x188] sm:$0xff] }
  0xd8   :  { %v294_v31 = vmul.f32 0.999, %v166_v4  ;;  %v295_v13 = vmul.f32 0.999, %v167_v25  ;;  %913 = vst [vmem:[#allocation11 + $0x358] sm:$0xff] %v695_v8  ;;  %v382_v4 = vld [vmem:[%s3570_s3 + $0x190] sm:$0xff] }
  0xd9   :  { %v2988_v42 = vadd.f32 %v1296_v53, %v1283_v52  ;;  %v1271_v62 = vadd.f32 %v1270_v5, %v1257_v18  ;;  %v1441_v52 = vpack.c.bf16 %v697_v15, %v696_v14  ;;  %v664_v23 = vadd.f32 %v536_v30, %v280_v49  ;;  %1501 = vmatpush.bf16.msrb.mxu0 %v1413_v41  ;;  %v126_v49 = vld [vmem:[%s3574_s7 + $0x190] sm:$0xff]  ;;  %v383_v30 = vld [vmem:[%s3570_s3 + $0x198] sm:$0xff]  ;;  %v180_v25 = vld [vmem:[%s3574_s7 + $0x340] sm:$0xff] }
  0xda   :  { %v551_v18 = vmul.f32 0.0009999871, %v423_v21  ;;  %v254_v15 = vmul.f32 0.999, %v126_v49  ;;  %v510_v22 = vmul.f32 0.0009999871, %v382_v4 }
  0xdb   :  { %v1301_v63 = vmax.f32 %v2988_v42, 0.0  ;;  %1539 = vmatpush.bf16.msrb.mxu3 %v1441_v52  ;;  %882 = vst [vmem:[#allocation11 + $0x260] sm:$0xff] %v664_v23  ;;  %v678_v42 = vadd.f32 %v550_v32, %v294_v31  ;;  %v1425_v44 = vpack.c.bf16 %v665_v24, %v664_v23  ;;  %v511_v31 = vmul.f32 0.0009999871, %v383_v30  ;;  %v436_v23 = vld [vmem:[%s3570_s3 + $0x340] sm:$0xff]  ;;  %v437_v24 = vld [vmem:[%s3570_s3 + $0x348] sm:$0xff] }
  0xdc   :  { %v679_v45 = vadd.f32 %v551_v18, %v295_v13  ;;  %v181_v13 = vld [vmem:[%s3574_s7 + $0x348] sm:$0xff]  ;;  %881 = vst [vmem:[#allocation11 + $0x258] sm:$0xff] %v663_v1  ;;  %v308_v52 = vmul.f32 0.999, %v180_v25  ;;  %v638_v33 = vadd.f32 %v510_v22, %v254_v15  ;;  %v564_v18 = vmul.f32 0.0009999871, %v436_v23 }
  0xdd   :  { %896 = vst [vmem:[#allocation11 + $0x2d0] sm:$0xff] %v678_v42  ;;  %1511 = vmatpush.bf16.msrb.mxu1 %v1425_v44  ;;  %v533_v48 = vmul.f32 0.0009999871, %v405_v54  ;;  %v419_v58 = vld [vmem:[%s3570_s3 + $0x2b8] sm:$0xff]  ;;  %v124_v41 = vld [vmem:[%s3574_s7 + $0x180] sm:$0xff]  ;;  %v434_v49 = vld [vmem:[%s3570_s3 + $0x330] sm:$0xff] }
  0xde   :  { %v1284_v0 = vpop.f32.mrf.mxu2  ;;  %897 = vst [vmem:[#allocation11 + $0x2d8] sm:$0xff] %v679_v45  ;;  %v1432_v5 = vpack.c.bf16 %v679_v45, %v678_v42  ;;  %v1380_v42 = vpack.c.bf16 %v1372_v38, %v1364_v34  ;;  %v692_v45 = vadd.f32 %v564_v18, %v308_v52  ;;  %v546_v6 = vmul.f32 0.0009999871, %v418_v19  ;;  %v380_v2 = vld [vmem:[%s3570_s3 + $0x180] sm:$0xff]  ;;  %v202_v30 = vld [vmem:[%s3574_s7 + $0x3f0] sm:$0xff]  ;;  %v203_v25 = vld [vmem:[%s3574_s7 + $0x3f8] sm:$0xff] }
  0xdf   :  { %v1285_v12 = vadd.f32 %v1284_v0, %v1271_v62  ;;  %v1298_v17 = vpop.f32.mrf.mxu3  ;;  %v406_v62 = vld [vmem:[%s3570_s3 + $0x250] sm:$0xff]  ;;  %1540 = vmatpush.bf16.msrb.mxu3 %v1440_v35  ;;  %856 = vst [vmem:[#allocation11 + $0x190] sm:$0xff] %v638_v33  ;;  %v661_v60 = vadd.f32 %v533_v48, %v277_v50  ;;  %v547_v8 = vmul.f32 0.0009999871, %v419_v58  ;;  %v253_v26 = vmul.f32 0.999, %v125_v9 }
  0xe0   :  { %1526 = vmatpush.bf16.msrb.mxu2 %v1432_v5  ;;  %v534_v0 = vmul.f32 0.0009999871, %v406_v62  ;;  %910 = vst [vmem:[#allocation11 + $0x340] sm:$0xff] %v692_v45  ;;  %v290_v5 = vmul.f32 0.999, %v162_v56  ;;  %v1365_v62 = vld [vmem:[%s3569_s2 + $0x10] sm:$0xff] }
  0xe1   :  { %v1299_v20 = vadd.f32 %v1298_v17, %v1285_v12  ;;  %v548_v12 = vmul.f32 0.0009999871, %v420_v7  ;;  %v549_v17 = vmul.f32 0.0009999871, %v421_v10  ;;  %1476 = vmatmul.bf16.vlgmr.msra.gmra.mxu2 %v1380_v42  ;;  %v1381_v3 = vpack.c.bf16 %v1373_v11, %v1365_v62  ;;  %879 = vst [vmem:[#allocation11 + $0x248] sm:$0xff] %v661_v60  ;;  %v1363_v23 = vld [vmem:[%s3569_s2] sm:$0xff] }
  0xe2   :  { %v674_v35 = vadd.f32 %v546_v6, %v290_v5  ;;  %v508_v10 = vmul.f32 0.0009999871, %v380_v2  ;;  %v330_v52 = vmul.f32 0.999, %v202_v30  ;;  %v1371_v18 = vld [vmem:[%s3569_s2 + $0x40] sm:$0xff]  ;;  %v146_v38 = vld [vmem:[%s3574_s7 + $0x230] sm:$0xff] }
  0xe3   :  { %v1302_v53 = vmax.f32 %v1299_v20, 0.0  ;;  %v676_v14 = vadd.f32 %v548_v12, %v292_v27  ;;  %v255_v20 = vmul.f32 0.999, %v127_v28  ;;  %v677_v21 = vadd.f32 %v549_v17, %v293_v36  ;;  %v381_v27 = vld [vmem:[%s3570_s3 + $0x188] sm:$0xff]  ;;  %1490 = vmatmul.bf16.vlgmr.msra.gmra.mxu3 %v1381_v3  ;;  %v435_v28 = vld [vmem:[%s3570_s3 + $0x338] sm:$0xff]  ;;  %v402_v42 = vld [vmem:[%s3570_s3 + $0x230] sm:$0xff] }
  0xe4   :  { %v509_v12 = vmul.f32 0.0009999871, %v381_v27  ;;  %892 = vst [vmem:[#allocation11 + $0x2b0] sm:$0xff] %v674_v35  ;;  %v563_v22 = vmul.f32 0.0009999871, %v435_v28  ;;  %v1379_v34 = vpack.c.bf16 %v1371_v18, %v1363_v23  ;;  %v161_v50 = vld [vmem:[%s3574_s7 + $0x2a8] sm:$0xff] }
  0xe5   :  { %v1303_v37 = vpack.c.bf16 %v1302_v53, %v1301_v63  ;;  %v278_v63 = vmul.f32 0.999, %v150_v59  ;;  %v309_v53 = vmul.f32 0.999, %v181_v13  ;;  %894 = vst [vmem:[#allocation11 + $0x2c0] sm:$0xff] %v676_v14  ;;  %v1431_v32 = vpack.c.bf16 %v677_v21, %v676_v14  ;;  %v417_v5 = vld [vmem:[%s3570_s3 + $0x2a8] sm:$0xff] }
  0xe6   :  { %v639_v29 = vadd.f32 %v511_v31, %v255_v20  ;;  %895 = vst [vmem:[#allocation11 + $0x2c8] sm:$0xff] %v677_v21  ;;  %v660_v59 = vadd.f32 %v532_v40, %v276_v46  ;;  %v637_v15 = vadd.f32 %v509_v12, %v253_v26  ;;  %v562_v21 = vmul.f32 0.0009999871, %v434_v49  ;;  %v459_v31 = vld [vmem:[%s3570_s3 + $0x3f8] sm:$0xff]  ;;  %v160_v46 = vld [vmem:[%s3574_s7 + $0x2a0] sm:$0xff]  ;;  %1462 = vmatmul.bf16.vlgmr.msra.gmra.mxu1 %v1379_v34  ;;  %v177_v62 = vld [vmem:[%s3574_s7 + $0x328] sm:$0xff] }
  0xe7   :  { %1323 = vmatmul.bf16.vlgmr.msra.gmra.mxu0 %v1303_v37  ;;  %v662_v16 = vadd.f32 %v534_v0, %v278_v63  ;;  %v565_v37 = vmul.f32 0.0009999871, %v437_v24  ;;  %1527 = vmatpush.bf16.msrb.mxu2 %v1431_v32  ;;  %v291_v63 = vmul.f32 0.999, %v163_v57  ;;  %v252_v0 = vmul.f32 0.999, %v124_v41 }
  0xe8   :  { %v1412_v44 = vpack.c.bf16 %v639_v29, %v638_v33  ;;  %857 = vst [vmem:[#allocation11 + $0x198] sm:$0xff] %v639_v29  ;;  %v1423_v7 = vpack.c.bf16 %v661_v60, %v660_v59  ;;  %v587_v24 = vmul.f32 0.0009999871, %v459_v31  ;;  %v416_v40 = vld [vmem:[%s3570_s3 + $0x2a0] sm:$0xff]  ;;  %v288_v57 = vmul.f32 0.999, %v160_v46 }
  0xe9   :  { %880 = vst [vmem:[#allocation11 + $0x250] sm:$0xff] %v662_v16  ;;  %v1424_v51 = vpack.c.bf16 %v663_v1, %v662_v16  ;;  %v693_v55 = vadd.f32 %v565_v37, %v309_v53  ;;  %v675_v36 = vadd.f32 %v547_v8, %v291_v63  ;;  %v178_v16 = vld [vmem:[%s3574_s7 + $0x330] sm:$0xff]  ;;  %v179_v1 = vld [vmem:[%s3574_s7 + $0x338] sm:$0xff]  ;;  %v636_v14 = vadd.f32 %v508_v10, %v252_v0  ;;  %v432_v41 = vld [vmem:[%s3570_s3 + $0x320] sm:$0xff] }
  0xea   :  { %1502 = vmatpush.bf16.msrb.mxu0 %v1412_v44  ;;  %878 = vst [vmem:[#allocation11 + $0x240] sm:$0xff] %v660_v59  ;;  %v306_v17 = vmul.f32 0.999, %v178_v16  ;;  %v307_v20 = vmul.f32 0.999, %v179_v1  ;;  %v147_v37 = vld [vmem:[%s3574_s7 + $0x238] sm:$0xff] }
  0xeb   :  { %1512 = vmatpush.bf16.msrb.mxu1 %v1424_v51  ;;  %911 = vst [vmem:[#allocation11 + $0x348] sm:$0xff] %v693_v55  ;;  %v1439_v61 = vpack.c.bf16 %v693_v55, %v692_v45  ;;  %v1430_v4 = vpack.c.bf16 %v675_v36, %v674_v35  ;;  %v458_v51 = vld [vmem:[%s3570_s3 + $0x3f0] sm:$0xff]  ;;  %v1411_v13 = vpack.c.bf16 %v637_v15, %v636_v14  ;;  %v331_v53 = vmul.f32 0.999, %v203_v25  ;;  %v403_v45 = vld [vmem:[%s3570_s3 + $0x238] sm:$0xff]  ;;  %v176_v59 = vld [vmem:[%s3574_s7 + $0x320] sm:$0xff] }
  0xec   :  { %893 = vst [vmem:[#allocation11 + $0x2b8] sm:$0xff] %v675_v36  ;;  %v690_v32 = vadd.f32 %v562_v21, %v306_v17  ;;  %v691_v33 = vadd.f32 %v563_v22, %v307_v20  ;;  %v586_v29 = vmul.f32 0.0009999871, %v458_v51  ;;  %v274_v44 = vmul.f32 0.999, %v146_v38  ;;  %v433_v3 = vld [vmem:[%s3570_s3 + $0x328] sm:$0xff] }
  0xed   :  { %1541 = vmatpush.bf16.msrb.mxu3 %v1439_v61  ;;  %1528 = vmatpush.bf16.msrb.mxu2 %v1430_v4  ;;  %854 = vst [vmem:[#allocation11 + $0x180] sm:$0xff] %v636_v14  ;;  %v715_v43 = vadd.f32 %v587_v24, %v331_v53  ;;  %v275_v54 = vmul.f32 0.999, %v147_v37  ;;  %v530_v55 = vmul.f32 0.0009999871, %v402_v42  ;;  %v200_v26 = vld [vmem:[%s3574_s7 + $0x3e0] sm:$0xff] }
  0xee   :  { %855 = vst [vmem:[#allocation11 + $0x188] sm:$0xff] %v637_v15  ;;  %1503 = vmatpush.bf16.msrb.mxu0 %v1411_v13  ;;  %v1438_v39 = vpack.c.bf16 %v691_v33, %v690_v32  ;;  %v714_v47 = vadd.f32 %v586_v29, %v330_v52  ;;  %v531_v56 = vmul.f32 0.0009999871, %v403_v45  ;;  %v289_v58 = vmul.f32 0.999, %v161_v50  ;;  %v201_v27 = vld [vmem:[%s3574_s7 + $0x3e8] sm:$0xff] }
  0xef   :  { %1513 = vmatpush.bf16.msrb.mxu1 %v1423_v7  ;;  %908 = vst [vmem:[#allocation11 + $0x330] sm:$0xff] %v690_v32  ;;  %v658_v19 = vadd.f32 %v530_v55, %v274_v44  ;;  %v544_v61 = vmul.f32 0.0009999871, %v416_v40  ;;  %v545_v63 = vmul.f32 0.0009999871, %v417_v5  ;;  %v456_v35 = vld [vmem:[%s3570_s3 + $0x3e0] sm:$0xff] }
  0xf0   :  { %909 = vst [vmem:[#allocation11 + $0x338] sm:$0xff] %v691_v33  ;;  %v1450_v48 = vpack.c.bf16 %v715_v43, %v714_v47  ;;  %v659_v60 = vadd.f32 %v531_v56, %v275_v54  ;;  %v304_v11 = vmul.f32 0.999, %v176_v59  ;;  %v305_v8 = vmul.f32 0.999, %v177_v62  ;;  %v457_v16 = vld [vmem:[%s3570_s3 + $0x3e8] sm:$0xff] }
  0xf1   :  { %1542 = vmatpush.bf16.msrb.mxu3 %v1438_v39  ;;  %932 = vst [vmem:[#allocation11 + $0x3f0] sm:$0xff] %v714_v47  ;;  %v672_v6 = vadd.f32 %v544_v61, %v288_v57  ;;  %v560_v9 = vmul.f32 0.0009999871, %v432_v41  ;;  %v673_v7 = vadd.f32 %v545_v63, %v289_v58  ;;  %v561_v0 = vmul.f32 0.0009999871, %v433_v3  ;;  %v144_v4 = vld [vmem:[%s3574_s7 + $0x220] sm:$0xff] }
  0xf2   :  { %933 = vst [vmem:[#allocation11 + $0x3f8] sm:$0xff] %v715_v43  ;;  %1552 = vmatpush.bf16.msra.mxu0 %v1450_v48  ;;  %v1422_v2 = vpack.c.bf16 %v659_v60, %v658_v19  ;;  %v328_v10 = vmul.f32 0.999, %v200_v26  ;;  %v329_v12 = vmul.f32 0.999, %v201_v27  ;;  %v145_v14 = vld [vmem:[%s3574_s7 + $0x228] sm:$0xff] }
  0xf3   :  { %876 = vst [vmem:[#allocation11 + $0x230] sm:$0xff] %v658_v19  ;;  %v688_v36 = vadd.f32 %v560_v9, %v304_v11  ;;  %v1429_v1 = vpack.c.bf16 %v673_v7, %v672_v6  ;;  %v689_v17 = vadd.f32 %v561_v0, %v305_v8  ;;  %v584_v49 = vmul.f32 0.0009999871, %v456_v35  ;;  %v400_v20 = vld [vmem:[%s3570_s3 + $0x220] sm:$0xff]  ;;  %v401_v30 = vld [vmem:[%s3570_s3 + $0x228] sm:$0xff]  ;;  %v158_v31 = vld [vmem:[%s3574_s7 + $0x290] sm:$0xff] }
  0xf4   :  { %877 = vst [vmem:[#allocation11 + $0x238] sm:$0xff] %v659_v60  ;;  %1514 = vmatpush.bf16.msrb.mxu1 %v1422_v2  ;;  %v585_v28 = vmul.f32 0.0009999871, %v457_v16  ;;  %v272_v15 = vmul.f32 0.999, %v144_v4  ;;  %v159_v13 = vld [vmem:[%s3574_s7 + $0x298] sm:$0xff] }
  0xf5   :  { %890 = vst [vmem:[#allocation11 + $0x2a0] sm:$0xff] %v672_v6  ;;  %1529 = vmatpush.bf16.msrb.mxu2 %v1429_v1  ;;  %v1437_v25 = vpack.c.bf16 %v689_v17, %v688_v36  ;;  %v712_v51 = vadd.f32 %v584_v49, %v328_v10  ;;  %v273_v22 = vmul.f32 0.999, %v145_v14  ;;  %v414_v52 = vld [vmem:[%s3570_s3 + $0x290] sm:$0xff]  ;;  %v528_v53 = vmul.f32 0.0009999871, %v400_v20 }
  0xf6   :  { %891 = vst [vmem:[#allocation11 + $0x2a8] sm:$0xff] %v673_v7  ;;  %v713_v21 = vadd.f32 %v585_v28, %v329_v12  ;;  %v529_v23 = vmul.f32 0.0009999871, %v401_v30  ;;  %v286_v32 = vmul.f32 0.999, %v158_v31  ;;  %v415_v24 = vld [vmem:[%s3570_s3 + $0x298] sm:$0xff] }
  0xf7   :  { %906 = vst [vmem:[#allocation11 + $0x320] sm:$0xff] %v688_v36  ;;  %1543 = vmatpush.bf16.msrb.mxu3 %v1437_v25  ;;  %v287_v29 = vmul.f32 0.999, %v159_v13  ;;  %v542_v18 = vmul.f32 0.0009999871, %v414_v52  ;;  %v656_v34 = vadd.f32 %v528_v53, %v272_v15  ;;  %v174_v42 = vld [vmem:[%s3574_s7 + $0x310] sm:$0xff] }
  0xf8   :  { %907 = vst [vmem:[#allocation11 + $0x328] sm:$0xff] %v689_v17  ;;  %v1449_v33 = vpack.c.bf16 %v713_v21, %v712_v51  ;;  %v657_v38 = vadd.f32 %v529_v23, %v273_v22  ;;  %v543_v37 = vmul.f32 0.0009999871, %v415_v24  ;;  %v175_v39 = vld [vmem:[%s3574_s7 + $0x318] sm:$0xff]  ;;  %v430_v47 = vld [vmem:[%s3570_s3 + $0x310] sm:$0xff]  ;;  %v156_v35 = vld [vmem:[%s3574_s7 + $0x280] sm:$0xff] }
  0xf9   :  { %930 = vst [vmem:[#allocation11 + $0x3e0] sm:$0xff] %v712_v51  ;;  %v670_v43 = vadd.f32 %v542_v18, %v286_v32  ;;  %v302_v44 = vmul.f32 0.999, %v174_v42  ;;  %v303_v45 = vmul.f32 0.999, %v175_v39  ;;  %v431_v46 = vld [vmem:[%s3570_s3 + $0x318] sm:$0xff] }
  0xfa   :  { %931 = vst [vmem:[#allocation11 + $0x3e8] sm:$0xff] %v713_v21  ;;  %1553 = vmatpush.bf16.msra.mxu0 %v1449_v33  ;;  %v198_v50 = vld [vmem:[%s3574_s7 + $0x3d0] sm:$0xff]  ;;  %v1421_v54 = vpack.c.bf16 %v657_v38, %v656_v34  ;;  %v671_v55 = vadd.f32 %v543_v37, %v287_v29  ;;  %v558_v40 = vmul.f32 0.0009999871, %v430_v47  ;;  %v559_v48 = vmul.f32 0.0009999871, %v431_v46 }
  0xfb   :  { %874 = vst [vmem:[#allocation11 + $0x220] sm:$0xff] %v656_v34  ;;  %v199_v56 = vld [vmem:[%s3574_s7 + $0x3d8] sm:$0xff]  ;;  %v326_v57 = vmul.f32 0.999, %v198_v50  ;;  %v454_v19 = vld [vmem:[%s3570_s3 + $0x3d0] sm:$0xff]  ;;  %v157_v36 = vld [vmem:[%s3574_s7 + $0x288] sm:$0xff] }
  0xfc   :  { %875 = vst [vmem:[#allocation11 + $0x228] sm:$0xff] %v657_v38  ;;  %v327_v5 = vmul.f32 0.999, %v199_v56  ;;  %1515 = vmatpush.bf16.msrb.mxu1 %v1421_v54  ;;  %v1428_v58 = vpack.c.bf16 %v671_v55, %v670_v43  ;;  %v686_v61 = vadd.f32 %v558_v40, %v302_v44  ;;  %v687_v59 = vadd.f32 %v559_v48, %v303_v45  ;;  %v455_v60 = vld [vmem:[%s3570_s3 + $0x3d8] sm:$0xff]  ;;  %v142_v62 = vld [vmem:[%s3574_s7 + $0x210] sm:$0xff]  ;;  %v412_v10 = vld [vmem:[%s3570_s3 + $0x280] sm:$0xff] }
  0xfd   :  { %888 = vst [vmem:[#allocation11 + $0x290] sm:$0xff] %v670_v43  ;;  %v582_v63 = vmul.f32 0.0009999871, %v454_v19  ;;  %v143_v11 = vld [vmem:[%s3574_s7 + $0x218] sm:$0xff]  ;;  %v583_v41 = vmul.f32 0.0009999871, %v455_v60 }
  0xfe   :  { %889 = vst [vmem:[#allocation11 + $0x298] sm:$0xff] %v671_v55  ;;  %v270_v6 = vmul.f32 0.999, %v142_v62  ;;  %v398_v8 = vld [vmem:[%s3570_s3 + $0x210] sm:$0xff]  ;;  %1530 = vmatpush.bf16.msrb.mxu2 %v1428_v58  ;;  %v1436_v3 = vpack.c.bf16 %v687_v59, %v686_v61  ;;  %v271_v2 = vmul.f32 0.999, %v143_v11 }
  0xff   :  { %904 = vst [vmem:[#allocation11 + $0x310] sm:$0xff] %v686_v61  ;;  %v710_v9 = vadd.f32 %v582_v63, %v326_v57  ;;  %v399_v7 = vld [vmem:[%s3570_s3 + $0x218] sm:$0xff]  ;;  %v526_v0 = vmul.f32 0.0009999871, %v398_v8  ;;  %v711_v26 = vadd.f32 %v583_v41, %v327_v5  ;;  %v284_v16 = vmul.f32 0.999, %v156_v35 }
 0x100   :  { %905 = vst [vmem:[#allocation11 + $0x318] sm:$0xff] %v687_v59  ;;  %v527_v27 = vmul.f32 0.0009999871, %v399_v7  ;;  %1544 = vmatpush.bf16.msrb.mxu3 %v1436_v3  ;;  %v285_v1 = vmul.f32 0.999, %v157_v36  ;;  %v413_v17 = vld [vmem:[%s3570_s3 + $0x288] sm:$0xff] }
 0x101   :  { %928 = vst [vmem:[#allocation11 + $0x3d0] sm:$0xff] %v710_v9  ;;  %v654_v12 = vadd.f32 %v526_v0, %v270_v6  ;;  %v1448_v49 = vpack.c.bf16 %v711_v26, %v710_v9  ;;  %v540_v4 = vmul.f32 0.0009999871, %v412_v10  ;;  %v541_v14 = vmul.f32 0.0009999871, %v413_v17  ;;  %v172_v15 = vld [vmem:[%s3574_s7 + $0x300] sm:$0xff] }
 0x102   :  { %929 = vst [vmem:[#allocation11 + $0x3d8] sm:$0xff] %v711_v26  ;;  %v655_v28 = vadd.f32 %v527_v27, %v271_v2  ;;  %v173_v20 = vld [vmem:[%s3574_s7 + $0x308] sm:$0xff]  ;;  %v300_v30 = vmul.f32 0.999, %v172_v15  ;;  %v428_v25 = vld [vmem:[%s3570_s3 + $0x300] sm:$0xff]  ;;  %v1366_v19 = vld [vmem:[%s3569_s2 + $0x18] sm:$0xff] }
 0x103   :  { %872 = vst [vmem:[#allocation11 + $0x210] sm:$0xff] %v654_v12  ;;  %v429_v51 = vld [vmem:[%s3570_s3 + $0x308] sm:$0xff]  ;;  %1554 = vmatpush.bf16.msra.mxu0 %v1448_v49  ;;  %v668_v22 = vadd.f32 %v540_v4, %v284_v16  ;;  %v669_v31 = vadd.f32 %v541_v14, %v285_v1  ;;  %v301_v13 = vmul.f32 0.999, %v173_v20  ;;  %v196_v52 = vld [vmem:[%s3574_s7 + $0x3c0] sm:$0xff]  ;;  %v1374_v61 = vld [vmem:[%s3569_s2 + $0x58] sm:$0xff] }
 0x104   :  { %873 = vst [vmem:[#allocation11 + $0x218] sm:$0xff] %v655_v28  ;;  %v1420_v21 = vpack.c.bf16 %v655_v28, %v654_v12  ;;  %v197_v53 = vld [vmem:[%s3574_s7 + $0x3c8] sm:$0xff]  ;;  %v452_v23 = vld [vmem:[%s3570_s3 + $0x3c0] sm:$0xff]  ;;  %v556_v32 = vmul.f32 0.0009999871, %v428_v25  ;;  %v1369_v59 = vld [vmem:[%s3569_s2 + $0x30] sm:$0xff]  ;;  %v1382_v11 = vpack.c.bf16 %v1374_v61, %v1366_v19 }
 0x105   :  { %v557_v33 = vmul.f32 0.0009999871, %v429_v51  ;;  %v324_v29 = vmul.f32 0.999, %v196_v52  ;;  %886 = vst [vmem:[#allocation11 + $0x280] sm:$0xff] %v668_v22  ;;  %v1427_v24 = vpack.c.bf16 %v669_v31, %v668_v22  ;;  %v453_v34 = vld [vmem:[%s3570_s3 + $0x3c8] sm:$0xff] }
 0x106   :  { %1516 = vmatpush.bf16.msrb.mxu1 %v1420_v21  ;;  %v325_v18 = vmul.f32 0.999, %v197_v53  ;;  %v580_v38 = vmul.f32 0.0009999871, %v452_v23  ;;  %887 = vst [vmem:[#allocation11 + $0x288] sm:$0xff] %v669_v31  ;;  %v684_v37 = vadd.f32 %v556_v32, %v300_v30  ;;  %v1368_v47 = vld [vmem:[%s3569_s2 + $0x28] sm:$0xff]  ;;  %1504 = vmatmul.bf16.vlgmr.msrb.gmra.mxu0 %v1382_v11 }
 0x107   :  { %v685_v42 = vadd.f32 %v557_v33, %v301_v13  ;;  %v581_v39 = vmul.f32 0.0009999871, %v453_v34  ;;  %v1376_v43 = vld [vmem:[%s3569_s2 + $0x68] sm:$0xff]  ;;  %v140_v44 = vld [vmem:[%s3574_s7 + $0x200] sm:$0xff]  ;;  %1531 = vmatpush.bf16.msrb.mxu2 %v1427_v24  ;;  %v1377_v60 = vld [vmem:[%s3569_s2 + $0x70] sm:$0xff] }
 0x108   :  { %v708_v45 = vadd.f32 %v580_v38, %v324_v29  ;;  %v1384_v46 = vpack.c.bf16 %v1376_v43, %v1368_v47  ;;  %v141_v50 = vld [vmem:[%s3574_s7 + $0x208] sm:$0xff]  ;;  %v268_v54 = vmul.f32 0.999, %v140_v44  ;;  %v396_v55 = vld [vmem:[%s3570_s3 + $0x200] sm:$0xff]  ;;  %902 = vst [vmem:[#allocation11 + $0x300] sm:$0xff] %v684_v37  ;;  %v194_v41 = vld [vmem:[%s3574_s7 + $0x3b0] sm:$0xff]  ;;  %v1385_v9 = vpack.c.bf16 %v1377_v60, %v1369_v59 }
 0x109   :  { %v397_v40 = vld [vmem:[%s3570_s3 + $0x208] sm:$0xff]  ;;  %v1435_v48 = vpack.c.bf16 %v685_v42, %v684_v37  ;;  %v709_v56 = vadd.f32 %v581_v39, %v325_v18  ;;  %v269_v57 = vmul.f32 0.999, %v141_v50  ;;  %v524_v5 = vmul.f32 0.0009999871, %v396_v55  ;;  %903 = vst [vmem:[#allocation11 + $0x308] sm:$0xff] %v685_v42 }
 0x10a   :  { %v525_v58 = vmul.f32 0.0009999871, %v397_v40  ;;  %926 = vst [vmem:[#allocation11 + $0x3c0] sm:$0xff] %v708_v45  ;;  %1532 = vmatmul.bf16.vlgmr.msrb.gmra.mxu2 %v1384_v46  ;;  %v195_v6 = vld [vmem:[%s3574_s7 + $0x3b8] sm:$0xff]  ;;  %v450_v8 = vld [vmem:[%s3570_s3 + $0x3b0] sm:$0xff]  ;;  %v1367_v35 = vld [vmem:[%s3569_s2 + $0x20] sm:$0xff] }
 0x10b   :  { %1545 = vmatpush.bf16.msrb.mxu3 %v1435_v48  ;;  %v1447_v63 = vpack.c.bf16 %v709_v56, %v708_v45  ;;  %v652_v62 = vadd.f32 %v524_v5, %v268_v54  ;;  %927 = vst [vmem:[#allocation11 + $0x3c8] sm:$0xff] %v709_v56  ;;  %v322_v2 = vmul.f32 0.999, %v194_v41  ;;  %v323_v7 = vmul.f32 0.999, %v195_v6  ;;  %v451_v0 = vld [vmem:[%s3570_s3 + $0x3b8] sm:$0xff] }
 0x10c   :  { %v653_v3 = vadd.f32 %v525_v58, %v269_v57  ;;  %v578_v26 = vmul.f32 0.0009999871, %v450_v8  ;;  %v579_v27 = vmul.f32 0.0009999871, %v451_v0  ;;  %v1375_v10 = vld [vmem:[%s3569_s2 + $0x60] sm:$0xff]  ;;  %v193_v16 = vld [vmem:[%s3574_s7 + $0x3a8] sm:$0xff] }
 0x10d   :  { %1555 = vmatpush.bf16.msra.mxu0 %v1447_v63  ;;  %870 = vst [vmem:[#allocation11 + $0x200] sm:$0xff] %v652_v62  ;;  %v192_v12 = vld [vmem:[%s3574_s7 + $0x3a0] sm:$0xff]  ;;  %v1383_v49 = vpack.c.bf16 %v1375_v10, %v1367_v35  ;;  %v449_v14 = vld [vmem:[%s3570_s3 + $0x3a8] sm:$0xff]  ;;  %v190_v15 = vld [vmem:[%s3574_s7 + $0x390] sm:$0xff]  ;;  %v321_v20 = vmul.f32 0.999, %v193_v16 }
 0x10e   :  { %871 = vst [vmem:[#allocation11 + $0x208] sm:$0xff] %v653_v3  ;;  %v1419_v36 = vpack.c.bf16 %v653_v3, %v652_v62  ;;  %1546 = vmatmul.bf16.vlgmr.msrb.gmra.mxu3 %v1385_v9  ;;  %v706_v1 = vadd.f32 %v578_v26, %v322_v2  ;;  %v707_v17 = vadd.f32 %v579_v27, %v323_v7  ;;  %v320_v28 = vmul.f32 0.999, %v192_v12  ;;  %v448_v4 = vld [vmem:[%s3570_s3 + $0x3a0] sm:$0xff]  ;;  %v191_v21 = vld [vmem:[%s3574_s7 + $0x398] sm:$0xff]  ;;  %v446_v31 = vld [vmem:[%s3570_s3 + $0x390] sm:$0xff] }
 0x10f   :  { %v576_v30 = vmul.f32 0.0009999871, %v448_v4  ;;  %v577_v25 = vmul.f32 0.0009999871, %v449_v14  ;;  %v318_v22 = vmul.f32 0.999, %v190_v15 }
 0x110   :  { %1517 = vmatpush.bf16.msrb.mxu1 %v1419_v36  ;;  %924 = vst [vmem:[#allocation11 + $0x3b0] sm:$0xff] %v706_v1  ;;  %v1446_v51 = vpack.c.bf16 %v707_v17, %v706_v1  ;;  %v447_v13 = vld [vmem:[%s3570_s3 + $0x398] sm:$0xff]  ;;  %v319_v23 = vmul.f32 0.999, %v191_v21  ;;  %v574_v32 = vmul.f32 0.0009999871, %v446_v31 }
 0x111   :  { %925 = vst [vmem:[#allocation11 + $0x3b8] sm:$0xff] %v707_v17  ;;  %v704_v52 = vadd.f32 %v576_v30, %v320_v28  ;;  %v705_v53 = vadd.f32 %v577_v25, %v321_v20  ;;  %v188_v33 = vld [vmem:[%s3574_s7 + $0x380] sm:$0xff]  ;;  %v575_v29 = vmul.f32 0.0009999871, %v447_v13  ;;  %v189_v24 = vld [vmem:[%s3574_s7 + $0x388] sm:$0xff]  ;;  %v1370_v55 = vld [vmem:[%s3569_s2 + $0x38] sm:$0xff] }
 0x112   :  { %1556 = vmatpush.bf16.msra.mxu0 %v1446_v51  ;;  %v316_v18 = vmul.f32 0.999, %v188_v33  ;;  %v444_v34 = vld [vmem:[%s3570_s3 + $0x380] sm:$0xff]  ;;  %v702_v37 = vadd.f32 %v574_v32, %v318_v22  ;;  %v317_v42 = vmul.f32 0.999, %v189_v24  ;;  %v445_v39 = vld [vmem:[%s3570_s3 + $0x388] sm:$0xff] }
 0x113   :  { %1518 = vmatmul.bf16.vlgmr.msrb.gmra.mxu1 %v1383_v49  ;;  %922 = vst [vmem:[#allocation11 + $0x3a0] sm:$0xff] %v704_v52  ;;  %v1445_v38 = vpack.c.bf16 %v705_v53, %v704_v52  ;;  %v572_v47 = vmul.f32 0.0009999871, %v444_v34  ;;  %v703_v43 = vadd.f32 %v575_v29, %v319_v23  ;;  %v573_v44 = vmul.f32 0.0009999871, %v445_v39  ;;  %v1378_v40 = vld [vmem:[%s3569_s2 + $0x78] sm:$0xff] }
 0x114   :  { %923 = vst [vmem:[#allocation11 + $0x3a8] sm:$0xff] %v705_v53  ;;  %v1386_v48 = vpack.c.bf16 %v1378_v40, %v1370_v55  ;;  %v716_v56 = vld [vmem:[%s3575_s8] sm:$0x1]  ;;  %v1823_v61 = vld [vmem:[#allocation9] ss:$0 sm:$0xff]  ;;  %v735_v6 = vld [vmem:[%s3576_s9 + $0x70] sm:$0xff] }
 0x115   :  { %920 = vst [vmem:[#allocation11 + $0x390] sm:$0xff] %v702_v37  ;;  %v700_v45 = vadd.f32 %v572_v47, %v316_v18  ;;  %v1444_v46 = vpack.c.bf16 %v703_v43, %v702_v37  ;;  %v701_v50 = vadd.f32 %v573_v44, %v317_v42  ;;  %v718_v57 = vld [vmem:[#allocation6] sm:$0x1]  ;;  %v717_v5 = vmul.f32 0.999, %v716_v56  ;;  %v736_v8 = vld [vmem:[%s3576_s9 + $0x78] sm:$0xff] }
 0x116   :  { %1557 = vmatpush.bf16.msra.mxu0 %v1445_v38  ;;  %921 = vst [vmem:[#allocation11 + $0x398] sm:$0xff] %v703_v43  ;;  %v719_v19 = vmul.f32 0.0009999871, %v718_v57  ;;  %v767_v3 = vld [vmem:[%s3572_s5 + $0x70] sm:$0xff]  ;;  %v751_v9 = vmul.f32 0.999, %v735_v6 }
 0x117   :  { %918 = vst [vmem:[#allocation11 + $0x380] sm:$0xff] %v700_v45  ;;  %v1443_v54 = vpack.c.bf16 %v701_v50, %v700_v45  ;;  %v752_v2 = vmul.f32 0.999, %v736_v8  ;;  %v768_v7 = vld [vmem:[%s3572_s5 + $0x78] sm:$0xff]  ;;  %v783_v0 = vmul.f32 0.0009999871, %v767_v3 }
 0x118   :  { %919 = vst [vmem:[#allocation11 + $0x388] sm:$0xff] %v701_v50  ;;  %v3429_v58 = vadd.f32 %v719_v19, %v717_v5  ;;  %v784_v26 = vmul.f32 0.0009999871, %v768_v7  ;;  %v733_v36 = vld [vmem:[%s3576_s9 + $0x60] sm:$0xff]  ;;  %v734_v10 = vld [vmem:[%s3576_s9 + $0x68] sm:$0xff]  ;;  %v731_v20 = vld [vmem:[%s3576_s9 + $0x50] sm:$0xff] }
 0x119   :  { %v799_v27 = vadd.f32 %v783_v0, %v751_v9  ;;  %v765_v12 = vld [vmem:[%s3572_s5 + $0x60] sm:$0xff]  ;;  %v749_v16 = vmul.f32 0.999, %v733_v36  ;;  %v750_v1 = vmul.f32 0.999, %v734_v10  ;;  %v766_v17 = vld [vmem:[%s3572_s5 + $0x68] sm:$0xff] }
 0x11a   :  { %1558 = vmatpush.bf16.msra.mxu0 %v1444_v46  ;;  %934 = vst [vmem:[#allocation12] sm:$0x1] %v3429_v58  ;;  %v800_v35 = vadd.f32 %v784_v26, %v752_v2  ;;  %v781_v28 = vmul.f32 0.0009999871, %v765_v12  ;;  %v782_v4 = vmul.f32 0.0009999871, %v766_v17 }
 0x11b   :  { %949 = vst [vmem:[#allocation14 + $0x70] sm:$0xff] %v799_v27  ;;  %v732_v30 = vld [vmem:[%s3576_s9 + $0x58] sm:$0xff]  ;;  %v763_v25 = vld [vmem:[%s3572_s5 + $0x50] sm:$0xff]  ;;  %v747_v51 = vmul.f32 0.999, %v731_v20  ;;  %v729_v32 = vld [vmem:[%s3576_s9 + $0x40] sm:$0xff] }
 0x11c   :  { %v1576_v49 = vpack.c.bf16 %v800_v35, %v799_v27  ;;  %950 = vst [vmem:[#allocation14 + $0x78] sm:$0xff] %v800_v35  ;;  %v797_v14 = vadd.f32 %v781_v28, %v749_v16  ;;  %v798_v15 = vadd.f32 %v782_v4, %v750_v1  ;;  %v748_v21 = vmul.f32 0.999, %v732_v30  ;;  %v764_v22 = vld [vmem:[%s3572_s5 + $0x58] sm:$0xff]  ;;  %v730_v33 = vld [vmem:[%s3576_s9 + $0x48] sm:$0xff]  ;;  %v761_v29 = vld [vmem:[%s3572_s5 + $0x40] sm:$0xff] }
 0x11d   :  { %v779_v13 = vmul.f32 0.0009999871, %v763_v25  ;;  %v780_v52 = vmul.f32 0.0009999871, %v764_v22  ;;  %v745_v24 = vmul.f32 0.999, %v729_v32 }
 0x11e   :  { %1559 = vmatpush.bf16.msra.mxu0 %v1443_v54  ;;  %1580 = vmatpush.bf16.msra.mxu1 %v1576_v49  ;;  %947 = vst [vmem:[#allocation14 + $0x60] sm:$0xff] %v797_v14  ;;  %v1575_v31 = vpack.c.bf16 %v798_v15, %v797_v14  ;;  %v746_v18 = vmul.f32 0.999, %v730_v33  ;;  %v762_v34 = vld [vmem:[%s3572_s5 + $0x48] sm:$0xff]  ;;  %v777_v37 = vmul.f32 0.0009999871, %v761_v29 }
 0x11f   :  { %948 = vst [vmem:[#allocation14 + $0x68] sm:$0xff] %v798_v15  ;;  %v795_v53 = vadd.f32 %v779_v13, %v747_v51  ;;  %v796_v23 = vadd.f32 %v780_v52, %v748_v21  ;;  %v778_v42 = vmul.f32 0.0009999871, %v762_v34  ;;  %v727_v43 = vld [vmem:[%s3576_s9 + $0x30] sm:$0xff]  ;;  %v728_v44 = vld [vmem:[%s3576_s9 + $0x38] sm:$0xff]  ;;  %v725_v5 = vld [vmem:[%s3576_s9 + $0x20] sm:$0xff] }
 0x120   :  { %v793_v39 = vadd.f32 %v777_v37, %v745_v24  ;;  %v759_v45 = vld [vmem:[%s3572_s5 + $0x30] sm:$0xff]  ;;  %v743_v46 = vmul.f32 0.999, %v727_v43  ;;  %v744_v50 = vmul.f32 0.999, %v728_v44  ;;  %v760_v54 = vld [vmem:[%s3572_s5 + $0x38] sm:$0xff] }
 0x121   :  { %1560 = vmatmul.bf16.vlgmr.msra.gmra.mxu0 %v1386_v48  ;;  %945 = vst [vmem:[#allocation14 + $0x50] sm:$0xff] %v795_v53  ;;  %v1574_v38 = vpack.c.bf16 %v796_v23, %v795_v53  ;;  %v794_v47 = vadd.f32 %v778_v42, %v746_v18  ;;  %v775_v40 = vmul.f32 0.0009999871, %v759_v45  ;;  %v776_v48 = vmul.f32 0.0009999871, %v760_v54  ;;  %v726_v19 = vld [vmem:[%s3576_s9 + $0x28] sm:$0xff] }
 0x122   :  { %1581 = vmatpush.bf16.msra.mxu1 %v1575_v31  ;;  %946 = vst [vmem:[#allocation14 + $0x58] sm:$0xff] %v796_v23  ;;  %v723_v7 = vld [vmem:[%s3576_s9 + $0x10] sm:$0xff]  ;;  %v724_v0 = vld [vmem:[%s3576_s9 + $0x18] sm:$0xff]  ;;  %v721_v28 = vld [vmem:[%s3576_s9] sm:$0xff]  ;;  %v1452_v13 = vperm.slane %v3429_v58, 0 }
 0x123   :  { %943 = vst [vmem:[#allocation14 + $0x40] sm:$0xff] %v793_v39  ;;  %v1573_v55 = vpack.c.bf16 %v794_v47, %v793_v39  ;;  %v791_v56 = vadd.f32 %v775_v40, %v743_v46  ;;  %v792_v57 = vadd.f32 %v776_v48, %v744_v50  ;;  %v755_v26 = vld [vmem:[%s3572_s5 + $0x10] sm:$0xff]  ;;  %v739_v35 = vmul.f32 0.999, %v723_v7  ;;  %v756_v10 = vld [vmem:[%s3572_s5 + $0x18] sm:$0xff]  ;;  %v722_v4 = vld [vmem:[%s3576_s9 + $0x8] sm:$0xff] }
 0x124   :  { %944 = vst [vmem:[#allocation14 + $0x48] sm:$0xff] %v794_v47  ;;  %v740_v36 = vmul.f32 0.999, %v724_v0  ;;  %v771_v16 = vmul.f32 0.0009999871, %v755_v26  ;;  %v753_v14 = vld [vmem:[%s3572_s5] sm:$0xff] }
 0x125   :  { %941 = vst [vmem:[#allocation14 + $0x30] sm:$0xff] %v791_v56  ;;  %v1572_v6 = vpack.c.bf16 %v792_v57, %v791_v56  ;;  %v772_v1 = vmul.f32 0.0009999871, %v756_v10  ;;  %v737_v20 = vmul.f32 0.999, %v721_v28  ;;  %v754_v25 = vld [vmem:[%s3572_s5 + $0x8] sm:$0xff] }
 0x126   :  { %1582 = vmatpush.bf16.msra.mxu1 %v1574_v38  ;;  %942 = vst [vmem:[#allocation14 + $0x38] sm:$0xff] %v792_v57  ;;  %v787_v17 = vadd.f32 %v771_v16, %v739_v35  ;;  %v738_v30 = vmul.f32 0.999, %v722_v4  ;;  %v769_v21 = vmul.f32 0.0009999871, %v753_v14 }
 0x127   :  { %v788_v49 = vadd.f32 %v772_v1, %v740_v36  ;;  %v770_v22 = vmul.f32 0.0009999871, %v754_v25 }
 0x128   :  { %937 = vst [vmem:[#allocation14 + $0x10] sm:$0xff] %v787_v17  ;;  %v785_v52 = vadd.f32 %v769_v21, %v737_v20 }
 0x129   :  { %v1570_v51 = vpack.c.bf16 %v788_v49, %v787_v17  ;;  %938 = vst [vmem:[#allocation14 + $0x18] sm:$0xff] %v788_v49  ;;  %v786_v53 = vadd.f32 %v770_v22, %v738_v30 }
 0x12a   :  { %1583 = vmatpush.bf16.msra.mxu1 %v1573_v55  ;;  %935 = vst [vmem:[#allocation14] sm:$0xff] %v785_v52 }
 0x12b   :  { %v1569_v23 = vpack.c.bf16 %v786_v53, %v785_v52  ;;  %936 = vst [vmem:[#allocation14 + $0x8] sm:$0xff] %v786_v53 }
 0x12e   :  { %1584 = vmatpush.bf16.msra.mxu1 %v1572_v6 }
 0x164   :  { %v1324_v59 = vpop.f32.mrf.mxu0  ;;  %v1477_v27 = vpop.f32.mrf.mxu2 }
 0x165   :  { %v3432_v60 = vadd.f32 %v1823_v61, %v1324_v59  ;;  %v1463_v59 = vpop.f32.mrf.mxu1 }
 0x166   :  { %v1491_v15 = vpop.f32.mrf.mxu3  ;;  %v1464_v29 = vadd.f32 %v1463_v59, %v1452_v13 }
 0x167   :  { %v1329_v63 = vmul.f32 %v3432_v60, %v3432_v60 }
 0x168   :  { %v1478_v18 = vadd.f32 %v1477_v27, %v1464_v29 }
 0x169   :  { %1331 = vadd.xlane.f32.xlu0 %v1329_v63  ;;  %v741_v63 = vmul.f32 0.999, %v725_v5 }
 0x16a   :  { %v1492_v37 = vadd.f32 %v1491_v15, %v1478_v18 }
 0x16c   :  { %v1326_v62 = vpop.f32.mrf.mxu0  ;;  %v1479_v32 = vpop.f32.mrf.mxu2 }
 0x16d   :  { %v3436_v11 = vadd.f32 %v1823_v61, %v1326_v62  ;;  %v757_v61 = vld [vmem:[%s3572_s5 + $0x20] sm:$0xff]  ;;  %v742_v62 = vmul.f32 0.999, %v726_v19  ;;  %v1465_v31 = vpop.f32.mrf.mxu1 }
 0x16e   :  { %v773_v8 = vmul.f32 0.0009999871, %v757_v61  ;;  %v1493_v24 = vpop.f32.mrf.mxu3  ;;  %v1466_v34 = vadd.f32 %v1465_v31, %v1452_v13 }
 0x16f   :  { %v1330_v41 = vmul.f32 %v3436_v11, %v3436_v11 }
 0x170   :  { %v789_v9 = vadd.f32 %v773_v8, %v741_v63  ;;  %v1480_v42 = vadd.f32 %v1479_v32, %v1466_v34 }
 0x171   :  { %1333 = vadd.xlane.f32.xlu0 %v1330_v41  ;;  %v758_v41 = vld [vmem:[%s3572_s5 + $0x28] sm:$0xff] }
 0x172   :  { %v774_v3 = vmul.f32 0.0009999871, %v758_v41  ;;  %939 = vst [vmem:[#allocation14 + $0x20] sm:$0xff] %v789_v9  ;;  %v1494_v43 = vadd.f32 %v1493_v24, %v1480_v42 }
 0x174   :  { %v790_v2 = vadd.f32 %v774_v3, %v742_v62 }
 0x176   :  { %v1571_v12 = vpack.c.bf16 %v790_v2, %v789_v9  ;;  %940 = vst [vmem:[#allocation14 + $0x28] sm:$0xff] %v790_v2  ;;  %v801_v9 = vld [vmem:[%s3577_s10] sm:$0x1]  ;;  %v803_v2 = vld [vmem:[#allocation9] sm:$0x1] }
 0x177   :  { %v802_v7 = vmul.f32 0.999, %v801_v9  ;;  %v804_v0 = vmul.f32 0.0009999871, %v803_v2 }
 0x178   :  { %1585 = vmatpush.bf16.msra.mxu1 %v1571_v12 }
 0x179   :  { %v805_v26 = vadd.f32 %v804_v0, %v802_v7 }
 0x17b   :  { %951 = vst [vmem:[#allocation15] sm:$0x1] %v805_v26  ;;  %v1578_v31 = vperm.slane %v805_v26, 0 }
 0x17c   :  { %1586 = vmatpush.bf16.msra.mxu1 %v1570_v51 }
 0x180   :  { %1587 = vmatpush.bf16.msra.mxu1 %v1569_v23 }
 0x183   :  { %v1505_v33 = vpop.f32.mrf.mxu0 }
 0x184   :  { %v1506_v58 = vadd.f32 %v1505_v33, %v1492_v37 }
 0x18b   :  { %v1507_v47 = vpop.f32.mrf.mxu0 }
 0x18c   :  { %v1508_v45 = vadd.f32 %v1507_v47, %v1494_v43 }
 0x18d   :  { %v1533_v39 = vpop.f32.mrf.mxu2 }
 0x190   :  { %v1519_v38 = vpop.f32.mrf.mxu1 }
 0x191   :  { %v1547_v44 = vpop.f32.mrf.mxu3  ;;  %v1520_v50 = vadd.f32 %v1519_v38, %v1506_v58 }
 0x193   :  { %v1534_v48 = vadd.f32 %v1533_v39, %v1520_v50 }
 0x195   :  { %v1535_v55 = vpop.f32.mrf.mxu2  ;;  %v1548_v5 = vadd.f32 %v1547_v44, %v1534_v48 }
 0x198   :  { %v1521_v46 = vpop.f32.mrf.mxu1 }
 0x199   :  { %v1522_v54 = vadd.f32 %v1521_v46, %v1508_v45  ;;  %v1549_v57 = vpop.f32.mrf.mxu3 }
 0x19b   :  { %v1536_v56 = vadd.f32 %v1535_v55, %v1522_v54 }
 0x19d   :  { %v1550_v19 = vadd.f32 %v1549_v57, %v1536_v56 }
 0x19e   :  { %v1561_v40 = vpop.f32.mrf.mxu0 }
 0x19f   :  { %v1562_v61 = vadd.f32 %v1561_v40, %v1548_v5 }
 0x1a1   :  { %v1566_v62 = vmax.f32 %v1562_v61, 0.0 }
 0x1a6   :  { %v1563_v59 = vpop.f32.mrf.mxu0 }
 0x1a7   :  { %v1564_v63 = vadd.f32 %v1563_v59, %v1550_v19 }
 0x1a9   :  { %v1567_v41 = vmax.f32 %v1564_v63, 0.0 }
 0x1ab   :  { %v1568_v6 = vpack.c.bf16 %v1567_v41, %v1566_v62 }
 0x1ad   :  { %1588 = vmatmul.bf16.vlgmr.msra.gmra.mxu1 %v1568_v6 }
 0x1dc   :  { %v1332_v8 = vpop.xlane.xlu0 %1331 }
 0x1dd   :  { %v1335_v3 = vmax.f32 %v1332_v8, 1e-24 }
 0x1df   :  { %1824 = vrsqrt.f32 %v1335_v3  ;;  %vm1343_vm1 = vweird.f32 %v1335_v3 }
 0x1e4   :  { %v1334_v27 = vpop.xlane.xlu0 %1333 }
 0x1e5   :  { %v1825_v35 = vpop.eup %1824  ;;  %v1336_v36 = vmax.f32 %v1334_v27, 1e-24 }
 0x1e6   :  { %v1338_v10 = vmul.f32 %v1825_v35, %v1335_v3  ;;  %vm1344_vm0 = vweird.f32 %v1825_v35 }
 0x1e7   :  { %1826 = vrsqrt.f32 %v1336_v36  ;;  %vm1345_vm3 = vmor %vm1343_vm1, %vm1344_vm0  ;;  %vm1353_vm4 = vweird.f32 %v1336_v36 }
 0x1e8   :  { %v1339_v12 = vmul.f32 %v1825_v35, %v1338_v10 }
 0x1ea   :  { %v1340_v16 = vmul.f32 0.5, %v1339_v12 }
 0x1ec   :  { %v1341_v17 = vsub.f32 1.5, %v1340_v16 }
 0x1ed   :  { %v1827_v1 = vpop.eup %1826 }
 0x1ee   :  { %v1348_v49 = vmul.f32 %v1827_v1, %v1336_v36  ;;  %v1342_v4 = vmul.f32 %v1825_v35, %v1341_v17  ;;  %vm1354_vm2 = vweird.f32 %v1827_v1 }
 0x1ef   :  { %vm1355_vm5 = vmor %vm1353_vm4, %vm1354_vm2 }
 0x1f0   :  { %v1349_v28 = vmul.f32 %v1827_v1, %v1348_v49  ;;  %v1346_v20 = vsel %vm1345_vm3, %v1825_v35, %v1342_v4 }
 0x1f1   :  { %v1357_v51 = vmul.f32 %v1346_v20, %v3432_v60 }
 0x1f2   :  { %v1350_v14 = vmul.f32 0.5, %v1349_v28 }
 0x1f4   :  { %v1351_v15 = vsub.f32 1.5, %v1350_v14 }
 0x1f6   :  { %v1352_v30 = vmul.f32 %v1827_v1, %v1351_v15 }
 0x1f8   :  { %v1356_v25 = vsel %vm1355_vm5, %v1827_v1, %v1352_v30 }
 0x1f9   :  { %v1358_v21 = vmul.f32 %v1356_v25, %v3436_v11 }
 0x1fb   :  { %v1807_v22 = vpack.c.bf16 %v1358_v21, %v1357_v51 }
 0x1fd   :  { %1657 = vst [vmem:[%s3579_s12] sm:$0xff] %v1807_v22 }
 0x22a   :  { %v1589_v13 = vpop.f32.mrf.mxu1 }
 0x22b   :  { %v1590_v52 = vadd.f32 %v1589_v13, %v1578_v31 }
 0x22d   :  { %v1594_v53 = vmul.f32 %v1590_v52, %v1590_v52 }
 0x22f   :  { %1596 = vadd.xlane.f32.xlu1 %v1594_v53 }
 0x232   :  { %v1591_v23 = vpop.f32.mrf.mxu1 }
 0x233   :  { %v1592_v32 = vadd.f32 %v1591_v23, %v1578_v31 }
 0x235   :  { %v1595_v33 = vmul.f32 %v1592_v32, %v1592_v32 }
 0x237   :  { %1598 = vadd.xlane.f32.xlu1 %v1595_v33 }
 0x2a2   :  { %v1597_v60 = vpop.xlane.xlu1 %1596 }
 0x2a3   :  { %v1600_v11 = vmax.f32 %v1597_v60, 1e-24 }
 0x2a5   :  { %1828 = vrsqrt.f32 %v1600_v11  ;;  %vm1608_vm7 = vweird.f32 %v1600_v11 }
 0x2aa   :  { %v1599_v29 = vpop.xlane.xlu1 %1598 }
 0x2ab   :  { %v1829_v24 = vpop.eup %1828  ;;  %v1601_v18 = vmax.f32 %v1599_v29, 1e-24 }
 0x2ac   :  { %v1603_v34 = vmul.f32 %v1829_v24, %v1600_v11  ;;  %vm1609_vm6 = vweird.f32 %v1829_v24 }
 0x2ad   :  { %1830 = vrsqrt.f32 %v1601_v18  ;;  %vm1610_vm9 = vmor %vm1608_vm7, %vm1609_vm6  ;;  %vm1618_vm10 = vweird.f32 %v1601_v18 }
 0x2ae   :  { %v1604_v38 = vmul.f32 %v1829_v24, %v1603_v34 }
 0x2b0   :  { %v1605_v37 = vmul.f32 0.5, %v1604_v38 }
 0x2b2   :  { %v1606_v39 = vsub.f32 1.5, %v1605_v37 }
 0x2b3   :  { %v1831_v42 = vpop.eup %1830 }
 0x2b4   :  { %v1613_v47 = vmul.f32 %v1831_v42, %v1601_v18  ;;  %v1607_v58 = vmul.f32 %v1829_v24, %v1606_v39  ;;  %vm1619_vm8 = vweird.f32 %v1831_v42 }
 0x2b5   :  { %vm1620_vm11 = vmor %vm1618_vm10, %vm1619_vm8 }
 0x2b6   :  { %v1614_v43 = vmul.f32 %v1831_v42, %v1613_v47  ;;  %v1611_v46 = vsel %vm1610_vm9, %v1829_v24, %v1607_v58 }
 0x2b7   :  { %v1622_v55 = vmul.f32 %v1611_v46, %v1590_v52 }
 0x2b8   :  { %v1615_v44 = vmul.f32 0.5, %v1614_v43 }
 0x2ba   :  { %v1616_v45 = vsub.f32 1.5, %v1615_v44 }
 0x2bc   :  { %v1617_v50 = vmul.f32 %v1831_v42, %v1616_v45 }
 0x2be   :  { %v1621_v54 = vsel %vm1620_vm11, %v1831_v42, %v1617_v50 }
 0x2bf   :  { %v1623_v40 = vmul.f32 %v1621_v54, %v1592_v32 }
 0x2c1   :  { %v1812_v48 = vpack.c.bf16 %v1623_v40, %v1622_v55 }
 0x2c2   :  { %1663 = vsyncadd [#allocation4], 128  ;;  %s1664_s25 = sshra.s32 %s1629_s24, 3 }
 0x2c3   :  { %s1801_s26 = sshll.u32 %s1664_s25, 2 }
 0x2c4   :  { %s1667_s29 = scalar_lea.vmem %s3579_s12, %s1801_s26 }
 0x2c5   :  { %1696 = vst [vmem:[%s1667_s29] sm:$0xff] %v1812_v48 }
 0x2c6   :  { %1702 = vsyncadd [#allocation4 + $0x1], 128 }
 0x2c7   :  { %1980 = dma.done.wait [#allocation4], 128 }
 0x2c8   :  { %1981 = vsyncadd [#allocation4], 4294967168 }
 0x2c9   :  { %1982 = dma.done.wait [#allocation4 + $0x1], 128 }
 0x2ca   :  { %1983 = vsyncadd [#allocation4 + $0x1], 4294967168  ;;  %s1729_s0 = sshll.u32 %s3581_s14, 4  ;;  %s1992_s17 = smov [#allocation12]   ;;  %s1730_s0 = int_to_ptr.hbm [resolvable:$true] %s1729_s0 }
 0x2cb   :  { %s1727_s6 = sshll.u32 %s1992_s17, 4  ;;  %s1993_s18 = smov [#allocation11]   ;;  %s1728_s6 = int_to_ptr.vmem [resolvable:$true] %s1727_s6 }
 0x2cc   :  { %1732 = dma.vmem_to_hbm [thread:$0]  %s1728_s6, 16, %s1730_s0, [#allocation13]  }
 0x2cd   :  { %s1713_s19 = sshll.u32 %s1993_s18, 4  ;;  %s1715_s12 = sshll.u32 %s3580_s13, 4  ;;  %s1714_s19 = int_to_ptr.vmem [resolvable:$true] %s1713_s19  ;;  %s1716_s12 = int_to_ptr.hbm [resolvable:$true] %s1715_s12 }
 0x2ce   :  { %s1994_s21 = smov 128   ;;  %s1995_s7 = smov 8  }
 0x2cf   :  { %1721 = dma.vmem_to_hbm [thread:$0]  %s1714_s19, 16384, %s1716_s12, [#allocation8], %s1994_s21, %s1994_s21, %s1995_s7  }
 0x2d0   :  { %s1739_s14 = sshll.u32 %s3582_s15, 4  ;;  %s1996_s10 = smov [#allocation14]   ;;  %s1740_s14 = int_to_ptr.hbm [resolvable:$true] %s1739_s14 }
 0x2d1   :  { %s1737_s22 = sshll.u32 %s1996_s10, 4  ;;  %s1997_s23 = smov [#allocation15]   ;;  %s1738_s22 = int_to_ptr.vmem [resolvable:$true] %s1737_s22 }
 0x2d2   :  { %1745 = dma.vmem_to_hbm [thread:$0]  %s1738_s22, 2048, %s1740_s14, [#allocation13], %s1994_s21, %s1994_s21, %s1995_s7  }
 0x2d3   :  { %s1751_s3 = sshll.u32 %s1997_s23, 4  ;;  %s1753_s13 = sshll.u32 %s3583_s16, 4  ;;  %s1752_s3 = int_to_ptr.vmem [resolvable:$true] %s1751_s3  ;;  %s1754_s13 = int_to_ptr.hbm [resolvable:$true] %s1753_s13 }
 0x2d4   :  { %1756 = dma.vmem_to_hbm [thread:$0]  %s1752_s3, 16, %s1754_s13, [#allocation16]  }
 0x2d5   :  { %1984 = dma.done.wait [#allocation8], 16384  }
 0x2d6   :  { %1985 = vsyncadd [#allocation8], 4294950912 }
 0x2d7   :  { %1986 = dma.done.wait [#allocation13], 2064  }
 0x2d8   :  { %1987 = vsyncadd [#allocation13], 4294965232 }
 0x2d9   :  { %1988 = dma.done.wait [#allocation16], 16  }
 0x2da   :  { %1989 = vsyncadd [#allocation16], 4294967280 }
 0x2db   :  { %1773 = vsyncpa [#allocation7], 1 }
 0x2dc   :  { %1774 = vsyncpa [#allocation10], 1 }
 0x2dd   :  { %1775 = vsyncpa [#allocation8], 1 }
 0x2de   :  { %1776 = vsyncpa [#allocation13], 1 }
 0x2df   :  { %1777 = vsyncpa [#allocation16], 1 }
 0x2e0   :  { %1778 = vsyncmov [#allocation4] }
 0x2e3   :  { %s1779_s15 = vpop.sfrf %1778 }
 0x2e4   :  { %p1802_p0 = scmp.ne.s32.totalorder %s1779_s15, 0 }
 0x2e6   :  { %1783 = shalt.err (%p1802_p0)  }
 0x2e7   :  { %1785 = vsyncmov [#allocation4 + $0x1] }
 0x2ea   :  { %s1786_s16 = vpop.sfrf %1785 }
 0x2eb   :  { %p1803_p1 = scmp.ne.s32.totalorder %s1786_s16, 0 }
 0x2ed   :  { %1790 = shalt.err (%p1803_p1)  }

// kernel: sup_moco_forward.3
= control target key start
LH: loop header
LB: loop body
LE: loop exit
PB: predicated region body
PF: predicated region fallthrough
CT: control target
= control target key end

     0   :  { %s4276_s18 = smov 0   ;;  %s4278_s19 = smov 0   ;;  %s6793_s0 = inlined_call_operand.vmem [shape: bf16[512,128], index: 0, kind: input, shape index: {}, may-alias: {0,1}]   ;;  %s6794_s1 = inlined_call_operand.vmem [shape: bf16[512,128], index: 1, kind: input, shape index: {}, may-alias: {0,1}]   ;;  %s6795_s2 = inlined_call_operand.vmem [shape: s32[512,1], index: 2, kind: input, shape index: {}]   ;;  %s6796_s3 = inlined_call_operand.vmem [shape: s32[1,512], index: 3, kind: input, shape index: {}]   ;;  %s6797_s4 = inlined_call_operand.vmem [shape: f32[512,1], index: 4, kind: input, shape index: {}]   ;;  %s6798_s5 = inlined_call_operand.vmem [shape: f32[2,8,128], index: 5, kind: output, shape index: {}]  }
   0x1   :  { %s4280_s20 = smov 0   ;;  %s4282_s21 = smov 0  }
   0x2   :  { %s4284_s22 = smov 0  }
   0x3 LB: > { %s24_s23 = sadd.s32 1, %s4232_s20  ;;  %s27_s24 = sadd.s32 1, %s4236_s21  ;;  %s4240_s22 = sphi %s4284_s22, %s15_s22   ;;  %s4236_s21 = sphi %s4282_s21, %s7832_s21   ;;  %s4232_s20 = sphi %s4280_s20, %s7831_s20   ;;  %s4228_s19 = sphi %s4278_s19, %s7830_s19   ;;  %s4224_s18 = sphi %s4276_s18, %s7829_s18  }
   0x4   : > { %p25_p0 = scmp.ge.s32.totalorder %s24_s23, 2  ;;  %p3531_p1 = scmp.ge.s32.totalorder %s4240_s22, 1 }
   0x5   : > { %p243_p2 = scmp.lt.s32.totalorder %s4240_s22, 5 }
   0x6   : > { %s7834_s23 = smov (%p25_p0, %s24_s23), 0  ;;  %s7836_s24 = smov (!%p25_p0, %s27_s24), %s4236_s21 }
   0x7   : > { %p244_p3 = pnand %p3531_p1, %p243_p2  ;;  %p29_p4 = scmp.ge.s32.totalorder %s7836_s24, 2 }
   0x9   : > { %s7838_s24 = smov (%p29_p4, %s7836_s24), 0  ;;  %247 = sbr.rel (%p244_p3) target bundleno = 1592 (0x638), region = 40 }
   0xe   : > { %s3532_s25 = sshll.u32 %s4228_s19, 5  ;;  %s3534_s26 = sshll.u32 %s4224_s18, 5 }
   0xf   : > { %p290_p5 = scmp.lt.s32.totalorder %s3532_s25, 63  ;;  %p296_p6 = scmp.lt.s32.totalorder %s3534_s26, 63 }
  0x10   : > { %s3538_s27 = sshll.u32 %s4224_s18, 1  ;;  %p318_p7 = scmp.lt.s32.totalorder %s4228_s19, 1 }
  0x11   : > { %s7840_s25 = smov (!%p290_p5, %s3532_s25), 63  ;;  %s7842_s26 = smov (!%p296_p6, %s3534_s26), 63 }
  0x12   : > { %s3533_s28 = sshll.u32 %s7840_s25, 2  ;;  %s3537_s29 = sshll.u32 %s7840_s25, 3 }
  0x13   : > { %s4317_s7 = scalar_lea.vmem %s6793_s0, %s3533_s28  ;;  %s3535_s8 = sshll.u32 %s7842_s26, 2 }
  0x14   : > { %s4322_s11 = scalar_lea.vmem %s6794_s1, %s3535_s8  ;;  %s4327_s14 = scalar_lea.vmem %s6795_s2, %s3537_s29 }
  0x15   : > { %p308_p8 = scmp.lt.s32.totalorder %s3538_s27, 3  ;;  %s4332_s17 = scalar_lea.vmem %s6797_s4, %s3537_s29 }
  0x16   : > { %s319_s25 = scalar_select %p318_p7, %s4228_s19, 1 }
  0x17   : > { %s7844_s27 = smov (!%p308_p8, %s3538_s27), 3  ;;  %p3542_p9 = scmp.ne.s32.totalorder %s4224_s18, 0 }
  0x18   : > { %s3541_s26 = sshll.u32 %s319_s25, 3  ;;  %s310_s6 = scalar_lea.vmem %s6796_s3, %s7844_s27 }
  0x19   : > { %s4344_s10 = scalar_lea.vmem %s6798_s5, %s3541_s26  ;;  %325 = sbr.rel (%p3542_p9) target bundleno = 143 (0x8f), region = 44 }
  0x1e   : > { %vm326_vm0 = vcmask 7168   ;;  %v4242_v0 = vmov -inf   ;;  %v4243_v1 = vmov 0.0   ;;  %v3709_v2 = vld [vmem:[%s4317_s7] sm:$0xff]   ;;  %v3852_v3 = vld [vmem:[%s4317_s7 + $0x8] sm:$0xff]   ;;  %v3853_v4 = vld [vmem:[%s4317_s7 + $0x10] sm:$0xff]  }
  0x1f   : > { %327 = vst.msk [vmem:[#allocation2] sm:$0xff] %vm326_vm0, %v4242_v0  ;;  %v3710_v5 = vunpack.c.l.bf16 %v3709_v2  ;;  %v3711_v6 = vunpack.c.h.bf16 %v3709_v2  ;;  %v3854_v7 = vld [vmem:[%s4317_s7 + $0x18] sm:$0xff]   ;;  %v3714_v8 = vunpack.c.l.bf16 %v3852_v3  ;;  %v3715_v9 = vunpack.c.h.bf16 %v3852_v3  ;;  %v3855_v10 = vld [vmem:[%s4317_s7 + $0x20] sm:$0xff]   ;;  %v3856_v13 = vld [vmem:[%s4317_s7 + $0x28] sm:$0xff]  }
  0x20   : > { %328 = vst.msk [vmem:[#allocation2 + $0x8] sm:$0xff] %vm326_vm0, %v4242_v0  ;;  %v3718_v11 = vunpack.c.l.bf16 %v3853_v4  ;;  %v3719_v12 = vunpack.c.h.bf16 %v3853_v4  ;;  %v3722_v14 = vunpack.c.l.bf16 %v3854_v7  ;;  %v3723_v15 = vunpack.c.h.bf16 %v3854_v7  ;;  %v3857_v16 = vld [vmem:[%s4317_s7 + $0x30] sm:$0xff]   ;;  %v3858_v21 = vld [vmem:[%s4317_s7 + $0x38] sm:$0xff]   ;;  %v3859_v34 = vld [vmem:[%s4317_s7 + $0x40] sm:$0xff]  }
  0x21   : > { %329 = vst.msk [vmem:[#allocation2 + $0x10] sm:$0xff] %vm326_vm0, %v4242_v0  ;;  %v487_v17 = vmul.f32 14.285714, %v3710_v5  ;;  %v488_v18 = vmul.f32 14.285714, %v3711_v6  ;;  %v3726_v19 = vunpack.c.l.bf16 %v3855_v10  ;;  %v3727_v20 = vunpack.c.h.bf16 %v3855_v10  ;;  %v3860_v39 = vld [vmem:[%s4317_s7 + $0x48] sm:$0xff]  }
  0x22   : > { %330 = vst.msk [vmem:[#allocation2 + $0x18] sm:$0xff] %vm326_vm0, %v4242_v0  ;;  %v489_v22 = vmul.f32 14.285714, %v3714_v8  ;;  %v490_v23 = vmul.f32 14.285714, %v3715_v9  ;;  %v3730_v24 = vunpack.c.l.bf16 %v3856_v13  ;;  %v3731_v25 = vunpack.c.h.bf16 %v3856_v13  ;;  %v3861_v44 = vld [vmem:[%s4317_s7 + $0x50] sm:$0xff]  }
  0x23   : > { %331 = vst.msk [vmem:[#allocation2 + $0x20] sm:$0xff] %vm326_vm0, %v4242_v0  ;;  %v491_v26 = vmul.f32 14.285714, %v3718_v11  ;;  %v492_v27 = vmul.f32 14.285714, %v3719_v12  ;;  %v3734_v28 = vunpack.c.l.bf16 %v3857_v16  ;;  %v3735_v29 = vunpack.c.h.bf16 %v3857_v16  ;;  %v3862_v49 = vld [vmem:[%s4317_s7 + $0x58] sm:$0xff]  }
  0x24   : > { %332 = vst.msk [vmem:[#allocation2 + $0x28] sm:$0xff] %vm326_vm0, %v4242_v0  ;;  %v493_v30 = vmul.f32 14.285714, %v3722_v14  ;;  %v494_v31 = vmul.f32 14.285714, %v3723_v15  ;;  %v3738_v32 = vunpack.c.l.bf16 %v3858_v21  ;;  %v3739_v33 = vunpack.c.h.bf16 %v3858_v21  ;;  %v3863_v54 = vld [vmem:[%s4317_s7 + $0x60] sm:$0xff]  }
  0x25   : > { %333 = vst.msk [vmem:[#allocation2 + $0x30] sm:$0xff] %vm326_vm0, %v4242_v0  ;;  %v495_v35 = vmul.f32 14.285714, %v3726_v19  ;;  %v496_v36 = vmul.f32 14.285714, %v3727_v20  ;;  %v3775_v40 = vpack.c.bf16 %v488_v18, %v487_v17  ;;  %v3742_v43 = vunpack.c.l.bf16 %v3859_v34  ;;  %v3864_v59 = vld [vmem:[%s4317_s7 + $0x68] sm:$0xff]  }
  0x26   : > { %334 = vst.msk [vmem:[#allocation2 + $0x38] sm:$0xff] %vm326_vm0, %v4242_v0  ;;  %v497_v37 = vmul.f32 14.285714, %v3730_v24  ;;  %v498_v38 = vmul.f32 14.285714, %v3731_v25  ;;  %v3780_v45 = vpack.c.bf16 %v490_v23, %v489_v22  ;;  %v3743_v48 = vunpack.c.h.bf16 %v3859_v34  ;;  %v3866_v6 = vld [vmem:[%s4317_s7 + $0x78] sm:$0xff]  }
  0x27   : > { %335 = vst.msk [vmem:[#allocation2 + $0x40] sm:$0xff] %vm326_vm0, %v4242_v0  ;;  %v499_v41 = vmul.f32 14.285714, %v3734_v28  ;;  %v500_v42 = vmul.f32 14.285714, %v3735_v29  ;;  %v3785_v50 = vpack.c.bf16 %v492_v27, %v491_v26  ;;  %v3790_v51 = vpack.c.bf16 %v494_v31, %v493_v30 }
  0x28   : > { %336 = vst.msk [vmem:[#allocation2 + $0x48] sm:$0xff] %vm326_vm0, %v4242_v0  ;;  %v501_v46 = vmul.f32 14.285714, %v3738_v32  ;;  %v502_v47 = vmul.f32 14.285714, %v3739_v33  ;;  %v3746_v52 = vunpack.c.l.bf16 %v3860_v39  ;;  %v3747_v53 = vunpack.c.h.bf16 %v3860_v39 }
  0x29   : > { %337 = vst.msk [vmem:[#allocation2 + $0x50] sm:$0xff] %vm326_vm0, %v4242_v0  ;;  %v3795_v55 = vpack.c.bf16 %v496_v36, %v495_v35  ;;  %v3800_v56 = vpack.c.bf16 %v498_v38, %v497_v37  ;;  %v3750_v57 = vunpack.c.l.bf16 %v3861_v44  ;;  %v3751_v58 = vunpack.c.h.bf16 %v3861_v44 }
  0x2a   : > { %338 = vst.msk [vmem:[#allocation2 + $0x58] sm:$0xff] %vm326_vm0, %v4242_v0  ;;  %v3805_v60 = vpack.c.bf16 %v500_v42, %v499_v41  ;;  %v503_v61 = vmul.f32 14.285714, %v3742_v43  ;;  %v3754_v62 = vunpack.c.l.bf16 %v3862_v49  ;;  %v3755_v63 = vunpack.c.h.bf16 %v3862_v49 }
  0x2b   : > { %339 = vst.msk [vmem:[#allocation2 + $0x60] sm:$0xff] %vm326_vm0, %v4242_v0  ;;  %v3810_v2 = vpack.c.bf16 %v502_v47, %v501_v46  ;;  %v504_v3 = vmul.f32 14.285714, %v3743_v48  ;;  %v3758_v4 = vunpack.c.l.bf16 %v3863_v54  ;;  %v3759_v5 = vunpack.c.h.bf16 %v3863_v54 }
  0x2c   : > { %340 = vst.msk [vmem:[#allocation2 + $0x68] sm:$0xff] %vm326_vm0, %v4242_v0  ;;  %v505_v7 = vmul.f32 14.285714, %v3746_v52  ;;  %v506_v8 = vmul.f32 14.285714, %v3747_v53  ;;  %v3762_v9 = vunpack.c.l.bf16 %v3864_v59  ;;  %v3763_v10 = vunpack.c.h.bf16 %v3864_v59 }
  0x2d   : > { %341 = vst.msk [vmem:[#allocation2 + $0x70] sm:$0xff] %vm326_vm0, %v4242_v0  ;;  %v507_v11 = vmul.f32 14.285714, %v3750_v57  ;;  %v508_v12 = vmul.f32 14.285714, %v3751_v58  ;;  %v3770_v16 = vunpack.c.l.bf16 %v3866_v6  ;;  %v3771_v17 = vunpack.c.h.bf16 %v3866_v6 }
  0x2e   : > { %342 = vst.msk [vmem:[#allocation2 + $0x78] sm:$0xff] %vm326_vm0, %v4242_v0  ;;  %v509_v14 = vmul.f32 14.285714, %v3754_v62  ;;  %v510_v15 = vmul.f32 14.285714, %v3755_v63  ;;  %v3815_v18 = vpack.c.bf16 %v504_v3, %v503_v61  ;;  %v3820_v21 = vpack.c.bf16 %v506_v8, %v505_v7 }
  0x2f   : > { %343 = vst.msk [vmem:[#allocation2 + $0x80] sm:$0xff] %vm326_vm0, %v4242_v0  ;;  %v511_v19 = vmul.f32 14.285714, %v3758_v4  ;;  %v512_v20 = vmul.f32 14.285714, %v3759_v5  ;;  %v3825_v24 = vpack.c.bf16 %v508_v12, %v507_v11 }
  0x30   : > { %344 = vst.msk [vmem:[#allocation2 + $0x88] sm:$0xff] %vm326_vm0, %v4242_v0  ;;  %v513_v22 = vmul.f32 14.285714, %v3762_v9  ;;  %v514_v23 = vmul.f32 14.285714, %v3763_v10  ;;  %v3830_v27 = vpack.c.bf16 %v510_v15, %v509_v14 }
  0x31   : > { %345 = vst.msk [vmem:[#allocation2 + $0x90] sm:$0xff] %vm326_vm0, %v4242_v0  ;;  %v517_v28 = vmul.f32 14.285714, %v3770_v16  ;;  %v518_v29 = vmul.f32 14.285714, %v3771_v17  ;;  %v3835_v30 = vpack.c.bf16 %v512_v20, %v511_v19 }
  0x32   : > { %346 = vst.msk [vmem:[#allocation2 + $0x98] sm:$0xff] %vm326_vm0, %v4242_v0  ;;  %v3840_v31 = vpack.c.bf16 %v514_v23, %v513_v22 }
  0x33   : > { %347 = vst.msk [vmem:[#allocation2 + $0xa0] sm:$0xff] %vm326_vm0, %v4242_v0  ;;  %v3850_v33 = vpack.c.bf16 %v518_v29, %v517_v28 }
  0x34   : > { %348 = vst.msk [vmem:[#allocation2 + $0xa8] sm:$0xff] %vm326_vm0, %v4242_v0 }
  0x35   : > { %349 = vst.msk [vmem:[#allocation2 + $0xb0] sm:$0xff] %vm326_vm0, %v4242_v0 }
  0x36   : > { %350 = vst.msk [vmem:[#allocation2 + $0xb8] sm:$0xff] %vm326_vm0, %v4242_v0 }
  0x37   : > { %351 = vst.msk [vmem:[#allocation2 + $0xc0] sm:$0xff] %vm326_vm0, %v4242_v0 }
  0x38   : > { %352 = vst.msk [vmem:[#allocation2 + $0xc8] sm:$0xff] %vm326_vm0, %v4242_v0 }
  0x39   : > { %353 = vst.msk [vmem:[#allocation2 + $0xd0] sm:$0xff] %vm326_vm0, %v4242_v0 }
  0x3a   : > { %354 = vst.msk [vmem:[#allocation2 + $0xd8] sm:$0xff] %vm326_vm0, %v4242_v0 }
  0x3b   : > { %355 = vst.msk [vmem:[#allocation2 + $0xe0] sm:$0xff] %vm326_vm0, %v4242_v0 }
  0x3c   : > { %356 = vst.msk [vmem:[#allocation2 + $0xe8] sm:$0xff] %vm326_vm0, %v4242_v0 }
  0x3d   : > { %357 = vst.msk [vmem:[#allocation2 + $0xf0] sm:$0xff] %vm326_vm0, %v4242_v0 }
  0x3e   : > { %358 = vst.msk [vmem:[#allocation2 + $0xf8] sm:$0xff] %vm326_vm0, %v4242_v0  ;;  %v3865_v0 = vld [vmem:[%s4317_s7 + $0x70] sm:$0xff]  }
  0x3f   : > { %359 = vst.msk [vmem:[#allocation3] sm:$0xff] %vm326_vm0, %v4243_v1  ;;  %v3767_v13 = vunpack.c.h.bf16 %v3865_v0 }
  0x40   : > { %360 = vst.msk [vmem:[#allocation3 + $0x8] sm:$0xff] %vm326_vm0, %v4243_v1 }
  0x41   : > { %361 = vst.msk [vmem:[#allocation3 + $0x10] sm:$0xff] %vm326_vm0, %v4243_v1  ;;  %v516_v26 = vmul.f32 14.285714, %v3767_v13 }
  0x42   : > { %362 = vst.msk [vmem:[#allocation3 + $0x18] sm:$0xff] %vm326_vm0, %v4243_v1 }
  0x43   : > { %363 = vst.msk [vmem:[#allocation3 + $0x20] sm:$0xff] %vm326_vm0, %v4243_v1 }
  0x44   : > { %364 = vst.msk [vmem:[#allocation3 + $0x28] sm:$0xff] %vm326_vm0, %v4243_v1 }
  0x45   : > { %365 = vst.msk [vmem:[#allocation3 + $0x30] sm:$0xff] %vm326_vm0, %v4243_v1 }
  0x46   : > { %366 = vst.msk [vmem:[#allocation3 + $0x38] sm:$0xff] %vm326_vm0, %v4243_v1 }
  0x47   : > { %367 = vst.msk [vmem:[#allocation3 + $0x40] sm:$0xff] %vm326_vm0, %v4243_v1 }
  0x48   : > { %368 = vst.msk [vmem:[#allocation3 + $0x48] sm:$0xff] %vm326_vm0, %v4243_v1 }
  0x49   : > { %369 = vst.msk [vmem:[#allocation3 + $0x50] sm:$0xff] %vm326_vm0, %v4243_v1 }
  0x4a   : > { %370 = vst.msk [vmem:[#allocation3 + $0x58] sm:$0xff] %vm326_vm0, %v4243_v1 }
  0x4b   : > { %371 = vst.msk [vmem:[#allocation3 + $0x60] sm:$0xff] %vm326_vm0, %v4243_v1 }
  0x4c   : > { %372 = vst.msk [vmem:[#allocation3 + $0x68] sm:$0xff] %vm326_vm0, %v4243_v1 }
  0x4d   : > { %373 = vst.msk [vmem:[#allocation3 + $0x70] sm:$0xff] %vm326_vm0, %v4243_v1 }
  0x4e   : > { %374 = vst.msk [vmem:[#allocation3 + $0x78] sm:$0xff] %vm326_vm0, %v4243_v1 }
  0x4f   : > { %375 = vst.msk [vmem:[#allocation3 + $0x80] sm:$0xff] %vm326_vm0, %v4243_v1 }
  0x50   : > { %376 = vst.msk [vmem:[#allocation3 + $0x88] sm:$0xff] %vm326_vm0, %v4243_v1 }
  0x51   : > { %377 = vst.msk [vmem:[#allocation3 + $0x90] sm:$0xff] %vm326_vm0, %v4243_v1 }
  0x52   : > { %378 = vst.msk [vmem:[#allocation3 + $0x98] sm:$0xff] %vm326_vm0, %v4243_v1 }
  0x53   : > { %379 = vst.msk [vmem:[#allocation3 + $0xa0] sm:$0xff] %vm326_vm0, %v4243_v1 }
  0x54   : > { %380 = vst.msk [vmem:[#allocation3 + $0xa8] sm:$0xff] %vm326_vm0, %v4243_v1 }
  0x55   : > { %381 = vst.msk [vmem:[#allocation3 + $0xb0] sm:$0xff] %vm326_vm0, %v4243_v1 }
  0x56   : > { %382 = vst.msk [vmem:[#allocation3 + $0xb8] sm:$0xff] %vm326_vm0, %v4243_v1 }
  0x57   : > { %383 = vst.msk [vmem:[#allocation3 + $0xc0] sm:$0xff] %vm326_vm0, %v4243_v1 }
  0x58   : > { %384 = vst.msk [vmem:[#allocation3 + $0xc8] sm:$0xff] %vm326_vm0, %v4243_v1 }
  0x59   : > { %385 = vst.msk [vmem:[#allocation3 + $0xd0] sm:$0xff] %vm326_vm0, %v4243_v1 }
  0x5a   : > { %386 = vst.msk [vmem:[#allocation3 + $0xd8] sm:$0xff] %vm326_vm0, %v4243_v1 }
  0x5b   : > { %387 = vst.msk [vmem:[#allocation3 + $0xe0] sm:$0xff] %vm326_vm0, %v4243_v1 }
  0x5c   : > { %388 = vst.msk [vmem:[#allocation3 + $0xe8] sm:$0xff] %vm326_vm0, %v4243_v1 }
  0x5d   : > { %389 = vst.msk [vmem:[#allocation3 + $0xf0] sm:$0xff] %vm326_vm0, %v4243_v1 }
  0x5e   : > { %390 = vst.msk [vmem:[#allocation3 + $0xf8] sm:$0xff] %vm326_vm0, %v4243_v1 }
  0x5f   : > { %391 = vst.msk [vmem:[#allocation4] sm:$0xff] %vm326_vm0, %v4243_v1 }
  0x60   : > { %392 = vst.msk [vmem:[#allocation4 + $0x8] sm:$0xff] %vm326_vm0, %v4243_v1 }
  0x61   : > { %393 = vst.msk [vmem:[#allocation4 + $0x10] sm:$0xff] %vm326_vm0, %v4243_v1 }
  0x62   : > { %394 = vst.msk [vmem:[#allocation4 + $0x18] sm:$0xff] %vm326_vm0, %v4243_v1 }
  0x63   : > { %395 = vst.msk [vmem:[#allocation4 + $0x20] sm:$0xff] %vm326_vm0, %v4243_v1 }
  0x64   : > { %396 = vst.msk [vmem:[#allocation4 + $0x28] sm:$0xff] %vm326_vm0, %v4243_v1 }
  0x65   : > { %397 = vst.msk [vmem:[#allocation4 + $0x30] sm:$0xff] %vm326_vm0, %v4243_v1 }
  0x66   : > { %398 = vst.msk [vmem:[#allocation4 + $0x38] sm:$0xff] %vm326_vm0, %v4243_v1 }
  0x67   : > { %399 = vst.msk [vmem:[#allocation4 + $0x40] sm:$0xff] %vm326_vm0, %v4243_v1 }
  0x68   : > { %400 = vst.msk [vmem:[#allocation4 + $0x48] sm:$0xff] %vm326_vm0, %v4243_v1 }
  0x69   : > { %401 = vst.msk [vmem:[#allocation4 + $0x50] sm:$0xff] %vm326_vm0, %v4243_v1 }
  0x6a   : > { %402 = vst.msk [vmem:[#allocation4 + $0x58] sm:$0xff] %vm326_vm0, %v4243_v1 }
  0x6b   : > { %403 = vst.msk [vmem:[#allocation4 + $0x60] sm:$0xff] %vm326_vm0, %v4243_v1 }
  0x6c   : > { %404 = vst.msk [vmem:[#allocation4 + $0x68] sm:$0xff] %vm326_vm0, %v4243_v1 }
  0x6d   : > { %405 = vst.msk [vmem:[#allocation4 + $0x70] sm:$0xff] %vm326_vm0, %v4243_v1 }
  0x6e   : > { %406 = vst.msk [vmem:[#allocation4 + $0x78] sm:$0xff] %vm326_vm0, %v4243_v1 }
  0x6f   : > { %407 = vst.msk [vmem:[#allocation4 + $0x80] sm:$0xff] %vm326_vm0, %v4243_v1 }
  0x70   : > { %408 = vst.msk [vmem:[#allocation4 + $0x88] sm:$0xff] %vm326_vm0, %v4243_v1 }
  0x71   : > { %409 = vst.msk [vmem:[#allocation4 + $0x90] sm:$0xff] %vm326_vm0, %v4243_v1 }
  0x72   : > { %410 = vst.msk [vmem:[#allocation4 + $0x98] sm:$0xff] %vm326_vm0, %v4243_v1 }
  0x73   : > { %411 = vst.msk [vmem:[#allocation4 + $0xa0] sm:$0xff] %vm326_vm0, %v4243_v1 }
  0x74   : > { %412 = vst.msk [vmem:[#allocation4 + $0xa8] sm:$0xff] %vm326_vm0, %v4243_v1 }
  0x75   : > { %413 = vst.msk [vmem:[#allocation4 + $0xb0] sm:$0xff] %vm326_vm0, %v4243_v1 }
  0x76   : > { %414 = vst.msk [vmem:[#allocation4 + $0xb8] sm:$0xff] %vm326_vm0, %v4243_v1 }
  0x77   : > { %415 = vst.msk [vmem:[#allocation4 + $0xc0] sm:$0xff] %vm326_vm0, %v4243_v1 }
  0x78   : > { %416 = vst.msk [vmem:[#allocation4 + $0xc8] sm:$0xff] %vm326_vm0, %v4243_v1 }
  0x79   : > { %417 = vst.msk [vmem:[#allocation4 + $0xd0] sm:$0xff] %vm326_vm0, %v4243_v1 }
  0x7a   : > { %418 = vst.msk [vmem:[#allocation4 + $0xd8] sm:$0xff] %vm326_vm0, %v4243_v1 }
  0x7b   : > { %419 = vst.msk [vmem:[#allocation4 + $0xe0] sm:$0xff] %vm326_vm0, %v4243_v1 }
  0x7c   : > { %420 = vst.msk [vmem:[#allocation4 + $0xe8] sm:$0xff] %vm326_vm0, %v4243_v1 }
  0x7d   : > { %421 = vst.msk [vmem:[#allocation4 + $0xf0] sm:$0xff] %vm326_vm0, %v4243_v1 }
  0x7e   : > { %422 = vst.msk [vmem:[#allocation4 + $0xf8] sm:$0xff] %vm326_vm0, %v4243_v1  ;;  %v3766_v1 = vunpack.c.l.bf16 %v3865_v0 }
  0x7f   : > { %3776 = vst [vmem:[#allocation5 + $0x30] sm:$0xff] %v3775_v40  }
  0x80   : > { %3867 = vst [vmem:[#allocation5] sm:$0xff] %v3780_v45   ;;  %v515_v25 = vmul.f32 14.285714, %v3766_v1 }
  0x81   : > { %3868 = vst [vmem:[#allocation5 + $0x58] sm:$0xff] %v3785_v50  }
  0x82   : > { %3869 = vst [vmem:[#allocation5 + $0x18] sm:$0xff] %v3790_v51   ;;  %v3845_v32 = vpack.c.bf16 %v516_v26, %v515_v25 }
  0x83   : > { %3870 = vst [vmem:[#allocation5 + $0x50] sm:$0xff] %v3795_v55  }
  0x84   : > { %3871 = vst [vmem:[#allocation5 + $0x68] sm:$0xff] %v3800_v56  }
  0x85   : > { %3872 = vst [vmem:[#allocation5 + $0x8] sm:$0xff] %v3805_v60  }
  0x86   : > { %3873 = vst [vmem:[#allocation5 + $0x48] sm:$0xff] %v3810_v2  }
  0x87   : > { %3874 = vst [vmem:[#allocation5 + $0x40] sm:$0xff] %v3815_v18  }
  0x88   : > { %3875 = vst [vmem:[#allocation5 + $0x20] sm:$0xff] %v3820_v21  }
  0x89   : > { %3876 = vst [vmem:[#allocation5 + $0x10] sm:$0xff] %v3825_v24  }
  0x8a   : > { %3877 = vst [vmem:[#allocation5 + $0x38] sm:$0xff] %v3830_v27  }
  0x8b   : > { %3878 = vst [vmem:[#allocation5 + $0x60] sm:$0xff] %v3835_v30  }
  0x8c   : > { %3879 = vst [vmem:[#allocation5 + $0x70] sm:$0xff] %v3840_v31  }
  0x8d   : > { %3880 = vst [vmem:[#allocation5 + $0x78] sm:$0xff] %v3845_v32  }
  0x8e   : > { %3881 = vst [vmem:[#allocation5 + $0x28] sm:$0xff] %v3850_v33  }
  0x8f PF: > { %v3699_v34 = vld [vmem:[%s4322_s11 + $0x38] sm:$0xff]  ;;  %v1627_v36 = vld [vmem:[%s4327_s14 + $0x10] sm:$0xff]  ;;  %v4244_v37 = vmov 0   ;;  %v1630_v40 = vld [vmem:[%s4327_s14 + $0x28] sm:$0xff]  ;;  %p3671_p10 = scmp.ne.s32.totalorder %s4228_s19, %s4224_s18 }
  0x90   : > { %v3707_v35 = vld [vmem:[%s4322_s11 + $0x78] sm:$0xff]  ;;  %839 = vmatpush.bf16.xpose.msra.mxu0 %v3699_v34  ;;  %3882 = vmatpush.bf16.xpose.msra.mxu2 %v3699_v34  ;;  %v3698_v38 = vld [vmem:[%s4322_s11 + $0x30] sm:$0xff]  ;;  %v3697_v41 = vld [vmem:[%s4322_s11 + $0x28] sm:$0xff] }
  0x91   : > { %928 = vmatpush.bf16.xpose.msra.mxu1 %v3707_v35  ;;  %3890 = vmatpush.bf16.xpose.msra.mxu3 %v3707_v35  ;;  %v3706_v39 = vld [vmem:[%s4322_s11 + $0x70] sm:$0xff]  ;;  %v3705_v42 = vld [vmem:[%s4322_s11 + $0x68] sm:$0xff]  ;;  %v1633_v43 = vld [vmem:[%s4327_s14 + $0x40] sm:$0xff] }
  0x92   : > { %3944 = vset.pattern.permute.xlu1 %v4244_v37  ;;  %3942 = vset.pattern.permute.xlu0 %v4244_v37  ;;  %v3696_v44 = vld [vmem:[%s4322_s11 + $0x20] sm:$0xff]  ;;  %v1636_v46 = vld [vmem:[%s4327_s14 + $0x58] sm:$0xff]  ;;  %v1639_v49 = vld [vmem:[%s4327_s14 + $0x70] sm:$0xff] }
  0x93   : > { %1665 = vperm.xlu1 %3944, %v1627_v36   ;;  %3943 = vset.pattern.permute.xlu2 %v4244_v37  ;;  %v3704_v45 = vld [vmem:[%s4322_s11 + $0x60] sm:$0xff]  ;;  %v3695_v47 = vld [vmem:[%s4322_s11 + $0x18] sm:$0xff]  ;;  %v3694_v51 = vld [vmem:[%s4322_s11 + $0x10] sm:$0xff] }
  0x94   : > { %v3703_v48 = vld [vmem:[%s4322_s11 + $0x58] sm:$0xff]  ;;  %v1625_v50 = vld [vmem:[%s4327_s14] sm:$0xff]  ;;  %v3702_v52 = vld [vmem:[%s4322_s11 + $0x50] sm:$0xff] }
  0x95   : > { %1659 = vperm.xlu0 %3942, %v1625_v50   ;;  %v1642_v53 = vld [vmem:[%s4327_s14 + $0x88] sm:$0xff]  ;;  %v1628_v56 = vld [vmem:[%s4327_s14 + $0x18] sm:$0xff]  ;;  %v1645_v57 = vld [vmem:[%s4327_s14 + $0xa0] sm:$0xff] }
  0x96   : > { %v3693_v54 = vld [vmem:[%s4322_s11 + $0x8] sm:$0xff]  ;;  %v3692_v59 = vld [vmem:[%s4322_s11] sm:$0xff]  ;;  %v1631_v61 = vld [vmem:[%s4327_s14 + $0x30] sm:$0xff] }
  0x97   : > { %v3701_v55 = vld [vmem:[%s4322_s11 + $0x48] sm:$0xff]  ;;  %v3700_v60 = vld [vmem:[%s4322_s11 + $0x40] sm:$0xff]  ;;  %v1648_v62 = vld [vmem:[%s4327_s14 + $0xb8] sm:$0xff] }
  0x98   : > { %840 = vmatpush.bf16.xpose.msra.mxu0 %v3698_v38  ;;  %3883 = vmatpush.bf16.xpose.msra.mxu2 %v3698_v38  ;;  %v1626_v58 = vld [vmem:[%s4327_s14 + $0x8] sm:$0xff]  ;;  %v3676_v63 = vld [vmem:[#allocation5 + $0x30] sm:$0xff]  ;;  %v3684_v0 = vld [vmem:[#allocation5 + $0x40] sm:$0xff] }
  0x99   : > { %929 = vmatpush.bf16.xpose.msra.mxu1 %v3706_v39  ;;  %3891 = vmatpush.bf16.xpose.msra.mxu3 %v3706_v39  ;;  %v1629_v2 = vld [vmem:[%s4327_s14 + $0x20] sm:$0xff]  ;;  %v1634_v3 = vld [vmem:[%s4327_s14 + $0x48] sm:$0xff]  ;;  %v1651_v4 = vld [vmem:[%s4327_s14 + $0xd0] sm:$0xff] }
  0x9a   : > { %1662 = vperm.xlu2 %3943, %v1626_v58   ;;  %v1632_v5 = vld [vmem:[%s4327_s14 + $0x38] sm:$0xff]  ;;  %v1637_v6 = vld [vmem:[%s4327_s14 + $0x60] sm:$0xff]  ;;  %v1635_v9 = vld [vmem:[%s4327_s14 + $0x50] sm:$0xff] }
  0x9b   : > { %1674 = vperm.xlu1 %3944, %v1630_v40   ;;  %v3677_v7 = vld [vmem:[#allocation5] sm:$0xff]  ;;  %v1640_v10 = vld [vmem:[%s4327_s14 + $0x78] sm:$0xff]  ;;  %v1638_v11 = vld [vmem:[%s4327_s14 + $0x68] sm:$0xff] }
  0x9c   : > { %v3685_v8 = vld [vmem:[#allocation5 + $0x20] sm:$0xff]  ;;  %v1643_v12 = vld [vmem:[%s4327_s14 + $0x90] sm:$0xff]  ;;  %v3678_v1 = vld [vmem:[#allocation5 + $0x58] sm:$0xff] }
  0x9d   : > { %1668 = vperm.xlu0 %3942, %v1628_v56   ;;  %v3686_v13 = vld [vmem:[#allocation5 + $0x10] sm:$0xff]  ;;  %v1641_v14 = vld [vmem:[%s4327_s14 + $0x80] sm:$0xff]  ;;  %v1646_v15 = vld [vmem:[%s4327_s14 + $0xa8] sm:$0xff] }
  0x9e   : > { %v1644_v16 = vld [vmem:[%s4327_s14 + $0x98] sm:$0xff]  ;;  %v1649_v17 = vld [vmem:[%s4327_s14 + $0xc0] sm:$0xff]  ;;  %v1647_v20 = vld [vmem:[%s4327_s14 + $0xb0] sm:$0xff] }
  0x9f   : > { %v3679_v18 = vld [vmem:[#allocation5 + $0x18] sm:$0xff]  ;;  %v1657_v22 = vld [vmem:[%s310_s6] sm:$0x3]  ;;  %v1650_v26 = vld [vmem:[%s4327_s14 + $0xc8] sm:$0xff] }
  0xa0   : > { %841 = vmatpush.bf16.xpose.msra.mxu0 %v3697_v41  ;;  %3884 = vmatpush.bf16.xpose.msra.mxu2 %v3697_v41  ;;  %v3687_v19 = vld [vmem:[#allocation5 + $0x38] sm:$0xff]  ;;  %v4571_v23 = vperm.slane %v1657_v22, 0  ;;  %v4573_v24 = vperm.slane %v1657_v22, 1  ;;  %v3680_v27 = vld [vmem:[#allocation5 + $0x50] sm:$0xff]  ;;  %v3688_v28 = vld [vmem:[#allocation5 + $0x60] sm:$0xff] }
  0xa1   : > { %930 = vmatpush.bf16.xpose.msra.mxu1 %v3705_v42  ;;  %3892 = vmatpush.bf16.xpose.msra.mxu3 %v3705_v42  ;;  %v1652_v21 = vld [vmem:[%s4327_s14 + $0xd8] sm:$0xff]  ;;  %v1653_v30 = vld [vmem:[%s4327_s14 + $0xe0] sm:$0xff]  ;;  %v3681_v32 = vld [vmem:[#allocation5 + $0x68] sm:$0xff] }
  0xa2   : > { %1671 = vperm.xlu2 %3943, %v1629_v2   ;;  %7064 = vst [vmem:[#allocation6_spill] sm:$0xff] %v4571_v23  ;;  %v3689_v33 = vld [vmem:[#allocation5 + $0x70] sm:$0xff]  ;;  %v3682_v36 = vld [vmem:[#allocation5 + $0x8] sm:$0xff]  ;;  %v3690_v37 = vld [vmem:[#allocation5 + $0x78] sm:$0xff] }
  0xa3   : > { %1683 = vperm.xlu1 %3944, %v1633_v43   ;;  %7065 = vst [vmem:[#allocation7_spill] sm:$0xff] %v4573_v24  ;;  %v3691_v42 = vld [vmem:[#allocation5 + $0x28] sm:$0xff] }
  0xa4   : > { %v3683_v43 = vld [vmem:[#allocation5 + $0x48] sm:$0xff] }
  0xa5   : > { %1677 = vperm.xlu0 %3942, %v1631_v61  }
  0xa8   : > { %842 = vmatpush.bf16.xpose.msra.mxu0 %v3696_v44  ;;  %3885 = vmatpush.bf16.xpose.msra.mxu2 %v3696_v44 }
  0xa9   : > { %931 = vmatpush.bf16.xpose.msra.mxu1 %v3704_v45  ;;  %3893 = vmatpush.bf16.xpose.msra.mxu3 %v3704_v45 }
  0xaa   : > { %1680 = vperm.xlu2 %3943, %v1632_v5  }
  0xab   : > { %1692 = vperm.xlu1 %3944, %v1636_v46  }
  0xad   : > { %1686 = vperm.xlu0 %3942, %v1634_v3  }
  0xb0   : > { %843 = vmatpush.bf16.xpose.msra.mxu0 %v3695_v47  ;;  %3886 = vmatpush.bf16.xpose.msra.mxu2 %v3695_v47 }
  0xb1   : > { %932 = vmatpush.bf16.xpose.msra.mxu1 %v3703_v48  ;;  %3894 = vmatpush.bf16.xpose.msra.mxu3 %v3703_v48 }
  0xb2   : > { %1689 = vperm.xlu2 %3943, %v1635_v9  }
  0xb3   : > { %1701 = vperm.xlu1 %3944, %v1639_v49  }
  0xb5   : > { %1695 = vperm.xlu0 %3942, %v1637_v6  }
  0xb8   : > { %844 = vmatpush.bf16.xpose.msra.mxu0 %v3694_v51  ;;  %3887 = vmatpush.bf16.xpose.msra.mxu2 %v3694_v51 }
  0xb9   : > { %933 = vmatpush.bf16.xpose.msra.mxu1 %v3702_v52  ;;  %3895 = vmatpush.bf16.xpose.msra.mxu3 %v3702_v52 }
  0xba   : > { %1698 = vperm.xlu2 %3943, %v1638_v11  }
  0xbb   : > { %1710 = vperm.xlu1 %3944, %v1642_v53  }
  0xbd   : > { %1704 = vperm.xlu0 %3942, %v1640_v10  }
  0xc0   : > { %845 = vmatpush.bf16.xpose.msra.mxu0 %v3693_v54  ;;  %3888 = vmatpush.bf16.xpose.msra.mxu2 %v3693_v54 }
  0xc1   : > { %934 = vmatpush.bf16.xpose.msra.mxu1 %v3701_v55  ;;  %3896 = vmatpush.bf16.xpose.msra.mxu3 %v3701_v55 }
  0xc2   : > { %1707 = vperm.xlu2 %3943, %v1641_v14  }
  0xc3   : > { %1719 = vperm.xlu1 %3944, %v1645_v57  }
  0xc5   : > { %1713 = vperm.xlu0 %3942, %v1643_v12  }
  0xc8   : > { %846 = vmatpush.bf16.xpose.msra.mxu0 %v3692_v59  ;;  %3889 = vmatpush.bf16.xpose.msra.mxu2 %v3692_v59 }
  0xc9   : > { %935 = vmatpush.bf16.xpose.msra.mxu1 %v3700_v60  ;;  %3897 = vmatpush.bf16.xpose.msra.mxu3 %v3700_v60 }
  0xca   : > { %1716 = vperm.xlu2 %3943, %v1644_v16  }
  0xcb   : > { %1728 = vperm.xlu1 %3944, %v1648_v62  }
  0xcd   : > { %1722 = vperm.xlu0 %3942, %v1646_v15  }
  0xcf   : > { %847 = vmatmul.bf16.vlgmr.msra.gmra.mxu0 %v3676_v63  ;;  %887 = vmatmul.bf16.vlgmr.msra.gmra.mxu2 %v3684_v0 }
  0xd0   : > { %936 = vmatmul.bf16.vlgmr.msra.gmra.mxu1 %v3676_v63  ;;  %976 = vmatmul.bf16.vlgmr.msra.gmra.mxu3 %v3684_v0 }
  0xd2   : > { %1725 = vperm.xlu2 %3943, %v1647_v20  }
  0xd3   : > { %1737 = vperm.xlu1 %3944, %v1651_v4  }
  0xd5   : > { %1731 = vperm.xlu0 %3942, %v1649_v17  }
  0xda   : > { %1734 = vperm.xlu2 %3943, %v1650_v26  }
  0xdd   : > { %1740 = vperm.xlu0 %3942, %v1652_v21  }
  0xdf   : > { %852 = vmatmul.bf16.gmra.mxu0 %v3677_v7  ;;  %892 = vmatmul.bf16.gmra.mxu2 %v3685_v8 }
  0xe0   : > { %941 = vmatmul.bf16.gmra.mxu1 %v3677_v7  ;;  %981 = vmatmul.bf16.gmra.mxu3 %v3685_v8 }
  0xe2   : > { %1743 = vperm.xlu2 %3943, %v1653_v30  }
  0xef   : > { %857 = vmatmul.bf16.gmra.mxu0 %v3678_v1  ;;  %897 = vmatmul.bf16.gmra.mxu2 %v3686_v13 }
  0xf0   : > { %946 = vmatmul.bf16.gmra.mxu1 %v3678_v1  ;;  %986 = vmatmul.bf16.gmra.mxu3 %v3686_v13 }
  0xf4   : > { %v4609_v39 = vpop.permute.xlu2 %1662 }
  0xf5   : > { %7072 = vst [vmem:[#allocation14_spill] sm:$0xff] %v4609_v39  ;;  %vm1758_vm13 = vcmp.eq.s32.totalorder %v4609_v39, %v4571_v23  ;;  %vm1759_vm14 = vcmp.eq.s32.totalorder %v4609_v39, %v4573_v24 }
  0xfc   : > { %v4621_v41 = vpop.permute.xlu2 %1671 }
  0xfd   : > { %7074 = vst [vmem:[#allocation16_spill] sm:$0xff] %v4621_v41  ;;  %vm7063_vm11 = vcmp.eq.s32.totalorder %v4621_v41, %v4571_v23 }
  0xff   : > { %862 = vmatmul.bf16.gmra.mxu0 %v3679_v18  ;;  %902 = vmatmul.bf16.gmra.mxu2 %v3687_v19 }
 0x100   : > { %951 = vmatmul.bf16.gmra.mxu1 %v3679_v18  ;;  %991 = vmatmul.bf16.gmra.mxu3 %v3687_v19 }
 0x104   : > { %v4633_v45 = vpop.permute.xlu2 %1680 }
 0x105   : > { %v4575_v25 = vpop.permute.xlu1 %1665  ;;  %7076 = vst [vmem:[#allocation18_spill] sm:$0xff] %v4633_v45 }
 0x106   : > { %7066 = vst [vmem:[#allocation8_spill] sm:$0xff] %v4575_v25  ;;  %vm7062_vm1 = vcmp.eq.s32.totalorder %v4575_v25, %v4571_v23  ;;  %vm7061_vm2 = vcmp.eq.s32.totalorder %v4575_v25, %v4573_v24 }
 0x107   : > { %v4661_v51 = vpop.permute.xlu0 %1659 }
 0x108   : > { %7081 = vst [vmem:[#allocation23_spill] sm:$0xff] %v4661_v51  ;;  %vm1756_vm8 = vcmp.eq.s32.totalorder %v4661_v51, %v4571_v23  ;;  %vm7059_vm7 = vcmp.eq.s32.totalorder %v4661_v51, %v4573_v24 }
 0x10c   : > { %v4645_v47 = vpop.permute.xlu2 %1689 }
 0x10d   : > { %v4582_v29 = vpop.permute.xlu1 %1674  ;;  %7078 = vst [vmem:[#allocation20_spill] sm:$0xff] %v4645_v47 }
 0x10e   : > { %7067 = vst [vmem:[#allocation9_spill] sm:$0xff] %v4582_v29 }
 0x10f   : > { %867 = vmatmul.bf16.gmra.mxu0 %v3680_v27  ;;  %907 = vmatmul.bf16.gmra.mxu2 %v3688_v28  ;;  %v4685_v59 = vpop.permute.xlu0 %1668 }
 0x110   : > { %956 = vmatmul.bf16.gmra.mxu1 %v3680_v27  ;;  %996 = vmatmul.bf16.gmra.mxu3 %v3688_v28  ;;  %7087 = vst [vmem:[#allocation29_spill] sm:$0xff] %v4685_v59  ;;  %vm1762_vm15 = vcmp.eq.s32.totalorder %v4685_v59, %v4571_v23  ;;  %vm1763_vm0 = vcmp.eq.s32.totalorder %v4685_v59, %v4573_v24 }
 0x114   : > { %v4663_v52 = vpop.permute.xlu2 %1698 }
 0x115   : > { %v4589_v31 = vpop.permute.xlu1 %1683  ;;  %7082 = vst [vmem:[#allocation24_spill] sm:$0xff] %v4663_v52 }
 0x116   : > { %7068 = vst [vmem:[#allocation10_spill] sm:$0xff] %v4589_v31 }
 0x117   : > { %v4709_v4 = vpop.permute.xlu0 %1677 }
 0x118   : > { %7093 = vst [vmem:[#allocation35_spill] sm:$0xff] %v4709_v4 }
 0x11c   : > { %v4687_v60 = vpop.permute.xlu2 %1707 }
 0x11d   : > { %v4595_v34 = vpop.permute.xlu1 %1692  ;;  %7088 = vst [vmem:[#allocation30_spill] sm:$0xff] %v4687_v60 }
 0x11e   : > { %7069 = vst [vmem:[#allocation11_spill] sm:$0xff] %v4595_v34 }
 0x11f   : > { %872 = vmatmul.bf16.gmra.mxu0 %v3681_v32  ;;  %912 = vmatmul.bf16.gmra.mxu2 %v3689_v33  ;;  %v4733_v12 = vpop.permute.xlu0 %1686 }
 0x120   : > { %961 = vmatmul.bf16.gmra.mxu1 %v3681_v32  ;;  %1001 = vmatmul.bf16.gmra.mxu3 %v3689_v33  ;;  %7099 = vst [vmem:[#allocation41_spill] sm:$0xff] %v4733_v12 }
 0x124   : > { %v4711_v5 = vpop.permute.xlu2 %1716 }
 0x125   : > { %v4601_v35 = vpop.permute.xlu1 %1701  ;;  %7094 = vst [vmem:[#allocation36_spill] sm:$0xff] %v4711_v5 }
 0x126   : > { %7070 = vst [vmem:[#allocation12_spill] sm:$0xff] %v4601_v35 }
 0x127   : > { %v4757_v19 = vpop.permute.xlu0 %1695 }
 0x128   : > { %7105 = vst [vmem:[#allocation47_spill] sm:$0xff] %v4757_v19 }
 0x12c   : > { %v4735_v1 = vpop.permute.xlu2 %1725 }
 0x12d   : > { %v4607_v38 = vpop.permute.xlu1 %1710  ;;  %7100 = vst [vmem:[#allocation42_spill] sm:$0xff] %v4735_v1 }
 0x12e   : > { %7071 = vst [vmem:[#allocation13_spill] sm:$0xff] %v4607_v38 }
 0x12f   : > { %877 = vmatmul.bf16.gmra.mxu0 %v3682_v36  ;;  %917 = vmatmul.bf16.gmra.mxu2 %v3690_v37  ;;  %v4779_v30 = vpop.permute.xlu0 %1704 }
 0x130   : > { %966 = vmatmul.bf16.gmra.mxu1 %v3682_v36  ;;  %1006 = vmatmul.bf16.gmra.mxu3 %v3690_v37  ;;  %7111 = vst [vmem:[#allocation53_spill] sm:$0xff] %v4779_v30 }
 0x134   : > { %v4759_v20 = vpop.permute.xlu2 %1734 }
 0x135   : > { %v4619_v40 = vpop.permute.xlu1 %1719  ;;  %7106 = vst [vmem:[#allocation48_spill] sm:$0xff] %v4759_v20 }
 0x136   : > { %7073 = vst [vmem:[#allocation15_spill] sm:$0xff] %v4619_v40 }
 0x13c   : > { %v4781_v32 = vpop.permute.xlu2 %1743 }
 0x13d   : > { %v4631_v44 = vpop.permute.xlu1 %1728  ;;  %7112 = vst [vmem:[#allocation54_spill] sm:$0xff] %v4781_v32 }
 0x13e   : > { %7075 = vst [vmem:[#allocation17_spill] sm:$0xff] %v4631_v44 }
 0x13f   : > { %922 = vmatmul.bf16.gmra.mxu2 %v3691_v42  ;;  %882 = vmatmul.bf16.gmra.mxu0 %v3683_v43 }
 0x140   : > { %1011 = vmatmul.bf16.gmra.mxu3 %v3691_v42  ;;  %971 = vmatmul.bf16.gmra.mxu1 %v3683_v43 }
 0x145   : > { %v4643_v46 = vpop.permute.xlu1 %1737 }
 0x146   : > { %7077 = vst [vmem:[#allocation19_spill] sm:$0xff] %v4643_v46 }
 0x14c   : > { %v4655_v48 = vpop.f32.mrf.mxu0 }
 0x14d   : > { %7079 = vst [vmem:[#allocation21_spill] sm:$0xff] %v4655_v48  ;;  %v4657_v49 = vpop.f32.mrf.mxu1 }
 0x14e   : > { %7080 = vst [vmem:[#allocation22_spill] sm:$0xff] %v4657_v49  ;;  %v1049_v50 = vmax.f32 %v4655_v48, %v4657_v49 }
 0x150   : > { %1050 = vmax.xlane.f32.xlu0 %v1049_v50 }
 0x152   : > { %v4673_v53 = vpop.f32.mrf.mxu2 }
 0x153   : > { %7083 = vst [vmem:[#allocation25_spill] sm:$0xff] %v4673_v53  ;;  %v4675_v54 = vpop.f32.mrf.mxu3 }
 0x154   : > { %7084 = vst [vmem:[#allocation26_spill] sm:$0xff] %v4675_v54  ;;  %v4677_v55 = vpop.f32.mrf.mxu0  ;;  %v1097_v56 = vmax.f32 %v4673_v53, %v4675_v54 }
 0x155   : > { %7085 = vst [vmem:[#allocation27_spill] sm:$0xff] %v4677_v55  ;;  %v4681_v57 = vpop.f32.mrf.mxu1 }
 0x156   : > { %7086 = vst [vmem:[#allocation28_spill] sm:$0xff] %v4681_v57  ;;  %1098 = vmax.xlane.f32.xlu1 %v1097_v56  ;;  %v1052_v58 = vmax.f32 %v4677_v55, %v4681_v57  ;;  %v4803_v56 = vpop.permute.xlu0 %1713 }
 0x157   : > { %7117 = vst [vmem:[#allocation59_spill] sm:$0xff] %v4803_v56 }
 0x158   : > { %1053 = vmax.xlane.f32.xlu0 %v1052_v58 }
 0x15a   : > { %v4697_v61 = vpop.f32.mrf.mxu2 }
 0x15b   : > { %7089 = vst [vmem:[#allocation31_spill] sm:$0xff] %v4697_v61  ;;  %v4699_v62 = vpop.f32.mrf.mxu3 }
 0x15c   : > { %7090 = vst [vmem:[#allocation32_spill] sm:$0xff] %v4699_v62  ;;  %v4701_v63 = vpop.f32.mrf.mxu0  ;;  %v1100_v0 = vmax.f32 %v4697_v61, %v4699_v62 }
 0x15d   : > { %7091 = vst [vmem:[#allocation33_spill] sm:$0xff] %v4701_v63  ;;  %v4705_v2 = vpop.f32.mrf.mxu1 }
 0x15e   : > { %7092 = vst [vmem:[#allocation34_spill] sm:$0xff] %v4705_v2  ;;  %1101 = vmax.xlane.f32.xlu2 %v1100_v0  ;;  %v1055_v3 = vmax.f32 %v4701_v63, %v4705_v2 }
 0x160   : > { %1056 = vmax.xlane.f32.xlu1 %v1055_v3 }
 0x162   : > { %v4721_v6 = vpop.f32.mrf.mxu2 }
 0x163   : > { %7095 = vst [vmem:[#allocation37_spill] sm:$0xff] %v4721_v6  ;;  %v4723_v7 = vpop.f32.mrf.mxu3 }
 0x164   : > { %7096 = vst [vmem:[#allocation38_spill] sm:$0xff] %v4723_v7  ;;  %v4725_v8 = vpop.f32.mrf.mxu0  ;;  %v1103_v9 = vmax.f32 %v4721_v6, %v4723_v7 }
 0x165   : > { %7097 = vst [vmem:[#allocation39_spill] sm:$0xff] %v4725_v8  ;;  %v4729_v10 = vpop.f32.mrf.mxu1 }
 0x166   : > { %7098 = vst [vmem:[#allocation40_spill] sm:$0xff] %v4729_v10  ;;  %1104 = vmax.xlane.f32.xlu0 %v1103_v9  ;;  %v1058_v11 = vmax.f32 %v4725_v8, %v4729_v10 }
 0x168   : > { %1059 = vmax.xlane.f32.xlu1 %v1058_v11 }
 0x16a   : > { %v4745_v13 = vpop.f32.mrf.mxu2 }
 0x16b   : > { %7101 = vst [vmem:[#allocation43_spill] sm:$0xff] %v4745_v13  ;;  %v4747_v14 = vpop.f32.mrf.mxu3 }
 0x16c   : > { %7102 = vst [vmem:[#allocation44_spill] sm:$0xff] %v4747_v14  ;;  %v4749_v15 = vpop.f32.mrf.mxu0  ;;  %v1106_v17 = vmax.f32 %v4745_v13, %v4747_v14 }
 0x16d   : > { %7103 = vst [vmem:[#allocation45_spill] sm:$0xff] %v4749_v15  ;;  %v4751_v16 = vpop.f32.mrf.mxu1 }
 0x16e   : > { %7104 = vst [vmem:[#allocation46_spill] sm:$0xff] %v4751_v16  ;;  %v1061_v18 = vmax.f32 %v4749_v15, %v4751_v16 }
 0x170   : > { %1107 = vmax.xlane.f32.xlu1 %v1106_v17  ;;  %1062 = vmax.xlane.f32.xlu2 %v1061_v18  ;;  %v4821_v18 = vpop.permute.xlu0 %1722 }
 0x171   : > { %7122 = vst [vmem:[#allocation64_spill] sm:$0xff] %v4821_v18 }
 0x172   : > { %v4769_v21 = vpop.f32.mrf.mxu2 }
 0x173   : > { %7107 = vst [vmem:[#allocation49_spill] sm:$0xff] %v4769_v21  ;;  %v4771_v22 = vpop.f32.mrf.mxu3 }
 0x174   : > { %7108 = vst [vmem:[#allocation50_spill] sm:$0xff] %v4771_v22  ;;  %v4773_v26 = vpop.f32.mrf.mxu0  ;;  %v1109_v28 = vmax.f32 %v4769_v21, %v4771_v22 }
 0x175   : > { %7109 = vst [vmem:[#allocation51_spill] sm:$0xff] %v4773_v26  ;;  %v4775_v27 = vpop.f32.mrf.mxu1 }
 0x176   : > { %7110 = vst [vmem:[#allocation52_spill] sm:$0xff] %v4775_v27  ;;  %v1064_v50 = vmax.f32 %v4773_v26, %v4775_v27 }
 0x178   : > { %1110 = vmax.xlane.f32.xlu2 %v1109_v28  ;;  %v4839_v46 = vpop.permute.xlu0 %1731 }
 0x179   : > { %7127 = vst [vmem:[#allocation69_spill] sm:$0xff] %v4839_v46 }
 0x17a   : > { %v4791_v33 = vpop.f32.mrf.mxu2 }
 0x17b   : > { %7113 = vst [vmem:[#allocation55_spill] sm:$0xff] %v4791_v33  ;;  %v4793_v36 = vpop.f32.mrf.mxu3 }
 0x17c   : > { %7114 = vst [vmem:[#allocation56_spill] sm:$0xff] %v4793_v36  ;;  %v4795_v37 = vpop.f32.mrf.mxu0  ;;  %v1112_v42 = vmax.f32 %v4791_v33, %v4793_v36 }
 0x17d   : > { %7115 = vst [vmem:[#allocation57_spill] sm:$0xff] %v4795_v37  ;;  %v4799_v43 = vpop.f32.mrf.mxu1 }
 0x17e   : > { %7116 = vst [vmem:[#allocation58_spill] sm:$0xff] %v4799_v43  ;;  %1113 = vmax.xlane.f32.xlu0 %v1112_v42  ;;  %v1067_v0 = vmax.f32 %v4795_v37, %v4799_v43 }
 0x180   : > { %1065 = vmax.xlane.f32.xlu2 %v1064_v50  ;;  %v4857_v18 = vpop.permute.xlu0 %1740 }
 0x181   : > { %7132 = vst [vmem:[#allocation74_spill] sm:$0xff] %v4857_v18 }
 0x182   : > { %v4809_v58 = vpop.f32.mrf.mxu2 }
 0x183   : > { %7118 = vst [vmem:[#allocation60_spill] sm:$0xff] %v4809_v58  ;;  %v4813_v3 = vpop.f32.mrf.mxu3 }
 0x184   : > { %7119 = vst [vmem:[#allocation61_spill] sm:$0xff] %v4813_v3  ;;  %v4815_v9 = vpop.f32.mrf.mxu0  ;;  %v1115_v11 = vmax.f32 %v4809_v58, %v4813_v3 }
 0x185   : > { %7120 = vst [vmem:[#allocation62_spill] sm:$0xff] %v4815_v9  ;;  %v4819_v17 = vpop.f32.mrf.mxu1 }
 0x186   : > { %7121 = vst [vmem:[#allocation63_spill] sm:$0xff] %v4819_v17  ;;  %1116 = vmax.xlane.f32.xlu1 %v1115_v11  ;;  %1068 = vmax.xlane.f32.xlu0 %v1067_v0  ;;  %v1070_v0 = vmax.f32 %v4815_v9, %v4819_v17 }
 0x18a   : > { %v4827_v28 = vpop.f32.mrf.mxu2 }
 0x18b   : > { %7123 = vst [vmem:[#allocation65_spill] sm:$0xff] %v4827_v28  ;;  %v4829_v42 = vpop.f32.mrf.mxu3 }
 0x18c   : > { %7124 = vst [vmem:[#allocation66_spill] sm:$0xff] %v4829_v42  ;;  %v4831_v50 = vpop.f32.mrf.mxu0  ;;  %v1118_v32 = vmax.f32 %v4827_v28, %v4829_v42 }
 0x18d   : > { %7125 = vst [vmem:[#allocation67_spill] sm:$0xff] %v4831_v50  ;;  %v4837_v11 = vpop.f32.mrf.mxu1 }
 0x18e   : > { %7126 = vst [vmem:[#allocation68_spill] sm:$0xff] %v4837_v11  ;;  %1119 = vmax.xlane.f32.xlu2 %v1118_v32  ;;  %1071 = vmax.xlane.f32.xlu1 %v1070_v0  ;;  %v1073_v44 = vmax.f32 %v4831_v50, %v4837_v11 }
 0x192   : > { %v4845_v20 = vpop.f32.mrf.mxu2 }
 0x193   : > { %7128 = vst [vmem:[#allocation70_spill] sm:$0xff] %v4845_v20  ;;  %v4849_v1 = vpop.f32.mrf.mxu3 }
 0x194   : > { %7129 = vst [vmem:[#allocation71_spill] sm:$0xff] %v4849_v1  ;;  %v4851_v40 = vpop.f32.mrf.mxu0  ;;  %v1121_v32 = vmax.f32 %v4845_v20, %v4849_v1 }
 0x195   : > { %7130 = vst [vmem:[#allocation72_spill] sm:$0xff] %v4851_v40  ;;  %v4855_v0 = vpop.f32.mrf.mxu1 }
 0x196   : > { %7131 = vst [vmem:[#allocation73_spill] sm:$0xff] %v4855_v0  ;;  %1122 = vmax.xlane.f32.xlu0 %v1121_v32  ;;  %1074 = vmax.xlane.f32.xlu2 %v1073_v44  ;;  %v1076_v44 = vmax.f32 %v4851_v40, %v4855_v0 }
 0x19a   : > { %v4863_v46 = vpop.f32.mrf.mxu2 }
 0x19b   : > { %7133 = vst [vmem:[#allocation75_spill] sm:$0xff] %v4863_v46  ;;  %v4865_v5 = vpop.f32.mrf.mxu3 }
 0x19c   : > { %7134 = vst [vmem:[#allocation76_spill] sm:$0xff] %v4865_v5  ;;  %v4867_v38 = vpop.f32.mrf.mxu0  ;;  %v1124_v56 = vmax.f32 %v4863_v46, %v4865_v5 }
 0x19d   : > { %7135 = vst [vmem:[#allocation77_spill] sm:$0xff] %v4867_v38  ;;  %v4873_v32 = vpop.f32.mrf.mxu1 }
 0x19e   : > { %7136 = vst [vmem:[#allocation78_spill] sm:$0xff] %v4873_v32  ;;  %1125 = vmax.xlane.f32.xlu1 %v1124_v56  ;;  %1077 = vmax.xlane.f32.xlu0 %v1076_v44  ;;  %v1079_v18 = vmax.f32 %v4867_v38, %v4873_v32 }
 0x1a2   : > { %v4875_v60 = vpop.f32.mrf.mxu2 }
 0x1a3   : > { %7137 = vst [vmem:[#allocation79_spill] sm:$0xff] %v4875_v60  ;;  %v4879_v35 = vpop.f32.mrf.mxu3 }
 0x1a4   : > { %7138 = vst [vmem:[#allocation80_spill] sm:$0xff] %v4879_v35  ;;  %v4881_v30 = vpop.f32.mrf.mxu0  ;;  %v1127_v52 = vmax.f32 %v4875_v60, %v4879_v35 }
 0x1a5   : > { %7139 = vst [vmem:[#allocation81_spill] sm:$0xff] %v4881_v30  ;;  %v4885_v34 = vpop.f32.mrf.mxu1 }
 0x1a6   : > { %7140 = vst [vmem:[#allocation82_spill] sm:$0xff] %v4885_v34  ;;  %1128 = vmax.xlane.f32.xlu2 %v1127_v52  ;;  %1080 = vmax.xlane.f32.xlu1 %v1079_v18  ;;  %v1082_v31 = vmax.f32 %v4881_v30, %v4885_v34 }
 0x1aa   : > { %v4887_v19 = vpop.f32.mrf.mxu2 }
 0x1ab   : > { %7141 = vst [vmem:[#allocation83_spill] sm:$0xff] %v4887_v19  ;;  %v4889_v56 = vpop.f32.mrf.mxu3 }
 0x1ac   : > { %7142 = vst [vmem:[#allocation84_spill] sm:$0xff] %v4889_v56  ;;  %v4891_v44 = vpop.f32.mrf.mxu0  ;;  %v1130_v47 = vmax.f32 %v4887_v19, %v4889_v56 }
 0x1ad   : > { %7143 = vst [vmem:[#allocation85_spill] sm:$0xff] %v4891_v44  ;;  %v4897_v12 = vpop.f32.mrf.mxu1 }
 0x1ae   : > { %7144 = vst [vmem:[#allocation86_spill] sm:$0xff] %v4897_v12  ;;  %1131 = vmax.xlane.f32.xlu0 %v1130_v47  ;;  %1083 = vmax.xlane.f32.xlu2 %v1082_v31  ;;  %v1085_v52 = vmax.f32 %v4891_v44, %v4897_v12 }
 0x1b2   : > { %v4899_v45 = vpop.f32.mrf.mxu2 }
 0x1b3   : > { %7145 = vst [vmem:[#allocation87_spill] sm:$0xff] %v4899_v45  ;;  %v4903_v18 = vpop.f32.mrf.mxu3 }
 0x1b4   : > { %7146 = vst [vmem:[#allocation88_spill] sm:$0xff] %v4903_v18  ;;  %v1133_v29 = vmax.f32 %v4899_v45, %v4903_v18  ;;  %v4907_v4 = vpop.f32.mrf.mxu0  ;;  %v1017_v18 = vld [vmem:[#allocation2] sm:$0xff] }
 0x1b5   : > { %7147 = vst [vmem:[#allocation89_spill] sm:$0xff] %v4907_v4  ;;  %v4909_v41 = vpop.f32.mrf.mxu1 }
 0x1b6   : > { %7148 = vst [vmem:[#allocation90_spill] sm:$0xff] %v4909_v41  ;;  %1134 = vmax.xlane.f32.xlu1 %v1133_v29  ;;  %1086 = vmax.xlane.f32.xlu0 %v1085_v52  ;;  %v1088_v25 = vmax.f32 %v4907_v4, %v4909_v41 }
 0x1ba   : > { %v4911_v59 = vpop.f32.mrf.mxu2 }
 0x1bb   : > { %7149 = vst [vmem:[#allocation91_spill] sm:$0xff] %v4911_v59  ;;  %v4913_v47 = vpop.f32.mrf.mxu3 }
 0x1bc   : > { %7150 = vst [vmem:[#allocation92_spill] sm:$0xff] %v4913_v47  ;;  %v1136_v31 = vmax.f32 %v4911_v59, %v4913_v47  ;;  %v4921_v51 = vpop.f32.mrf.mxu0  ;;  %v1034_v59 = vld [vmem:[#allocation2 + $0x88] sm:$0xff] }
 0x1bd   : > { %v4919_v39 = vpop.f32.mrf.mxu1  ;;  %7152 = vst [vmem:[#allocation94_spill] sm:$0xff] %v4921_v51 }
 0x1be   : > { %7151 = vst [vmem:[#allocation93_spill] sm:$0xff] %v4919_v39  ;;  %1137 = vmax.xlane.f32.xlu2 %v1136_v31  ;;  %1089 = vmax.xlane.f32.xlu1 %v1088_v25  ;;  %v1091_v29 = vmax.f32 %v4921_v51, %v4919_v39  ;;  %v1033_v31 = vld [vmem:[#allocation2 + $0x80] sm:$0xff]  ;;  %v1018_v39 = vld [vmem:[#allocation2 + $0x8] sm:$0xff] }
 0x1c2   : > { %v4923_v45 = vpop.f32.mrf.mxu2 }
 0x1c3   : > { %7153 = vst [vmem:[#allocation95_spill] sm:$0xff] %v4923_v45  ;;  %v4927_v52 = vpop.f32.mrf.mxu3  ;;  %v1051_v32 = vpop.xlane.xlu0 %1050 }
 0x1c4   : > { %7154 = vst [vmem:[#allocation96_spill] sm:$0xff] %v4927_v52  ;;  %v4929_v38 = vmax.f32 %v1017_v18, %v1051_v32  ;;  %v1139_v41 = vmax.f32 %v4923_v45, %v4927_v52  ;;  %v4936_v5 = vpop.f32.mrf.mxu0 }
 0x1c5   : > { %v4934_v25 = vpop.f32.mrf.mxu1  ;;  %7157 = vst [vmem:[#allocation99_spill] sm:$0xff] %v4936_v5 }
 0x1c6   : > { %7155 = vst [vmem:[#allocation97_spill] sm:$0xff] %v4929_v38  ;;  %v1177_v4 = vsub.f32 %v1017_v18, %v4929_v38  ;;  %1140 = vmax.xlane.f32.xlu0 %v1139_v41  ;;  %1092 = vmax.xlane.f32.xlu2 %v1091_v29  ;;  %v1094_v32 = vmax.f32 %v4936_v5, %v4934_v25 }
 0x1c7   : > { %7156 = vst [vmem:[#allocation98_spill] sm:$0xff] %v4934_v25 }
 0x1c8   : > { %v1209_v46 = vmul.f32 1.442695, %v1177_v4 }
 0x1c9   : > { %v1099_v17 = vpop.xlane.xlu1 %1098 }
 0x1ca   : > { %3945 = vpow2.f32 %v1209_v46  ;;  %v4938_v51 = vmax.f32 %v1033_v31, %v1099_v17  ;;  %v1019_v17 = vld [vmem:[#allocation2 + $0x10] sm:$0xff] }
 0x1cb   : > { %v1054_v9 = vpop.xlane.xlu0 %1053 }
 0x1cc   : > { %7158 = vst [vmem:[#allocation100_spill] sm:$0xff] %v4938_v51  ;;  %v1193_v47 = vsub.f32 %v1033_v31, %v4938_v51  ;;  %v4943_v18 = vmax.f32 %v1018_v39, %v1054_v9 }
 0x1ce   : > { %7159 = vst [vmem:[#allocation101_spill] sm:$0xff] %v4943_v18  ;;  %v1241_v41 = vmul.f32 1.442695, %v1193_v47  ;;  %v1178_v29 = vsub.f32 %v1018_v39, %v4943_v18  ;;  %1095 = vmax.xlane.f32.xlu0 %v1094_v32  ;;  %v1035_v32 = vld [vmem:[#allocation2 + $0x90] sm:$0xff] }
 0x1d0   : > { %v4946_v24 = vpop.eup %3945  ;;  %3947 = vpow2.f32 %v1241_v41  ;;  %v1211_v4 = vmul.f32 1.442695, %v1178_v29 }
 0x1d1   : > { %7160 = vst [vmem:[#allocation102_spill] sm:$0xff] %v4946_v24  ;;  %v1102_v46 = vpop.xlane.xlu2 %1101 }
 0x1d2   : > { %3949 = vpow2.f32 %v1211_v4  ;;  %v4948_v23 = vmax.f32 %v1034_v59, %v1102_v46  ;;  %v1020_v46 = vld [vmem:[#allocation2 + $0x18] sm:$0xff] }
 0x1d3   : > { %v1057_v3 = vpop.xlane.xlu1 %1056 }
 0x1d4   : > { %7161 = vst [vmem:[#allocation103_spill] sm:$0xff] %v4948_v23  ;;  %v1194_v58 = vsub.f32 %v1034_v59, %v4948_v23  ;;  %v4951_v31 = vmax.f32 %v1019_v17, %v1057_v3 }
 0x1d6   : > { %7162 = vst [vmem:[#allocation104_spill] sm:$0xff] %v4951_v31  ;;  %v4953_v9 = vpop.eup %3947  ;;  %v1243_v47 = vmul.f32 1.442695, %v1194_v58  ;;  %v1179_v39 = vsub.f32 %v1019_v17, %v4951_v31 }
 0x1d7   : > { %7163 = vst [vmem:[#allocation105_spill] sm:$0xff] %v4953_v9  ;;  %1355 = vperm.xlu1 %3944, %v4938_v51  }
 0x1d8   : > { %v4957_v41 = vpop.eup %3949  ;;  %3951 = vpow2.f32 %v1243_v47  ;;  %v1213_v29 = vmul.f32 1.442695, %v1179_v39  ;;  %v1036_v39 = vld [vmem:[#allocation2 + $0x98] sm:$0xff] }
 0x1d9   : > { %7164 = vst [vmem:[#allocation106_spill] sm:$0xff] %v4957_v41  ;;  %v1105_v4 = vpop.xlane.xlu0 %1104 }
 0x1da   : > { %3953 = vpow2.f32 %v1213_v29  ;;  %v4959_v24 = vmax.f32 %v1035_v32, %v1105_v4  ;;  %v1021_v29 = vld [vmem:[#allocation2 + $0x20] sm:$0xff] }
 0x1db   : > { %v1060_v59 = vpop.xlane.xlu1 %1059 }
 0x1dc   : > { %7165 = vst [vmem:[#allocation107_spill] sm:$0xff] %v4959_v24  ;;  %v1195_v3 = vsub.f32 %v1035_v32, %v4959_v24  ;;  %v4962_v25 = vmax.f32 %v1020_v46, %v1060_v59 }
 0x1de   : > { %7166 = vst [vmem:[#allocation108_spill] sm:$0xff] %v4962_v25  ;;  %v4964_v58 = vpop.eup %3951  ;;  %v1245_v17 = vmul.f32 1.442695, %v1195_v3  ;;  %v1180_v51 = vsub.f32 %v1020_v46, %v4962_v25  ;;  %1275 = vperm.xlu2 %3943, %v4929_v38  }
 0x1df   : > { %7167 = vst [vmem:[#allocation109_spill] sm:$0xff] %v4964_v58  ;;  %v1037_v58 = vld [vmem:[#allocation2 + $0xa0] sm:$0xff] }
 0x1e0   : > { %v4968_v9 = vpop.eup %3953  ;;  %3955 = vpow2.f32 %v1245_v17  ;;  %v1215_v47 = vmul.f32 1.442695, %v1180_v51 }
 0x1e1   : > { %7168 = vst [vmem:[#allocation110_spill] sm:$0xff] %v4968_v9 }
 0x1e2   : > { %3957 = vpow2.f32 %v1215_v47  ;;  %1280 = vperm.xlu0 %3942, %v4943_v18  }
 0x1e3   : > { %v1108_v4 = vpop.xlane.xlu1 %1107  ;;  %v1063_v32 = vpop.xlane.xlu2 %1062 }
 0x1e4   : > { %v4971_v59 = vmax.f32 %v1036_v39, %v1108_v4  ;;  %v4973_v41 = vmax.f32 %v1021_v29, %v1063_v32 }
 0x1e6   : > { %7169 = vst [vmem:[#allocation111_spill] sm:$0xff] %v4971_v59  ;;  %v4975_v3 = vpop.eup %3955  ;;  %v1196_v46 = vsub.f32 %v1036_v39, %v4971_v59  ;;  %v1181_v38 = vsub.f32 %v1021_v29, %v4973_v41  ;;  %1365 = vperm.xlu2 %3943, %v4959_v24   ;;  %v1038_v39 = vld [vmem:[#allocation2 + $0xa8] sm:$0xff] }
 0x1e7   : > { %7170 = vst [vmem:[#allocation112_spill] sm:$0xff] %v4973_v41 }
 0x1e8   : > { %7171 = vst [vmem:[#allocation113_spill] sm:$0xff] %v4975_v3  ;;  %v4980_v51 = vpop.eup %3957  ;;  %v1247_v17 = vmul.f32 1.442695, %v1196_v46  ;;  %v1217_v47 = vmul.f32 1.442695, %v1181_v38  ;;  %v1022_v38 = vld [vmem:[#allocation2 + $0x28] sm:$0xff] }
 0x1e9   : > { %7172 = vst [vmem:[#allocation114_spill] sm:$0xff] %v4980_v51 }
 0x1ea   : > { %3959 = vpow2.f32 %v1247_v17  ;;  %1360 = vperm.xlu0 %3942, %v4948_v23  }
 0x1eb   : > { %3961 = vpow2.f32 %v1217_v47  ;;  %v1111_v4 = vpop.xlane.xlu2 %1110 }
 0x1ec   : > { %v4983_v32 = vmax.f32 %v1037_v58, %v1111_v4 }
 0x1ee   : > { %7173 = vst [vmem:[#allocation115_spill] sm:$0xff] %v4983_v32  ;;  %v1197_v18 = vsub.f32 %v1037_v58, %v4983_v32  ;;  %1290 = vperm.xlu2 %3943, %v4962_v25  }
 0x1f0   : > { %v4987_v29 = vpop.eup %3959  ;;  %v1249_v24 = vmul.f32 1.442695, %v1197_v18  ;;  %v1039_v18 = vld [vmem:[#allocation2 + $0xb0] sm:$0xff] }
 0x1f1   : > { %7174 = vst [vmem:[#allocation116_spill] sm:$0xff] %v4987_v29  ;;  %v4989_v3 = vpop.eup %3961  ;;  %v1114_v46 = vpop.xlane.xlu0 %1113  ;;  %v1023_v29 = vld [vmem:[#allocation2 + $0x30] sm:$0xff] }
 0x1f2   : > { %7175 = vst [vmem:[#allocation117_spill] sm:$0xff] %v4989_v3  ;;  %3963 = vpow2.f32 %v1249_v24  ;;  %v4991_v17 = vmax.f32 %v1038_v39, %v1114_v46  ;;  %1375 = vperm.xlu0 %3942, %v4983_v32  }
 0x1f3   : > { %v1066_v47 = vpop.xlane.xlu2 %1065 }
 0x1f4   : > { %7176 = vst [vmem:[#allocation118_spill] sm:$0xff] %v4991_v17  ;;  %v1198_v4 = vsub.f32 %v1038_v39, %v4991_v17  ;;  %v4995_v23 = vmax.f32 %v1022_v38, %v1066_v47  ;;  %v5005_v39 = vpop.f32.mrf.mxu2  ;;  %v5007_v47 = vpop.f32.mrf.mxu3 }
 0x1f5   : > { %7181 = vst [vmem:[#allocation123_spill] sm:$0xff] %v5005_v39 }
 0x1f6   : > { %7177 = vst [vmem:[#allocation119_spill] sm:$0xff] %v4995_v23  ;;  %v1251_v58 = vmul.f32 1.442695, %v1198_v4  ;;  %v1182_v25 = vsub.f32 %v1022_v38, %v4995_v23  ;;  %1295 = vperm.xlu2 %3943, %v4973_v41  }
 0x1f7   : > { %7182 = vst [vmem:[#allocation124_spill] sm:$0xff] %v5007_v47 }
 0x1f8   : > { %v4999_v51 = vpop.eup %3963  ;;  %3965 = vpow2.f32 %v1251_v58  ;;  %v1219_v24 = vmul.f32 1.442695, %v1182_v25  ;;  %v1142_v25 = vmax.f32 %v5005_v39, %v5007_v47 }
 0x1f9   : > { %7178 = vst [vmem:[#allocation120_spill] sm:$0xff] %v4999_v51  ;;  %v1117_v46 = vpop.xlane.xlu1 %1116  ;;  %v1069_v9 = vpop.xlane.xlu0 %1068 }
 0x1fa   : > { %3967 = vpow2.f32 %v1219_v24  ;;  %v5001_v32 = vmax.f32 %v1039_v18, %v1117_v46  ;;  %v5003_v3 = vmax.f32 %v1023_v29, %v1069_v9  ;;  %v1040_v24 = vld [vmem:[#allocation2 + $0xb8] sm:$0xff] }
 0x1fb   : > { %v1024_v9 = vld [vmem:[#allocation2 + $0x38] sm:$0xff] }
 0x1fc   : > { %7179 = vst [vmem:[#allocation121_spill] sm:$0xff] %v5001_v32  ;;  %v1199_v38 = vsub.f32 %v1039_v18, %v5001_v32  ;;  %v1183_v4 = vsub.f32 %v1023_v29, %v5003_v3 }
 0x1fd   : > { %7180 = vst [vmem:[#allocation122_spill] sm:$0xff] %v5003_v3 }
 0x1fe   : > { %v5011_v41 = vpop.eup %3965  ;;  %v1253_v51 = vmul.f32 1.442695, %v1199_v38  ;;  %v1221_v58 = vmul.f32 1.442695, %v1183_v4  ;;  %1380 = vperm.xlu2 %3943, %v4991_v17  }
 0x1ff   : > { %7183 = vst [vmem:[#allocation125_spill] sm:$0xff] %v5011_v41 }
 0x200   : > { %v5016_v46 = vpop.eup %3967  ;;  %3969 = vpow2.f32 %v1253_v51 }
 0x201   : > { %7184 = vst [vmem:[#allocation126_spill] sm:$0xff] %v5016_v46  ;;  %3971 = vpow2.f32 %v1221_v58  ;;  %v1120_v5 = vpop.xlane.xlu2 %1119  ;;  %v1072_v27 = vpop.xlane.xlu1 %1071  ;;  %1143 = vmax.xlane.f32.xlu1 %v1142_v25  ;;  %v1041_v58 = vld [vmem:[#allocation2 + $0xc0] sm:$0xff] }
 0x202   : > { %v5018_v18 = vmax.f32 %v1040_v24, %v1120_v5  ;;  %v5020_v29 = vmax.f32 %v1024_v9, %v1072_v27  ;;  %v1025_v25 = vld [vmem:[#allocation2 + $0x40] sm:$0xff] }
 0x204   : > { %7185 = vst [vmem:[#allocation127_spill] sm:$0xff] %v5018_v18  ;;  %v1200_v38 = vsub.f32 %v1040_v24, %v5018_v18  ;;  %v1184_v4 = vsub.f32 %v1024_v9, %v5020_v29  ;;  %1390 = vperm.xlu0 %3942, %v5018_v18  }
 0x205   : > { %7186 = vst [vmem:[#allocation128_spill] sm:$0xff] %v5020_v29 }
 0x206   : > { %v5025_v17 = vpop.eup %3969  ;;  %v1255_v41 = vmul.f32 1.442695, %v1200_v38  ;;  %v1223_v47 = vmul.f32 1.442695, %v1184_v4  ;;  %1305 = vperm.xlu2 %3943, %v5003_v3  }
 0x207   : > { %7187 = vst [vmem:[#allocation129_spill] sm:$0xff] %v5025_v17  ;;  %v5028_v51 = vpop.eup %3971  ;;  %v1026_v17 = vld [vmem:[#allocation2 + $0x48] sm:$0xff] }
 0x208   : > { %7188 = vst [vmem:[#allocation130_spill] sm:$0xff] %v5028_v51  ;;  %3973 = vpow2.f32 %v1255_v41 }
 0x209   : > { %3975 = vpow2.f32 %v1223_v47  ;;  %v1123_v5 = vpop.xlane.xlu0 %1122  ;;  %v1075_v27 = vpop.xlane.xlu2 %1074  ;;  %v1042_v47 = vld [vmem:[#allocation2 + $0xc8] sm:$0xff] }
 0x20a   : > { %v5030_v46 = vmax.f32 %v1041_v58, %v1123_v5  ;;  %v5032_v24 = vmax.f32 %v1025_v25, %v1075_v27 }
 0x20c   : > { %7189 = vst [vmem:[#allocation131_spill] sm:$0xff] %v5030_v46  ;;  %v1201_v9 = vsub.f32 %v1041_v58, %v5030_v46  ;;  %v1185_v18 = vsub.f32 %v1025_v25, %v5032_v24  ;;  %1315 = vperm.xlu0 %3942, %v5032_v24  }
 0x20d   : > { %7190 = vst [vmem:[#allocation132_spill] sm:$0xff] %v5032_v24 }
 0x20e   : > { %v5037_v38 = vpop.eup %3973  ;;  %v1257_v4 = vmul.f32 1.442695, %v1201_v9  ;;  %v1225_v3 = vmul.f32 1.442695, %v1185_v18  ;;  %1395 = vperm.xlu2 %3943, %v5030_v46  }
 0x20f   : > { %7191 = vst [vmem:[#allocation133_spill] sm:$0xff] %v5037_v38  ;;  %v5040_v41 = vpop.eup %3975 }
 0x210   : > { %7192 = vst [vmem:[#allocation134_spill] sm:$0xff] %v5040_v41  ;;  %3977 = vpow2.f32 %v1257_v4  ;;  %v1043_v4 = vld [vmem:[#allocation2 + $0xd0] sm:$0xff] }
 0x211   : > { %3979 = vpow2.f32 %v1225_v3  ;;  %v1126_v5 = vpop.xlane.xlu1 %1125  ;;  %v1078_v27 = vpop.xlane.xlu0 %1077  ;;  %v1027_v3 = vld [vmem:[#allocation2 + $0x50] sm:$0xff] }
 0x212   : > { %v5042_v51 = vmax.f32 %v1042_v47, %v1126_v5  ;;  %v5044_v58 = vmax.f32 %v1026_v17, %v1078_v27 }
 0x214   : > { %7193 = vst [vmem:[#allocation135_spill] sm:$0xff] %v5042_v51  ;;  %v1202_v25 = vsub.f32 %v1042_v47, %v5042_v51  ;;  %v1186_v24 = vsub.f32 %v1026_v17, %v5044_v58 }
 0x215   : > { %7194 = vst [vmem:[#allocation136_spill] sm:$0xff] %v5044_v58 }
 0x216   : > { %v5048_v9 = vpop.eup %3977  ;;  %v1259_v18 = vmul.f32 1.442695, %v1202_v25  ;;  %v1227_v46 = vmul.f32 1.442695, %v1186_v24  ;;  %1320 = vperm.xlu2 %3943, %v5044_v58  }
 0x217   : > { %7195 = vst [vmem:[#allocation137_spill] sm:$0xff] %v5048_v9  ;;  %v5051_v38 = vpop.eup %3979  ;;  %v1028_v9 = vld [vmem:[#allocation2 + $0x58] sm:$0xff] }
 0x218   : > { %7196 = vst [vmem:[#allocation138_spill] sm:$0xff] %v5051_v38  ;;  %3981 = vpow2.f32 %v1259_v18 }
 0x219   : > { %3983 = vpow2.f32 %v1227_v46  ;;  %v1129_v5 = vpop.xlane.xlu2 %1128  ;;  %v1081_v41 = vpop.xlane.xlu1 %1080  ;;  %v1044_v46 = vld [vmem:[#allocation2 + $0xd8] sm:$0xff] }
 0x21a   : > { %v5053_v27 = vmax.f32 %v1043_v4, %v1129_v5  ;;  %v5055_v39 = vmax.f32 %v1027_v3, %v1081_v41  ;;  %1285 = vperm.xlu1 %3944, %v4951_v31  }
 0x21c   : > { %7197 = vst [vmem:[#allocation139_spill] sm:$0xff] %v5053_v27  ;;  %v1203_v17 = vsub.f32 %v1043_v4, %v5053_v27  ;;  %v1187_v24 = vsub.f32 %v1027_v3, %v5055_v39  ;;  %1405 = vperm.xlu0 %3942, %v5053_v27   ;;  %v1029_v27 = vld [vmem:[#allocation2 + $0x60] sm:$0xff] }
 0x21d   : > { %7198 = vst [vmem:[#allocation140_spill] sm:$0xff] %v5055_v39 }
 0x21e   : > { %v5061_v47 = vpop.eup %3981  ;;  %v1261_v25 = vmul.f32 1.442695, %v1203_v17  ;;  %v1229_v58 = vmul.f32 1.442695, %v1187_v24 }
 0x21f   : > { %7199 = vst [vmem:[#allocation141_spill] sm:$0xff] %v5061_v47  ;;  %v5063_v18 = vpop.eup %3983 }
 0x220   : > { %7200 = vst [vmem:[#allocation142_spill] sm:$0xff] %v5063_v18  ;;  %3985 = vpow2.f32 %v1261_v25 }
 0x221   : > { %3987 = vpow2.f32 %v1229_v58  ;;  %v1132_v41 = vpop.xlane.xlu0 %1131  ;;  %v1084_v5 = vpop.xlane.xlu2 %1083 }
 0x222   : > { %v5065_v38 = vmax.f32 %v1044_v46, %v1132_v41  ;;  %v5067_v31 = vmax.f32 %v1028_v9, %v1084_v5  ;;  %1370 = vperm.xlu1 %3944, %v4971_v59   ;;  %v1045_v41 = vld [vmem:[#allocation2 + $0xe0] sm:$0xff] }
 0x224   : > { %7201 = vst [vmem:[#allocation143_spill] sm:$0xff] %v5065_v38  ;;  %v1204_v4 = vsub.f32 %v1044_v46, %v5065_v38  ;;  %v1188_v3 = vsub.f32 %v1028_v9, %v5067_v31  ;;  %1410 = vperm.xlu2 %3943, %v5065_v38   ;;  %1330 = vperm.xlu0 %3942, %v5067_v31  }
 0x225   : > { %7202 = vst [vmem:[#allocation144_spill] sm:$0xff] %v5067_v31 }
 0x226   : > { %v5074_v17 = vpop.eup %3985  ;;  %v1263_v24 = vmul.f32 1.442695, %v1204_v4  ;;  %v1231_v58 = vmul.f32 1.442695, %v1188_v3 }
 0x227   : > { %7203 = vst [vmem:[#allocation145_spill] sm:$0xff] %v5074_v17  ;;  %v5076_v25 = vpop.eup %3987  ;;  %v1030_v17 = vld [vmem:[#allocation2 + $0x68] sm:$0xff] }
 0x228   : > { %7204 = vst [vmem:[#allocation146_spill] sm:$0xff] %v5076_v25  ;;  %3989 = vpow2.f32 %v1263_v24 }
 0x229   : > { %3991 = vpow2.f32 %v1231_v58  ;;  %v1135_v5 = vpop.xlane.xlu1 %1134  ;;  %v1087_v59 = vpop.xlane.xlu0 %1086  ;;  %v1046_v58 = vld [vmem:[#allocation2 + $0xe8] sm:$0xff] }
 0x22a   : > { %v5078_v47 = vmax.f32 %v1045_v41, %v1135_v5  ;;  %v5080_v46 = vmax.f32 %v1029_v27, %v1087_v59  ;;  %1300 = vperm.xlu1 %3944, %v4995_v23  }
 0x22c   : > { %7205 = vst [vmem:[#allocation147_spill] sm:$0xff] %v5078_v47  ;;  %v1205_v9 = vsub.f32 %v1045_v41, %v5078_v47  ;;  %v1189_v38 = vsub.f32 %v1029_v27, %v5080_v46  ;;  %1335 = vperm.xlu2 %3943, %v5080_v46  }
 0x22d   : > { %7206 = vst [vmem:[#allocation148_spill] sm:$0xff] %v5080_v46 }
 0x22e   : > { %v5086_v4 = vpop.eup %3989  ;;  %v1265_v3 = vmul.f32 1.442695, %v1205_v9  ;;  %v1233_v31 = vmul.f32 1.442695, %v1189_v38 }
 0x22f   : > { %7207 = vst [vmem:[#allocation149_spill] sm:$0xff] %v5086_v4  ;;  %v5088_v24 = vpop.eup %3991  ;;  %v1031_v4 = vld [vmem:[#allocation2 + $0x70] sm:$0xff] }
 0x230   : > { %7208 = vst [vmem:[#allocation150_spill] sm:$0xff] %v5088_v24  ;;  %3993 = vpow2.f32 %v1265_v3 }
 0x231   : > { %3995 = vpow2.f32 %v1233_v31  ;;  %v1138_v59 = vpop.xlane.xlu2 %1137  ;;  %v1090_v5 = vpop.xlane.xlu1 %1089  ;;  %v1047_v31 = vld [vmem:[#allocation2 + $0xf0] sm:$0xff] }
 0x232   : > { %v5090_v25 = vmax.f32 %v1046_v58, %v1138_v59  ;;  %v5092_v23 = vmax.f32 %v1030_v17, %v1090_v5  ;;  %1385 = vperm.xlu1 %3944, %v5001_v32  }
 0x234   : > { %7209 = vst [vmem:[#allocation151_spill] sm:$0xff] %v5090_v25  ;;  %v1206_v27 = vsub.f32 %v1046_v58, %v5090_v25  ;;  %v1190_v41 = vsub.f32 %v1030_v17, %v5092_v23  ;;  %1420 = vperm.xlu0 %3942, %v5090_v25  }
 0x235   : > { %7210 = vst [vmem:[#allocation152_spill] sm:$0xff] %v5092_v23 }
 0x236   : > { %v5098_v38 = vpop.eup %3993  ;;  %v1267_v9 = vmul.f32 1.442695, %v1206_v27  ;;  %v1235_v46 = vmul.f32 1.442695, %v1190_v41 }
 0x237   : > { %7211 = vst [vmem:[#allocation153_spill] sm:$0xff] %v5098_v38  ;;  %v5100_v3 = vpop.eup %3995 }
 0x238   : > { %7212 = vst [vmem:[#allocation154_spill] sm:$0xff] %v5100_v3  ;;  %3997 = vpow2.f32 %v1267_v9 }
 0x239   : > { %3999 = vpow2.f32 %v1235_v46  ;;  %v1141_v59 = vpop.xlane.xlu0 %1140  ;;  %v1093_v5 = vpop.xlane.xlu2 %1092 }
 0x23a   : > { %v5102_v24 = vmax.f32 %v1047_v31, %v1141_v59  ;;  %v5104_v58 = vmax.f32 %v1031_v4, %v1093_v5  ;;  %1310 = vperm.xlu1 %3944, %v5020_v29   ;;  %v1032_v59 = vld [vmem:[#allocation2 + $0x78] sm:$0xff]  ;;  %v1655_v29 = vld [vmem:[%s4327_s14 + $0xf0] sm:$0xff] }
 0x23c   : > { %7213 = vst [vmem:[#allocation155_spill] sm:$0xff] %v5102_v24  ;;  %v1207_v17 = vsub.f32 %v1047_v31, %v5102_v24  ;;  %v1191_v27 = vsub.f32 %v1031_v4, %v5104_v58  ;;  %1425 = vperm.xlu2 %3943, %v5102_v24   ;;  %1345 = vperm.xlu0 %3942, %v5104_v58  }
 0x23d   : > { %7214 = vst [vmem:[#allocation156_spill] sm:$0xff] %v5104_v58 }
 0x23e   : > { %v5111_v41 = vpop.eup %3997  ;;  %v1269_v46 = vmul.f32 1.442695, %v1207_v17  ;;  %v1237_v9 = vmul.f32 1.442695, %v1191_v27 }
 0x23f   : > { %7215 = vst [vmem:[#allocation157_spill] sm:$0xff] %v5111_v41  ;;  %v5113_v25 = vpop.eup %3999  ;;  %v1656_v41 = vld [vmem:[%s4327_s14 + $0xf8] sm:$0xff] }
 0x240   : > { %7216 = vst [vmem:[#allocation158_spill] sm:$0xff] %v5113_v25  ;;  %4001 = vpow2.f32 %v1269_v46 }
 0x241   : > { %4003 = vpow2.f32 %v1237_v9  ;;  %v1276_v5 = vpop.permute.xlu2 %1275  ;;  %v1096_v32 = vpop.xlane.xlu0 %1095 }
 0x242   : > { %v1433_v31 = vsub.f32 %v4655_v48, %v1276_v5  ;;  %v1434_v4 = vsub.f32 %v4657_v49, %v1276_v5  ;;  %v5118_v24 = vmax.f32 %v1032_v59, %v1096_v32  ;;  %1400 = vperm.xlu1 %3944, %v5042_v51  }
 0x244   : > { %7217 = vst [vmem:[#allocation159_spill] sm:$0xff] %v5118_v24  ;;  %v1497_v58 = vmul.f32 1.442695, %v1433_v31  ;;  %v1499_v17 = vmul.f32 1.442695, %v1434_v4  ;;  %v1192_v27 = vsub.f32 %v1032_v59, %v5118_v24  ;;  %1749 = vperm.xlu0 %3942, %v1655_v29   ;;  %1350 = vperm.xlu2 %3943, %v5118_v24  }
 0x246   : > { %v5123_v46 = vpop.eup %4001  ;;  %4005 = vpow2.f32 %v1497_v58  ;;  %v1239_v9 = vmul.f32 1.442695, %v1192_v27 }
 0x247   : > { %7218 = vst [vmem:[#allocation160_spill] sm:$0xff] %v5123_v46  ;;  %v5125_v38 = vpop.eup %4003  ;;  %4007 = vpow2.f32 %v1499_v17 }
 0x248   : > { %7219 = vst [vmem:[#allocation161_spill] sm:$0xff] %v5125_v38  ;;  %4009 = vpow2.f32 %v1239_v9 }
 0x249   : > { %v1356_v5 = vpop.permute.xlu1 %1355  ;;  %v1366_v32 = vpop.permute.xlu2 %1365 }
 0x24a   : > { %v1465_v51 = vsub.f32 %v4673_v53, %v1356_v5  ;;  %v1466_v31 = vsub.f32 %v4675_v54, %v1356_v5  ;;  %v1469_v59 = vsub.f32 %v4721_v6, %v1366_v32  ;;  %v1470_v29 = vsub.f32 %v4723_v7, %v1366_v32  ;;  %1325 = vperm.xlu1 %3944, %v5055_v39  }
 0x24c   : > { %v5133_v4 = vpop.eup %4005  ;;  %v1561_v58 = vmul.f32 1.442695, %v1465_v51  ;;  %v1563_v27 = vmul.f32 1.442695, %v1466_v31  ;;  %v1569_v24 = vmul.f32 1.442695, %v1469_v59  ;;  %1752 = vperm.xlu2 %3943, %v1656_v41  }
 0x24d   : > { %v5135_v17 = vpop.eup %4007  ;;  %v1571_v9 = vmul.f32 1.442695, %v1470_v29 }
 0x24e   : > { %7220 = vst [vmem:[#allocation162_spill] sm:$0xff] %v5135_v17  ;;  %v5137_v46 = vpop.eup %4009  ;;  %4011 = vpow2.f32 %v1561_v58 }
 0x24f   : > { %7221 = vst [vmem:[#allocation163_spill] sm:$0xff] %v5137_v46  ;;  %4013 = vpow2.f32 %v1563_v27 }
 0x250   : > { %4015 = vpow2.f32 %v1569_v24 }
 0x251   : > { %4017 = vpow2.f32 %v1571_v9  ;;  %v1291_v5 = vpop.permute.xlu2 %1290 }
 0x252   : > { %v1439_v32 = vsub.f32 %v4725_v8, %v1291_v5  ;;  %v1440_v39 = vsub.f32 %v4729_v10, %v1291_v5  ;;  %1415 = vperm.xlu1 %3944, %v5078_v47   ;;  %v7267_v8 = vld [vmem:[#allocation62_spill] sm:$0xff] }
 0x254   : > { %v5142_v51 = vpop.eup %4011  ;;  %v1509_v31 = vmul.f32 1.442695, %v1439_v32  ;;  %v1511_v41 = vmul.f32 1.442695, %v1440_v39  ;;  %v1281_v59 = vpop.permute.xlu0 %1280 }
 0x255   : > { %7222 = vst [vmem:[#allocation164_spill] sm:$0xff] %v5142_v51  ;;  %v5144_v25 = vpop.eup %4013  ;;  %v1435_v29 = vsub.f32 %v4677_v55, %v1281_v59  ;;  %v1436_v58 = vsub.f32 %v4681_v57, %v1281_v59 }
 0x256   : > { %7223 = vst [vmem:[#allocation165_spill] sm:$0xff] %v5144_v25  ;;  %v5148_v24 = vpop.eup %4015  ;;  %4019 = vpow2.f32 %v1509_v31 }
 0x257   : > { %7224 = vst [vmem:[#allocation166_spill] sm:$0xff] %v5148_v24  ;;  %v5150_v27 = vpop.eup %4017  ;;  %4021 = vpow2.f32 %v1511_v41  ;;  %v1501_v9 = vmul.f32 1.442695, %v1435_v29  ;;  %v1503_v5 = vmul.f32 1.442695, %v1436_v58 }
 0x258   : > { %7225 = vst [vmem:[#allocation167_spill] sm:$0xff] %v5150_v27 }
 0x259   : > { %4023 = vpow2.f32 %v1501_v9  ;;  %v1296_v47 = vpop.permute.xlu2 %1295 }
 0x25a   : > { %4025 = vpow2.f32 %v1503_v5  ;;  %v1441_v39 = vsub.f32 %v4749_v15, %v1296_v47  ;;  %v1442_v32 = vsub.f32 %v4751_v16, %v1296_v47  ;;  %1340 = vperm.xlu1 %3944, %v5092_v23   ;;  %v7254_v16 = vld [vmem:[#allocation98_spill] sm:$0xff] }
 0x25c   : > { %v5155_v46 = vpop.eup %4019  ;;  %v1513_v59 = vmul.f32 1.442695, %v1441_v39  ;;  %v1515_v38 = vmul.f32 1.442695, %v1442_v32  ;;  %v1361_v3 = vpop.permute.xlu0 %1360 }
 0x25d   : > { %7226 = vst [vmem:[#allocation168_spill] sm:$0xff] %v5155_v46  ;;  %v5157_v31 = vpop.eup %4021  ;;  %v1467_v41 = vsub.f32 %v4697_v61, %v1361_v3  ;;  %v1468_v29 = vsub.f32 %v4699_v62, %v1361_v3 }
 0x25e   : > { %7227 = vst [vmem:[#allocation169_spill] sm:$0xff] %v5157_v31  ;;  %4027 = vpow2.f32 %v1513_v59 }
 0x25f   : > { %v5161_v58 = vpop.eup %4023  ;;  %4029 = vpow2.f32 %v1515_v38  ;;  %v1565_v9 = vmul.f32 1.442695, %v1467_v41  ;;  %v1567_v5 = vmul.f32 1.442695, %v1468_v29 }
 0x260   : > { %7228 = vst [vmem:[#allocation170_spill] sm:$0xff] %v5161_v58  ;;  %v5163_v47 = vpop.eup %4025 }
 0x261   : > { %4031 = vpow2.f32 %v1565_v9  ;;  %v1381_v23 = vpop.permute.xlu2 %1380 }
 0x262   : > { %4033 = vpow2.f32 %v1567_v5  ;;  %v1475_v39 = vsub.f32 %v4791_v33, %v1381_v23  ;;  %v1476_v32 = vsub.f32 %v4793_v36, %v1381_v23 }
 0x264   : > { %v5167_v18 = vpop.eup %4027  ;;  %v1581_v61 = vmul.f32 1.442695, %v1475_v39  ;;  %v1583_v7 = vmul.f32 1.442695, %v1476_v32  ;;  %v1376_v3 = vpop.permute.xlu0 %1375 }
 0x265   : > { %v5169_v59 = vpop.eup %4029  ;;  %v1473_v38 = vsub.f32 %v4769_v21, %v1376_v3  ;;  %v1474_v41 = vsub.f32 %v4771_v22, %v1376_v3 }
 0x266   : > { %4035 = vpow2.f32 %v1581_v61 }
 0x267   : > { %v5173_v29 = vpop.eup %4031  ;;  %4037 = vpow2.f32 %v1583_v7  ;;  %v1577_v9 = vmul.f32 1.442695, %v1473_v38  ;;  %v1579_v5 = vmul.f32 1.442695, %v1474_v41 }
 0x268   : > { %7229 = vst [vmem:[#allocation171_spill] sm:$0xff] %v5173_v29  ;;  %v5175_v33 = vpop.eup %4033 }
 0x269   : > { %7230 = vst [vmem:[#allocation172_spill] sm:$0xff] %v5175_v33  ;;  %4039 = vpow2.f32 %v1577_v9  ;;  %v1306_v23 = vpop.permute.xlu2 %1305 }
 0x26a   : > { %4041 = vpow2.f32 %v1579_v5  ;;  %v1445_v39 = vsub.f32 %v4795_v37, %v1306_v23  ;;  %v1446_v32 = vsub.f32 %v4799_v43, %v1306_v23  ;;  %v1048_v5 = vld [vmem:[#allocation2 + $0xf8] sm:$0xff]  ;;  %v1654_v37 = vld [vmem:[%s4327_s14 + $0xe8] sm:$0xff] }
 0x26c   : > { %v5179_v36 = vpop.eup %4035  ;;  %v1521_v21 = vmul.f32 1.442695, %v1445_v39  ;;  %v1523_v62 = vmul.f32 1.442695, %v1446_v32 }
 0x26d   : > { %7231 = vst [vmem:[#allocation173_spill] sm:$0xff] %v5179_v36  ;;  %v5181_v3 = vpop.eup %4037 }
 0x26e   : > { %7232 = vst [vmem:[#allocation174_spill] sm:$0xff] %v5181_v3  ;;  %4043 = vpow2.f32 %v1521_v21 }
 0x26f   : > { %v5183_v61 = vpop.eup %4039  ;;  %4045 = vpow2.f32 %v1523_v62 }
 0x270   : > { %7233 = vst [vmem:[#allocation175_spill] sm:$0xff] %v5183_v61  ;;  %v5185_v7 = vpop.eup %4041 }
 0x271   : > { %7234 = vst [vmem:[#allocation176_spill] sm:$0xff] %v5185_v7  ;;  %v1396_v38 = vpop.permute.xlu2 %1395 }
 0x272   : > { %v1481_v41 = vsub.f32 %v4845_v20, %v1396_v38  ;;  %v1482_v9 = vsub.f32 %v4849_v1, %v1396_v38 }
 0x274   : > { %v5189_v22 = vpop.eup %4043  ;;  %v1593_v23 = vmul.f32 1.442695, %v1481_v41  ;;  %v1595_v6 = vmul.f32 1.442695, %v1482_v9  ;;  %v1144_v39 = vpop.xlane.xlu1 %1143 }
 0x275   : > { %7235 = vst [vmem:[#allocation177_spill] sm:$0xff] %v5189_v22  ;;  %v5191_v32 = vpop.eup %4045  ;;  %v5193_v54 = vmax.f32 %v1048_v5, %v1144_v39 }
 0x276   : > { %4047 = vpow2.f32 %v1593_v23  ;;  %v1391_v21 = vpop.permute.xlu0 %1390 }
 0x277   : > { %7236 = vst [vmem:[#allocation178_spill] sm:$0xff] %v5193_v54  ;;  %4049 = vpow2.f32 %v1595_v6  ;;  %v1208_v62 = vsub.f32 %v1048_v5, %v5193_v54  ;;  %v1479_v20 = vsub.f32 %v4827_v28, %v1391_v21  ;;  %v1480_v38 = vsub.f32 %v4829_v42, %v1391_v21  ;;  %1430 = vperm.xlu1 %3944, %v5193_v54  }
 0x279   : > { %v1271_v1 = vmul.f32 1.442695, %v1208_v62  ;;  %v1589_v41 = vmul.f32 1.442695, %v1479_v20  ;;  %v1591_v9 = vmul.f32 1.442695, %v1480_v38  ;;  %v1321_v53 = vpop.permute.xlu2 %1320 }
 0x27a   : > { %v1451_v43 = vsub.f32 %v4851_v40, %v1321_v53  ;;  %v1452_v39 = vsub.f32 %v4855_v0, %v1321_v53 }
 0x27b   : > { %4051 = vpow2.f32 %v1271_v1 }
 0x27c   : > { %v5201_v23 = vpop.eup %4047  ;;  %4053 = vpow2.f32 %v1589_v41  ;;  %v1533_v6 = vmul.f32 1.442695, %v1451_v43  ;;  %v1535_v5 = vmul.f32 1.442695, %v1452_v39 }
 0x27d   : > { %7237 = vst [vmem:[#allocation179_spill] sm:$0xff] %v5201_v23  ;;  %v5204_v28 = vpop.eup %4049  ;;  %4055 = vpow2.f32 %v1591_v9 }
 0x27e   : > { %7238 = vst [vmem:[#allocation180_spill] sm:$0xff] %v5204_v28  ;;  %4057 = vpow2.f32 %v1533_v6  ;;  %v1316_v21 = vpop.permute.xlu0 %1315 }
 0x27f   : > { %4059 = vpow2.f32 %v1535_v5  ;;  %v1449_v20 = vsub.f32 %v4831_v50, %v1316_v21  ;;  %v1450_v62 = vsub.f32 %v4837_v11, %v1316_v21  ;;  %1746 = vperm.xlu1 %3944, %v1654_v37  }
 0x281   : > { %v5208_v38 = vpop.eup %4051  ;;  %v1529_v53 = vmul.f32 1.442695, %v1449_v20  ;;  %v1531_v1 = vmul.f32 1.442695, %v1450_v62  ;;  %v1411_v54 = vpop.permute.xlu2 %1410 }
 0x282   : > { %7239 = vst [vmem:[#allocation181_spill] sm:$0xff] %v5208_v38  ;;  %v5210_v41 = vpop.eup %4053  ;;  %v1487_v43 = vsub.f32 %v4887_v19, %v1411_v54  ;;  %v1488_v39 = vsub.f32 %v4889_v56, %v1411_v54 }
 0x283   : > { %7240 = vst [vmem:[#allocation182_spill] sm:$0xff] %v5210_v41  ;;  %v5214_v9 = vpop.eup %4055  ;;  %4061 = vpow2.f32 %v1529_v53 }
 0x284   : > { %7241 = vst [vmem:[#allocation183_spill] sm:$0xff] %v5214_v9  ;;  %v5216_v6 = vpop.eup %4057  ;;  %4063 = vpow2.f32 %v1531_v1  ;;  %v1605_v5 = vmul.f32 1.442695, %v1487_v43  ;;  %v1607_v21 = vmul.f32 1.442695, %v1488_v39 }
 0x285   : > { %7242 = vst [vmem:[#allocation184_spill] sm:$0xff] %v5216_v6  ;;  %v5218_v37 = vpop.eup %4059 }
 0x286   : > { %4065 = vpow2.f32 %v1605_v5 }
 0x287   : > { %4067 = vpow2.f32 %v1607_v21 }
 0x289   : > { %v5220_v20 = vpop.eup %4061  ;;  %v1336_v62 = vpop.permute.xlu2 %1335 }
 0x28a   : > { %v5222_v38 = vpop.eup %4063  ;;  %v1457_v19 = vsub.f32 %v4891_v44, %v1336_v62  ;;  %v1458_v54 = vsub.f32 %v4897_v12, %v1336_v62 }
 0x28c   : > { %v5226_v56 = vpop.eup %4065  ;;  %v1545_v53 = vmul.f32 1.442695, %v1457_v19  ;;  %v1547_v42 = vmul.f32 1.442695, %v1458_v54  ;;  %v1286_v1 = vpop.permute.xlu1 %1285 }
 0x28d   : > { %7243 = vst [vmem:[#allocation185_spill] sm:$0xff] %v5226_v56  ;;  %v5228_v43 = vpop.eup %4067  ;;  %v1437_v39 = vsub.f32 %v4701_v63, %v1286_v1  ;;  %v1438_v5 = vsub.f32 %v4705_v2, %v1286_v1 }
 0x28e   : > { %7244 = vst [vmem:[#allocation186_spill] sm:$0xff] %v5228_v43  ;;  %4069 = vpow2.f32 %v1545_v53  ;;  %v1406_v21 = vpop.permute.xlu0 %1405 }
 0x28f   : > { %4071 = vpow2.f32 %v1547_v42  ;;  %v1505_v11 = vmul.f32 1.442695, %v1437_v39  ;;  %v1507_v50 = vmul.f32 1.442695, %v1438_v5  ;;  %v1485_v44 = vsub.f32 %v4875_v60, %v1406_v21 }
 0x290   : > { %v1486_v62 = vsub.f32 %v4879_v35, %v1406_v21 }
 0x291   : > { %4073 = vpow2.f32 %v1505_v11  ;;  %v1601_v12 = vmul.f32 1.442695, %v1485_v44 }
 0x292   : > { %4075 = vpow2.f32 %v1507_v50  ;;  %v1603_v19 = vmul.f32 1.442695, %v1486_v62 }
 0x293   : > { %4077 = vpow2.f32 %v1601_v12 }
 0x294   : > { %v5234_v54 = vpop.eup %4069  ;;  %4079 = vpow2.f32 %v1603_v19  ;;  %v1371_v0 = vpop.permute.xlu1 %1370 }
 0x295   : > { %7245 = vst [vmem:[#allocation187_spill] sm:$0xff] %v5234_v54  ;;  %v5236_v40 = vpop.eup %4071  ;;  %v1471_v53 = vsub.f32 %v4745_v13, %v1371_v0  ;;  %v1472_v42 = vsub.f32 %v4747_v14, %v1371_v0 }
 0x296   : > { %7246 = vst [vmem:[#allocation188_spill] sm:$0xff] %v5236_v40  ;;  %v1426_v1 = vpop.permute.xlu2 %1425  ;;  %v1331_v39 = vpop.permute.xlu0 %1330 }
 0x297   : > { %v5240_v5 = vpop.eup %4073  ;;  %v1573_v21 = vmul.f32 1.442695, %v1471_v53  ;;  %v1575_v11 = vmul.f32 1.442695, %v1472_v42  ;;  %v1493_v50 = vsub.f32 %v4923_v45, %v1426_v1  ;;  %v1494_v12 = vsub.f32 %v4927_v52, %v1426_v1  ;;  %v7251_v52 = vld [vmem:[#allocation52_spill] sm:$0xff] }
 0x298   : > { %7247 = vst [vmem:[#allocation189_spill] sm:$0xff] %v5240_v5  ;;  %v5244_v44 = vpop.eup %4075  ;;  %v1455_v62 = vsub.f32 %v4881_v30, %v1331_v39  ;;  %v1456_v19 = vsub.f32 %v4885_v34, %v1331_v39 }
 0x299   : > { %7248 = vst [vmem:[#allocation190_spill] sm:$0xff] %v5244_v44  ;;  %v5248_v35 = vpop.eup %4077  ;;  %4081 = vpow2.f32 %v1573_v21  ;;  %v1617_v0 = vmul.f32 1.442695, %v1493_v50  ;;  %v1619_v60 = vmul.f32 1.442695, %v1494_v12  ;;  %v7253_v12 = vld [vmem:[#allocation99_spill] sm:$0xff] }
 0x29a   : > { %7249 = vst [vmem:[#allocation191_spill] sm:$0xff] %v5248_v35  ;;  %v5250_v14 = vpop.eup %4079  ;;  %4083 = vpow2.f32 %v1575_v11  ;;  %v1541_v53 = vmul.f32 1.442695, %v1455_v62  ;;  %v1543_v42 = vmul.f32 1.442695, %v1456_v19 }
 0x29b   : > { %7250 = vst [vmem:[#allocation192_spill] sm:$0xff] %v5250_v14  ;;  %4085 = vpow2.f32 %v1617_v0 }
 0x29c   : > { %4087 = vpow2.f32 %v1619_v60  ;;  %v1301_v45 = vpop.permute.xlu1 %1300 }
 0x29d   : > { %4089 = vpow2.f32 %v1541_v53  ;;  %v1443_v1 = vsub.f32 %v4773_v26, %v1301_v45  ;;  %v1444_v13 = vsub.f32 %v7251_v52, %v1301_v45 }
 0x29e   : > { %4091 = vpow2.f32 %v1543_v42  ;;  %v1351_v39 = vpop.permute.xlu2 %1350  ;;  %v7258_v42 = vld [vmem:[#allocation60_spill] sm:$0xff] }
 0x29f   : > { %v5254_v34 = vpop.eup %4081  ;;  %v1517_v21 = vmul.f32 1.442695, %v1443_v1  ;;  %v1519_v50 = vmul.f32 1.442695, %v1444_v13  ;;  %v1463_v30 = vsub.f32 %v7253_v12, %v1351_v39  ;;  %v1464_v11 = vsub.f32 %v7254_v16, %v1351_v39  ;;  %v7259_v16 = vld [vmem:[#allocation61_spill] sm:$0xff] }
 0x2a0   : > { %7252 = vst [vmem:[#allocation193_spill] sm:$0xff] %v5254_v34  ;;  %v5258_v62 = vpop.eup %4083 }
 0x2a1   : > { %7255 = vst [vmem:[#allocation194_spill] sm:$0xff] %v5258_v62  ;;  %v5260_v19 = vpop.eup %4085  ;;  %4093 = vpow2.f32 %v1517_v21  ;;  %v1557_v60 = vmul.f32 1.442695, %v1463_v30  ;;  %v1559_v0 = vmul.f32 1.442695, %v1464_v11 }
 0x2a2   : > { %7256 = vst [vmem:[#allocation195_spill] sm:$0xff] %v5260_v19  ;;  %v5262_v53 = vpop.eup %4087  ;;  %4095 = vpow2.f32 %v1519_v50 }
 0x2a3   : > { %7257 = vst [vmem:[#allocation196_spill] sm:$0xff] %v5262_v53  ;;  %v5264_v45 = vpop.eup %4089  ;;  %4097 = vpow2.f32 %v1557_v60 }
 0x2a4   : > { %v5266_v52 = vpop.eup %4091  ;;  %4099 = vpow2.f32 %v1559_v0  ;;  %v1386_v13 = vpop.permute.xlu1 %1385  ;;  %v7263_v0 = vld [vmem:[#allocation91_spill] sm:$0xff] }
 0x2a5   : > { %v1477_v1 = vsub.f32 %v7258_v42, %v1386_v13  ;;  %v1478_v39 = vsub.f32 %v7259_v16, %v1386_v13  ;;  %v7264_v42 = vld [vmem:[#allocation92_spill] sm:$0xff] }
 0x2a6   : > { %v5270_v12 = vpop.permute.xlu2 %1752  ;;  %v1421_v26 = vpop.permute.xlu0 %1420 }
 0x2a7   : > { %7260 = vst [vmem:[#allocation197_spill] sm:$0xff] %v5270_v12  ;;  %v5272_v21 = vpop.eup %4093  ;;  %v1585_v30 = vmul.f32 1.442695, %v1477_v1  ;;  %v1587_v11 = vmul.f32 1.442695, %v1478_v39  ;;  %v1491_v2 = vsub.f32 %v7263_v0, %v1421_v26  ;;  %v1492_v63 = vsub.f32 %v7264_v42, %v1421_v26  ;;  %v7268_v12 = vld [vmem:[#allocation63_spill] sm:$0xff] }
 0x2a8   : > { %v5278_v60 = vpop.eup %4095  ;;  %v7270_v42 = vld [vmem:[#allocation94_spill] sm:$0xff] }
 0x2a9   : > { %v5282_v13 = vpop.eup %4097  ;;  %4101 = vpow2.f32 %v1585_v30  ;;  %v1613_v1 = vmul.f32 1.442695, %v1491_v2  ;;  %v1615_v39 = vmul.f32 1.442695, %v1492_v63  ;;  %v7271_v30 = vld [vmem:[#allocation93_spill] sm:$0xff] }
 0x2aa   : > { %7265 = vst [vmem:[#allocation198_spill] sm:$0xff] %v5282_v13  ;;  %v5284_v16 = vpop.eup %4099  ;;  %4103 = vpow2.f32 %v1587_v11 }
 0x2ab   : > { %7266 = vst [vmem:[#allocation199_spill] sm:$0xff] %v5284_v16  ;;  %4105 = vpow2.f32 %v1613_v1 }
 0x2ac   : > { %v1311_v10 = vpop.permute.xlu1 %1310  ;;  %4107 = vpow2.f32 %v1615_v39 }
 0x2ad   : > { %v1447_v57 = vsub.f32 %v7267_v8, %v1311_v10  ;;  %v1448_v55 = vsub.f32 %v7268_v12, %v1311_v10  ;;  %v7275_v12 = vld [vmem:[#allocation75_spill] sm:$0xff] }
 0x2ae   : > { %v1346_v19 = vpop.permute.xlu0 %1345 }
 0x2af   : > { %v5288_v49 = vpop.eup %4101  ;;  %v1525_v0 = vmul.f32 1.442695, %v1447_v57  ;;  %v1527_v26 = vmul.f32 1.442695, %v1448_v55  ;;  %v1461_v48 = vsub.f32 %v7270_v42, %v1346_v19  ;;  %v1462_v53 = vsub.f32 %v7271_v30, %v1346_v19  ;;  %v7276_v55 = vld [vmem:[#allocation76_spill] sm:$0xff] }
 0x2b0   : > { %7269 = vst [vmem:[#allocation200_spill] sm:$0xff] %v5288_v49  ;;  %v5292_v56 = vpop.eup %4103 }
 0x2b1   : > { %7272 = vst [vmem:[#allocation201_spill] sm:$0xff] %v5292_v56  ;;  %4109 = vpow2.f32 %v1525_v0  ;;  %v1553_v63 = vmul.f32 1.442695, %v1461_v48  ;;  %v1555_v2 = vmul.f32 1.442695, %v1462_v53  ;;  %v5294_v11 = vpop.eup %4105 }
 0x2b2   : > { %7273 = vst [vmem:[#allocation202_spill] sm:$0xff] %v5294_v11  ;;  %4111 = vpow2.f32 %v1527_v26  ;;  %v5296_v8 = vpop.eup %4107 }
 0x2b3   : > { %7274 = vst [vmem:[#allocation203_spill] sm:$0xff] %v5296_v8  ;;  %4113 = vpow2.f32 %v1553_v63  ;;  %v7282_v63 = vld [vmem:[#allocation77_spill] sm:$0xff]  ;;  %v7286_v8 = vld [vmem:[#allocation87_spill] sm:$0xff] }
 0x2b4   : > { %4115 = vpow2.f32 %v1555_v2  ;;  %v1401_v10 = vpop.permute.xlu1 %1400 }
 0x2b5   : > { %v1483_v57 = vsub.f32 %v7275_v12, %v1401_v10  ;;  %v1484_v1 = vsub.f32 %v7276_v55, %v1401_v10  ;;  %v7283_v10 = vld [vmem:[#allocation78_spill] sm:$0xff] }
 0x2b6   : > { %v5300_v39 = vpop.permute.xlu0 %1749 }
 0x2b7   : > { %7277 = vst [vmem:[#allocation204_spill] sm:$0xff] %v5300_v39  ;;  %v5302_v19 = vpop.eup %4109  ;;  %v1597_v42 = vmul.f32 1.442695, %v1483_v57  ;;  %v1599_v0 = vmul.f32 1.442695, %v1484_v1 }
 0x2b8   : > { %7278 = vst [vmem:[#allocation205_spill] sm:$0xff] %v5302_v19  ;;  %v5308_v48 = vpop.eup %4111 }
 0x2b9   : > { %7279 = vst [vmem:[#allocation206_spill] sm:$0xff] %v5308_v48  ;;  %v5310_v53 = vpop.eup %4113  ;;  %4117 = vpow2.f32 %v1597_v42  ;;  %v7287_v42 = vld [vmem:[#allocation88_spill] sm:$0xff] }
 0x2ba   : > { %7280 = vst [vmem:[#allocation207_spill] sm:$0xff] %v5310_v53  ;;  %v5312_v26 = vpop.eup %4115  ;;  %4119 = vpow2.f32 %v1599_v0 }
 0x2bb   : > { %7281 = vst [vmem:[#allocation208_spill] sm:$0xff] %v5312_v26 }
 0x2bc   : > { %v1326_v30 = vpop.permute.xlu1 %1325 }
 0x2bd   : > { %v1453_v2 = vsub.f32 %v7282_v63, %v1326_v30  ;;  %v1454_v12 = vsub.f32 %v7283_v10, %v1326_v30 }
 0x2bf   : > { %v5316_v57 = vpop.eup %4117  ;;  %v1537_v55 = vmul.f32 1.442695, %v1453_v2  ;;  %v1539_v1 = vmul.f32 1.442695, %v1454_v12  ;;  %v7290_v2 = vld [vmem:[#allocation89_spill] sm:$0xff]  ;;  %v7291_v12 = vld [vmem:[#allocation90_spill] sm:$0xff] }
 0x2c0   : > { %7284 = vst [vmem:[#allocation209_spill] sm:$0xff] %v5316_v57  ;;  %v5318_v11 = vpop.eup %4119 }
 0x2c1   : > { %7285 = vst [vmem:[#allocation210_spill] sm:$0xff] %v5318_v11  ;;  %4121 = vpow2.f32 %v1537_v55 }
 0x2c2   : > { %4123 = vpow2.f32 %v1539_v1 }
 0x2c4   : > { %v1416_v39 = vpop.permute.xlu1 %1415 }
 0x2c5   : > { %v1489_v43 = vsub.f32 %v7286_v8, %v1416_v39  ;;  %v1490_v35 = vsub.f32 %v7287_v42, %v1416_v39  ;;  %v7296_v42 = vld [vmem:[#allocation123_spill] sm:$0xff] }
 0x2c7   : > { %v5322_v23 = vpop.eup %4121  ;;  %v1609_v0 = vmul.f32 1.442695, %v1489_v43  ;;  %v1611_v14 = vmul.f32 1.442695, %v1490_v35 }
 0x2c8   : > { %7288 = vst [vmem:[#allocation211_spill] sm:$0xff] %v5322_v23  ;;  %v5324_v63 = vpop.eup %4123 }
 0x2c9   : > { %7289 = vst [vmem:[#allocation212_spill] sm:$0xff] %v5324_v63  ;;  %4125 = vpow2.f32 %v1609_v0  ;;  %v7297_v0 = vld [vmem:[#allocation124_spill] sm:$0xff] }
 0x2ca   : > { %4127 = vpow2.f32 %v1611_v14 }
 0x2cc   : > { %v1341_v30 = vpop.permute.xlu1 %1340 }
 0x2cd   : > { %v1459_v10 = vsub.f32 %v7290_v2, %v1341_v30  ;;  %v1460_v57 = vsub.f32 %v7291_v12, %v1341_v30 }
 0x2cf   : > { %v5328_v55 = vpop.eup %4125  ;;  %v1549_v1 = vmul.f32 1.442695, %v1459_v10  ;;  %v1551_v11 = vmul.f32 1.442695, %v1460_v57 }
 0x2d0   : > { %7292 = vst [vmem:[#allocation213_spill] sm:$0xff] %v5328_v55  ;;  %v5330_v8 = vpop.eup %4127 }
 0x2d1   : > { %7293 = vst [vmem:[#allocation214_spill] sm:$0xff] %v5330_v8  ;;  %4129 = vpow2.f32 %v1549_v1 }
 0x2d2   : > { %4131 = vpow2.f32 %v1551_v11 }
 0x2d7   : > { %v5332_v39 = vpop.eup %4129 }
 0x2d8   : > { %7294 = vst [vmem:[#allocation215_spill] sm:$0xff] %v5332_v39  ;;  %v5334_v35 = vpop.eup %4131 }
 0x2d9   : > { %7295 = vst [vmem:[#allocation216_spill] sm:$0xff] %v5334_v35 }
 0x2e9   : > { %v1431_v43 = vpop.permute.xlu1 %1430 }
 0x2ea   : > { %v1495_v14 = vsub.f32 %v7296_v42, %v1431_v43  ;;  %v1496_v28 = vsub.f32 %v7297_v0, %v1431_v43 }
 0x2ec   : > { %v1621_v2 = vmul.f32 1.442695, %v1495_v14  ;;  %v1623_v49 = vmul.f32 1.442695, %v1496_v28 }
 0x2ee   : > { %4133 = vpow2.f32 %v1621_v2 }
 0x2ef   : > { %4135 = vpow2.f32 %v1623_v49 }
 0x2f1   : > { %v5338_v30 = vpop.permute.xlu1 %1746 }
 0x2f2   : > { %1823 = sbr.rel (%p3671_p10) target bundleno = 1054 (0x41e), region = 48 }
 0x2f4   : > { %v5344_v11 = vpop.eup %4133 }
 0x2f5   : > { %v5346_v57 = vpop.eup %4135 }
 0x2f6   : > { %7298 = vst [vmem:[#allocation217_spill] sm:$0xff] %v5346_v57 }
 0x2f7   : > { %v1824_v10 = vlaneseq }
 0x2f9   : > { %v5350_v28 = vshrl.u32 %v1824_v10, 7  ;;  %v5352_v49 = vand.u32 127, %v1824_v10 }
 0x2fb   : > { %vm1860_vm5 = vcmp.ne.s32.totalorder %v5350_v28, %v5352_v49  ;;  %v5357_v15 = vadd.s32 32, %v5350_v28  ;;  %v5360_v50 = vadd.s32 16, %v5350_v28  ;;  %v5363_v12 = vadd.s32 8, %v5350_v28 }
 0x2fc   : > { %v1988_v1 = vsel %vm1860_vm5, %v5133_v4, 0.0  ;;  %v5370_v43 = vadd.s32 40, %v5350_v28  ;;  %v5373_v42 = vadd.s32 24, %v5350_v28 }
 0x2fd   : > { %v2052_v14 = vadd.f32 %v5135_v17, %v1988_v1  ;;  %vm7001_vm9 = vcmp.ne.s32.totalorder %v5357_v15, %v5352_v49  ;;  %vm1864_vm4 = vcmp.ne.s32.totalorder %v5360_v50, %v5352_v49  ;;  %vm1862_vm10 = vcmp.ne.s32.totalorder %v5363_v12, %v5352_v49 }
 0x2fe   : > { %v1996_v0 = vsel %vm7001_vm9, %v5167_v18, 0.0  ;;  %v1992_v2 = vsel %vm1864_vm4, %v5240_v5, 0.0  ;;  %vm7000_vm12 = vcmp.ne.s32.totalorder %v5370_v43, %v5352_v49  ;;  %v1990_v17 = vsel %vm1862_vm10, %v5161_v58, 0.0 }
 0x2ff   : > { %2053 = vadd.xlane.f32.xlu0 %v2052_v14  ;;  %v2064_v10 = vadd.f32 %v5169_v59, %v1996_v0  ;;  %v2058_v1 = vadd.f32 %v5244_v44, %v1992_v2  ;;  %vm1866_vm3 = vcmp.ne.s32.totalorder %v5373_v42, %v5352_v49  ;;  %v5401_v5 = vadd.s32 48, %v5350_v28  ;;  %v7325_v42 = vld [vmem:[#allocation34_spill] sm:$0xff] }
 0x300   : > { %v1998_v14 = vsel %vm7000_vm12, %v5272_v21, 0.0  ;;  %v1994_v0 = vsel %vm1866_vm3, %v5155_v46, 0.0  ;;  %v2055_v2 = vadd.f32 %v5163_v47, %v1990_v17  ;;  %v5413_v58 = vadd.s32 64, %v5350_v28 }
 0x301   : > { %2065 = vadd.xlane.f32.xlu2 %v2064_v10  ;;  %2059 = vadd.xlane.f32.xlu1 %v2058_v1  ;;  %v5416_v10 = vadd.s32 56, %v5350_v28  ;;  %v2067_v1 = vadd.f32 %v5278_v60, %v1998_v14  ;;  %v2061_v44 = vadd.f32 %v5157_v31, %v1994_v0  ;;  %vm7006_vm12 = vcmp.ne.s32.totalorder %v5401_v5, %v5352_v49 }
 0x302   : > { %vm7005_vm6 = vcmp.ne.s32.totalorder %v5413_v58, %v5352_v49  ;;  %v2000_v17 = vsel %vm7006_vm12, %v5189_v22, 0.0  ;;  %v5431_v14 = vadd.s32 72, %v5350_v28  ;;  %v5443_v46 = vadd.s32 88, %v5350_v28 }
 0x303   : > { %vm7007_vm9 = vcmp.ne.s32.totalorder %v5416_v10, %v5352_v49  ;;  %v2004_v0 = vsel %vm7005_vm6, %v5220_v20, 0.0  ;;  %v2070_v31 = vadd.f32 %v5191_v32, %v2000_v17 }
 0x304   : > { %vm7012_vm6 = vcmp.ne.s32.totalorder %v5431_v14, %v5352_v49  ;;  %vm7011_vm12 = vcmp.ne.s32.totalorder %v5443_v46, %v5352_v49 }
 0x305   : > { %v2006_v17 = vsel %vm7012_vm6, %v5216_v6, 0.0 }
 0x307   : > { %2056 = vadd.xlane.f32.xlu0 %v2055_v2  ;;  %v2002_v2 = vsel %vm7007_vm9, %v5302_v19, 0.0  ;;  %v5473_v19 = vadd.s32 112, %v5350_v28 }
 0x308   : > { %v2073_v22 = vadd.f32 %v5308_v48, %v2002_v2  ;;  %v2079_v48 = vadd.f32 %v5218_v37, %v2006_v17 }
 0x309   : > { %2068 = vadd.xlane.f32.xlu2 %v2067_v1  ;;  %2062 = vadd.xlane.f32.xlu1 %v2061_v44  ;;  %v5446_v44 = vadd.s32 80, %v5350_v28  ;;  %v2076_v1 = vadd.f32 %v5222_v38, %v2004_v0  ;;  %v5461_v0 = vadd.s32 96, %v5350_v28  ;;  %vm7018_vm6 = vcmp.ne.s32.totalorder %v5473_v19, %v5352_v49 }
 0x30b   : > { %vm7013_vm9 = vcmp.ne.s32.totalorder %v5446_v44, %v5352_v49 }
 0x30c   : > { %v2008_v2 = vsel %vm7013_vm9, %v5322_v23, 0.0  ;;  %v5503_v23 = vadd.s32 136, %v5350_v28 }
 0x30d   : > { %v2082_v6 = vadd.f32 %v5324_v63, %v2008_v2 }
 0x30f   : > { %2071 = vadd.xlane.f32.xlu0 %v2070_v31  ;;  %v2010_v31 = vsel %vm7011_vm12, %v5264_v45, 0.0  ;;  %vm7020_vm12 = vcmp.ne.s32.totalorder %v5461_v0, %v5352_v49 }
 0x310   : > { %v2012_v17 = vsel %vm7020_vm12, %v5234_v54, 0.0 }
 0x311   : > { %2077 = vadd.xlane.f32.xlu2 %v2076_v1  ;;  %2074 = vadd.xlane.f32.xlu1 %v2073_v22  ;;  %v5476_v22 = vadd.s32 104, %v5350_v28  ;;  %v2085_v1 = vadd.f32 %v5266_v52, %v2010_v31  ;;  %v5491_v31 = vadd.s32 120, %v5350_v28  ;;  %v2088_v63 = vadd.f32 %v5236_v40, %v2012_v17 }
 0x313   : > { %vm7019_vm9 = vcmp.ne.s32.totalorder %v5476_v22, %v5352_v49 }
 0x314   : > { %v2014_v2 = vsel %vm7019_vm9, %v5332_v39, 0.0  ;;  %v5536_v39 = vadd.s32 160, %v5350_v28 }
 0x317   : > { %2080 = vadd.xlane.f32.xlu0 %v2079_v48  ;;  %v2016_v48 = vsel %vm7018_vm6, %v5310_v53, 0.0  ;;  %v2091_v53 = vadd.f32 %v5334_v35, %v2014_v2  ;;  %vm7025_vm6 = vcmp.ne.s32.totalorder %v5491_v31, %v5352_v49 }
 0x318   : > { %v2094_v54 = vadd.f32 %v5312_v26, %v2016_v48  ;;  %v2018_v17 = vsel %vm7025_vm6, %v5282_v13, 0.0  ;;  %v5524_v48 = vadd.s32 144, %v5350_v28 }
 0x319   : > { %2086 = vadd.xlane.f32.xlu2 %v2085_v1  ;;  %2083 = vadd.xlane.f32.xlu1 %v2082_v6  ;;  %v5506_v6 = vadd.s32 128, %v5352_v49  ;;  %v5509_v1 = vadd.s32 128, %v5350_v28  ;;  %v2097_v35 = vadd.f32 %v5284_v16, %v2018_v17  ;;  %v7311_v16 = vld [vmem:[#allocation6_spill] sm:$0xff] }
 0x31b   : > { %vm7024_vm9 = vcmp.ne.s32.totalorder %v5503_v23, %v5506_v6  ;;  %vm7026_vm12 = vcmp.ne.s32.totalorder %v5509_v1, %v5506_v6  ;;  %vm7030_vm6 = vcmp.ne.s32.totalorder %v5536_v39, %v5506_v6 }
 0x31c   : > { %v2021_v2 = vsel %vm7026_vm12, %v5144_v25, 0.0 }
 0x31d   : > { %v2100_v13 = vadd.f32 %v5142_v51, %v2021_v2  ;;  %v5566_v51 = vadd.s32 184, %v5350_v28 }
 0x31f   : > { %2089 = vadd.xlane.f32.xlu0 %v2088_v63  ;;  %v2023_v63 = vsel %vm7024_vm9, %v5175_v33, 0.0  ;;  %vm7031_vm9 = vcmp.ne.s32.totalorder %v5524_v48, %v5506_v6 }
 0x320   : > { %v2025_v17 = vsel %vm7031_vm9, %v5150_v27, 0.0  ;;  %vm7037_vm9 = vcmp.ne.s32.totalorder %v5566_v51, %v5506_v6 }
 0x321   : > { %2095 = vadd.xlane.f32.xlu2 %v2094_v54  ;;  %2092 = vadd.xlane.f32.xlu1 %v2091_v53  ;;  %v5539_v54 = vadd.s32 152, %v5350_v28  ;;  %v2103_v53 = vadd.f32 %v5173_v29, %v2023_v63  ;;  %v5554_v63 = vadd.s32 168, %v5350_v28  ;;  %v2106_v25 = vadd.f32 %v5148_v24, %v2025_v17  ;;  %v7305_v24 = vld [vmem:[#allocation209_spill] sm:$0xff] }
 0x322   : > { %v7334_v29 = vld [vmem:[#allocation45_spill] sm:$0xff] }
 0x323   : > { %vm7032_vm12 = vcmp.ne.s32.totalorder %v5539_v54, %v5506_v6 }
 0x324   : > { %v2027_v2 = vsel %vm7032_vm12, %v5258_v62, 0.0 }
 0x325   : > { %v2109_v27 = vadd.f32 %v5254_v34, %v2027_v2  ;;  %v5596_v34 = vadd.s32 208, %v5350_v28 }
 0x327   : > { %2098 = vadd.xlane.f32.xlu0 %v2097_v35  ;;  %v2029_v35 = vsel %vm7030_vm6, %v5185_v7, 0.0  ;;  %vm7038_vm6 = vcmp.ne.s32.totalorder %v5554_v63, %v5506_v6 }
 0x328   : > { %v2031_v17 = vsel %vm7038_vm6, %v5181_v3, 0.0  ;;  %v7299_v3 = vld [vmem:[#allocation200_spill] sm:$0xff]  ;;  %vm7047_vm6 = vcmp.ne.s32.totalorder %v5596_v34, %v5506_v6 }
 0x329   : > { %2104 = vadd.xlane.f32.xlu2 %v2103_v53  ;;  %2101 = vadd.xlane.f32.xlu1 %v2100_v13  ;;  %v5569_v13 = vadd.s32 176, %v5350_v28  ;;  %v2112_v53 = vadd.f32 %v5183_v61, %v2029_v35  ;;  %v5584_v35 = vadd.s32 192, %v5350_v28  ;;  %v2115_v62 = vadd.f32 %v5179_v36, %v2031_v17  ;;  %v7300_v17 = vld [vmem:[#allocation180_spill] sm:$0xff] }
 0x32a   : > { %v5626_v61 = vadd.s32 232, %v5350_v28 }
 0x32b   : > { %vm7039_vm12 = vcmp.ne.s32.totalorder %v5569_v13, %v5506_v6 }
 0x32c   : > { %v2033_v2 = vsel %vm7039_vm12, %v5292_v56, 0.0 }
 0x32d   : > { %v2118_v7 = vadd.f32 %v7299_v3, %v2033_v2  ;;  %v7301_v3 = vld [vmem:[#allocation192_spill] sm:$0xff]  ;;  %v7302_v2 = vld [vmem:[#allocation210_spill] sm:$0xff] }
 0x32f   : > { %2107 = vadd.xlane.f32.xlu0 %v2106_v25  ;;  %v2035_v25 = vsel %vm7037_vm9, %v5214_v9, 0.0  ;;  %vm7048_vm9 = vcmp.ne.s32.totalorder %v5584_v35, %v5506_v6 }
 0x330   : > { %v2037_v56 = vsel %vm7048_vm9, %v7300_v17, 0.0  ;;  %vm7053_vm9 = vcmp.ne.s32.totalorder %v5626_v61, %v5506_v6 }
 0x331   : > { %2113 = vadd.xlane.f32.xlu2 %v2112_v53  ;;  %2110 = vadd.xlane.f32.xlu1 %v2109_v27  ;;  %v5599_v27 = vadd.s32 200, %v5350_v28  ;;  %v2121_v53 = vadd.f32 %v5210_v41, %v2035_v25  ;;  %v5614_v25 = vadd.s32 216, %v5350_v28  ;;  %v7303_v41 = vld [vmem:[#allocation179_spill] sm:$0xff] }
 0x332   : > { %v2124_v36 = vadd.f32 %v7303_v41, %v2037_v56  ;;  %v7306_v56 = vld [vmem:[#allocation186_spill] sm:$0xff] }
 0x333   : > { %vm7049_vm12 = vcmp.ne.s32.totalorder %v5599_v27, %v5506_v6 }
 0x334   : > { %v2039_v9 = vsel %vm7049_vm12, %v7302_v2, 0.0 }
 0x335   : > { %v2127_v33 = vadd.f32 %v7305_v24, %v2039_v9  ;;  %v7307_v24 = vld [vmem:[#allocation203_spill] sm:$0xff] }
 0x337   : > { %2116 = vadd.xlane.f32.xlu0 %v2115_v62  ;;  %v2041_v62 = vsel %vm7047_vm6, %v7301_v3, 0.0  ;;  %vm7050_vm6 = vcmp.ne.s32.totalorder %v5614_v25, %v5506_v6  ;;  %v5644_v3 = vadd.s32 240, %v5350_v28 }
 0x338   : > { %v2043_v41 = vsel %vm7050_vm6, %v7306_v56, 0.0 }
 0x339   : > { %2122 = vadd.xlane.f32.xlu2 %v2121_v53  ;;  %2119 = vadd.xlane.f32.xlu1 %v2118_v7  ;;  %v5629_v7 = vadd.s32 224, %v5350_v28  ;;  %v7304_v53 = vld [vmem:[#allocation191_spill] sm:$0xff]  ;;  %vm1921_vm6 = vcmp.ne.s32.totalorder %v5644_v3, %v5506_v6 }
 0x33a   : > { %v2130_v17 = vadd.f32 %v7304_v53, %v2041_v62  ;;  %v7308_v62 = vld [vmem:[#allocation185_spill] sm:$0xff]  ;;  %v5656_v53 = vadd.s32 248, %v5350_v28  ;;  %v7528_v3 = vld [vmem:[#allocation87_spill] sm:$0xff] }
 0x33b   : > { %vm7054_vm12 = vcmp.ne.s32.totalorder %v5629_v7, %v5506_v6  ;;  %v2133_v2 = vadd.f32 %v7308_v62, %v2043_v41  ;;  %v7312_v41 = vld [vmem:[#allocation196_spill] sm:$0xff]  ;;  %v7314_v62 = vld [vmem:[#allocation22_spill] sm:$0xff] }
 0x33c   : > { %v2045_v9 = vsel %vm7054_vm12, %v5330_v8, 0.0  ;;  %vm1923_vm12 = vcmp.ne.s32.totalorder %v5656_v53, %v5506_v6  ;;  %v2310_v8 = vsel %vm7059_vm7, %v7314_v62, 0.0  ;;  %vm2251_vm7 = vmand %vm1866_vm3, %vm1762_vm15  ;;  %v7324_v62 = vld [vmem:[#allocation33_spill] sm:$0xff]  ;;  %vm7327_vm3 = vcmp.ne.s32.totalorder %v5357_v15, %v5352_v49 }
 0x33d   : > { %v2136_v56 = vadd.f32 %v5328_v55, %v2045_v9  ;;  %v2051_v28 = vsel %vm1923_vm12, %v5346_v57, 0.0  ;;  %v7326_v57 = vld [vmem:[#allocation16_spill] sm:$0xff] }
 0x33e   : > { %v2145_v40 = vadd.f32 %v5344_v11, %v2051_v28 }
 0x33f   : > { %2125 = vadd.xlane.f32.xlu0 %v2124_v36  ;;  %v2047_v36 = vsel %vm7053_vm9, %v7307_v24, 0.0  ;;  %vm2245_vm9 = vmand %vm1860_vm5, %vm1756_vm8  ;;  %v2049_v24 = vsel %vm1921_vm6, %v7312_v41, 0.0  ;;  %v7328_v41 = vld [vmem:[#allocation35_spill] sm:$0xff] }
 0x340   : > { %vm2247_vm5 = vmand %vm1862_vm10, %vm1758_vm13  ;;  %vm7330_vm10 = vcmp.ne.s32.totalorder %v5401_v5, %v5352_v49 }
 0x341   : > { %2131 = vadd.xlane.f32.xlu2 %v2130_v17  ;;  %2128 = vadd.xlane.f32.xlu1 %v2127_v33  ;;  %v7309_v17 = vld [vmem:[#allocation202_spill] sm:$0xff] }
 0x342   : > { %v2139_v33 = vadd.f32 %v7309_v17, %v2047_v36  ;;  %v7313_v36 = vld [vmem:[#allocation21_spill] sm:$0xff]  ;;  %v7315_v17 = vld [vmem:[#allocation7_spill] sm:$0xff] }
 0x343   : > { %v2309_v9 = vsel %vm2245_vm9, %v7313_v36, 0.0  ;;  %vm2249_vm9 = vmand %vm1864_vm4, %vm7062_vm1  ;;  %v7322_v36 = vld [vmem:[#allocation39_spill] sm:$0xff] }
 0x344   : > { %v2373_v26 = vadd.f32 %v2310_v8, %v2309_v9  ;;  %v7320_v8 = vld [vmem:[#allocation27_spill] sm:$0xff]  ;;  %v2315_v50 = vsel %vm2251_vm7, %v7322_v36, 0.0  ;;  %v7323_v9 = vld [vmem:[#allocation40_spill] sm:$0xff]  ;;  %v2313_v28 = vsel %vm2249_vm9, %v7324_v62, 0.0  ;;  %vm2253_vm4 = vmand %vm7327_vm3, %vm7063_vm11  ;;  %vm7329_vm7 = vcmp.eq.s32.totalorder %v7328_v41, %v7311_v16 }
 0x345   : > { %v2317_v15 = vsel %vm2253_vm4, %v7334_v29, 0.0  ;;  %vm7336_vm3 = vcmp.eq.s32.totalorder %v7326_v57, %v7315_v17  ;;  %v7338_v36 = vld [vmem:[#allocation58_spill] sm:$0xff]  ;;  %v7355_v29 = vld [vmem:[#allocation72_spill] sm:$0xff] }
 0x347   : > { %2134 = vadd.xlane.f32.xlu0 %v2133_v2  ;;  %v7316_v2 = vld [vmem:[#allocation195_spill] sm:$0xff] }
 0x348   : > { %v2142_v55 = vadd.f32 %v7316_v2, %v2049_v24  ;;  %v7321_v24 = vld [vmem:[#allocation28_spill] sm:$0xff]  ;;  %v2314_v2 = vsel %vm7061_vm2, %v7325_v42, 0.0  ;;  %vm7333_vm2 = vcmp.ne.s32.totalorder %v5370_v43, %v5352_v49 }
 0x349   : > { %2140 = vadd.xlane.f32.xlu2 %v2139_v33  ;;  %2137 = vadd.xlane.f32.xlu1 %v2136_v56  ;;  %v2311_v56 = vsel %vm2247_vm5, %v7320_v8, 0.0  ;;  %v2312_v12 = vsel %vm1759_vm14, %v7321_v24, 0.0  ;;  %vm2257_vm5 = vmand %vm7330_vm10, %vm7329_vm7  ;;  %v7331_v33 = vld [vmem:[#allocation9_spill] sm:$0xff]  ;;  %vm7339_vm7 = vcmp.eq.s32.totalorder %v7328_v41, %v7315_v17  ;;  %v7341_v43 = vld [vmem:[#allocation52_spill] sm:$0xff]  ;;  %vm7345_vm10 = vcmp.ne.s32.totalorder %v5416_v10, %v5352_v49 }
 0x34a   : > { %v2376_v8 = vadd.f32 %v2312_v12, %v2311_v56  ;;  %vm7332_vm9 = vcmp.eq.s32.totalorder %v7331_v33, %v7311_v16  ;;  %v7335_v56 = vld [vmem:[#allocation46_spill] sm:$0xff]  ;;  %v7337_v12 = vld [vmem:[#allocation57_spill] sm:$0xff] }
 0x34b   : > { %vm2255_vm1 = vmand %vm7333_vm2, %vm7332_vm9  ;;  %v2318_v24 = vsel %vm7336_vm3, %v7335_v56, 0.0  ;;  %v2321_v5 = vsel %vm2257_vm5, %v7337_v12, 0.0  ;;  %vm7342_vm2 = vcmp.eq.s32.totalorder %v7331_v33, %v7315_v17  ;;  %v7353_v33 = vld [vmem:[#allocation63_spill] sm:$0xff] }
 0x34c   : > { %v2320_v62 = vsel %vm7342_vm2, %v7341_v43, 0.0  ;;  %vm7351_vm2 = vcmp.ne.s32.totalorder %v5413_v58, %v5352_v49  ;;  %v7359_v58 = vld [vmem:[#allocation68_spill] sm:$0xff]  ;;  %v7364_v43 = vld [vmem:[#allocation47_spill] sm:$0xff] }
 0x34f   : > { %2143 = vadd.xlane.f32.xlu0 %v2142_v55  ;;  %v2316_v55 = vsel %vm1763_vm0, %v7323_v9, 0.0  ;;  %v7340_v9 = vld [vmem:[#allocation51_spill] sm:$0xff] }
 0x351   : > { %2374 = vadd.xlane.f32.xlu2 %v2373_v26  ;;  %2146 = vadd.xlane.f32.xlu1 %v2145_v40  ;;  %v2382_v40 = vadd.f32 %v2316_v55, %v2315_v50  ;;  %v2379_v26 = vadd.f32 %v2314_v2, %v2313_v28  ;;  %v2322_v50 = vsel %vm7339_vm7, %v7338_v36, 0.0  ;;  %v2319_v55 = vsel %vm2255_vm1, %v7340_v9, 0.0  ;;  %v7343_v2 = vld [vmem:[#allocation18_spill] sm:$0xff] }
 0x352   : > { %v2385_v28 = vadd.f32 %v2318_v24, %v2317_v15  ;;  %v2391_v42 = vadd.f32 %v2322_v50, %v2321_v5  ;;  %v2388_v57 = vadd.f32 %v2320_v62, %v2319_v55  ;;  %vm7344_vm4 = vcmp.eq.s32.totalorder %v7343_v2, %v7311_v16  ;;  %v7356_v15 = vld [vmem:[#allocation73_spill] sm:$0xff]  ;;  %v7358_v24 = vld [vmem:[#allocation67_spill] sm:$0xff]  ;;  %v7361_v55 = vld [vmem:[#allocation20_spill] sm:$0xff] }
 0x353   : > { %vm2259_vm5 = vmand %vm7345_vm10, %vm7344_vm4  ;;  %vm7348_vm1 = vcmp.ne.s32.totalorder %v5431_v14, %v5352_v49  ;;  %vm7354_vm4 = vcmp.eq.s32.totalorder %v7343_v2, %v7315_v17  ;;  %v7367_v62 = vld [vmem:[#allocation11_spill] sm:$0xff]  ;;  %v7373_v2 = vld [vmem:[#allocation85_spill] sm:$0xff] }
 0x354   : > { %v2324_v10 = vsel %vm7354_vm4, %v7353_v33, 0.0  ;;  %vm7368_vm4 = vcmp.eq.s32.totalorder %v7367_v62, %v7311_v16 }
 0x357   : > { %2377 = vadd.xlane.f32.xlu0 %v2376_v8  ;;  %v7346_v8 = vld [vmem:[#allocation41_spill] sm:$0xff] }
 0x358   : > { %vm7347_vm9 = vcmp.eq.s32.totalorder %v7346_v8, %v7311_v16  ;;  %vm7357_vm10 = vcmp.eq.s32.totalorder %v7346_v8, %v7315_v17  ;;  %v7374_v8 = vld [vmem:[#allocation86_spill] sm:$0xff] }
 0x359   : > { %2383 = vadd.xlane.f32.xlu2 %v2382_v40  ;;  %2380 = vadd.xlane.f32.xlu1 %v2379_v26  ;;  %vm2263_vm3 = vmand %vm7348_vm1, %vm7347_vm9  ;;  %v7349_v40 = vld [vmem:[#allocation10_spill] sm:$0xff]  ;;  %v2328_v56 = vsel %vm7357_vm10, %v7356_v15, 0.0  ;;  %vm7362_vm9 = vcmp.eq.s32.totalorder %v7361_v55, %v7311_v16  ;;  %vm7363_vm1 = vcmp.ne.s32.totalorder %v5446_v44, %v5352_v49  ;;  %vm7369_vm10 = vcmp.ne.s32.totalorder %v5443_v46, %v5352_v49 }
 0x35a   : > { %vm7350_vm7 = vcmp.eq.s32.totalorder %v7349_v40, %v7311_v16  ;;  %v7352_v26 = vld [vmem:[#allocation62_spill] sm:$0xff]  ;;  %v2327_v14 = vsel %vm2263_vm3, %v7355_v29, 0.0  ;;  %vm2265_vm3 = vmand %vm7363_vm1, %vm7362_vm9  ;;  %vm7372_vm9 = vcmp.eq.s32.totalorder %v7361_v55, %v7315_v17  ;;  %vm7375_vm1 = vcmp.eq.s32.totalorder %v7364_v43, %v7315_v17  ;;  %v7411_v55 = vld [vmem:[#allocation59_spill] sm:$0xff] }
 0x35b   : > { %vm2261_vm11 = vmand %vm7351_vm2, %vm7350_vm7  ;;  %v2323_v41 = vsel %vm2259_vm5, %v7352_v26, 0.0  ;;  %vm7360_vm5 = vcmp.eq.s32.totalorder %v7349_v40, %v7315_v17  ;;  %v2400_v50 = vadd.f32 %v2328_v56, %v2327_v14  ;;  %vm7365_vm7 = vcmp.eq.s32.totalorder %v7364_v43, %v7311_v16  ;;  %v7376_v26 = vld [vmem:[#allocation81_spill] sm:$0xff]  ;;  %v7377_v46 = vld [vmem:[#allocation82_spill] sm:$0xff] }
 0x35c   : > { %v2325_v12 = vsel %vm2261_vm11, %v7358_v24, 0.0  ;;  %v2326_v5 = vsel %vm7360_vm5, %v7359_v58, 0.0  ;;  %v2394_v36 = vadd.f32 %v2324_v10, %v2323_v41  ;;  %vm7366_vm11 = vcmp.ne.s32.totalorder %v5461_v0, %v5352_v49  ;;  %vm2267_vm5 = vmand %vm7369_vm10, %vm7368_vm4  ;;  %v1924_v29 = vld [vmem:[#allocation3] sm:$0xff]  ;;  %v7379_v56 = vld [vmem:[#allocation24_spill] sm:$0xff] }
 0x35d   : > { %v2397_v9 = vadd.f32 %v2326_v5, %v2325_v12  ;;  %vm2269_vm2 = vmand %vm7366_vm11, %vm7365_vm7  ;;  %v2334_v40 = vsel %vm7375_vm1, %v7374_v8, 0.0  ;;  %v2331_v41 = vsel %vm2267_vm5, %v7376_v26, 0.0  ;;  %vm7380_vm7 = vcmp.eq.s32.totalorder %v7379_v56, %v7311_v16  ;;  %v1928_v12 = vld [vmem:[#allocation3 + $0x20] sm:$0xff]  ;;  %v1926_v58 = vld [vmem:[#allocation3 + $0x10] sm:$0xff] }
 0x35e   : > { %v2333_v0 = vsel %vm2269_vm2, %v7373_v2, 0.0  ;;  %vm7381_vm11 = vcmp.ne.s32.totalorder %v5476_v22, %v5352_v49  ;;  %v7384_v5 = vld [vmem:[#allocation53_spill] sm:$0xff]  ;;  %vm7386_vm10 = vcmp.ne.s32.totalorder %v5491_v31, %v5352_v49  ;;  %v7390_v22 = vld [vmem:[#allocation12_spill] sm:$0xff]  ;;  %vm7392_vm1 = vcmp.ne.s32.totalorder %v5473_v19, %v5352_v49  ;;  %v7400_v2 = vld [vmem:[#allocation99_spill] sm:$0xff] }
 0x35f   : > { %2386 = vadd.xlane.f32.xlu0 %v2385_v28  ;;  %v7370_v28 = vld [vmem:[#allocation77_spill] sm:$0xff]  ;;  %v2409_v14 = vadd.f32 %v2334_v40, %v2333_v0  ;;  %vm5823_vm2 = vmand %vm7381_vm11, %vm7380_vm7  ;;  %vm7385_vm4 = vcmp.eq.s32.totalorder %v7384_v5, %v7311_v16  ;;  %vm7397_vm7 = vcmp.eq.s32.totalorder %v7379_v56, %v7315_v17  ;;  %vm2180_vm11 = vcmask 7168   ;;  %v7401_v8 = vld [vmem:[#allocation98_spill] sm:$0xff] }
 0x360   : > { %vm5833_vm5 = vmand %vm7386_vm10, %vm7385_vm4  ;;  %v7395_v43 = vld [vmem:[#allocation89_spill] sm:$0xff]  ;;  %v7403_v26 = vld [vmem:[#allocation94_spill] sm:$0xff]  ;;  %vm7405_vm4 = vcmp.eq.s32.totalorder %v7390_v22, %v7315_v17 }
 0x361   : > { %2392 = vadd.xlane.f32.xlu2 %v2391_v42  ;;  %2389 = vadd.xlane.f32.xlu1 %v2388_v57  ;;  %v2329_v42 = vsel %vm2265_vm3, %v7370_v28, 0.0  ;;  %v7371_v57 = vld [vmem:[#allocation78_spill] sm:$0xff]  ;;  %vm7378_vm3 = vcmp.eq.s32.totalorder %v7367_v62, %v7315_v17  ;;  %v2335_v31 = vsel %vm5823_vm2, %v7395_v43, 0.0  ;;  %v2339_v0 = vsel %vm5833_vm5, %v7400_v2, 0.0  ;;  %v1925_v56 = vld [vmem:[#allocation3 + $0x8] sm:$0xff]  ;;  %v1931_v43 = vld [vmem:[#allocation3 + $0x38] sm:$0xff] }
 0x362   : > { %v2330_v44 = vsel %vm7372_vm9, %v7371_v57, 0.0  ;;  %v2332_v33 = vsel %vm7378_vm3, %v7377_v46, 0.0  ;;  %vm7391_vm9 = vcmp.eq.s32.totalorder %v7390_v22, %v7311_v16  ;;  %v7396_v62 = vld [vmem:[#allocation90_spill] sm:$0xff]  ;;  %vm7402_vm2 = vcmp.eq.s32.totalorder %v7384_v5, %v7315_v17  ;;  %v7404_v46 = vld [vmem:[#allocation93_spill] sm:$0xff] }
 0x363   : > { %v2403_v10 = vadd.f32 %v2330_v44, %v2329_v42  ;;  %v2406_v15 = vadd.f32 %v2332_v33, %v2331_v41  ;;  %vm5844_vm3 = vmand %vm7392_vm1, %vm7391_vm9  ;;  %v2336_v28 = vsel %vm7397_vm7, %v7396_v62, 0.0  ;;  %v7398_v42 = vld [vmem:[#allocation117_spill] sm:$0xff]  ;;  %v7399_v44 = vld [vmem:[#allocation110_spill] sm:$0xff]  ;;  %v2340_v40 = vsel %vm7402_vm2, %v7401_v8, 0.0 }
 0x364   : > { %v1960_v57 = vmul.f32 %v7398_v42, %v1928_v12  ;;  %v1958_v19 = vmul.f32 %v7399_v44, %v1926_v58  ;;  %v2337_v41 = vsel %vm5844_vm3, %v7403_v26, 0.0  ;;  %v2338_v33 = vsel %vm7405_vm4, %v7404_v46, 0.0  ;;  %v1927_v22 = vld [vmem:[#allocation3 + $0x18] sm:$0xff]  ;;  %v7429_v26 = vld [vmem:[#allocation38_spill] sm:$0xff]  ;;  %v7430_v46 = vld [vmem:[#allocation31_spill] sm:$0xff] }
 0x365   : > { %v2418_v58 = vadd.f32 %v2340_v40, %v2339_v0  ;;  %v2415_v5 = vadd.f32 %v2338_v33, %v2337_v41  ;;  %vm7408_vm5 = vcmp.ne.s32.totalorder %v5509_v1, %v5506_v6  ;;  %vm7412_vm1 = vcmp.eq.s32.totalorder %v7411_v55, %v7315_v17  ;;  %v7416_v1 = vld [vmem:[#allocation106_spill] sm:$0xff]  ;;  %v7417_v62 = vld [vmem:[#allocation13_spill] sm:$0xff] }
 0x366   : > { %vm7413_vm3 = vcmp.ne.s32.totalorder %v5524_v48, %v5506_v6  ;;  %vm7418_vm2 = vcmp.eq.s32.totalorder %v7417_v62, %v7315_v17  ;;  %vm7419_vm4 = vcmp.ne.s32.totalorder %v5503_v23, %v5506_v6  ;;  %v7422_v48 = vld [vmem:[#allocation25_spill] sm:$0xff]  ;;  %v7426_v23 = vld [vmem:[#allocation114_spill] sm:$0xff] }
 0x367   : > { %2395 = vadd.xlane.f32.xlu0 %v2394_v36  ;;  %v7406_v36 = vld [vmem:[#allocation30_spill] sm:$0xff]  ;;  %vm5888_vm7 = vmand %vm7413_vm3, %vm7412_vm1  ;;  %v1959_v2 = vmul.f32 %v7426_v23, %v1927_v22  ;;  %v7427_v8 = vld [vmem:[#allocation37_spill] sm:$0xff]  ;;  %vm7428_vm1 = vcmp.eq.s32.totalorder %v7411_v55, %v7311_v16 }
 0x368   : > { %vm7407_vm10 = vcmp.eq.s32.totalorder %v7406_v36, %v7315_v17  ;;  %v2345_v40 = vsel %vm7428_vm1, %v7427_v8, 0.0  ;;  %v2346_v41 = vsel %vm5888_vm7, %v7429_v26, 0.0  ;;  %vm7435_vm7 = vcmp.ne.s32.totalorder %v5539_v54, %v5506_v6  ;;  %v1932_v55 = vld [vmem:[#allocation3 + $0x40] sm:$0xff]  ;;  %v1935_v22 = vld [vmem:[#allocation3 + $0x58] sm:$0xff] }
 0x369   : > { %2401 = vadd.xlane.f32.xlu2 %v2400_v50  ;;  %2398 = vadd.xlane.f32.xlu1 %v2397_v9  ;;  %v7389_v50 = vld [vmem:[#allocation102_spill] sm:$0xff]  ;;  %vm5878_vm9 = vmand %vm7408_vm5, %vm7407_vm10  ;;  %vm7423_vm5 = vcmp.eq.s32.totalorder %v7406_v36, %v7311_v16  ;;  %v2427_v36 = vadd.f32 %v2346_v41, %v2345_v40  ;;  %v7456_v40 = vld [vmem:[#allocation56_spill] sm:$0xff] }
 0x36a   : > { %v1956_v9 = vmul.f32 %v7389_v50, %v1924_v29  ;;  %v2412_v29 = vadd.f32 %v2336_v28, %v2335_v31  ;;  %v1957_v31 = vmul.f32 %v7416_v1, %v1925_v56  ;;  %vm5900_vm10 = vmand %vm7419_vm4, %vm7418_vm2  ;;  %v2341_v42 = vsel %vm7423_vm5, %v7422_v48, 0.0  ;;  %v7438_v1 = vld [vmem:[#allocation64_spill] sm:$0xff]  ;;  %v7443_v54 = vld [vmem:[#allocation130_spill] sm:$0xff] }
 0x36b   : > { %vm7439_vm4 = vcmp.eq.s32.totalorder %v7438_v1, %v7315_v17  ;;  %v7444_v28 = vld [vmem:[#allocation15_spill] sm:$0xff]  ;;  %v7457_v41 = vld [vmem:[#allocation49_spill] sm:$0xff] }
 0x36c   : > { %vm7445_vm1 = vcmp.eq.s32.totalorder %v7444_v28, %v7315_v17  ;;  %v7478_v48 = vld [vmem:[#allocation61_spill] sm:$0xff] }
 0x36f   : > { %2404 = vadd.xlane.f32.xlu0 %v2403_v10 }
 0x371   : > { %2410 = vadd.xlane.f32.xlu2 %v2409_v14  ;;  %2407 = vadd.xlane.f32.xlu1 %v2406_v15 }
 0x372   : > { %v2054_v49 = vpop.xlane.xlu0 %2053 }
 0x373   : > { %v2148_v10 = vadd.f32 %v2054_v49, %v1956_v9  ;;  %v1929_v9 = vld [vmem:[#allocation3 + $0x28] sm:$0xff] }
 0x374   : > { %v2066_v14 = vpop.xlane.xlu2 %2065  ;;  %v2060_v15 = vpop.xlane.xlu1 %2059 }
 0x375   : > { %2181 = vst.msk [vmem:[#allocation3] sm:$0xff] %vm2180_vm11, %v2148_v10  ;;  %v2152_v24 = vadd.f32 %v2066_v14, %v1960_v57  ;;  %v2150_v12 = vadd.f32 %v2060_v15, %v1958_v19  ;;  %v7424_v57 = vld [vmem:[#allocation26_spill] sm:$0xff]  ;;  %v7432_v10 = vld [vmem:[#allocation32_spill] sm:$0xff] }
 0x376   : > { %v2342_v44 = vsel %vm5878_vm9, %v7424_v57, 0.0  ;;  %v7425_v19 = vld [vmem:[#allocation126_spill] sm:$0xff]  ;;  %vm7431_vm9 = vcmp.eq.s32.totalorder %v7417_v62, %v7311_v16  ;;  %v7451_v57 = vld [vmem:[#allocation44_spill] sm:$0xff] }
 0x377   : > { %2413 = vadd.xlane.f32.xlu0 %v2412_v29  ;;  %2185 = vst.msk [vmem:[#allocation3 + $0x20] sm:$0xff] %vm2180_vm11, %v2152_v24  ;;  %v1961_v49 = vmul.f32 %v7425_v19, %v1929_v9  ;;  %v2343_v33 = vsel %vm7431_vm9, %v7430_v46, 0.0  ;;  %v2344_v29 = vsel %vm5900_vm10, %v7432_v10, 0.0  ;;  %v2421_v15 = vadd.f32 %v2342_v44, %v2341_v42  ;;  %v7433_v9 = vld [vmem:[#allocation36_spill] sm:$0xff]  ;;  %v7452_v19 = vld [vmem:[#allocation138_spill] sm:$0xff] }
 0x378   : > { %2183 = vst.msk [vmem:[#allocation3 + $0x10] sm:$0xff] %vm2180_vm11, %v2150_v12  ;;  %v1930_v12 = vld [vmem:[#allocation3 + $0x30] sm:$0xff]  ;;  %v2424_v50 = vadd.f32 %v2344_v29, %v2343_v33  ;;  %vm7434_vm3 = vcmp.eq.s32.totalorder %v7433_v9, %v7315_v17  ;;  %vm7440_vm10 = vcmp.ne.s32.totalorder %v5554_v63, %v5506_v6  ;;  %vm7446_vm9 = vcmp.ne.s32.totalorder %v5536_v39, %v5506_v6  ;;  %v7449_v63 = vld [vmem:[#allocation43_spill] sm:$0xff]  ;;  %v7453_v39 = vld [vmem:[#allocation134_spill] sm:$0xff] }
 0x379   : > { %2419 = vadd.xlane.f32.xlu2 %v2418_v58  ;;  %2416 = vadd.xlane.f32.xlu1 %v2415_v5  ;;  %vm5935_vm2 = vmand %vm7435_vm7, %vm7434_vm3  ;;  %v1962_v62 = vmul.f32 %v7443_v54, %v1930_v12  ;;  %vm7450_vm7 = vcmp.eq.s32.totalorder %v7433_v9, %v7311_v16  ;;  %v1963_v23 = vmul.f32 %v7453_v39, %v1931_v43  ;;  %v7459_v33 = vld [vmem:[#allocation50_spill] sm:$0xff]  ;;  %v7465_v43 = vld [vmem:[#allocation69_spill] sm:$0xff] }
 0x37a   : > { %v2057_v0 = vpop.xlane.xlu0 %2056  ;;  %vm5945_vm5 = vmand %vm7440_vm10, %vm7439_vm4  ;;  %v2347_v42 = vsel %vm7450_vm7, %v7449_v63, 0.0  ;;  %v2348_v44 = vsel %vm5935_vm2, %v7451_v57, 0.0  ;;  %vm7455_vm4 = vcmp.eq.s32.totalorder %v7438_v1, %v7311_v16  ;;  %vm7458_vm2 = vcmp.eq.s32.totalorder %v7444_v28, %v7311_v16  ;;  %v7471_v54 = vld [vmem:[#allocation17_spill] sm:$0xff] }
 0x37b   : > { %v2149_v14 = vadd.f32 %v2057_v0, %v1957_v31  ;;  %vm5957_vm3 = vmand %vm7446_vm9, %vm7445_vm1  ;;  %v7454_v0 = vld [vmem:[#allocation55_spill] sm:$0xff]  ;;  %v2352_v26 = vsel %vm5945_vm5, %v7456_v40, 0.0  ;;  %v2349_v46 = vsel %vm7458_vm2, %v7457_v41, 0.0  ;;  %vm7462_vm5 = vcmp.ne.s32.totalorder %v5569_v13, %v5506_v6  ;;  %v7470_v13 = vld [vmem:[#allocation142_spill] sm:$0xff] }
 0x37c   : > { %v2069_v56 = vpop.xlane.xlu2 %2068  ;;  %v2063_v24 = vpop.xlane.xlu1 %2062  ;;  %v2351_v8 = vsel %vm7455_vm4, %v7454_v0, 0.0  ;;  %v2350_v10 = vsel %vm5957_vm3, %v7459_v33, 0.0  ;;  %vm7466_vm9 = vcmp.eq.s32.totalorder %v7465_v43, %v7315_v17  ;;  %vm7467_vm3 = vcmp.ne.s32.totalorder %v5584_v35, %v5506_v6  ;;  %v7476_v35 = vld [vmem:[#allocation60_spill] sm:$0xff]  ;;  %v7484_v0 = vld [vmem:[#allocation65_spill] sm:$0xff]  ;;  %v7486_v40 = vld [vmem:[#allocation66_spill] sm:$0xff] }
 0x37d   : > { %2182 = vst.msk [vmem:[#allocation3 + $0x8] sm:$0xff] %vm2180_vm11, %v2149_v14  ;;  %v2153_v58 = vadd.f32 %v2069_v56, %v1961_v49  ;;  %v2151_v5 = vadd.f32 %v2063_v24, %v1959_v2  ;;  %v1964_v49 = vmul.f32 %v7452_v19, %v1932_v55  ;;  %v2430_v14 = vadd.f32 %v2348_v44, %v2347_v42  ;;  %v1933_v24 = vld [vmem:[#allocation3 + $0x48] sm:$0xff]  ;;  %v1934_v55 = vld [vmem:[#allocation3 + $0x50] sm:$0xff]  ;;  %vm6002_vm7 = vmand %vm7467_vm3, %vm7466_vm9 }
 0x37e   : > { %v1965_v31 = vmul.f32 %v7470_v13, %v1933_v24  ;;  %vm7472_vm4 = vcmp.eq.s32.totalorder %v7471_v54, %v7315_v17  ;;  %vm7473_vm2 = vcmp.ne.s32.totalorder %v5566_v51, %v5506_v6  ;;  %v7479_v42 = vld [vmem:[#allocation150_spill] sm:$0xff]  ;;  %vm7482_vm9 = vcmp.eq.s32.totalorder %v7465_v43, %v7311_v16  ;;  %v7505_v13 = vld [vmem:[#allocation76_spill] sm:$0xff] }
 0x37f   : > { %2422 = vadd.xlane.f32.xlu0 %v2421_v15  ;;  %2186 = vst.msk [vmem:[#allocation3 + $0x28] sm:$0xff] %vm2180_vm11, %v2153_v58  ;;  %v1967_v57 = vmul.f32 %v7479_v42, %v1935_v22  ;;  %v7480_v51 = vld [vmem:[#allocation146_spill] sm:$0xff]  ;;  %v7510_v42 = vld [vmem:[#allocation84_spill] sm:$0xff] }
 0x380   : > { %2184 = vst.msk [vmem:[#allocation3 + $0x18] sm:$0xff] %vm2180_vm11, %v2151_v5  ;;  %v2436_v5 = vadd.f32 %v2352_v26, %v2351_v8  ;;  %v1966_v44 = vmul.f32 %v7480_v51, %v1934_v55  ;;  %v7498_v55 = vld [vmem:[#allocation19_spill] sm:$0xff] }
 0x381   : > { %2428 = vadd.xlane.f32.xlu2 %v2427_v36  ;;  %2425 = vadd.xlane.f32.xlu1 %v2424_v50  ;;  %v2433_v36 = vadd.f32 %v2350_v10, %v2349_v46  ;;  %v7460_v50 = vld [vmem:[#allocation42_spill] sm:$0xff]  ;;  %v7511_v51 = vld [vmem:[#allocation79_spill] sm:$0xff] }
 0x382   : > { %v2072_v2 = vpop.xlane.xlu0 %2071  ;;  %vm7461_vm10 = vcmp.eq.s32.totalorder %v7460_v50, %v7315_v17 }
 0x383   : > { %v2154_v29 = vadd.f32 %v2072_v2, %v1962_v62  ;;  %vm5992_vm1 = vmand %vm7462_vm5, %vm7461_vm10  ;;  %vm7477_vm5 = vcmp.eq.s32.totalorder %v7460_v50, %v7311_v16  ;;  %v7492_v50 = vld [vmem:[#allocation74_spill] sm:$0xff] }
 0x384   : > { %v2078_v15 = vpop.xlane.xlu2 %2077  ;;  %v2075_v56 = vpop.xlane.xlu1 %2074  ;;  %vm6014_vm10 = vmand %vm7473_vm2, %vm7472_vm4  ;;  %v2353_v28 = vsel %vm7477_vm5, %v7476_v35, 0.0  ;;  %v2354_v63 = vsel %vm5992_vm1, %v7478_v48, 0.0  ;;  %vm7485_vm1 = vcmp.eq.s32.totalorder %v7471_v54, %v7311_v16  ;;  %vm7493_vm2 = vcmp.eq.s32.totalorder %v7492_v50, %v7315_v17  ;;  %v7506_v54 = vld [vmem:[#allocation161_spill] sm:$0xff]  ;;  %v7508_v48 = vld [vmem:[#allocation83_spill] sm:$0xff] }
 0x385   : > { %2187 = vst.msk [vmem:[#allocation3 + $0x30] sm:$0xff] %vm2180_vm11, %v2154_v29  ;;  %v2156_v12 = vadd.f32 %v2078_v15, %v1964_v49  ;;  %v2155_v58 = vadd.f32 %v2075_v56, %v1963_v23  ;;  %v7481_v49 = vld [vmem:[#allocation70_spill] sm:$0xff]  ;;  %v7483_v23 = vld [vmem:[#allocation71_spill] sm:$0xff]  ;;  %v2355_v8 = vsel %vm7485_vm1, %v7484_v0, 0.0  ;;  %v2356_v26 = vsel %vm6014_vm10, %v7486_v40, 0.0 }
 0x386   : > { %v2357_v39 = vsel %vm7482_vm9, %v7481_v49, 0.0  ;;  %v2358_v2 = vsel %vm6002_vm7, %v7483_v23, 0.0  ;;  %v2439_v46 = vadd.f32 %v2354_v63, %v2353_v28  ;;  %v1936_v29 = vld [vmem:[#allocation3 + $0x60] sm:$0xff]  ;;  %v2442_v24 = vadd.f32 %v2356_v26, %v2355_v8  ;;  %v1939_v8 = vld [vmem:[#allocation3 + $0x78] sm:$0xff] }
 0x387   : > { %2431 = vadd.xlane.f32.xlu0 %v2430_v14  ;;  %2189 = vst.msk [vmem:[#allocation3 + $0x40] sm:$0xff] %vm2180_vm11, %v2156_v12  ;;  %v2445_v56 = vadd.f32 %v2358_v2, %v2357_v39  ;;  %v7487_v12 = vld [vmem:[#allocation48_spill] sm:$0xff]  ;;  %vm7489_vm7 = vcmp.ne.s32.totalorder %v5599_v27, %v5506_v6  ;;  %vm7494_vm10 = vcmp.ne.s32.totalorder %v5614_v25, %v5506_v6  ;;  %v7497_v27 = vld [vmem:[#allocation154_spill] sm:$0xff]  ;;  %v7503_v25 = vld [vmem:[#allocation75_spill] sm:$0xff] }
 0x388   : > { %2188 = vst.msk [vmem:[#allocation3 + $0x38] sm:$0xff] %vm2180_vm11, %v2155_v58  ;;  %vm7488_vm3 = vcmp.eq.s32.totalorder %v7487_v12, %v7315_v17  ;;  %vm6059_vm5 = vmand %vm7494_vm10, %vm7493_vm2  ;;  %v1968_v22 = vmul.f32 %v7497_v27, %v1936_v29  ;;  %vm7499_vm9 = vcmp.eq.s32.totalorder %v7498_v55, %v7315_v17  ;;  %vm7500_vm1 = vcmp.ne.s32.totalorder %v5596_v34, %v5506_v6  ;;  %v7507_v34 = vld [vmem:[#allocation158_spill] sm:$0xff]  ;;  %v1941_v29 = vld [vmem:[#allocation3 + $0x88] sm:$0xff] }
 0x389   : > { %2437 = vadd.xlane.f32.xlu2 %v2436_v5  ;;  %2434 = vadd.xlane.f32.xlu1 %v2433_v36  ;;  %vm6049_vm4 = vmand %vm7489_vm7, %vm7488_vm3  ;;  %v1938_v5 = vld [vmem:[#allocation3 + $0x70] sm:$0xff]  ;;  %v1937_v36 = vld [vmem:[#allocation3 + $0x68] sm:$0xff]  ;;  %vm7504_vm7 = vcmp.eq.s32.totalorder %v7487_v12, %v7311_v16  ;;  %vm7509_vm2 = vcmp.eq.s32.totalorder %v7492_v50, %v7311_v16 }
 0x38a   : > { %v2081_v19 = vpop.xlane.xlu0 %2080  ;;  %vm6071_vm3 = vmand %vm7500_vm1, %vm7499_vm9  ;;  %v2359_v1 = vsel %vm7504_vm7, %v7503_v25, 0.0  ;;  %v1970_v62 = vmul.f32 %v7506_v54, %v1938_v5  ;;  %v1969_v35 = vmul.f32 %v7507_v34, %v1937_v36  ;;  %v2363_v63 = vsel %vm7509_vm2, %v7508_v48, 0.0  ;;  %v7530_v5 = vld [vmem:[#allocation88_spill] sm:$0xff]  ;;  %v7531_v50 = vld [vmem:[#allocation109_spill] sm:$0xff] }
 0x38b   : > { %v2157_v41 = vadd.f32 %v2081_v19, %v1965_v31  ;;  %v2360_v31 = vsel %vm6049_vm4, %v7505_v13, 0.0  ;;  %vm7512_vm4 = vcmp.eq.s32.totalorder %v7498_v55, %v7311_v16  ;;  %v7513_v19 = vld [vmem:[#allocation80_spill] sm:$0xff]  ;;  %vm7524_vm7 = vcmp.eq.s32.totalorder %v5338_v30, %v7315_v17  ;;  %v7533_v55 = vld [vmem:[#allocation95_spill] sm:$0xff]  ;;  %v7547_v12 = vld [vmem:[#allocation125_spill] sm:$0xff] }
 0x38c   : > { %v2087_v33 = vpop.xlane.xlu2 %2086  ;;  %v2084_v10 = vpop.xlane.xlu1 %2083  ;;  %v2362_v49 = vsel %vm6071_vm3, %v7513_v19, 0.0  ;;  %v2448_v23 = vadd.f32 %v2360_v31, %v2359_v1  ;;  %vm7525_vm2 = vcmp.ne.s32.totalorder %v5626_v61, %v5506_v6  ;;  %v1973_v9 = vmul.f32 %v7531_v50, %v1941_v29  ;;  %v7532_v61 = vld [vmem:[#allocation105_spill] sm:$0xff]  ;;  %v7535_v25 = vld [vmem:[#allocation96_spill] sm:$0xff]  ;;  %v7536_v13 = vld [vmem:[#allocation91_spill] sm:$0xff] }
 0x38d   : > { %2190 = vst.msk [vmem:[#allocation3 + $0x48] sm:$0xff] %vm2180_vm11, %v2157_v41  ;;  %v2159_v14 = vadd.f32 %v2087_v33, %v1967_v57  ;;  %v2158_v15 = vadd.f32 %v2084_v10, %v1966_v44  ;;  %v2364_v57 = vsel %vm6059_vm5, %v7510_v42, 0.0  ;;  %v2361_v44 = vsel %vm7512_vm4, %v7511_v51, 0.0  ;;  %v7514_v33 = vld [vmem:[#allocation54_spill] sm:$0xff]  ;;  %vm6128_vm4 = vmand %vm7525_vm2, %vm7524_vm7  ;;  %v7538_v54 = vld [vmem:[#allocation92_spill] sm:$0xff] }
 0x38e   : > { %v2454_v41 = vadd.f32 %v2364_v57, %v2363_v63  ;;  %vm7515_vm10 = vcmp.eq.s32.totalorder %v7514_v33, %v7315_v17  ;;  %vm7516_vm5 = vcmp.ne.s32.totalorder %v5629_v7, %v5506_v6  ;;  %v7523_v7 = vld [vmem:[#allocation163_spill] sm:$0xff]  ;;  %v1942_v63 = vld [vmem:[#allocation3 + $0x90] sm:$0xff]  ;;  %v7539_v19 = vld [vmem:[#allocation197_spill] sm:$0xff] }
 0x38f   : > { %2440 = vadd.xlane.f32.xlu0 %v2439_v46  ;;  %2192 = vst.msk [vmem:[#allocation3 + $0x58] sm:$0xff] %vm2180_vm11, %v2159_v14  ;;  %v2451_v46 = vadd.f32 %v2362_v49, %v2361_v44  ;;  %vm6106_vm9 = vmand %vm7516_vm5, %vm7515_vm10  ;;  %v1940_v14 = vld [vmem:[#allocation3 + $0x80] sm:$0xff]  ;;  %vm7537_vm5 = vcmp.eq.s32.totalorder %v5338_v30, %v7311_v16  ;;  %v7545_v6 = vld [vmem:[#allocation120_spill] sm:$0xff] }
 0x390   : > { %2191 = vst.msk [vmem:[#allocation3 + $0x50] sm:$0xff] %vm2180_vm11, %v2158_v15  ;;  %v7519_v15 = vld [vmem:[#allocation204_spill] sm:$0xff]  ;;  %v2366_v36 = vsel %vm6106_vm9, %v7530_v5, 0.0  ;;  %v1972_v27 = vmul.f32 %v7532_v61, %v1940_v14  ;;  %v2367_v31 = vsel %vm7537_vm5, %v7536_v13, 0.0  ;;  %vm7540_vm9 = vcmp.eq.s32.totalorder %v7539_v19, %v7315_v17  ;;  %v1944_v49 = vld [vmem:[#allocation3 + $0xa0] sm:$0xff]  ;;  %v1949_v13 = vld [vmem:[#allocation3 + $0xc8] sm:$0xff] }
 0x391   : > { %2446 = vadd.xlane.f32.xlu2 %v2445_v56  ;;  %2443 = vadd.xlane.f32.xlu1 %v2442_v24  ;;  %vm7520_vm1 = vcmp.eq.s32.totalorder %v7519_v15, %v7315_v17  ;;  %v1971_v24 = vmul.f32 %v7523_v7, %v1939_v8  ;;  %vm7534_vm10 = vcmp.eq.s32.totalorder %v7519_v15, %v7311_v16  ;;  %v1945_v15 = vld [vmem:[#allocation3 + $0xa8] sm:$0xff] }
 0x392   : > { %v2090_v28 = vpop.xlane.xlu0 %2089  ;;  %vm6116_vm3 = vmand %vm1921_vm6, %vm7520_vm1  ;;  %vm7529_vm6 = vcmp.eq.s32.totalorder %v7514_v33, %v7311_v16  ;;  %v2369_v43 = vsel %vm7534_vm10, %v7533_v55, 0.0  ;;  %v1976_v53 = vmul.f32 %v7545_v6, %v1944_v49  ;;  %v1948_v55 = vld [vmem:[#allocation3 + $0xc0] sm:$0xff]  ;;  %v1953_v49 = vld [vmem:[#allocation3 + $0xe8] sm:$0xff] }
 0x393   : > { %v2160_v39 = vadd.f32 %v2090_v28, %v1968_v22  ;;  %v2365_v58 = vsel %vm7529_vm6, %v7528_v3, 0.0  ;;  %v2370_v1 = vsel %vm6116_vm3, %v7535_v25, 0.0  ;;  %vm2308_vm1 = vmand %vm1923_vm12, %vm7540_vm9  ;;  %vm7543_vm3 = vcmp.eq.s32.totalorder %v7539_v19, %v7311_v16  ;;  %v1947_v16 = vld [vmem:[#allocation3 + $0xb8] sm:$0xff] }
 0x394   : > { %v2096_v2 = vpop.xlane.xlu2 %2095  ;;  %v2093_v0 = vpop.xlane.xlu1 %2092  ;;  %v2463_v51 = vadd.f32 %v2370_v1, %v2369_v43  ;;  %v1977_v3 = vmul.f32 %v7547_v12, %v1945_v15  ;;  %v1950_v1 = vld [vmem:[#allocation3 + $0xd0] sm:$0xff] }
 0x395   : > { %2193 = vst.msk [vmem:[#allocation3 + $0x60] sm:$0xff] %vm2180_vm11, %v2160_v39  ;;  %v2162_v40 = vadd.f32 %v2096_v2, %v1970_v62  ;;  %v2161_v26 = vadd.f32 %v2093_v0, %v1969_v35  ;;  %v2368_v62 = vsel %vm6128_vm4, %v7538_v54, 0.0  ;;  %v2457_v35 = vadd.f32 %v2366_v36, %v2365_v58  ;;  %v1943_v39 = vld [vmem:[#allocation3 + $0x98] sm:$0xff]  ;;  %v7542_v0 = vld [vmem:[#allocation123_spill] sm:$0xff] }
 0x396   : > { %v2460_v44 = vadd.f32 %v2368_v62, %v2367_v31  ;;  %v2371_v8 = vsel %vm7543_vm3, %v7542_v0, 0.0  ;;  %v7548_v58 = vld [vmem:[#allocation133_spill] sm:$0xff] }
 0x397   : > { %2449 = vadd.xlane.f32.xlu0 %v2448_v23  ;;  %2195 = vst.msk [vmem:[#allocation3 + $0x70] sm:$0xff] %vm2180_vm11, %v2162_v40  ;;  %v7541_v23 = vld [vmem:[#allocation113_spill] sm:$0xff]  ;;  %v7544_v40 = vld [vmem:[#allocation124_spill] sm:$0xff]  ;;  %v1979_v5 = vmul.f32 %v7548_v58, %v1947_v16 }
 0x398   : > { %2194 = vst.msk [vmem:[#allocation3 + $0x68] sm:$0xff] %vm2180_vm11, %v2161_v26  ;;  %v1974_v2 = vmul.f32 %v7541_v23, %v1942_v63  ;;  %v2372_v17 = vsel %vm2308_vm1, %v7544_v40, 0.0  ;;  %v7546_v26 = vld [vmem:[#allocation116_spill] sm:$0xff]  ;;  %v7549_v36 = vld [vmem:[#allocation129_spill] sm:$0xff] }
 0x399   : > { %2455 = vadd.xlane.f32.xlu2 %v2454_v41  ;;  %2452 = vadd.xlane.f32.xlu1 %v2451_v46  ;;  %v1975_v41 = vmul.f32 %v7546_v26, %v1943_v39  ;;  %v2466_v10 = vadd.f32 %v2372_v17, %v2371_v8  ;;  %v7550_v31 = vld [vmem:[#allocation137_spill] sm:$0xff]  ;;  %v1952_v39 = vld [vmem:[#allocation3 + $0xe0] sm:$0xff] }
 0x39a   : > { %v2099_v22 = vpop.xlane.xlu0 %2098  ;;  %v1980_v54 = vmul.f32 %v7550_v31, %v1948_v55  ;;  %v7551_v62 = vld [vmem:[#allocation145_spill] sm:$0xff] }
 0x39b   : > { %v2163_v34 = vadd.f32 %v2099_v22, %v1971_v24  ;;  %v1946_v24 = vld [vmem:[#allocation3 + $0xb0] sm:$0xff]  ;;  %v7553_v23 = vld [vmem:[#allocation149_spill] sm:$0xff] }
 0x39c   : > { %v2105_v28 = vpop.xlane.xlu2 %2104  ;;  %v2102_v48 = vpop.xlane.xlu1 %2101  ;;  %v1978_v50 = vmul.f32 %v7549_v36, %v1946_v24  ;;  %v7554_v0 = vld [vmem:[#allocation157_spill] sm:$0xff]  ;;  %v2213_v24 = vld [vmem:[#allocation4] sm:$0xff] }
 0x39d   : > { %2196 = vst.msk [vmem:[#allocation3 + $0x78] sm:$0xff] %vm2180_vm11, %v2163_v34  ;;  %v2165_v42 = vadd.f32 %v2105_v28, %v1973_v9  ;;  %v2164_v57 = vadd.f32 %v2102_v48, %v1972_v27  ;;  %v1982_v34 = vmul.f32 %v7551_v62, %v1950_v1  ;;  %v1985_v8 = vmul.f32 %v7554_v0, %v1953_v49  ;;  %v7555_v40 = vld [vmem:[#allocation153_spill] sm:$0xff]  ;;  %v2218_v62 = vld [vmem:[#allocation4 + $0x28] sm:$0xff]  ;;  %v2223_v0 = vld [vmem:[#allocation4 + $0x50] sm:$0xff] }
 0x39e   : > { %v1984_v17 = vmul.f32 %v7555_v40, %v1952_v39  ;;  %v2225_v40 = vld [vmem:[#allocation4 + $0x60] sm:$0xff] }
 0x39f   : > { %2458 = vadd.xlane.f32.xlu0 %v2457_v35  ;;  %2198 = vst.msk [vmem:[#allocation3 + $0x88] sm:$0xff] %vm2180_vm11, %v2165_v42  ;;  %v7552_v35 = vld [vmem:[#allocation141_spill] sm:$0xff] }
 0x3a0   : > { %2197 = vst.msk [vmem:[#allocation3 + $0x80] sm:$0xff] %vm2180_vm11, %v2164_v57  ;;  %v1981_v28 = vmul.f32 %v7552_v35, %v1949_v13  ;;  %v2217_v13 = vld [vmem:[#allocation4 + $0x20] sm:$0xff] }
 0x3a1   : > { %2464 = vadd.xlane.f32.xlu2 %v2463_v51  ;;  %2461 = vadd.xlane.f32.xlu1 %v2460_v44  ;;  %v1951_v51 = vld [vmem:[#allocation3 + $0xd8] sm:$0xff] }
 0x3a2   : > { %v2108_v46 = vpop.xlane.xlu0 %2107 }
 0x3a3   : > { %v2166_v33 = vadd.f32 %v2108_v46, %v1974_v2  ;;  %v1983_v2 = vmul.f32 %v7553_v23, %v1951_v51  ;;  %v1954_v46 = vld [vmem:[#allocation3 + $0xf0] sm:$0xff]  ;;  %v2222_v51 = vld [vmem:[#allocation4 + $0x48] sm:$0xff] }
 0x3a4   : > { %v2114_v29 = vpop.xlane.xlu2 %2113  ;;  %v2111_v14 = vpop.xlane.xlu1 %2110 }
 0x3a5   : > { %2199 = vst.msk [vmem:[#allocation3 + $0x90] sm:$0xff] %vm2180_vm11, %v2166_v33  ;;  %v2168_v56 = vadd.f32 %v2114_v29, %v1976_v53  ;;  %v2167_v7 = vadd.f32 %v2111_v14, %v1975_v41  ;;  %v1955_v29 = vld [vmem:[#allocation3 + $0xf8] sm:$0xff]  ;;  %v7556_v14 = vld [vmem:[#allocation160_spill] sm:$0xff] }
 0x3a6   : > { %v1986_v15 = vmul.f32 %v7556_v14, %v1954_v46  ;;  %v2227_v14 = vld [vmem:[#allocation4 + $0x70] sm:$0xff] }
 0x3a7   : > { %2467 = vadd.xlane.f32.xlu0 %v2466_v10  ;;  %2201 = vst.msk [vmem:[#allocation3 + $0xa0] sm:$0xff] %vm2180_vm11, %v2168_v56  ;;  %v7557_v56 = vld [vmem:[#allocation181_spill] sm:$0xff] }
 0x3a8   : > { %2200 = vst.msk [vmem:[#allocation3 + $0x98] sm:$0xff] %vm2180_vm11, %v2167_v7  ;;  %v1987_v7 = vmul.f32 %v7557_v56, %v1955_v29  ;;  %v2228_v29 = vld [vmem:[#allocation4 + $0x78] sm:$0xff] }
 0x3aa   : > { %v2117_v9 = vpop.xlane.xlu0 %2116 }
 0x3ab   : > { %v2169_v61 = vadd.f32 %v2117_v9, %v1977_v3 }
 0x3ac   : > { %v2123_v27 = vpop.xlane.xlu2 %2122  ;;  %v2120_v22 = vpop.xlane.xlu1 %2119 }
 0x3ad   : > { %2202 = vst.msk [vmem:[#allocation3 + $0xa8] sm:$0xff] %vm2180_vm11, %v2169_v61  ;;  %v2171_v43 = vadd.f32 %v2123_v27, %v1979_v5  ;;  %v2170_v25 = vadd.f32 %v2120_v22, %v1978_v50  ;;  %v2214_v50 = vld [vmem:[#allocation4 + $0x8] sm:$0xff]  ;;  %v2216_v61 = vld [vmem:[#allocation4 + $0x18] sm:$0xff]  ;;  %v2215_v27 = vld [vmem:[#allocation4 + $0x10] sm:$0xff] }
 0x3af   : > { %2204 = vst.msk [vmem:[#allocation3 + $0xb8] sm:$0xff] %vm2180_vm11, %v2171_v43 }
 0x3b0   : > { %2203 = vst.msk [vmem:[#allocation3 + $0xb0] sm:$0xff] %vm2180_vm11, %v2170_v25 }
 0x3b2   : > { %v2126_v48 = vpop.xlane.xlu0 %2125 }
 0x3b3   : > { %v2172_v63 = vadd.f32 %v2126_v48, %v1980_v54  ;;  %v2219_v54 = vld [vmem:[#allocation4 + $0x30] sm:$0xff] }
 0x3b4   : > { %v2132_v42 = vpop.xlane.xlu2 %2131  ;;  %v2129_v57 = vpop.xlane.xlu1 %2128 }
 0x3b5   : > { %2205 = vst.msk [vmem:[#allocation3 + $0xc0] sm:$0xff] %vm2180_vm11, %v2172_v63  ;;  %v2174_v44 = vadd.f32 %v2132_v42, %v1982_v34  ;;  %v2173_v19 = vadd.f32 %v2129_v57, %v1981_v28  ;;  %v2220_v42 = vld [vmem:[#allocation4 + $0x38] sm:$0xff] }
 0x3b7   : > { %2207 = vst.msk [vmem:[#allocation3 + $0xd0] sm:$0xff] %vm2180_vm11, %v2174_v44  ;;  %v2221_v44 = vld [vmem:[#allocation4 + $0x40] sm:$0xff] }
 0x3b8   : > { %2206 = vst.msk [vmem:[#allocation3 + $0xc8] sm:$0xff] %vm2180_vm11, %v2173_v19 }
 0x3ba   : > { %v2135_v6 = vpop.xlane.xlu0 %2134 }
 0x3bb   : > { %v2175_v53 = vadd.f32 %v2135_v6, %v1983_v2 }
 0x3bc   : > { %v2141_v26 = vpop.xlane.xlu2 %2140  ;;  %v2138_v41 = vpop.xlane.xlu1 %2137 }
 0x3bd   : > { %2208 = vst.msk [vmem:[#allocation3 + $0xd8] sm:$0xff] %vm2180_vm11, %v2175_v53  ;;  %v2177_v33 = vadd.f32 %v2141_v26, %v1985_v8  ;;  %v2176_v10 = vadd.f32 %v2138_v41, %v1984_v17  ;;  %v2224_v17 = vld [vmem:[#allocation4 + $0x58] sm:$0xff] }
 0x3bf   : > { %2210 = vst.msk [vmem:[#allocation3 + $0xe8] sm:$0xff] %vm2180_vm11, %v2177_v33  ;;  %v2226_v33 = vld [vmem:[#allocation4 + $0x68] sm:$0xff] }
 0x3c0   : > { %2209 = vst.msk [vmem:[#allocation3 + $0xe0] sm:$0xff] %vm2180_vm11, %v2176_v10 }
 0x3c2   : > { %v2144_v16 = vpop.xlane.xlu0 %2143 }
 0x3c3   : > { %v2178_v12 = vadd.f32 %v2144_v16, %v1986_v15 }
 0x3c4   : > { %v2375_v3 = vpop.xlane.xlu2 %2374  ;;  %v2147_v58 = vpop.xlane.xlu1 %2146 }
 0x3c5   : > { %2211 = vst.msk [vmem:[#allocation3 + $0xf0] sm:$0xff] %vm2180_vm11, %v2178_v12  ;;  %v2469_v5 = vadd.f32 %v2375_v3, %v2213_v24  ;;  %v2179_v36 = vadd.f32 %v2147_v58, %v1987_v7  ;;  %v2229_v12 = vld [vmem:[#allocation4 + $0x80] sm:$0xff]  ;;  %v2231_v58 = vld [vmem:[#allocation4 + $0x90] sm:$0xff] }
 0x3c7   : > { %2501 = vst.msk [vmem:[#allocation4] sm:$0xff] %vm2180_vm11, %v2469_v5  ;;  %v2230_v5 = vld [vmem:[#allocation4 + $0x88] sm:$0xff] }
 0x3c8   : > { %2212 = vst.msk [vmem:[#allocation3 + $0xf8] sm:$0xff] %vm2180_vm11, %v2179_v36 }
 0x3ca   : > { %v2378_v9 = vpop.xlane.xlu0 %2377 }
 0x3cb   : > { %v2470_v22 = vadd.f32 %v2378_v9, %v2214_v50 }
 0x3cc   : > { %v2384_v55 = vpop.xlane.xlu2 %2383  ;;  %v2381_v43 = vpop.xlane.xlu1 %2380 }
 0x3cd   : > { %2502 = vst.msk [vmem:[#allocation4 + $0x8] sm:$0xff] %vm2180_vm11, %v2470_v22  ;;  %v2472_v25 = vadd.f32 %v2384_v55, %v2216_v61  ;;  %v2471_v1 = vadd.f32 %v2381_v43, %v2215_v27  ;;  %v2232_v22 = vld [vmem:[#allocation4 + $0x98] sm:$0xff]  ;;  %v2234_v43 = vld [vmem:[#allocation4 + $0xa8] sm:$0xff] }
 0x3cf   : > { %2504 = vst.msk [vmem:[#allocation4 + $0x18] sm:$0xff] %vm2180_vm11, %v2472_v25  ;;  %v2233_v25 = vld [vmem:[#allocation4 + $0xa0] sm:$0xff] }
 0x3d0   : > { %2503 = vst.msk [vmem:[#allocation4 + $0x10] sm:$0xff] %vm2180_vm11, %v2471_v1 }
 0x3d2   : > { %v2387_v31 = vpop.xlane.xlu0 %2386 }
 0x3d3   : > { %v2473_v34 = vadd.f32 %v2387_v31, %v2217_v13 }
 0x3d4   : > { %v2393_v35 = vpop.xlane.xlu2 %2392  ;;  %v2390_v28 = vpop.xlane.xlu1 %2389 }
 0x3d5   : > { %2505 = vst.msk [vmem:[#allocation4 + $0x20] sm:$0xff] %vm2180_vm11, %v2473_v34  ;;  %v2475_v48 = vadd.f32 %v2393_v35, %v2219_v54  ;;  %v2474_v63 = vadd.f32 %v2390_v28, %v2218_v62  ;;  %v2235_v34 = vld [vmem:[#allocation4 + $0xb0] sm:$0xff]  ;;  %v2237_v28 = vld [vmem:[#allocation4 + $0xc0] sm:$0xff] }
 0x3d7   : > { %2507 = vst.msk [vmem:[#allocation4 + $0x30] sm:$0xff] %vm2180_vm11, %v2475_v48  ;;  %v2236_v48 = vld [vmem:[#allocation4 + $0xb8] sm:$0xff] }
 0x3d8   : > { %2506 = vst.msk [vmem:[#allocation4 + $0x28] sm:$0xff] %vm2180_vm11, %v2474_v63 }
 0x3da   : > { %v2396_v57 = vpop.xlane.xlu0 %2395 }
 0x3db   : > { %v2476_v19 = vadd.f32 %v2396_v57, %v2220_v42 }
 0x3dc   : > { %v2402_v49 = vpop.xlane.xlu2 %2401  ;;  %v2399_v39 = vpop.xlane.xlu1 %2398 }
 0x3dd   : > { %2508 = vst.msk [vmem:[#allocation4 + $0x38] sm:$0xff] %vm2180_vm11, %v2476_v19  ;;  %v2478_v23 = vadd.f32 %v2402_v49, %v2222_v51  ;;  %v2477_v2 = vadd.f32 %v2399_v39, %v2221_v44  ;;  %v2238_v19 = vld [vmem:[#allocation4 + $0xc8] sm:$0xff]  ;;  %v2240_v39 = vld [vmem:[#allocation4 + $0xd8] sm:$0xff] }
 0x3df   : > { %2510 = vst.msk [vmem:[#allocation4 + $0x48] sm:$0xff] %vm2180_vm11, %v2478_v23  ;;  %v2239_v23 = vld [vmem:[#allocation4 + $0xd0] sm:$0xff] }
 0x3e0   : > { %2509 = vst.msk [vmem:[#allocation4 + $0x40] sm:$0xff] %vm2180_vm11, %v2477_v2 }
 0x3e2   : > { %v2405_v8 = vpop.xlane.xlu0 %2404 }
 0x3e3   : > { %v2479_v6 = vadd.f32 %v2405_v8, %v2223_v0 }
 0x3e4   : > { %v2411_v53 = vpop.xlane.xlu2 %2410  ;;  %v2408_v26 = vpop.xlane.xlu1 %2407 }
 0x3e5   : > { %2511 = vst.msk [vmem:[#allocation4 + $0x50] sm:$0xff] %vm2180_vm11, %v2479_v6  ;;  %v2481_v41 = vadd.f32 %v2411_v53, %v2225_v40  ;;  %v2480_v46 = vadd.f32 %v2408_v26, %v2224_v17  ;;  %v2241_v6 = vld [vmem:[#allocation4 + $0xe0] sm:$0xff]  ;;  %v2243_v26 = vld [vmem:[#allocation4 + $0xf0] sm:$0xff] }
 0x3e7   : > { %2513 = vst.msk [vmem:[#allocation4 + $0x60] sm:$0xff] %vm2180_vm11, %v2481_v41  ;;  %v2242_v41 = vld [vmem:[#allocation4 + $0xe8] sm:$0xff] }
 0x3e8   : > { %2512 = vst.msk [vmem:[#allocation4 + $0x58] sm:$0xff] %vm2180_vm11, %v2480_v46 }
 0x3ea   : > { %v2414_v10 = vpop.xlane.xlu0 %2413 }
 0x3eb   : > { %v2482_v15 = vadd.f32 %v2414_v10, %v2226_v33 }
 0x3ec   : > { %v2420_v56 = vpop.xlane.xlu2 %2419  ;;  %v2417_v7 = vpop.xlane.xlu1 %2416 }
 0x3ed   : > { %2514 = vst.msk [vmem:[#allocation4 + $0x68] sm:$0xff] %vm2180_vm11, %v2482_v15  ;;  %v2484_v16 = vadd.f32 %v2420_v56, %v2228_v29  ;;  %v2483_v24 = vadd.f32 %v2417_v7, %v2227_v14  ;;  %v2244_v15 = vld [vmem:[#allocation4 + $0xf8] sm:$0xff] }
 0x3ef   : > { %2516 = vst.msk [vmem:[#allocation4 + $0x78] sm:$0xff] %vm2180_vm11, %v2484_v16 }
 0x3f0   : > { %2515 = vst.msk [vmem:[#allocation4 + $0x70] sm:$0xff] %vm2180_vm11, %v2483_v24 }
 0x3f2   : > { %v2423_v3 = vpop.xlane.xlu0 %2422 }
 0x3f3   : > { %v2485_v36 = vadd.f32 %v2423_v3, %v2229_v12 }
 0x3f4   : > { %v2429_v50 = vpop.xlane.xlu2 %2428  ;;  %v2426_v9 = vpop.xlane.xlu1 %2425 }
 0x3f5   : > { %2517 = vst.msk [vmem:[#allocation4 + $0x80] sm:$0xff] %vm2180_vm11, %v2485_v36  ;;  %v2487_v61 = vadd.f32 %v2429_v50, %v2231_v58  ;;  %v2486_v27 = vadd.f32 %v2426_v9, %v2230_v5 }
 0x3f7   : > { %2519 = vst.msk [vmem:[#allocation4 + $0x90] sm:$0xff] %vm2180_vm11, %v2487_v61 }
 0x3f8   : > { %2518 = vst.msk [vmem:[#allocation4 + $0x88] sm:$0xff] %vm2180_vm11, %v2486_v27 }
 0x3fa   : > { %v2432_v55 = vpop.xlane.xlu0 %2431 }
 0x3fb   : > { %v2488_v1 = vadd.f32 %v2432_v55, %v2232_v22 }
 0x3fc   : > { %v2438_v13 = vpop.xlane.xlu2 %2437  ;;  %v2435_v31 = vpop.xlane.xlu1 %2434 }
 0x3fd   : > { %2520 = vst.msk [vmem:[#allocation4 + $0x98] sm:$0xff] %vm2180_vm11, %v2488_v1  ;;  %v2490_v54 = vadd.f32 %v2438_v13, %v2234_v43  ;;  %v2489_v62 = vadd.f32 %v2435_v31, %v2233_v25 }
 0x3ff   : > { %2522 = vst.msk [vmem:[#allocation4 + $0xa8] sm:$0xff] %vm2180_vm11, %v2490_v54 }
 0x400   : > { %2521 = vst.msk [vmem:[#allocation4 + $0xa0] sm:$0xff] %vm2180_vm11, %v2489_v62 }
 0x402   : > { %v2441_v35 = vpop.xlane.xlu0 %2440 }
 0x403   : > { %v2491_v63 = vadd.f32 %v2441_v35, %v2235_v34 }
 0x404   : > { %v2447_v42 = vpop.xlane.xlu2 %2446  ;;  %v2444_v57 = vpop.xlane.xlu1 %2443 }
 0x405   : > { %2523 = vst.msk [vmem:[#allocation4 + $0xb0] sm:$0xff] %vm2180_vm11, %v2491_v63  ;;  %v2493_v51 = vadd.f32 %v2447_v42, %v2237_v28  ;;  %v2492_v44 = vadd.f32 %v2444_v57, %v2236_v48 }
 0x407   : > { %2525 = vst.msk [vmem:[#allocation4 + $0xc0] sm:$0xff] %vm2180_vm11, %v2493_v51 }
 0x408   : > { %2524 = vst.msk [vmem:[#allocation4 + $0xb8] sm:$0xff] %vm2180_vm11, %v2492_v44 }
 0x40a   : > { %v2450_v49 = vpop.xlane.xlu0 %2449 }
 0x40b   : > { %v2494_v2 = vadd.f32 %v2450_v49, %v2238_v19 }
 0x40c   : > { %v2456_v0 = vpop.xlane.xlu2 %2455  ;;  %v2453_v8 = vpop.xlane.xlu1 %2452 }
 0x40d   : > { %2526 = vst.msk [vmem:[#allocation4 + $0xc8] sm:$0xff] %vm2180_vm11, %v2494_v2  ;;  %v2496_v40 = vadd.f32 %v2456_v0, %v2240_v39  ;;  %v2495_v17 = vadd.f32 %v2453_v8, %v2239_v23 }
 0x40f   : > { %2528 = vst.msk [vmem:[#allocation4 + $0xd8] sm:$0xff] %vm2180_vm11, %v2496_v40 }
 0x410   : > { %2527 = vst.msk [vmem:[#allocation4 + $0xd0] sm:$0xff] %vm2180_vm11, %v2495_v17 }
 0x412   : > { %v2459_v53 = vpop.xlane.xlu0 %2458 }
 0x413   : > { %v2497_v46 = vadd.f32 %v2459_v53, %v2241_v6 }
 0x414   : > { %v2465_v33 = vpop.xlane.xlu2 %2464  ;;  %v2462_v10 = vpop.xlane.xlu1 %2461 }
 0x415   : > { %2529 = vst.msk [vmem:[#allocation4 + $0xe0] sm:$0xff] %vm2180_vm11, %v2497_v46  ;;  %v2499_v29 = vadd.f32 %v2465_v33, %v2243_v26  ;;  %v2498_v14 = vadd.f32 %v2462_v10, %v2242_v41 }
 0x417   : > { %2531 = vst.msk [vmem:[#allocation4 + $0xf0] sm:$0xff] %vm2180_vm11, %v2499_v29 }
 0x418   : > { %2530 = vst.msk [vmem:[#allocation4 + $0xe8] sm:$0xff] %vm2180_vm11, %v2498_v14 }
 0x41a   : > { %v2468_v56 = vpop.xlane.xlu0 %2467 }
 0x41b   : > { %v2500_v7 = vadd.f32 %v2468_v56, %v2244_v15 }
 0x41d   : > { %2532 = vst.msk [vmem:[#allocation4 + $0xf8] sm:$0xff] %vm2180_vm11, %v2500_v7 }
 0x41e PF: > { %p3672_p11 = scmp.eq.s32.totalorder %s4228_s19, %s4224_s18 }
 0x420   : > { %2536 = sbr.rel (%p3672_p11) target bundleno = 1351 (0x547), region = 52 }
 0x425   : > { %v7558_v16 = vld [vmem:[#allocation162_spill] sm:$0xff]  ;;  %v2613_v12 = vadd.f32 %v5169_v59, %v5167_v18  ;;  %v7559_v3 = vld [vmem:[#allocation189_spill] sm:$0xff]  ;;  %v2616_v9 = vadd.f32 %v5278_v60, %v5272_v21  ;;  %v7562_v61 = vld [vmem:[#allocation168_spill] sm:$0xff]  ;;  %v2625_v59 = vadd.f32 %v5222_v38, %v5220_v20  ;;  %v2634_v60 = vadd.f32 %v5266_v52, %v5264_v45 }
 0x426   : > { %v2601_v24 = vadd.f32 %v7558_v16, %v5133_v4  ;;  %v7560_v58 = vld [vmem:[#allocation190_spill] sm:$0xff]  ;;  %v7563_v27 = vld [vmem:[#allocation169_spill] sm:$0xff]  ;;  %v7568_v1 = vld [vmem:[#allocation211_spill] sm:$0xff] }
 0x427   : > { %v2607_v5 = vadd.f32 %v7560_v58, %v7559_v3  ;;  %2614 = vadd.xlane.f32.xlu2 %v2613_v12  ;;  %v7561_v36 = vld [vmem:[#allocation170_spill] sm:$0xff]  ;;  %v2610_v22 = vadd.f32 %v7563_v27, %v7562_v61  ;;  %v7564_v4 = vld [vmem:[#allocation177_spill] sm:$0xff]  ;;  %v7569_v13 = vld [vmem:[#allocation212_spill] sm:$0xff] }
 0x428   : > { %2602 = vadd.xlane.f32.xlu0 %v2601_v24  ;;  %v2604_v50 = vadd.f32 %v5163_v47, %v7561_v36  ;;  %v2619_v18 = vadd.f32 %v5191_v32, %v7564_v4  ;;  %v7565_v55 = vld [vmem:[#allocation205_spill] sm:$0xff]  ;;  %v7566_v43 = vld [vmem:[#allocation206_spill] sm:$0xff]  ;;  %v7567_v47 = vld [vmem:[#allocation184_spill] sm:$0xff]  ;;  %v2631_v31 = vadd.f32 %v7569_v13, %v7568_v1 }
 0x429   : > { %2608 = vadd.xlane.f32.xlu1 %v2607_v5  ;;  %v2622_v25 = vadd.f32 %v7566_v43, %v7565_v55  ;;  %v2628_v21 = vadd.f32 %v5218_v37, %v7567_v47  ;;  %v7570_v32 = vld [vmem:[#allocation187_spill] sm:$0xff]  ;;  %v7571_v38 = vld [vmem:[#allocation188_spill] sm:$0xff]  ;;  %v7576_v37 = vld [vmem:[#allocation198_spill] sm:$0xff] }
 0x42a   : > { %v2637_v20 = vadd.f32 %v7571_v38, %v7570_v32  ;;  %v7572_v54 = vld [vmem:[#allocation207_spill] sm:$0xff]  ;;  %v7573_v62 = vld [vmem:[#allocation208_spill] sm:$0xff]  ;;  %v7581_v44 = vld [vmem:[#allocation165_spill] sm:$0xff] }
 0x42b   : > { %v2643_v34 = vadd.f32 %v7573_v62, %v7572_v54  ;;  %v7574_v35 = vld [vmem:[#allocation215_spill] sm:$0xff]  ;;  %v7575_v28 = vld [vmem:[#allocation216_spill] sm:$0xff]  ;;  %v7582_v49 = vld [vmem:[#allocation166_spill] sm:$0xff] }
 0x42c   : > { %v2640_v48 = vadd.f32 %v7575_v28, %v7574_v35  ;;  %v7577_v45 = vld [vmem:[#allocation199_spill] sm:$0xff]  ;;  %v7579_v42 = vld [vmem:[#allocation172_spill] sm:$0xff]  ;;  %v7586_v40 = vld [vmem:[#allocation193_spill] sm:$0xff] }
 0x42d   : > { %v2646_v52 = vadd.f32 %v7577_v45, %v7576_v37  ;;  %v7578_v63 = vld [vmem:[#allocation171_spill] sm:$0xff]  ;;  %v7580_v51 = vld [vmem:[#allocation164_spill] sm:$0xff]  ;;  %v7587_v17 = vld [vmem:[#allocation194_spill] sm:$0xff] }
 0x42e   : > { %v2652_v57 = vadd.f32 %v7579_v42, %v7578_v63  ;;  %v2649_v19 = vadd.f32 %v7581_v44, %v7580_v51  ;;  %v7583_v39 = vld [vmem:[#allocation167_spill] sm:$0xff]  ;;  %v7585_v0 = vld [vmem:[#allocation176_spill] sm:$0xff]  ;;  %v2658_v6 = vadd.f32 %v7587_v17, %v7586_v40  ;;  %v7588_v53 = vld [vmem:[#allocation173_spill] sm:$0xff] }
 0x42f   : > { %2617 = vadd.xlane.f32.xlu2 %v2616_v9  ;;  %v2655_v23 = vadd.f32 %v7583_v39, %v7582_v49  ;;  %v7584_v2 = vld [vmem:[#allocation175_spill] sm:$0xff]  ;;  %v7589_v26 = vld [vmem:[#allocation174_spill] sm:$0xff]  ;;  %v7592_v29 = vld [vmem:[#allocation200_spill] sm:$0xff] }
 0x430   : > { %2605 = vadd.xlane.f32.xlu0 %v2604_v50  ;;  %v2661_v8 = vadd.f32 %v7585_v0, %v7584_v2  ;;  %v2664_v41 = vadd.f32 %v7589_v26, %v7588_v53  ;;  %v7590_v46 = vld [vmem:[#allocation182_spill] sm:$0xff]  ;;  %v7591_v33 = vld [vmem:[#allocation183_spill] sm:$0xff]  ;;  %v7593_v14 = vld [vmem:[#allocation201_spill] sm:$0xff] }
 0x431   : > { %2611 = vadd.xlane.f32.xlu1 %v2610_v22  ;;  %v2670_v10 = vadd.f32 %v7591_v33, %v7590_v46  ;;  %v2667_v15 = vadd.f32 %v7593_v14, %v7592_v29  ;;  %v7594_v56 = vld [vmem:[#allocation179_spill] sm:$0xff]  ;;  %v7595_v7 = vld [vmem:[#allocation180_spill] sm:$0xff]  ;;  %v7598_v58 = vld [vmem:[#allocation209_spill] sm:$0xff] }
 0x432   : > { %v2673_v16 = vadd.f32 %v7595_v7, %v7594_v56  ;;  %v7596_v24 = vld [vmem:[#allocation191_spill] sm:$0xff]  ;;  %v7597_v12 = vld [vmem:[#allocation192_spill] sm:$0xff]  ;;  %v7599_v5 = vld [vmem:[#allocation210_spill] sm:$0xff] }
 0x433   : > { %v2679_v3 = vadd.f32 %v7597_v12, %v7596_v24  ;;  %v2676_v36 = vadd.f32 %v7599_v5, %v7598_v58  ;;  %v7600_v50 = vld [vmem:[#allocation185_spill] sm:$0xff]  ;;  %v7601_v9 = vld [vmem:[#allocation186_spill] sm:$0xff]  ;;  %v7603_v22 = vld [vmem:[#allocation203_spill] sm:$0xff] }
 0x434   : > { %v2682_v61 = vadd.f32 %v7601_v9, %v7600_v50  ;;  %v7602_v27 = vld [vmem:[#allocation202_spill] sm:$0xff]  ;;  %v7606_v43 = vld [vmem:[#allocation21_spill] sm:$0xff]  ;;  %v7610_v1 = vld [vmem:[#allocation7_spill] sm:$0xff] }
 0x435   : > { %v2688_v4 = vadd.f32 %v7603_v22, %v7602_v27  ;;  %v7608_v47 = vld [vmem:[#allocation6_spill] sm:$0xff]  ;;  %v7613_v32 = vld [vmem:[#allocation196_spill] sm:$0xff]  ;;  %v7614_v54 = vld [vmem:[#allocation217_spill] sm:$0xff] }
 0x436   : > { %v2694_v62 = vadd.f32 %v7614_v54, %v5344_v11  ;;  %v7618_v45 = vld [vmem:[#allocation39_spill] sm:$0xff]  ;;  %v7620_v42 = vld [vmem:[#allocation40_spill] sm:$0xff]  ;;  %v7626_v0 = vld [vmem:[#allocation45_spill] sm:$0xff] }
 0x437   : > { %2626 = vadd.xlane.f32.xlu2 %v2625_v59  ;;  %v7605_v59 = vld [vmem:[#allocation214_spill] sm:$0xff]  ;;  %v2800_v63 = vsel %vm1762_vm15, %v7618_v45, 0.0  ;;  %v2801_v11 = vsel %vm1763_vm0, %v7620_v42, 0.0  ;;  %v7622_v51 = vld [vmem:[#allocation8_spill] sm:$0xff]  ;;  %v7631_v53 = vld [vmem:[#allocation57_spill] sm:$0xff] }
 0x438   : > { %2620 = vadd.xlane.f32.xlu0 %v2619_v18  ;;  %v7604_v18 = vld [vmem:[#allocation213_spill] sm:$0xff]  ;;  %v7629_v17 = vld [vmem:[#allocation46_spill] sm:$0xff]  ;;  %v7632_v26 = vld [vmem:[#allocation35_spill] sm:$0xff] }
 0x439   : > { %2623 = vadd.xlane.f32.xlu1 %v2622_v25  ;;  %v2685_v55 = vadd.f32 %v7605_v59, %v7604_v18  ;;  %v7607_v25 = vld [vmem:[#allocation23_spill] sm:$0xff]  ;;  %vm7633_vm0 = vcmp.eq.s32.totalorder %v7632_v26, %v7608_v47  ;;  %v7634_v46 = vld [vmem:[#allocation58_spill] sm:$0xff]  ;;  %vm7635_vm11 = vcmp.eq.s32.totalorder %v7632_v26, %v7610_v1  ;;  %v7637_v29 = vld [vmem:[#allocation9_spill] sm:$0xff] }
 0x43a   : > { %vm7611_vm12 = vcmp.eq.s32.totalorder %v7607_v25, %v7610_v1  ;;  %v2807_v33 = vsel %vm7635_vm11, %v7634_v46, 0.0  ;;  %vm7638_vm7 = vcmp.eq.s32.totalorder %v7637_v29, %v7608_v47  ;;  %vm7640_vm2 = vcmp.eq.s32.totalorder %v7637_v29, %v7610_v1  ;;  %v7641_v12 = vld [vmem:[#allocation62_spill] sm:$0xff]  ;;  %v7644_v5 = vld [vmem:[#allocation63_spill] sm:$0xff]  ;;  %v7646_v50 = vld [vmem:[#allocation72_spill] sm:$0xff] }
 0x43b   : > { %v7647_v9 = vld [vmem:[#allocation41_spill] sm:$0xff]  ;;  %v7652_v18 = vld [vmem:[#allocation10_spill] sm:$0xff] }
 0x43c   : > { %vm7648_vm10 = vcmp.eq.s32.totalorder %v7647_v9, %v7608_v47  ;;  %v7649_v27 = vld [vmem:[#allocation73_spill] sm:$0xff]  ;;  %vm7650_vm5 = vcmp.eq.s32.totalorder %v7647_v9, %v7610_v1  ;;  %vm7653_vm9 = vcmp.eq.s32.totalorder %v7652_v18, %v7608_v47  ;;  %vm7655_vm1 = vcmp.eq.s32.totalorder %v7652_v18, %v7610_v1  ;;  %v7664_v35 = vld [vmem:[#allocation86_spill] sm:$0xff] }
 0x43d   : > { %v2813_v22 = vsel %vm7650_vm5, %v7649_v27, 0.0  ;;  %v7661_v54 = vld [vmem:[#allocation85_spill] sm:$0xff]  ;;  %v7689_v18 = vld [vmem:[#allocation106_spill] sm:$0xff] }
 0x43e   : > { %v7680_v46 = vld [vmem:[#allocation53_spill] sm:$0xff] }
 0x43f   : > { %2635 = vadd.xlane.f32.xlu2 %v2634_v60  ;;  %v7609_v60 = vld [vmem:[#allocation22_spill] sm:$0xff] }
 0x440   : > { %2629 = vadd.xlane.f32.xlu0 %v2628_v21  ;;  %v2794_v21 = vsel %vm1756_vm8, %v7606_v43, 0.0  ;;  %v2795_v13 = vsel %vm7611_vm12, %v7609_v60, 0.0  ;;  %vm7623_vm8 = vcmp.eq.s32.totalorder %v7622_v51, %v7608_v47 }
 0x441   : > { %2632 = vadd.xlane.f32.xlu1 %v2631_v31  ;;  %v7612_v31 = vld [vmem:[#allocation195_spill] sm:$0xff] }
 0x442   : > { %v2691_v38 = vadd.f32 %v7613_v32, %v7612_v31  ;;  %v7657_v31 = vld [vmem:[#allocation20_spill] sm:$0xff] }
 0x443   : > { %vm7658_vm3 = vcmp.eq.s32.totalorder %v7657_v31, %v7608_v47  ;;  %vm7660_vm12 = vcmp.eq.s32.totalorder %v7657_v31, %v7610_v1 }
 0x447   : > { %2644 = vadd.xlane.f32.xlu2 %v2643_v34  ;;  %v7615_v34 = vld [vmem:[#allocation27_spill] sm:$0xff] }
 0x448   : > { %2638 = vadd.xlane.f32.xlu0 %v2637_v20  ;;  %v2858_v20 = vadd.f32 %v2795_v13, %v2794_v21  ;;  %v2796_v28 = vsel %vm1758_vm13, %v7615_v34, 0.0  ;;  %vm7625_vm13 = vcmp.eq.s32.totalorder %v7622_v51, %v7610_v1  ;;  %v7656_v13 = vld [vmem:[#allocation77_spill] sm:$0xff] }
 0x449   : > { %2641 = vadd.xlane.f32.xlu1 %v2640_v48  ;;  %v7617_v48 = vld [vmem:[#allocation28_spill] sm:$0xff]  ;;  %v2814_v32 = vsel %vm7658_vm3, %v7656_v13, 0.0  ;;  %v7694_v13 = vld [vmem:[#allocation26_spill] sm:$0xff] }
 0x44a   : > { %v2797_v37 = vsel %vm1759_vm14, %v7617_v48, 0.0  ;;  %v7666_v48 = vld [vmem:[#allocation81_spill] sm:$0xff] }
 0x44b   : > { %v2861_v39 = vadd.f32 %v2797_v37, %v2796_v28  ;;  %v7667_v37 = vld [vmem:[#allocation11_spill] sm:$0xff] }
 0x44f   : > { %2653 = vadd.xlane.f32.xlu2 %v2652_v57  ;;  %v7621_v57 = vld [vmem:[#allocation33_spill] sm:$0xff] }
 0x450   : > { %2647 = vadd.xlane.f32.xlu0 %v2646_v52  ;;  %v2798_v44 = vsel %vm7623_vm8, %v7621_v57, 0.0  ;;  %v7669_v52 = vld [vmem:[#allocation82_spill] sm:$0xff] }
 0x451   : > { %2650 = vadd.xlane.f32.xlu1 %v2649_v19  ;;  %v7624_v19 = vld [vmem:[#allocation34_spill] sm:$0xff] }
 0x452   : > { %v2799_v49 = vsel %vm7625_vm13, %v7624_v19, 0.0  ;;  %v2537_v57 = vld [vmem:[#allocation3] sm:$0xff]  ;;  %v2539_v19 = vld [vmem:[#allocation3 + $0x10] sm:$0xff] }
 0x453   : > { %v2864_v2 = vadd.f32 %v2799_v49, %v2798_v44  ;;  %v2541_v44 = vld [vmem:[#allocation3 + $0x20] sm:$0xff] }
 0x454   : > { %v7671_v49 = vld [vmem:[#allocation102_spill] sm:$0xff] }
 0x457   : > { %2662 = vadd.xlane.f32.xlu2 %v2661_v8  ;;  %v7627_v8 = vld [vmem:[#allocation16_spill] sm:$0xff] }
 0x458   : > { %2656 = vadd.xlane.f32.xlu0 %v2655_v23  ;;  %v2867_v23 = vadd.f32 %v2801_v11, %v2800_v63  ;;  %vm7628_vm14 = vcmp.eq.s32.totalorder %v7627_v8, %v7608_v47  ;;  %vm7630_vm15 = vcmp.eq.s32.totalorder %v7627_v8, %v7610_v1  ;;  %v7675_v8 = vld [vmem:[#allocation117_spill] sm:$0xff] }
 0x459   : > { %2659 = vadd.xlane.f32.xlu1 %v2658_v6  ;;  %v2802_v40 = vsel %vm7628_vm14, %v7626_v0, 0.0  ;;  %v2803_v6 = vsel %vm7630_vm15, %v7629_v17, 0.0  ;;  %vm7668_vm14 = vcmp.eq.s32.totalorder %v7667_v37, %v7608_v47  ;;  %vm7670_vm15 = vcmp.eq.s32.totalorder %v7667_v37, %v7610_v1  ;;  %v7676_v17 = vld [vmem:[#allocation90_spill] sm:$0xff] }
 0x45a   : > { %v2870_v7 = vadd.f32 %v2803_v6, %v2802_v40  ;;  %v2816_v45 = vsel %vm7668_vm14, %v7666_v48, 0.0  ;;  %v2817_v63 = vsel %vm7670_vm15, %v7669_v52, 0.0  ;;  %v2573_v40 = vmul.f32 %v7675_v8, %v2541_v44  ;;  %v7703_v48 = vld [vmem:[#allocation13_spill] sm:$0xff]  ;;  %v7707_v8 = vld [vmem:[#allocation130_spill] sm:$0xff] }
 0x45b   : > { %v2891_v51 = vadd.f32 %v2817_v63, %v2816_v45  ;;  %v7705_v45 = vld [vmem:[#allocation32_spill] sm:$0xff] }
 0x45f   : > { %2671 = vadd.xlane.f32.xlu2 %v2670_v10  ;;  %v7636_v10 = vld [vmem:[#allocation51_spill] sm:$0xff] }
 0x460   : > { %2665 = vadd.xlane.f32.xlu0 %v2664_v41  ;;  %v2806_v41 = vsel %vm7633_vm0, %v7631_v53, 0.0  ;;  %v2804_v14 = vsel %vm7638_vm7, %v7636_v10, 0.0  ;;  %v7678_v53 = vld [vmem:[#allocation110_spill] sm:$0xff]  ;;  %vm7681_vm7 = vcmp.eq.s32.totalorder %v7680_v46, %v7608_v47 }
 0x461   : > { %2668 = vadd.xlane.f32.xlu1 %v2667_v15  ;;  %v7639_v15 = vld [vmem:[#allocation52_spill] sm:$0xff]  ;;  %v2571_v26 = vmul.f32 %v7678_v53, %v2539_v19  ;;  %v7682_v10 = vld [vmem:[#allocation98_spill] sm:$0xff] }
 0x462   : > { %v2805_v56 = vsel %vm7640_vm2, %v7639_v15, 0.0  ;;  %vm7683_vm2 = vcmp.eq.s32.totalorder %v7680_v46, %v7610_v1  ;;  %v7685_v15 = vld [vmem:[#allocation12_spill] sm:$0xff] }
 0x463   : > { %v2873_v24 = vadd.f32 %v2805_v56, %v2804_v14  ;;  %v2825_v29 = vsel %vm7683_vm2, %v7682_v10, 0.0  ;;  %v7684_v14 = vld [vmem:[#allocation94_spill] sm:$0xff]  ;;  %v7712_v46 = vld [vmem:[#allocation44_spill] sm:$0xff] }
 0x464   : > { %v7714_v10 = vld [vmem:[#allocation134_spill] sm:$0xff] }
 0x467   : > { %2680 = vadd.xlane.f32.xlu2 %v2679_v3  ;;  %v7642_v3 = vld [vmem:[#allocation18_spill] sm:$0xff] }
 0x468   : > { %2674 = vadd.xlane.f32.xlu0 %v2673_v16  ;;  %v2876_v16 = vadd.f32 %v2807_v33, %v2806_v41  ;;  %vm7643_vm4 = vcmp.eq.s32.totalorder %v7642_v3, %v7608_v47  ;;  %vm7645_vm6 = vcmp.eq.s32.totalorder %v7642_v3, %v7610_v1  ;;  %v7679_v41 = vld [vmem:[#allocation99_spill] sm:$0xff] }
 0x469   : > { %2677 = vadd.xlane.f32.xlu1 %v2676_v36  ;;  %v2808_v58 = vsel %vm7643_vm4, %v7641_v12, 0.0  ;;  %v2809_v36 = vsel %vm7645_vm6, %v7644_v5, 0.0  ;;  %v2824_v33 = vsel %vm7681_vm7, %v7679_v41, 0.0  ;;  %vm7686_vm4 = vcmp.eq.s32.totalorder %v7685_v15, %v7608_v47 }
 0x46a   : > { %v2879_v25 = vadd.f32 %v2809_v36, %v2808_v58  ;;  %v2822_v56 = vsel %vm7686_vm4, %v7684_v14, 0.0  ;;  %vm7688_vm6 = vcmp.eq.s32.totalorder %v7685_v15, %v7610_v1  ;;  %v7715_v14 = vld [vmem:[#allocation55_spill] sm:$0xff]  ;;  %v7716_v15 = vld [vmem:[#allocation64_spill] sm:$0xff] }
 0x46b   : > { %vm7717_vm15 = vcmp.eq.s32.totalorder %v7716_v15, %v7608_v47 }
 0x46f   : > { %2689 = vadd.xlane.f32.xlu2 %v2688_v4  ;;  %v7651_v4 = vld [vmem:[#allocation67_spill] sm:$0xff] }
 0x470   : > { %2683 = vadd.xlane.f32.xlu0 %v2682_v61  ;;  %v2812_v61 = vsel %vm7648_vm10, %v7646_v50, 0.0  ;;  %v2810_v59 = vsel %vm7653_vm9, %v7651_v4, 0.0  ;;  %vm2729_vm10 = vcmask 7168   ;;  %v2903_v50 = vadd.f32 %v2825_v29, %v2824_v33  ;;  %v2540_v4 = vld [vmem:[#allocation3 + $0x18] sm:$0xff] }
 0x471   : > { %2686 = vadd.xlane.f32.xlu1 %v2685_v55  ;;  %v7654_v55 = vld [vmem:[#allocation68_spill] sm:$0xff]  ;;  %v2885_v21 = vadd.f32 %v2813_v22, %v2812_v61  ;;  %v2538_v61 = vld [vmem:[#allocation3 + $0x8] sm:$0xff] }
 0x472   : > { %v2811_v43 = vsel %vm7655_vm1, %v7654_v55, 0.0  ;;  %v2542_v22 = vld [vmem:[#allocation3 + $0x28] sm:$0xff]  ;;  %v7690_v55 = vld [vmem:[#allocation25_spill] sm:$0xff] }
 0x473   : > { %v2882_v60 = vadd.f32 %v2811_v43, %v2810_v59  ;;  %v2570_v59 = vmul.f32 %v7689_v18, %v2538_v61  ;;  %v7691_v43 = vld [vmem:[#allocation30_spill] sm:$0xff] }
 0x474   : > { %vm7692_vm5 = vcmp.eq.s32.totalorder %v7691_v43, %v7608_v47  ;;  %vm7695_vm9 = vcmp.eq.s32.totalorder %v7691_v43, %v7610_v1  ;;  %v2548_v43 = vld [vmem:[#allocation3 + $0x58] sm:$0xff] }
 0x475   : > { %v2827_v31 = vsel %vm7695_vm9, %v7694_v13, 0.0  ;;  %v7726_v13 = vld [vmem:[#allocation60_spill] sm:$0xff] }
 0x477   : > { %2859 = vadd.xlane.f32.xlu2 %v2858_v20 }
 0x478   : > { %2692 = vadd.xlane.f32.xlu0 %v2691_v38  ;;  %v7659_v38 = vld [vmem:[#allocation78_spill] sm:$0xff] }
 0x479   : > { %2695 = vadd.xlane.f32.xlu1 %v2694_v62  ;;  %v2815_v20 = vsel %vm7660_vm12, %v7659_v38, 0.0  ;;  %v7662_v62 = vld [vmem:[#allocation47_spill] sm:$0xff]  ;;  %vm7704_vm12 = vcmp.eq.s32.totalorder %v7703_v48, %v7608_v47 }
 0x47a   : > { %vm7663_vm8 = vcmp.eq.s32.totalorder %v7662_v62, %v7608_v47  ;;  %vm7665_vm13 = vcmp.eq.s32.totalorder %v7662_v62, %v7610_v1  ;;  %v2888_v42 = vadd.f32 %v2815_v20, %v2814_v32  ;;  %v7696_v32 = vld [vmem:[#allocation114_spill] sm:$0xff]  ;;  %v7697_v20 = vld [vmem:[#allocation37_spill] sm:$0xff] }
 0x47b   : > { %v2818_v34 = vsel %vm7663_vm8, %v7661_v54, 0.0  ;;  %v2819_v28 = vsel %vm7665_vm13, %v7664_v35, 0.0  ;;  %v2572_v38 = vmul.f32 %v7696_v32, %v2540_v4  ;;  %v7698_v54 = vld [vmem:[#allocation59_spill] sm:$0xff]  ;;  %vm7706_vm8 = vcmp.eq.s32.totalorder %v7703_v48, %v7610_v1  ;;  %v7734_v48 = vld [vmem:[#allocation69_spill] sm:$0xff] }
 0x47c   : > { %v2894_v11 = vadd.f32 %v2819_v28, %v2818_v34  ;;  %vm7699_vm1 = vcmp.eq.s32.totalorder %v7698_v54, %v7608_v47  ;;  %v7700_v34 = vld [vmem:[#allocation38_spill] sm:$0xff]  ;;  %vm7701_vm3 = vcmp.eq.s32.totalorder %v7698_v54, %v7610_v1  ;;  %v7702_v28 = vld [vmem:[#allocation31_spill] sm:$0xff]  ;;  %v2829_v52 = vsel %vm7706_vm8, %v7705_v45, 0.0  ;;  %v7730_v54 = vld [vmem:[#allocation61_spill] sm:$0xff] }
 0x47d   : > { %v2830_v62 = vsel %vm7699_vm1, %v7697_v20, 0.0  ;;  %v2831_v35 = vsel %vm7701_vm3, %v7700_v34, 0.0  ;;  %v2828_v37 = vsel %vm7704_vm12, %v7702_v28, 0.0  ;;  %v7732_v34 = vld [vmem:[#allocation146_spill] sm:$0xff]  ;;  %v7736_v45 = vld [vmem:[#allocation71_spill] sm:$0xff] }
 0x47e   : > { %v2912_v19 = vadd.f32 %v2831_v35, %v2830_v62  ;;  %v7733_v28 = vld [vmem:[#allocation70_spill] sm:$0xff] }
 0x47f   : > { %2868 = vadd.xlane.f32.xlu2 %v2867_v23  ;;  %v7672_v23 = vld [vmem:[#allocation89_spill] sm:$0xff] }
 0x480   : > { %2862 = vadd.xlane.f32.xlu0 %v2861_v39  ;;  %v2569_v39 = vmul.f32 %v7671_v49, %v2537_v57 }
 0x481   : > { %2865 = vadd.xlane.f32.xlu1 %v2864_v2  ;;  %v7673_v2 = vld [vmem:[#allocation24_spill] sm:$0xff] }
 0x482   : > { %vm7674_vm0 = vcmp.eq.s32.totalorder %v7673_v2, %v7608_v47  ;;  %vm7677_vm11 = vcmp.eq.s32.totalorder %v7673_v2, %v7610_v1  ;;  %v2545_v2 = vld [vmem:[#allocation3 + $0x40] sm:$0xff] }
 0x483   : > { %v2820_v0 = vsel %vm7674_vm0, %v7672_v23, 0.0  ;;  %v2821_v6 = vsel %vm7677_vm11, %v7676_v17, 0.0  ;;  %v2909_v23 = vadd.f32 %v2829_v52, %v2828_v37  ;;  %v7708_v17 = vld [vmem:[#allocation43_spill] sm:$0xff]  ;;  %vm7719_vm0 = vcmp.eq.s32.totalorder %v7716_v15, %v7610_v1  ;;  %v7748_v15 = vld [vmem:[#allocation76_spill] sm:$0xff] }
 0x484   : > { %v2897_v58 = vadd.f32 %v2821_v6, %v2820_v0  ;;  %v2544_v0 = vld [vmem:[#allocation3 + $0x38] sm:$0xff]  ;;  %v7709_v6 = vld [vmem:[#allocation36_spill] sm:$0xff] }
 0x485   : > { %vm7710_vm13 = vcmp.eq.s32.totalorder %v7709_v6, %v7608_v47  ;;  %vm7713_vm14 = vcmp.eq.s32.totalorder %v7709_v6, %v7610_v1  ;;  %v2576_v29 = vmul.f32 %v7714_v10, %v2544_v0  ;;  %v2551_v6 = vld [vmem:[#allocation3 + $0x70] sm:$0xff] }
 0x486   : > { %v2832_v53 = vsel %vm7710_vm13, %v7708_v17, 0.0  ;;  %v2833_v33 = vsel %vm7713_vm14, %v7712_v46, 0.0  ;;  %v7744_v46 = vld [vmem:[#allocation75_spill] sm:$0xff] }
 0x487   : > { %2877 = vadd.xlane.f32.xlu2 %v2876_v16  ;;  %v2915_v61 = vadd.f32 %v2833_v33, %v2832_v53  ;;  %v2550_v53 = vld [vmem:[#allocation3 + $0x68] sm:$0xff]  ;;  %v7745_v33 = vld [vmem:[#allocation48_spill] sm:$0xff] }
 0x488   : > { %2871 = vadd.xlane.f32.xlu0 %v2870_v7  ;;  %v7687_v7 = vld [vmem:[#allocation93_spill] sm:$0xff]  ;;  %vm7746_vm3 = vcmp.eq.s32.totalorder %v7745_v33, %v7608_v47  ;;  %vm7749_vm12 = vcmp.eq.s32.totalorder %v7745_v33, %v7610_v1 }
 0x489   : > { %2874 = vadd.xlane.f32.xlu1 %v2873_v24  ;;  %v2823_v16 = vsel %vm7688_vm6, %v7687_v7, 0.0  ;;  %v7718_v7 = vld [vmem:[#allocation56_spill] sm:$0xff]  ;;  %vm7735_vm6 = vcmp.eq.s32.totalorder %v7734_v48, %v7608_v47  ;;  %v2844_v10 = vsel %vm7746_vm3, %v7744_v46, 0.0  ;;  %v2557_v46 = vld [vmem:[#allocation3 + $0xa0] sm:$0xff]  ;;  %v2556_v33 = vld [vmem:[#allocation3 + $0x98] sm:$0xff] }
 0x48a   : > { %v2900_v27 = vadd.f32 %v2823_v16, %v2822_v56  ;;  %v2836_v56 = vsel %vm7717_vm15, %v7715_v14, 0.0  ;;  %v2837_v16 = vsel %vm7719_vm0, %v7718_v7, 0.0  ;;  %v2842_v37 = vsel %vm7735_vm6, %v7733_v28, 0.0  ;;  %v7750_v7 = vld [vmem:[#allocation158_spill] sm:$0xff] }
 0x48b   : > { %v2921_v4 = vadd.f32 %v2837_v16, %v2836_v56  ;;  %v2845_v56 = vsel %vm7749_vm12, %v7748_v15, 0.0  ;;  %v2582_v16 = vmul.f32 %v7750_v7, %v2550_v53  ;;  %vm7777_vm6 = vcmp.eq.s32.totalorder %v5338_v30, %v7610_v1  ;;  %v7780_v15 = vld [vmem:[#allocation123_spill] sm:$0xff] }
 0x48f   : > { %2886 = vadd.xlane.f32.xlu2 %v2885_v21  ;;  %v7693_v21 = vld [vmem:[#allocation126_spill] sm:$0xff] }
 0x490   : > { %2880 = vadd.xlane.f32.xlu0 %v2879_v25  ;;  %v2826_v25 = vsel %vm7692_vm5, %v7690_v55, 0.0  ;;  %vm7737_vm5 = vcmp.eq.s32.totalorder %v7734_v48, %v7610_v1  ;;  %v7766_v48 = vld [vmem:[#allocation88_spill] sm:$0xff] }
 0x491   : > { %2883 = vadd.xlane.f32.xlu1 %v2882_v60  ;;  %v2574_v60 = vmul.f32 %v7693_v21, %v2542_v22  ;;  %v2906_v57 = vadd.f32 %v2827_v31, %v2826_v25  ;;  %v2547_v25 = vld [vmem:[#allocation3 + $0x50] sm:$0xff]  ;;  %v7725_v21 = vld [vmem:[#allocation142_spill] sm:$0xff]  ;;  %v2843_v52 = vsel %vm7737_vm5, %v7736_v45, 0.0  ;;  %v7768_v45 = vld [vmem:[#allocation105_spill] sm:$0xff] }
 0x492   : > { %v7727_v31 = vld [vmem:[#allocation42_spill] sm:$0xff]  ;;  %v2579_v35 = vmul.f32 %v7732_v34, %v2547_v25  ;;  %v2930_v0 = vadd.f32 %v2843_v52, %v2842_v37 }
 0x493   : > { %vm7728_vm2 = vcmp.eq.s32.totalorder %v7727_v31, %v7608_v47  ;;  %vm7731_vm4 = vcmp.eq.s32.totalorder %v7727_v31, %v7610_v1  ;;  %v2554_v31 = vld [vmem:[#allocation3 + $0x88] sm:$0xff] }
 0x494   : > { %v2838_v32 = vsel %vm7728_vm2, %v7726_v13, 0.0  ;;  %v2839_v62 = vsel %vm7731_vm4, %v7730_v54, 0.0  ;;  %v7762_v54 = vld [vmem:[#allocation87_spill] sm:$0xff]  ;;  %vm7775_vm4 = vcmp.eq.s32.totalorder %v5338_v30, %v7608_v47  ;;  %v7778_v30 = vld [vmem:[#allocation113_spill] sm:$0xff] }
 0x497   : > { %2895 = vadd.xlane.f32.xlu2 %v2894_v11 }
 0x498   : > { %2889 = vadd.xlane.f32.xlu0 %v2888_v42 }
 0x499   : > { %2892 = vadd.xlane.f32.xlu1 %v2891_v51 }
 0x49a   : > { %v2615_v12 = vpop.xlane.xlu2 %2614 }
 0x49b   : > { %v2603_v24 = vpop.xlane.xlu0 %2602  ;;  %v2701_v5 = vadd.f32 %v2615_v12, %v2573_v40  ;;  %v7721_v12 = vld [vmem:[#allocation15_spill] sm:$0xff] }
 0x49c   : > { %v2697_v3 = vadd.f32 %v2603_v24, %v2569_v39  ;;  %v2609_v36 = vpop.xlane.xlu1 %2608  ;;  %v2543_v39 = vld [vmem:[#allocation3 + $0x30] sm:$0xff]  ;;  %v7720_v24 = vld [vmem:[#allocation49_spill] sm:$0xff]  ;;  %vm7722_vm11 = vcmp.eq.s32.totalorder %v7721_v12, %v7608_v47  ;;  %vm7724_vm7 = vcmp.eq.s32.totalorder %v7721_v12, %v7610_v1  ;;  %v7752_v12 = vld [vmem:[#allocation74_spill] sm:$0xff] }
 0x49d   : > { %v2699_v9 = vadd.f32 %v2609_v36, %v2571_v26  ;;  %2734 = vst.msk [vmem:[#allocation3 + $0x20] sm:$0xff] %vm2729_vm10, %v2701_v5  ;;  %v2575_v40 = vmul.f32 %v7707_v8, %v2543_v39  ;;  %v7711_v26 = vld [vmem:[#allocation138_spill] sm:$0xff]  ;;  %v2924_v39 = vadd.f32 %v2839_v62, %v2838_v32  ;;  %vm7753_vm8 = vcmp.eq.s32.totalorder %v7752_v12, %v7608_v47 }
 0x49e   : > { %2730 = vst.msk [vmem:[#allocation3] sm:$0xff] %vm2729_vm10, %v2697_v3  ;;  %v2577_v41 = vmul.f32 %v7711_v26, %v2545_v2  ;;  %v2834_v3 = vsel %vm7722_vm11, %v7720_v24, 0.0  ;;  %v7743_v26 = vld [vmem:[#allocation154_spill] sm:$0xff]  ;;  %v7751_v24 = vld [vmem:[#allocation83_spill] sm:$0xff]  ;;  %vm7755_vm13 = vcmp.eq.s32.totalorder %v7752_v12, %v7610_v1  ;;  %v7785_v12 = vld [vmem:[#allocation116_spill] sm:$0xff] }
 0x49f   : > { %2732 = vst.msk [vmem:[#allocation3 + $0x10] sm:$0xff] %vm2729_vm10, %v2699_v9  ;;  %2904 = vadd.xlane.f32.xlu2 %v2903_v50  ;;  %v2553_v32 = vld [vmem:[#allocation3 + $0x80] sm:$0xff] }
 0x4a0   : > { %2898 = vadd.xlane.f32.xlu0 %v2897_v58  ;;  %v7723_v58 = vld [vmem:[#allocation50_spill] sm:$0xff]  ;;  %v2585_v52 = vmul.f32 %v7768_v45, %v2553_v32 }
 0x4a1   : > { %2901 = vadd.xlane.f32.xlu1 %v2900_v27  ;;  %v2835_v5 = vsel %vm7724_vm7, %v7723_v58, 0.0  ;;  %v7754_v58 = vld [vmem:[#allocation84_spill] sm:$0xff]  ;;  %v7763_v62 = vld [vmem:[#allocation54_spill] sm:$0xff] }
 0x4a2   : > { %v2618_v42 = vpop.xlane.xlu2 %2617  ;;  %v2918_v55 = vadd.f32 %v2835_v5, %v2834_v3  ;;  %v2848_v3 = vsel %vm7753_vm8, %v7751_v24, 0.0  ;;  %v2849_v5 = vsel %vm7755_vm13, %v7754_v58, 0.0  ;;  %vm7764_vm0 = vcmp.eq.s32.totalorder %v7763_v62, %v7608_v47 }
 0x4a3   : > { %v2606_v63 = vpop.xlane.xlu0 %2605  ;;  %v2702_v51 = vadd.f32 %v2618_v42, %v2574_v60  ;;  %v7739_v42 = vld [vmem:[#allocation17_spill] sm:$0xff]  ;;  %v2939_v25 = vadd.f32 %v2849_v5, %v2848_v3  ;;  %v2850_v34 = vsel %vm7764_vm0, %v7762_v54, 0.0  ;;  %vm7767_vm11 = vcmp.eq.s32.totalorder %v7763_v62, %v7610_v1  ;;  %v2563_v54 = vld [vmem:[#allocation3 + $0xd0] sm:$0xff]  ;;  %v2562_v62 = vld [vmem:[#allocation3 + $0xc8] sm:$0xff] }
 0x4a4   : > { %v2698_v11 = vadd.f32 %v2606_v63, %v2570_v59  ;;  %v2612_v44 = vpop.xlane.xlu1 %2611  ;;  %v2546_v59 = vld [vmem:[#allocation3 + $0x48] sm:$0xff]  ;;  %v7738_v63 = vld [vmem:[#allocation65_spill] sm:$0xff]  ;;  %vm7740_vm9 = vcmp.eq.s32.totalorder %v7739_v42, %v7608_v47  ;;  %vm7742_vm1 = vcmp.eq.s32.totalorder %v7739_v42, %v7610_v1  ;;  %v2851_v37 = vsel %vm7767_vm11, %v7766_v48, 0.0  ;;  %v7770_v42 = vld [vmem:[#allocation204_spill] sm:$0xff] }
 0x4a5   : > { %v2700_v49 = vadd.f32 %v2612_v44, %v2572_v38  ;;  %2735 = vst.msk [vmem:[#allocation3 + $0x28] sm:$0xff] %vm2729_vm10, %v2702_v51  ;;  %v2578_v60 = vmul.f32 %v7725_v21, %v2546_v59  ;;  %v7729_v38 = vld [vmem:[#allocation150_spill] sm:$0xff]  ;;  %v2933_v59 = vadd.f32 %v2845_v56, %v2844_v10  ;;  %vm7771_vm7 = vcmp.eq.s32.totalorder %v7770_v42, %v7608_v47  ;;  %v7781_v56 = vld [vmem:[#allocation197_spill] sm:$0xff] }
 0x4a6   : > { %2731 = vst.msk [vmem:[#allocation3 + $0x8] sm:$0xff] %vm2729_vm10, %v2698_v11  ;;  %v2580_v20 = vmul.f32 %v7729_v38, %v2548_v43  ;;  %v2840_v11 = vsel %vm7740_vm9, %v7738_v63, 0.0  ;;  %v7761_v38 = vld [vmem:[#allocation163_spill] sm:$0xff]  ;;  %vm7773_vm2 = vcmp.eq.s32.totalorder %v7770_v42, %v7610_v1  ;;  %vm7782_vm5 = vcmp.eq.s32.totalorder %v7781_v56, %v7608_v47 }
 0x4a7   : > { %2733 = vst.msk [vmem:[#allocation3 + $0x18] sm:$0xff] %vm2729_vm10, %v2700_v49  ;;  %2913 = vadd.xlane.f32.xlu2 %v2912_v19  ;;  %v7769_v63 = vld [vmem:[#allocation95_spill] sm:$0xff]  ;;  %v2856_v7 = vsel %vm7782_vm5, %v7780_v15, 0.0  ;;  %vm7784_vm9 = vcmp.eq.s32.totalorder %v7781_v56, %v7610_v1  ;;  %v2588_v3 = vmul.f32 %v7785_v12, %v2556_v33  ;;  %v2567_v33 = vld [vmem:[#allocation3 + $0xf0] sm:$0xff]  ;;  %v7796_v15 = vld [vmem:[#allocation181_spill] sm:$0xff] }
 0x4a8   : > { %2907 = vadd.xlane.f32.xlu0 %v2906_v57  ;;  %v7741_v57 = vld [vmem:[#allocation66_spill] sm:$0xff] }
 0x4a9   : > { %2910 = vadd.xlane.f32.xlu1 %v2909_v23  ;;  %v2841_v51 = vsel %vm7742_vm1, %v7741_v57, 0.0  ;;  %v7772_v57 = vld [vmem:[#allocation96_spill] sm:$0xff] }
 0x4aa   : > { %v2627_v50 = vpop.xlane.xlu2 %2626  ;;  %v2927_v17 = vadd.f32 %v2841_v51, %v2840_v11  ;;  %v2854_v11 = vsel %vm7771_vm7, %v7769_v63, 0.0  ;;  %v2855_v51 = vsel %vm7773_vm2, %v7772_v57, 0.0 }
 0x4ab   : > { %v2621_v36 = vpop.xlane.xlu0 %2620  ;;  %v2705_v27 = vadd.f32 %v2627_v50, %v2577_v41  ;;  %v7757_v50 = vld [vmem:[#allocation19_spill] sm:$0xff] }
 0x4ac   : > { %v2703_v9 = vadd.f32 %v2621_v36, %v2575_v40  ;;  %v2624_v22 = vpop.xlane.xlu1 %2623  ;;  %v2549_v40 = vld [vmem:[#allocation3 + $0x60] sm:$0xff]  ;;  %v7756_v36 = vld [vmem:[#allocation79_spill] sm:$0xff]  ;;  %vm7758_vm14 = vcmp.eq.s32.totalorder %v7757_v50, %v7608_v47  ;;  %vm7760_vm15 = vcmp.eq.s32.totalorder %v7757_v50, %v7610_v1  ;;  %v2559_v47 = vld [vmem:[#allocation3 + $0xb0] sm:$0xff] }
 0x4ad   : > { %v2704_v18 = vadd.f32 %v2624_v22, %v2576_v29  ;;  %2738 = vst.msk [vmem:[#allocation3 + $0x40] sm:$0xff] %vm2729_vm10, %v2705_v27  ;;  %v2581_v41 = vmul.f32 %v7743_v26, %v2549_v40  ;;  %v7747_v29 = vld [vmem:[#allocation161_spill] sm:$0xff]  ;;  %v2555_v26 = vld [vmem:[#allocation3 + $0x90] sm:$0xff] }
 0x4ae   : > { %2736 = vst.msk [vmem:[#allocation3 + $0x30] sm:$0xff] %vm2729_vm10, %v2703_v9  ;;  %v2583_v14 = vmul.f32 %v7747_v29, %v2551_v6  ;;  %v2846_v9 = vsel %vm7758_vm14, %v7756_v36, 0.0  ;;  %v2948_v6 = vadd.f32 %v2855_v51, %v2854_v11  ;;  %v2587_v10 = vmul.f32 %v7778_v30, %v2555_v26  ;;  %v7779_v29 = vld [vmem:[#allocation120_spill] sm:$0xff]  ;;  %v7786_v1 = vld [vmem:[#allocation125_spill] sm:$0xff] }
 0x4af   : > { %2737 = vst.msk [vmem:[#allocation3 + $0x38] sm:$0xff] %vm2729_vm10, %v2704_v18  ;;  %2922 = vadd.xlane.f32.xlu2 %v2921_v4  ;;  %v2568_v30 = vld [vmem:[#allocation3 + $0xf8] sm:$0xff] }
 0x4b0   : > { %2916 = vadd.xlane.f32.xlu0 %v2915_v61  ;;  %v7759_v61 = vld [vmem:[#allocation80_spill] sm:$0xff]  ;;  %v2600_v56 = vmul.f32 %v7796_v15, %v2568_v30  ;;  %v2782_v15 = vld [vmem:[#allocation4 + $0xa0] sm:$0xff] }
 0x4b1   : > { %2919 = vadd.xlane.f32.xlu1 %v2918_v55  ;;  %v2847_v27 = vsel %vm7760_vm15, %v7759_v61, 0.0 }
 0x4b2   : > { %v2636_v19 = vpop.xlane.xlu2 %2635  ;;  %v2936_v13 = vadd.f32 %v2847_v27, %v2846_v9 }
 0x4b3   : > { %v2630_v44 = vpop.xlane.xlu0 %2629  ;;  %v2708_v23 = vadd.f32 %v2636_v19, %v2580_v20 }
 0x4b4   : > { %v2706_v49 = vadd.f32 %v2630_v44, %v2578_v60  ;;  %v2633_v2 = vpop.xlane.xlu1 %2632  ;;  %v2552_v60 = vld [vmem:[#allocation3 + $0x78] sm:$0xff]  ;;  %v7774_v44 = vld [vmem:[#allocation91_spill] sm:$0xff] }
 0x4b5   : > { %v2707_v8 = vadd.f32 %v2633_v2, %v2579_v35  ;;  %2741 = vst.msk [vmem:[#allocation3 + $0x58] sm:$0xff] %vm2729_vm10, %v2708_v23  ;;  %v2584_v20 = vmul.f32 %v7761_v38, %v2552_v60  ;;  %v7765_v35 = vld [vmem:[#allocation109_spill] sm:$0xff]  ;;  %v2852_v19 = vsel %vm7775_vm4, %v7774_v44, 0.0 }
 0x4b6   : > { %2739 = vst.msk [vmem:[#allocation3 + $0x48] sm:$0xff] %vm2729_vm10, %v2706_v49  ;;  %v2586_v28 = vmul.f32 %v7765_v35, %v2554_v31  ;;  %v7776_v49 = vld [vmem:[#allocation92_spill] sm:$0xff]  ;;  %v2564_v44 = vld [vmem:[#allocation3 + $0xd8] sm:$0xff] }
 0x4b7   : > { %2740 = vst.msk [vmem:[#allocation3 + $0x50] sm:$0xff] %vm2729_vm10, %v2707_v8  ;;  %2931 = vadd.xlane.f32.xlu2 %v2930_v0  ;;  %v2942_v8 = vadd.f32 %v2851_v37, %v2850_v34  ;;  %v7789_v34 = vld [vmem:[#allocation137_spill] sm:$0xff] }
 0x4b8   : > { %2925 = vadd.xlane.f32.xlu0 %v2924_v39  ;;  %v2853_v39 = vsel %vm7777_vm6, %v7776_v49, 0.0  ;;  %v7791_v37 = vld [vmem:[#allocation141_spill] sm:$0xff]  ;;  %v2565_v49 = vld [vmem:[#allocation3 + $0xe0] sm:$0xff] }
 0x4b9   : > { %2928 = vadd.xlane.f32.xlu1 %v2927_v17  ;;  %v2594_v45 = vmul.f32 %v7791_v37, %v2562_v62  ;;  %v2774_v37 = vld [vmem:[#allocation4 + $0x60] sm:$0xff] }
 0x4ba   : > { %v2645_v4 = vpop.xlane.xlu2 %2644 }
 0x4bb   : > { %v2639_v22 = vpop.xlane.xlu0 %2638  ;;  %v2711_v55 = vadd.f32 %v2645_v4, %v2583_v14  ;;  %v2589_v14 = vmul.f32 %v7779_v29, %v2557_v46  ;;  %v2560_v4 = vld [vmem:[#allocation3 + $0xb8] sm:$0xff] }
 0x4bc   : > { %v2709_v18 = vadd.f32 %v2639_v22, %v2581_v41  ;;  %v2642_v43 = vpop.xlane.xlu1 %2641  ;;  %v2945_v41 = vadd.f32 %v2853_v39, %v2852_v19  ;;  %v2558_v22 = vld [vmem:[#allocation3 + $0xa8] sm:$0xff]  ;;  %v7792_v39 = vld [vmem:[#allocation149_spill] sm:$0xff] }
 0x4bd   : > { %v2710_v21 = vadd.f32 %v2642_v43, %v2582_v16  ;;  %2744 = vst.msk [vmem:[#allocation3 + $0x70] sm:$0xff] %vm2729_vm10, %v2711_v55  ;;  %v7783_v16 = vld [vmem:[#allocation124_spill] sm:$0xff]  ;;  %v7788_v43 = vld [vmem:[#allocation129_spill] sm:$0xff]  ;;  %v2566_v19 = vld [vmem:[#allocation3 + $0xe8] sm:$0xff] }
 0x4be   : > { %2742 = vst.msk [vmem:[#allocation3 + $0x60] sm:$0xff] %vm2729_vm10, %v2709_v18  ;;  %v2857_v24 = vsel %vm7784_vm9, %v7783_v16, 0.0  ;;  %v2590_v18 = vmul.f32 %v7786_v1, %v2558_v22  ;;  %v2766_v1 = vld [vmem:[#allocation4 + $0x20] sm:$0xff] }
 0x4bf   : > { %2743 = vst.msk [vmem:[#allocation3 + $0x68] sm:$0xff] %vm2729_vm10, %v2710_v21  ;;  %2940 = vadd.xlane.f32.xlu2 %v2939_v25  ;;  %v2951_v50 = vadd.f32 %v2857_v24, %v2856_v7  ;;  %v2591_v25 = vmul.f32 %v7788_v43, %v2559_v47 }
 0x4c0   : > { %2934 = vadd.xlane.f32.xlu0 %v2933_v59  ;;  %v7787_v59 = vld [vmem:[#allocation133_spill] sm:$0xff] }
 0x4c1   : > { %2937 = vadd.xlane.f32.xlu1 %v2936_v13  ;;  %v2592_v55 = vmul.f32 %v7787_v59, %v2560_v4  ;;  %v2767_v59 = vld [vmem:[#allocation4 + $0x28] sm:$0xff] }
 0x4c2   : > { %v2654_v2 = vpop.xlane.xlu2 %2653 }
 0x4c3   : > { %v2648_v23 = vpop.xlane.xlu0 %2647  ;;  %v2714_v40 = vadd.f32 %v2654_v2, %v2586_v28  ;;  %v7790_v28 = vld [vmem:[#allocation145_spill] sm:$0xff] }
 0x4c4   : > { %v2712_v0 = vadd.f32 %v2648_v23, %v2584_v20  ;;  %v2651_v17 = vpop.xlane.xlu1 %2650  ;;  %v2561_v20 = vld [vmem:[#allocation3 + $0xc0] sm:$0xff]  ;;  %v2595_v48 = vmul.f32 %v7790_v28, %v2563_v54  ;;  %v2596_v23 = vmul.f32 %v7792_v39, %v2564_v44  ;;  %v7793_v2 = vld [vmem:[#allocation157_spill] sm:$0xff]  ;;  %v2775_v44 = vld [vmem:[#allocation4 + $0x68] sm:$0xff] }
 0x4c5   : > { %v2713_v53 = vadd.f32 %v2651_v17, %v2585_v52  ;;  %2747 = vst.msk [vmem:[#allocation3 + $0x88] sm:$0xff] %vm2729_vm10, %v2714_v40  ;;  %v2593_v35 = vmul.f32 %v7789_v34, %v2561_v20 }
 0x4c6   : > { %2745 = vst.msk [vmem:[#allocation3 + $0x78] sm:$0xff] %vm2729_vm10, %v2712_v0  ;;  %v2598_v0 = vmul.f32 %v7793_v2, %v2566_v19  ;;  %v2777_v19 = vld [vmem:[#allocation4 + $0x78] sm:$0xff] }
 0x4c7   : > { %2746 = vst.msk [vmem:[#allocation3 + $0x80] sm:$0xff] %vm2729_vm10, %v2713_v53  ;;  %2949 = vadd.xlane.f32.xlu2 %v2948_v6 }
 0x4c8   : > { %2943 = vadd.xlane.f32.xlu0 %v2942_v8  ;;  %v7794_v8 = vld [vmem:[#allocation153_spill] sm:$0xff] }
 0x4c9   : > { %2946 = vadd.xlane.f32.xlu1 %v2945_v41  ;;  %v2597_v40 = vmul.f32 %v7794_v8, %v2565_v49  ;;  %v2776_v49 = vld [vmem:[#allocation4 + $0x70] sm:$0xff] }
 0x4ca   : > { %v2663_v5 = vpop.xlane.xlu2 %2662 }
 0x4cb   : > { %v2657_v58 = vpop.xlane.xlu0 %2656  ;;  %v2717_v9 = vadd.f32 %v2663_v5, %v2589_v14  ;;  %v2762_v14 = vld [vmem:[#allocation4] sm:$0xff]  ;;  %v2763_v5 = vld [vmem:[#allocation4 + $0x8] sm:$0xff] }
 0x4cc   : > { %v2715_v36 = vadd.f32 %v2657_v58, %v2587_v10  ;;  %v2660_v61 = vpop.xlane.xlu1 %2659  ;;  %v7795_v10 = vld [vmem:[#allocation160_spill] sm:$0xff] }
 0x4cd   : > { %v2716_v27 = vadd.f32 %v2660_v61, %v2588_v3  ;;  %2750 = vst.msk [vmem:[#allocation3 + $0xa0] sm:$0xff] %vm2729_vm10, %v2717_v9  ;;  %v2599_v29 = vmul.f32 %v7795_v10, %v2567_v33 }
 0x4ce   : > { %2748 = vst.msk [vmem:[#allocation3 + $0x90] sm:$0xff] %vm2729_vm10, %v2715_v36  ;;  %v2765_v36 = vld [vmem:[#allocation4 + $0x18] sm:$0xff] }
 0x4cf   : > { %2749 = vst.msk [vmem:[#allocation3 + $0x98] sm:$0xff] %vm2729_vm10, %v2716_v27 }
 0x4d0   : > { %2952 = vadd.xlane.f32.xlu0 %v2951_v50  ;;  %v2764_v50 = vld [vmem:[#allocation4 + $0x10] sm:$0xff] }
 0x4d2   : > { %v2672_v60 = vpop.xlane.xlu2 %2671 }
 0x4d3   : > { %v2666_v21 = vpop.xlane.xlu0 %2665  ;;  %v2720_v31 = vadd.f32 %v2672_v60, %v2592_v55 }
 0x4d4   : > { %v2718_v13 = vadd.f32 %v2666_v21, %v2590_v18  ;;  %v2669_v32 = vpop.xlane.xlu1 %2668  ;;  %v2768_v18 = vld [vmem:[#allocation4 + $0x30] sm:$0xff] }
 0x4d5   : > { %v2719_v38 = vadd.f32 %v2669_v32, %v2591_v25  ;;  %2753 = vst.msk [vmem:[#allocation3 + $0xb8] sm:$0xff] %vm2729_vm10, %v2720_v31  ;;  %v2769_v31 = vld [vmem:[#allocation4 + $0x38] sm:$0xff]  ;;  %v2771_v32 = vld [vmem:[#allocation4 + $0x48] sm:$0xff] }
 0x4d6   : > { %2751 = vst.msk [vmem:[#allocation3 + $0xa8] sm:$0xff] %vm2729_vm10, %v2718_v13 }
 0x4d7   : > { %2752 = vst.msk [vmem:[#allocation3 + $0xb0] sm:$0xff] %vm2729_vm10, %v2719_v38  ;;  %v2770_v38 = vld [vmem:[#allocation4 + $0x40] sm:$0xff] }
 0x4da   : > { %v2681_v63 = vpop.xlane.xlu2 %2680 }
 0x4db   : > { %v2675_v52 = vpop.xlane.xlu0 %2674  ;;  %v2723_v11 = vadd.f32 %v2681_v63, %v2595_v48  ;;  %v2772_v48 = vld [vmem:[#allocation4 + $0x50] sm:$0xff] }
 0x4dc   : > { %v2721_v42 = vadd.f32 %v2675_v52, %v2593_v35  ;;  %v2678_v57 = vpop.xlane.xlu1 %2677 }
 0x4dd   : > { %v2722_v51 = vadd.f32 %v2678_v57, %v2594_v45  ;;  %2756 = vst.msk [vmem:[#allocation3 + $0xd0] sm:$0xff] %vm2729_vm10, %v2723_v11  ;;  %v2773_v45 = vld [vmem:[#allocation4 + $0x58] sm:$0xff] }
 0x4de   : > { %2754 = vst.msk [vmem:[#allocation3 + $0xc0] sm:$0xff] %vm2729_vm10, %v2721_v42 }
 0x4df   : > { %2755 = vst.msk [vmem:[#allocation3 + $0xc8] sm:$0xff] %vm2729_vm10, %v2722_v51 }
 0x4e2   : > { %v2690_v6 = vpop.xlane.xlu2 %2689 }
 0x4e3   : > { %v2684_v17 = vpop.xlane.xlu0 %2683  ;;  %v2726_v26 = vadd.f32 %v2690_v6, %v2598_v0  ;;  %v2780_v6 = vld [vmem:[#allocation4 + $0x90] sm:$0xff] }
 0x4e4   : > { %v2724_v53 = vadd.f32 %v2684_v17, %v2596_v23  ;;  %v2687_v41 = vpop.xlane.xlu1 %2686  ;;  %v2778_v17 = vld [vmem:[#allocation4 + $0x80] sm:$0xff] }
 0x4e5   : > { %v2725_v46 = vadd.f32 %v2687_v41, %v2597_v40  ;;  %2759 = vst.msk [vmem:[#allocation3 + $0xe8] sm:$0xff] %vm2729_vm10, %v2726_v26 }
 0x4e6   : > { %2757 = vst.msk [vmem:[#allocation3 + $0xd8] sm:$0xff] %vm2729_vm10, %v2724_v53  ;;  %v2779_v53 = vld [vmem:[#allocation4 + $0x88] sm:$0xff] }
 0x4e7   : > { %2758 = vst.msk [vmem:[#allocation3 + $0xe0] sm:$0xff] %vm2729_vm10, %v2725_v46 }
 0x4ea   : > { %v2860_v16 = vpop.xlane.xlu2 %2859 }
 0x4eb   : > { %v2693_v7 = vpop.xlane.xlu0 %2692  ;;  %v2954_v12 = vadd.f32 %v2860_v16, %v2762_v14  ;;  %v2783_v14 = vld [vmem:[#allocation4 + $0xa8] sm:$0xff] }
 0x4ec   : > { %v2727_v24 = vadd.f32 %v2693_v7, %v2599_v29  ;;  %v2696_v3 = vpop.xlane.xlu1 %2695  ;;  %v2781_v29 = vld [vmem:[#allocation4 + $0x98] sm:$0xff] }
 0x4ed   : > { %v2728_v58 = vadd.f32 %v2696_v3, %v2600_v56  ;;  %2986 = vst.msk [vmem:[#allocation4] sm:$0xff] %vm2729_vm10, %v2954_v12 }
 0x4ee   : > { %2760 = vst.msk [vmem:[#allocation3 + $0xf0] sm:$0xff] %vm2729_vm10, %v2727_v24 }
 0x4ef   : > { %2761 = vst.msk [vmem:[#allocation3 + $0xf8] sm:$0xff] %vm2729_vm10, %v2728_v58  ;;  %v2784_v58 = vld [vmem:[#allocation4 + $0xb0] sm:$0xff] }
 0x4f2   : > { %v2869_v61 = vpop.xlane.xlu2 %2868 }
 0x4f3   : > { %v2863_v9 = vpop.xlane.xlu0 %2862  ;;  %v2957_v22 = vadd.f32 %v2869_v61, %v2765_v36  ;;  %v2785_v36 = vld [vmem:[#allocation4 + $0xb8] sm:$0xff] }
 0x4f4   : > { %v2955_v27 = vadd.f32 %v2863_v9, %v2763_v5  ;;  %v2866_v4 = vpop.xlane.xlu1 %2865  ;;  %v2786_v5 = vld [vmem:[#allocation4 + $0xc0] sm:$0xff] }
 0x4f5   : > { %v2956_v47 = vadd.f32 %v2866_v4, %v2764_v50  ;;  %2989 = vst.msk [vmem:[#allocation4 + $0x18] sm:$0xff] %vm2729_vm10, %v2957_v22 }
 0x4f6   : > { %2987 = vst.msk [vmem:[#allocation4 + $0x8] sm:$0xff] %vm2729_vm10, %v2955_v27 }
 0x4f7   : > { %2988 = vst.msk [vmem:[#allocation4 + $0x10] sm:$0xff] %vm2729_vm10, %v2956_v47  ;;  %v2787_v47 = vld [vmem:[#allocation4 + $0xc8] sm:$0xff] }
 0x4fa   : > { %v2878_v43 = vpop.xlane.xlu2 %2877 }
 0x4fb   : > { %v2872_v55 = vpop.xlane.xlu0 %2871  ;;  %v2960_v21 = vadd.f32 %v2878_v43, %v2768_v18  ;;  %v2788_v18 = vld [vmem:[#allocation4 + $0xd0] sm:$0xff] }
 0x4fc   : > { %v2958_v25 = vadd.f32 %v2872_v55, %v2766_v1  ;;  %v2875_v60 = vpop.xlane.xlu1 %2874  ;;  %v2789_v1 = vld [vmem:[#allocation4 + $0xd8] sm:$0xff] }
 0x4fd   : > { %v2959_v13 = vadd.f32 %v2875_v60, %v2767_v59  ;;  %2992 = vst.msk [vmem:[#allocation4 + $0x30] sm:$0xff] %vm2729_vm10, %v2960_v21 }
 0x4fe   : > { %2990 = vst.msk [vmem:[#allocation4 + $0x20] sm:$0xff] %vm2729_vm10, %v2958_v25 }
 0x4ff   : > { %2991 = vst.msk [vmem:[#allocation4 + $0x28] sm:$0xff] %vm2729_vm10, %v2959_v13  ;;  %v2790_v13 = vld [vmem:[#allocation4 + $0xe0] sm:$0xff] }
 0x502   : > { %v2887_v54 = vpop.xlane.xlu2 %2886 }
 0x503   : > { %v2881_v20 = vpop.xlane.xlu0 %2880  ;;  %v2963_v34 = vadd.f32 %v2887_v54, %v2771_v32  ;;  %v2791_v32 = vld [vmem:[#allocation4 + $0xe8] sm:$0xff] }
 0x504   : > { %v2961_v62 = vadd.f32 %v2881_v20, %v2769_v31  ;;  %v2884_v35 = vpop.xlane.xlu1 %2883  ;;  %v2792_v31 = vld [vmem:[#allocation4 + $0xf0] sm:$0xff] }
 0x505   : > { %v2962_v28 = vadd.f32 %v2884_v35, %v2770_v38  ;;  %2995 = vst.msk [vmem:[#allocation4 + $0x48] sm:$0xff] %vm2729_vm10, %v2963_v34 }
 0x506   : > { %2993 = vst.msk [vmem:[#allocation4 + $0x38] sm:$0xff] %vm2729_vm10, %v2961_v62 }
 0x507   : > { %2994 = vst.msk [vmem:[#allocation4 + $0x40] sm:$0xff] %vm2729_vm10, %v2962_v28  ;;  %v2793_v28 = vld [vmem:[#allocation4 + $0xf8] sm:$0xff] }
 0x50a   : > { %v2896_v63 = vpop.xlane.xlu2 %2895 }
 0x50b   : > { %v2890_v52 = vpop.xlane.xlu0 %2889  ;;  %v2966_v11 = vadd.f32 %v2896_v63, %v2774_v37 }
 0x50c   : > { %v2964_v42 = vadd.f32 %v2890_v52, %v2772_v48  ;;  %v2893_v57 = vpop.xlane.xlu1 %2892 }
 0x50d   : > { %v2965_v51 = vadd.f32 %v2893_v57, %v2773_v45  ;;  %2998 = vst.msk [vmem:[#allocation4 + $0x60] sm:$0xff] %vm2729_vm10, %v2966_v11 }
 0x50e   : > { %2996 = vst.msk [vmem:[#allocation4 + $0x50] sm:$0xff] %vm2729_vm10, %v2964_v42 }
 0x50f   : > { %2997 = vst.msk [vmem:[#allocation4 + $0x58] sm:$0xff] %vm2729_vm10, %v2965_v51 }
 0x512   : > { %v2905_v23 = vpop.xlane.xlu2 %2904 }
 0x513   : > { %v2899_v39 = vpop.xlane.xlu0 %2898  ;;  %v2969_v0 = vadd.f32 %v2905_v23, %v2777_v19 }
 0x514   : > { %v2967_v2 = vadd.f32 %v2899_v39, %v2775_v44  ;;  %v2902_v8 = vpop.xlane.xlu1 %2901 }
 0x515   : > { %v2968_v40 = vadd.f32 %v2902_v8, %v2776_v49  ;;  %3001 = vst.msk [vmem:[#allocation4 + $0x78] sm:$0xff] %vm2729_vm10, %v2969_v0 }
 0x516   : > { %2999 = vst.msk [vmem:[#allocation4 + $0x68] sm:$0xff] %vm2729_vm10, %v2967_v2 }
 0x517   : > { %3000 = vst.msk [vmem:[#allocation4 + $0x70] sm:$0xff] %vm2729_vm10, %v2968_v40 }
 0x51a   : > { %v2914_v41 = vpop.xlane.xlu2 %2913 }
 0x51b   : > { %v2908_v26 = vpop.xlane.xlu0 %2907  ;;  %v2972_v33 = vadd.f32 %v2914_v41, %v2780_v6 }
 0x51c   : > { %v2970_v46 = vadd.f32 %v2908_v26, %v2778_v17  ;;  %v2911_v30 = vpop.xlane.xlu1 %2910 }
 0x51d   : > { %v2971_v10 = vadd.f32 %v2911_v30, %v2779_v53  ;;  %3004 = vst.msk [vmem:[#allocation4 + $0x90] sm:$0xff] %vm2729_vm10, %v2972_v33 }
 0x51e   : > { %3002 = vst.msk [vmem:[#allocation4 + $0x80] sm:$0xff] %vm2729_vm10, %v2970_v46 }
 0x51f   : > { %3003 = vst.msk [vmem:[#allocation4 + $0x88] sm:$0xff] %vm2729_vm10, %v2971_v10 }
 0x522   : > { %v2923_v7 = vpop.xlane.xlu2 %2922 }
 0x523   : > { %v2917_v56 = vpop.xlane.xlu0 %2916  ;;  %v2975_v24 = vadd.f32 %v2923_v7, %v2783_v14 }
 0x524   : > { %v2973_v16 = vadd.f32 %v2917_v56, %v2781_v29  ;;  %v2920_v12 = vpop.xlane.xlu1 %2919 }
 0x525   : > { %v2974_v3 = vadd.f32 %v2920_v12, %v2782_v15  ;;  %3007 = vst.msk [vmem:[#allocation4 + $0xa8] sm:$0xff] %vm2729_vm10, %v2975_v24 }
 0x526   : > { %3005 = vst.msk [vmem:[#allocation4 + $0x98] sm:$0xff] %vm2729_vm10, %v2973_v16 }
 0x527   : > { %3006 = vst.msk [vmem:[#allocation4 + $0xa0] sm:$0xff] %vm2729_vm10, %v2974_v3 }
 0x52a   : > { %v2932_v9 = vpop.xlane.xlu2 %2931 }
 0x52b   : > { %v2926_v50 = vpop.xlane.xlu0 %2925  ;;  %v2978_v27 = vadd.f32 %v2932_v9, %v2786_v5 }
 0x52c   : > { %v2976_v61 = vadd.f32 %v2926_v50, %v2784_v58  ;;  %v2929_v22 = vpop.xlane.xlu1 %2928 }
 0x52d   : > { %v2977_v4 = vadd.f32 %v2929_v22, %v2785_v36  ;;  %3010 = vst.msk [vmem:[#allocation4 + $0xc0] sm:$0xff] %vm2729_vm10, %v2978_v27 }
 0x52e   : > { %3008 = vst.msk [vmem:[#allocation4 + $0xb0] sm:$0xff] %vm2729_vm10, %v2976_v61 }
 0x52f   : > { %3009 = vst.msk [vmem:[#allocation4 + $0xb8] sm:$0xff] %vm2729_vm10, %v2977_v4 }
 0x532   : > { %v2941_v55 = vpop.xlane.xlu2 %2940 }
 0x533   : > { %v2935_v59 = vpop.xlane.xlu0 %2934  ;;  %v2981_v25 = vadd.f32 %v2941_v55, %v2789_v1 }
 0x534   : > { %v2979_v43 = vadd.f32 %v2935_v59, %v2787_v47  ;;  %v2938_v21 = vpop.xlane.xlu1 %2937 }
 0x535   : > { %v2980_v60 = vadd.f32 %v2938_v21, %v2788_v18  ;;  %3013 = vst.msk [vmem:[#allocation4 + $0xd8] sm:$0xff] %vm2729_vm10, %v2981_v25 }
 0x536   : > { %3011 = vst.msk [vmem:[#allocation4 + $0xc8] sm:$0xff] %vm2729_vm10, %v2979_v43 }
 0x537   : > { %3012 = vst.msk [vmem:[#allocation4 + $0xd0] sm:$0xff] %vm2729_vm10, %v2980_v60 }
 0x53a   : > { %v2950_v20 = vpop.xlane.xlu2 %2949 }
 0x53b   : > { %v2944_v38 = vpop.xlane.xlu0 %2943  ;;  %v2984_v62 = vadd.f32 %v2950_v20, %v2792_v31 }
 0x53c   : > { %v2982_v54 = vadd.f32 %v2944_v38, %v2790_v13  ;;  %v2947_v34 = vpop.xlane.xlu1 %2946 }
 0x53d   : > { %v2983_v35 = vadd.f32 %v2947_v34, %v2791_v32  ;;  %3016 = vst.msk [vmem:[#allocation4 + $0xf0] sm:$0xff] %vm2729_vm10, %v2984_v62 }
 0x53e   : > { %3014 = vst.msk [vmem:[#allocation4 + $0xe0] sm:$0xff] %vm2729_vm10, %v2982_v54 }
 0x53f   : > { %3015 = vst.msk [vmem:[#allocation4 + $0xe8] sm:$0xff] %vm2729_vm10, %v2983_v35 }
 0x543   : > { %v2953_v48 = vpop.xlane.xlu0 %2952 }
 0x544   : > { %v2985_v37 = vadd.f32 %v2953_v48, %v2793_v28 }
 0x546   : > { %3017 = vst.msk [vmem:[#allocation4 + $0xf8] sm:$0xff] %vm2729_vm10, %v2985_v37 }
 0x547 PF: > { %vm3018_vm1 = vcmask 7168   ;;  %v7797_v45 = vld [vmem:[#allocation97_spill] sm:$0xff]  ;;  %v7799_v63 = vld [vmem:[#allocation104_spill] sm:$0xff]  ;;  %v7802_v57 = vld [vmem:[#allocation119_spill] sm:$0xff]  ;;  %p3673_p12 = scmp.ne.s32.totalorder %s4224_s18, 1 }
 0x548   : > { %3019 = vst.msk [vmem:[#allocation2] sm:$0xff] %vm3018_vm1, %v7797_v45  ;;  %v7798_v52 = vld [vmem:[#allocation101_spill] sm:$0xff]  ;;  %v7800_v42 = vld [vmem:[#allocation108_spill] sm:$0xff]  ;;  %v7803_v51 = vld [vmem:[#allocation122_spill] sm:$0xff] }
 0x549   : > { %3020 = vst.msk [vmem:[#allocation2 + $0x8] sm:$0xff] %vm3018_vm1, %v7798_v52  ;;  %v7801_v11 = vld [vmem:[#allocation112_spill] sm:$0xff]  ;;  %v7812_v40 = vld [vmem:[#allocation159_spill] sm:$0xff]  ;;  %v7818_v46 = vld [vmem:[#allocation118_spill] sm:$0xff] }
 0x54a   : > { %3021 = vst.msk [vmem:[#allocation2 + $0x10] sm:$0xff] %vm3018_vm1, %v7799_v63  ;;  %v7804_v44 = vld [vmem:[#allocation128_spill] sm:$0xff]  ;;  %v7814_v6 = vld [vmem:[#allocation103_spill] sm:$0xff]  ;;  %v7819_v33 = vld [vmem:[#allocation121_spill] sm:$0xff] }
 0x54b   : > { %3022 = vst.msk [vmem:[#allocation2 + $0x18] sm:$0xff] %vm3018_vm1, %v7800_v42  ;;  %v7805_v19 = vld [vmem:[#allocation132_spill] sm:$0xff]  ;;  %v7815_v53 = vld [vmem:[#allocation107_spill] sm:$0xff]  ;;  %v7828_v24 = vld [vmem:[#allocation178_spill] sm:$0xff] }
 0x54c   : > { %3023 = vst.msk [vmem:[#allocation2 + $0x20] sm:$0xff] %vm3018_vm1, %v7801_v11  ;;  %v7806_v49 = vld [vmem:[#allocation136_spill] sm:$0xff]  ;;  %v7816_v26 = vld [vmem:[#allocation111_spill] sm:$0xff] }
 0x54d   : > { %3024 = vst.msk [vmem:[#allocation2 + $0x28] sm:$0xff] %vm3018_vm1, %v7802_v57  ;;  %v7807_v39 = vld [vmem:[#allocation140_spill] sm:$0xff]  ;;  %v7817_v41 = vld [vmem:[#allocation115_spill] sm:$0xff] }
 0x54e   : > { %3025 = vst.msk [vmem:[#allocation2 + $0x30] sm:$0xff] %vm3018_vm1, %v7803_v51  ;;  %v7808_v23 = vld [vmem:[#allocation144_spill] sm:$0xff]  ;;  %v7820_v30 = vld [vmem:[#allocation127_spill] sm:$0xff] }
 0x54f   : > { %3026 = vst.msk [vmem:[#allocation2 + $0x38] sm:$0xff] %vm3018_vm1, %v7804_v44  ;;  %v7809_v2 = vld [vmem:[#allocation148_spill] sm:$0xff]  ;;  %v7821_v10 = vld [vmem:[#allocation131_spill] sm:$0xff] }
 0x550   : > { %3027 = vst.msk [vmem:[#allocation2 + $0x40] sm:$0xff] %vm3018_vm1, %v7805_v19  ;;  %v7810_v0 = vld [vmem:[#allocation152_spill] sm:$0xff]  ;;  %v7822_v29 = vld [vmem:[#allocation135_spill] sm:$0xff] }
 0x551   : > { %3028 = vst.msk [vmem:[#allocation2 + $0x48] sm:$0xff] %vm3018_vm1, %v7806_v49  ;;  %v7811_v8 = vld [vmem:[#allocation156_spill] sm:$0xff]  ;;  %v7823_v14 = vld [vmem:[#allocation139_spill] sm:$0xff] }
 0x552   : > { %3029 = vst.msk [vmem:[#allocation2 + $0x50] sm:$0xff] %vm3018_vm1, %v7807_v39  ;;  %v7813_v17 = vld [vmem:[#allocation100_spill] sm:$0xff]  ;;  %v7824_v15 = vld [vmem:[#allocation143_spill] sm:$0xff] }
 0x553   : > { %3030 = vst.msk [vmem:[#allocation2 + $0x58] sm:$0xff] %vm3018_vm1, %v7808_v23  ;;  %v7825_v56 = vld [vmem:[#allocation147_spill] sm:$0xff] }
 0x554   : > { %3031 = vst.msk [vmem:[#allocation2 + $0x60] sm:$0xff] %vm3018_vm1, %v7809_v2  ;;  %v7826_v7 = vld [vmem:[#allocation151_spill] sm:$0xff] }
 0x555   : > { %3032 = vst.msk [vmem:[#allocation2 + $0x68] sm:$0xff] %vm3018_vm1, %v7810_v0  ;;  %v7827_v16 = vld [vmem:[#allocation155_spill] sm:$0xff] }
 0x556   : > { %3033 = vst.msk [vmem:[#allocation2 + $0x70] sm:$0xff] %vm3018_vm1, %v7811_v8 }
 0x557   : > { %3034 = vst.msk [vmem:[#allocation2 + $0x78] sm:$0xff] %vm3018_vm1, %v7812_v40 }
 0x558   : > { %3035 = vst.msk [vmem:[#allocation2 + $0x80] sm:$0xff] %vm3018_vm1, %v7813_v17 }
 0x559   : > { %3036 = vst.msk [vmem:[#allocation2 + $0x88] sm:$0xff] %vm3018_vm1, %v7814_v6 }
 0x55a   : > { %3037 = vst.msk [vmem:[#allocation2 + $0x90] sm:$0xff] %vm3018_vm1, %v7815_v53 }
 0x55b   : > { %3038 = vst.msk [vmem:[#allocation2 + $0x98] sm:$0xff] %vm3018_vm1, %v7816_v26 }
 0x55c   : > { %3039 = vst.msk [vmem:[#allocation2 + $0xa0] sm:$0xff] %vm3018_vm1, %v7817_v41 }
 0x55d   : > { %3040 = vst.msk [vmem:[#allocation2 + $0xa8] sm:$0xff] %vm3018_vm1, %v7818_v46 }
 0x55e   : > { %3041 = vst.msk [vmem:[#allocation2 + $0xb0] sm:$0xff] %vm3018_vm1, %v7819_v33 }
 0x55f   : > { %3042 = vst.msk [vmem:[#allocation2 + $0xb8] sm:$0xff] %vm3018_vm1, %v7820_v30 }
 0x560   : > { %3043 = vst.msk [vmem:[#allocation2 + $0xc0] sm:$0xff] %vm3018_vm1, %v7821_v10 }
 0x561   : > { %3044 = vst.msk [vmem:[#allocation2 + $0xc8] sm:$0xff] %vm3018_vm1, %v7822_v29 }
 0x562   : > { %3045 = vst.msk [vmem:[#allocation2 + $0xd0] sm:$0xff] %vm3018_vm1, %v7823_v14 }
 0x563   : > { %3046 = vst.msk [vmem:[#allocation2 + $0xd8] sm:$0xff] %vm3018_vm1, %v7824_v15  ;;  %3054 = sbr.rel (%p3673_p12) target bundleno = 1592 (0x638), region = 56 }
 0x564   : > { %3047 = vst.msk [vmem:[#allocation2 + $0xe0] sm:$0xff] %vm3018_vm1, %v7825_v56 }
 0x565   : > { %3048 = vst.msk [vmem:[#allocation2 + $0xe8] sm:$0xff] %vm3018_vm1, %v7826_v7 }
 0x566   : > { %3049 = vst.msk [vmem:[#allocation2 + $0xf0] sm:$0xff] %vm3018_vm1, %v7827_v16 }
 0x567   : > { %3050 = vst.msk [vmem:[#allocation2 + $0xf8] sm:$0xff] %vm3018_vm1, %v7828_v24 }
 0x568   : > { %v4245_v12 = vmov 0   ;;  %v3087_v3 = vld [vmem:[#allocation3] sm:$0xff]  ;;  %v3088_v58 = vld [vmem:[#allocation3 + $0x8] sm:$0xff]  ;;  %v3089_v5 = vld [vmem:[#allocation3 + $0x10] sm:$0xff] }
 0x569   : > { %4137 = vset.pattern.permute.xlu0 %v4245_v12  ;;  %v3090_v36 = vld [vmem:[#allocation3 + $0x18] sm:$0xff]  ;;  %4138 = vlog2.f32 %v3087_v3  ;;  %v3091_v50 = vld [vmem:[#allocation3 + $0x20] sm:$0xff]  ;;  %v3092_v9 = vld [vmem:[#allocation3 + $0x28] sm:$0xff] }
 0x56a   : > { %4140 = vlog2.f32 %v3088_v58  ;;  %v3093_v61 = vld [vmem:[#allocation3 + $0x30] sm:$0xff]  ;;  %v3094_v47 = vld [vmem:[#allocation3 + $0x38] sm:$0xff]  ;;  %v3055_v18 = vld [vmem:[#allocation2] sm:$0xff] }
 0x56b   : > { %4142 = vlog2.f32 %v3089_v5  ;;  %v3056_v59 = vld [vmem:[#allocation2 + $0x8] sm:$0xff]  ;;  %v3095_v55 = vld [vmem:[#allocation3 + $0x40] sm:$0xff]  ;;  %v3057_v25 = vld [vmem:[#allocation2 + $0x10] sm:$0xff] }
 0x56c   : > { %4144 = vlog2.f32 %v3090_v36  ;;  %v3096_v21 = vld [vmem:[#allocation3 + $0x48] sm:$0xff]  ;;  %v3215_v13 = vld [vmem:[#allocation4] sm:$0xff]  ;;  %v3058_v62 = vld [vmem:[#allocation2 + $0x18] sm:$0xff] }
 0x56d   : > { %4146 = vlog2.f32 %v3091_v50  ;;  %v3216_v38 = vld [vmem:[#allocation4 + $0x8] sm:$0xff]  ;;  %v3247_v20 = vld [vmem:[%s4332_s17] sm:$0xff]  ;;  %v3217_v35 = vld [vmem:[#allocation4 + $0x10] sm:$0xff] }
 0x56e   : > { %4148 = vlog2.f32 %v3092_v9  ;;  %v3248_v54 = vld [vmem:[%s4332_s17 + $0x8] sm:$0xff]  ;;  %v3249_v28 = vld [vmem:[%s4332_s17 + $0x10] sm:$0xff]  ;;  %v3218_v52 = vld [vmem:[#allocation4 + $0x18] sm:$0xff]  ;;  %v3279_v44 = vmul.f32 %v3247_v20, %v3215_v13 }
 0x56f   : > { %v4139_v27 = vpop.eup %4138  ;;  %4150 = vlog2.f32 %v3093_v61  ;;  %v3097_v37 = vld [vmem:[#allocation3 + $0x50] sm:$0xff]  ;;  %v3250_v63 = vld [vmem:[%s4332_s17 + $0x18] sm:$0xff]  ;;  %v3280_v19 = vmul.f32 %v3248_v54, %v3216_v38  ;;  %v3059_v49 = vld [vmem:[#allocation2 + $0x20] sm:$0xff]  ;;  %v3281_v0 = vmul.f32 %v3249_v28, %v3217_v35 }
 0x570   : > { %v4141_v22 = vpop.eup %4140  ;;  %v3120_v43 = vmul.f32 0.6931472, %v4139_v27  ;;  %4152 = vlog2.f32 %v3094_v47  ;;  %v3098_v11 = vld [vmem:[#allocation3 + $0x58] sm:$0xff]  ;;  %v3219_v23 = vld [vmem:[#allocation4 + $0x20] sm:$0xff]  ;;  %v3282_v6 = vmul.f32 %v3250_v63, %v3218_v52  ;;  %v3060_v26 = vld [vmem:[#allocation2 + $0x28] sm:$0xff] }
 0x571   : > { %v4143_v4 = vpop.eup %4142  ;;  %v3122_v60 = vmul.f32 0.6931472, %v4141_v22  ;;  %4154 = vlog2.f32 %v3095_v55  ;;  %v3251_v2 = vld [vmem:[%s4332_s17 + $0x20] sm:$0xff]  ;;  %v3220_v46 = vld [vmem:[#allocation4 + $0x28] sm:$0xff]  ;;  %v3061_v10 = vld [vmem:[#allocation2 + $0x30] sm:$0xff] }
 0x572   : > { %v4145_v1 = vpop.eup %4144  ;;  %v3124_v32 = vmul.f32 0.6931472, %v4143_v4  ;;  %4156 = vlog2.f32 %v3096_v21  ;;  %v3183_v45 = vadd.f32 %v3120_v43, %v3055_v18  ;;  %v3099_v8 = vld [vmem:[#allocation3 + $0x60] sm:$0xff]  ;;  %v3252_v33 = vld [vmem:[%s4332_s17 + $0x28] sm:$0xff]  ;;  %v3283_v15 = vmul.f32 %v3251_v2, %v3219_v23  ;;  %v3221_v24 = vld [vmem:[#allocation4 + $0x30] sm:$0xff] }
 0x573   : > { %v4147_v31 = vpop.eup %4146  ;;  %v3126_v34 = vmul.f32 0.6931472, %v4145_v1  ;;  %v3184_v51 = vadd.f32 %v3122_v60, %v3056_v59  ;;  %4158 = vlog2.f32 %v3097_v37  ;;  %v3100_v29 = vld [vmem:[#allocation3 + $0x68] sm:$0xff]  ;;  %v3253_v12 = vld [vmem:[%s4332_s17 + $0x30] sm:$0xff]  ;;  %v3284_v50 = vmul.f32 %v3252_v33, %v3220_v46  ;;  %v3062_v61 = vld [vmem:[#allocation2 + $0x38] sm:$0xff] }
 0x574   : > { %v4149_v48 = vpop.eup %4148  ;;  %v3128_v57 = vmul.f32 0.6931472, %v4147_v31  ;;  %v3185_v39 = vadd.f32 %v3124_v32, %v3057_v25  ;;  %4160 = vlog2.f32 %v3098_v11  ;;  %v3311_v56 = vsub.f32 %v3183_v45, %v3279_v44  ;;  %v3101_v58 = vld [vmem:[#allocation3 + $0x70] sm:$0xff]  ;;  %v3222_v4 = vld [vmem:[#allocation4 + $0x38] sm:$0xff]  ;;  %v3063_v60 = vld [vmem:[#allocation2 + $0x40] sm:$0xff] }
 0x575   : > { %v4151_v42 = vpop.eup %4150  ;;  %v3130_v40 = vmul.f32 0.6931472, %v4149_v48  ;;  %v3186_v17 = vadd.f32 %v3126_v34, %v3058_v62  ;;  %v3312_v7 = vsub.f32 %v3184_v51, %v3280_v19  ;;  %4162 = vlog2.f32 %v3099_v8  ;;  %v3254_v47 = vld [vmem:[%s4332_s17 + $0x38] sm:$0xff]  ;;  %v3223_v31 = vld [vmem:[#allocation4 + $0x40] sm:$0xff]  ;;  %v3064_v37 = vld [vmem:[#allocation2 + $0x48] sm:$0xff] }
 0x576   : > { %v4153_v53 = vpop.eup %4152  ;;  %v3132_v41 = vmul.f32 0.6931472, %v4151_v42  ;;  %v3187_v14 = vadd.f32 %v3128_v57, %v3059_v49  ;;  %v3313_v3 = vsub.f32 %v3185_v39, %v3281_v0  ;;  %4164 = vlog2.f32 %v3100_v29  ;;  %v3102_v18 = vld [vmem:[#allocation3 + $0x78] sm:$0xff]  ;;  %v3255_v32 = vld [vmem:[%s4332_s17 + $0x40] sm:$0xff]  ;;  %v3224_v52 = vld [vmem:[#allocation4 + $0x48] sm:$0xff] }
 0x577   : > { %v4155_v30 = vpop.eup %4154  ;;  %v3134_v5 = vmul.f32 0.6931472, %v4153_v53  ;;  %v3188_v36 = vadd.f32 %v3130_v40, %v3060_v26  ;;  %v3314_v9 = vsub.f32 %v3186_v17, %v3282_v6  ;;  %v3285_v59 = vmul.f32 %v3253_v12, %v3221_v24  ;;  %v3103_v54 = vld [vmem:[#allocation3 + $0x80] sm:$0xff]  ;;  %v3256_v63 = vld [vmem:[%s4332_s17 + $0x48] sm:$0xff]  ;;  %v3065_v39 = vld [vmem:[#allocation2 + $0x50] sm:$0xff] }
 0x578   : > { %v4157_v16 = vpop.eup %4156  ;;  %v3136_v27 = vmul.f32 0.6931472, %v4155_v30  ;;  %v3189_v22 = vadd.f32 %v3132_v41, %v3061_v10  ;;  %v3315_v55 = vsub.f32 %v3187_v14, %v3283_v15  ;;  %v3343_v43 = vsel %vm3018_vm1, %v3311_v56, 0.0  ;;  %v3104_v11 = vld [vmem:[#allocation3 + $0x88] sm:$0xff]  ;;  %v3225_v2 = vld [vmem:[#allocation4 + $0x50] sm:$0xff]  ;;  %v3066_v46 = vld [vmem:[#allocation2 + $0x58] sm:$0xff] }
 0x579   : > { %v4159_v1 = vpop.eup %4158  ;;  %v3344_v25 = vsel %vm3018_vm1, %v3312_v7, 0.0  ;;  %v3138_v13 = vmul.f32 0.6931472, %v4157_v16  ;;  %4166 = vlog2.f32 %v3101_v58  ;;  %v3346_v20 = vsel %vm3018_vm1, %v3313_v3, 0.0  ;;  %v3257_v0 = vld [vmem:[%s4332_s17 + $0x50] sm:$0xff]  ;;  %v3226_v30 = vld [vmem:[#allocation4 + $0x58] sm:$0xff] }
 0x57a   : > { %v4161_v21 = vpop.eup %4160  ;;  %v3345_v38 = vadd.f32 %v3344_v25, %v3343_v43  ;;  %v3190_v62 = vadd.f32 %v3134_v5, %v3062_v61  ;;  %v3286_v34 = vmul.f32 %v3254_v47, %v3222_v4  ;;  %v3316_v35 = vsub.f32 %v3188_v36, %v3284_v50  ;;  %v3105_v40 = vld [vmem:[#allocation3 + $0x90] sm:$0xff]  ;;  %v3258_v10 = vld [vmem:[%s4332_s17 + $0x58] sm:$0xff]  ;;  %v3067_v12 = vld [vmem:[#allocation2 + $0x60] sm:$0xff] }
 0x57b   : > { %v3348_v28 = vsel %vm3018_vm1, %v3314_v9, 0.0  ;;  %v4163_v48 = vpop.eup %4162  ;;  %v3140_v45 = vmul.f32 0.6931472, %v4159_v1  ;;  %4168 = vlog2.f32 %v3102_v18  ;;  %v3191_v57 = vadd.f32 %v3136_v27, %v3063_v60  ;;  %v3106_v14 = vld [vmem:[#allocation3 + $0x98] sm:$0xff]  ;;  %v3227_v58 = vld [vmem:[#allocation4 + $0x60] sm:$0xff]  ;;  %v3068_v47 = vld [vmem:[#allocation2 + $0x68] sm:$0xff] }
 0x57c   : > { %v3347_v42 = vadd.f32 %v3346_v20, %v3345_v38  ;;  %v3287_v51 = vmul.f32 %v3255_v32, %v3223_v31  ;;  %v3317_v44 = vsub.f32 %v3189_v22, %v3285_v59  ;;  %v3350_v19 = vsel %vm3018_vm1, %v3315_v55, 0.0  ;;  %v4165_v49 = vpop.eup %4164  ;;  %v3259_v5 = vld [vmem:[%s4332_s17 + $0x60] sm:$0xff]  ;;  %v3228_v18 = vld [vmem:[#allocation4 + $0x68] sm:$0xff]  ;;  %v3069_v32 = vld [vmem:[#allocation2 + $0x70] sm:$0xff] }
 0x57d   : > { %v3142_v23 = vmul.f32 0.6931472, %v4161_v21  ;;  %4170 = vlog2.f32 %v3103_v54  ;;  %v3192_v17 = vadd.f32 %v3138_v13, %v3064_v37  ;;  %v3288_v6 = vmul.f32 %v3256_v63, %v3224_v52  ;;  %v3107_v50 = vld [vmem:[#allocation3 + $0xa0] sm:$0xff]  ;;  %v3260_v59 = vld [vmem:[%s4332_s17 + $0x68] sm:$0xff]  ;;  %v3229_v20 = vld [vmem:[#allocation4 + $0x70] sm:$0xff] }
 0x57e   : > { %v3349_v8 = vadd.f32 %v3348_v28, %v3347_v42  ;;  %v3318_v53 = vsub.f32 %v3190_v62, %v3286_v34  ;;  %v3352_v26 = vsel %vm3018_vm1, %v3316_v35, 0.0  ;;  %v3144_v33 = vmul.f32 0.6931472, %v4163_v48  ;;  %v3108_v43 = vld [vmem:[#allocation3 + $0xa8] sm:$0xff]  ;;  %v3261_v54 = vld [vmem:[%s4332_s17 + $0x70] sm:$0xff]  ;;  %v3070_v52 = vld [vmem:[#allocation2 + $0x78] sm:$0xff] }
 0x57f   : > { %v4167_v41 = vpop.eup %4166  ;;  %4172 = vlog2.f32 %v3104_v11  ;;  %v3193_v15 = vadd.f32 %v3140_v45, %v3065_v39  ;;  %v3289_v56 = vmul.f32 %v3257_v0, %v3225_v2  ;;  %v3319_v7 = vsub.f32 %v3191_v57, %v3287_v51  ;;  %v3109_v34 = vld [vmem:[#allocation3 + $0xb0] sm:$0xff]  ;;  %v3230_v42 = vld [vmem:[#allocation4 + $0x78] sm:$0xff]  ;;  %v3071_v2 = vld [vmem:[#allocation2 + $0x80] sm:$0xff] }
 0x580   : > { %v3351_v29 = vadd.f32 %v3350_v19, %v3349_v8  ;;  %v3354_v16 = vsel %vm3018_vm1, %v3317_v44, 0.0  ;;  %v3146_v3 = vmul.f32 0.6931472, %v4165_v49  ;;  %4174 = vlog2.f32 %v3105_v40  ;;  %v3262_v11 = vld [vmem:[%s4332_s17 + $0x78] sm:$0xff]  ;;  %v3231_v8 = vld [vmem:[#allocation4 + $0x80] sm:$0xff] }
 0x581   : > { %v4169_v24 = vpop.eup %4168  ;;  %v3194_v9 = vadd.f32 %v3142_v23, %v3066_v46  ;;  %v3290_v61 = vmul.f32 %v3258_v10, %v3226_v30  ;;  %v3320_v27 = vsub.f32 %v3192_v17, %v3288_v6  ;;  %v3356_v22 = vsel %vm3018_vm1, %v3318_v53, 0.0  ;;  %v3110_v51 = vld [vmem:[#allocation3 + $0xb8] sm:$0xff]  ;;  %v3263_v40 = vld [vmem:[%s4332_s17 + $0x80] sm:$0xff]  ;;  %v3072_v30 = vld [vmem:[#allocation2 + $0x88] sm:$0xff] }
 0x582   : > { %v3353_v36 = vadd.f32 %v3352_v26, %v3351_v29  ;;  %v3148_v1 = vmul.f32 0.6931472, %v4167_v41  ;;  %4176 = vlog2.f32 %v3106_v14  ;;  %v3195_v25 = vadd.f32 %v3144_v33, %v3067_v12  ;;  %v3111_v6 = vld [vmem:[#allocation3 + $0xc0] sm:$0xff]  ;;  %v3232_v29 = vld [vmem:[#allocation4 + $0x88] sm:$0xff] }
 0x583   : > { %v4171_v4 = vpop.eup %4170  ;;  %v3291_v21 = vmul.f32 %v3259_v5, %v3227_v58  ;;  %v3321_v60 = vsub.f32 %v3193_v15, %v3289_v56  ;;  %v3358_v13 = vsel %vm3018_vm1, %v3319_v7, 0.0  ;;  %v3150_v38 = vmul.f32 0.6931472, %v4169_v24  ;;  %v3264_v14 = vld [vmem:[%s4332_s17 + $0x88] sm:$0xff]  ;;  %v3073_v58 = vld [vmem:[#allocation2 + $0x90] sm:$0xff] }
 0x584   : > { %v3355_v55 = vadd.f32 %v3354_v16, %v3353_v36  ;;  %4178 = vlog2.f32 %v3107_v50  ;;  %v3196_v35 = vadd.f32 %v3146_v3, %v3068_v47  ;;  %v3292_v28 = vmul.f32 %v3260_v59, %v3228_v18  ;;  %v3112_v56 = vld [vmem:[#allocation3 + $0xc8] sm:$0xff]  ;;  %v3233_v36 = vld [vmem:[#allocation4 + $0x90] sm:$0xff]  ;;  %v3074_v18 = vld [vmem:[#allocation2 + $0x98] sm:$0xff] }
 0x585   : > { %v4173_v31 = vpop.eup %4172  ;;  %v3322_v48 = vsub.f32 %v3194_v9, %v3290_v61  ;;  %v3360_v37 = vsel %vm3018_vm1, %v3320_v27, 0.0  ;;  %v3152_v63 = vmul.f32 0.6931472, %v4171_v4  ;;  %4180 = vlog2.f32 %v3108_v43  ;;  %v3265_v50 = vld [vmem:[%s4332_s17 + $0x90] sm:$0xff]  ;;  %v3266_v43 = vld [vmem:[%s4332_s17 + $0x98] sm:$0xff] }
 0x586   : > { %v3357_v62 = vadd.f32 %v3356_v22, %v3355_v55  ;;  %v4175_v45 = vpop.eup %4174  ;;  %v3197_v44 = vadd.f32 %v3148_v1, %v3069_v32  ;;  %v3293_v19 = vmul.f32 %v3261_v54, %v3229_v20  ;;  %v3323_v49 = vsub.f32 %v3195_v25, %v3291_v21  ;;  %v3113_v61 = vld [vmem:[#allocation3 + $0xd0] sm:$0xff]  ;;  %v3234_v55 = vld [vmem:[#allocation4 + $0x98] sm:$0xff]  ;;  %v3075_v20 = vld [vmem:[#allocation2 + $0xa0] sm:$0xff] }
 0x587   : > { %v3362_v39 = vsel %vm3018_vm1, %v3321_v60, 0.0  ;;  %v3154_v0 = vmul.f32 0.6931472, %v4173_v31  ;;  %4182 = vlog2.f32 %v3109_v34  ;;  %v3198_v53 = vadd.f32 %v3150_v38, %v3070_v52  ;;  %v3114_v21 = vld [vmem:[#allocation3 + $0xd8] sm:$0xff]  ;;  %v3267_v34 = vld [vmem:[%s4332_s17 + $0xa0] sm:$0xff] }
 0x588   : > { %v3359_v57 = vadd.f32 %v3358_v13, %v3357_v62  ;;  %v4177_v23 = vpop.eup %4176  ;;  %v3294_v26 = vmul.f32 %v3262_v11, %v3230_v42  ;;  %v3324_v41 = vsub.f32 %v3196_v35, %v3292_v28  ;;  %v3364_v46 = vsel %vm3018_vm1, %v3322_v48, 0.0  ;;  %v3235_v62 = vld [vmem:[#allocation4 + $0xa0] sm:$0xff]  ;;  %v3076_v42 = vld [vmem:[#allocation2 + $0xa8] sm:$0xff] }
 0x589   : > { %v3156_v10 = vmul.f32 0.6931472, %v4175_v45  ;;  %4184 = vlog2.f32 %v3110_v51  ;;  %v3199_v7 = vadd.f32 %v3152_v63, %v3071_v2  ;;  %v3295_v16 = vmul.f32 %v3263_v40, %v3231_v8  ;;  %v3115_v28 = vld [vmem:[#allocation3 + $0xe0] sm:$0xff]  ;;  %v3268_v51 = vld [vmem:[%s4332_s17 + $0xa8] sm:$0xff]  ;;  %v3077_v8 = vld [vmem:[#allocation2 + $0xb0] sm:$0xff] }
 0x58a   : > { %v3361_v17 = vadd.f32 %v3360_v37, %v3359_v57  ;;  %v4179_v33 = vpop.eup %4178  ;;  %v3325_v24 = vsub.f32 %v3197_v44, %v3293_v19  ;;  %v3366_v12 = vsel %vm3018_vm1, %v3323_v49, 0.0  ;;  %v3158_v5 = vmul.f32 0.6931472, %v4177_v23  ;;  %v3236_v57 = vld [vmem:[#allocation4 + $0xa8] sm:$0xff] }
 0x58b   : > { %v4181_v3 = vpop.eup %4180  ;;  %4186 = vlog2.f32 %v3111_v6  ;;  %v3200_v27 = vadd.f32 %v3154_v0, %v3072_v30  ;;  %v3296_v22 = vmul.f32 %v3264_v14, %v3232_v29  ;;  %v3326_v4 = vsub.f32 %v3198_v53, %v3294_v26  ;;  %v3116_v19 = vld [vmem:[#allocation3 + $0xe8] sm:$0xff]  ;;  %v3269_v6 = vld [vmem:[%s4332_s17 + $0xb0] sm:$0xff]  ;;  %v3078_v29 = vld [vmem:[#allocation2 + $0xb8] sm:$0xff] }
 0x58c   : > { %v3363_v15 = vadd.f32 %v3362_v39, %v3361_v17  ;;  %v3368_v47 = vsel %vm3018_vm1, %v3324_v41, 0.0  ;;  %v3160_v59 = vmul.f32 0.6931472, %v4179_v33  ;;  %4188 = vlog2.f32 %v3112_v56  ;;  %v3237_v17 = vld [vmem:[#allocation4 + $0xb0] sm:$0xff]  ;;  %v3270_v56 = vld [vmem:[%s4332_s17 + $0xb8] sm:$0xff] }
 0x58d   : > { %v4183_v1 = vpop.eup %4182  ;;  %v3201_v60 = vadd.f32 %v3156_v10, %v3073_v58  ;;  %v3297_v13 = vmul.f32 %v3265_v50, %v3233_v36  ;;  %v3327_v31 = vsub.f32 %v3199_v7, %v3295_v16  ;;  %v3370_v32 = vsel %vm3018_vm1, %v3325_v24, 0.0  ;;  %v3117_v26 = vld [vmem:[#allocation3 + $0xf0] sm:$0xff]  ;;  %v3118_v16 = vld [vmem:[#allocation3 + $0xf8] sm:$0xff]  ;;  %v3079_v36 = vld [vmem:[#allocation2 + $0xc0] sm:$0xff] }
 0x58e   : > { %v3365_v9 = vadd.f32 %v3364_v46, %v3363_v15  ;;  %v3162_v54 = vmul.f32 0.6931472, %v4181_v3  ;;  %4190 = vlog2.f32 %v3113_v61  ;;  %v3202_v48 = vadd.f32 %v3158_v5, %v3074_v18  ;;  %v3238_v15 = vld [vmem:[#allocation4 + $0xb8] sm:$0xff]  ;;  %v3271_v61 = vld [vmem:[%s4332_s17 + $0xc0] sm:$0xff] }
 0x58f   : > { %v4185_v38 = vpop.eup %4184  ;;  %v3298_v37 = vmul.f32 %v3266_v43, %v3234_v55  ;;  %v3328_v45 = vsub.f32 %v3200_v27, %v3296_v22  ;;  %v3372_v52 = vsel %vm3018_vm1, %v3326_v4, 0.0  ;;  %v3164_v11 = vmul.f32 0.6931472, %v4183_v1  ;;  %v3240_v43 = vld [vmem:[#allocation4 + $0xc8] sm:$0xff] }
 0x590   : > { %v3367_v25 = vadd.f32 %v3366_v12, %v3365_v9  ;;  %4192 = vlog2.f32 %v3114_v21  ;;  %v3203_v49 = vadd.f32 %v3160_v59, %v3075_v20  ;;  %v3299_v39 = vmul.f32 %v3267_v34, %v3235_v62  ;;  %v3239_v9 = vld [vmem:[#allocation4 + $0xc0] sm:$0xff]  ;;  %v3080_v59 = vld [vmem:[#allocation2 + $0xc8] sm:$0xff]  ;;  %v3081_v20 = vld [vmem:[#allocation2 + $0xd0] sm:$0xff] }
 0x591   : > { %v4187_v63 = vpop.eup %4186  ;;  %v3329_v23 = vsub.f32 %v3201_v60, %v3297_v13  ;;  %v3374_v2 = vsel %vm3018_vm1, %v3327_v31, 0.0  ;;  %v3166_v40 = vmul.f32 0.6931472, %v4185_v38  ;;  %4194 = vlog2.f32 %v3115_v28  ;;  %v3241_v62 = vld [vmem:[#allocation4 + $0xd0] sm:$0xff] }
 0x592   : > { %v3369_v35 = vadd.f32 %v3368_v47, %v3367_v25  ;;  %v4189_v0 = vpop.eup %4188  ;;  %v3204_v41 = vadd.f32 %v3162_v54, %v3076_v42  ;;  %v3300_v46 = vmul.f32 %v3268_v51, %v3236_v57  ;;  %v3330_v33 = vsub.f32 %v3202_v48, %v3298_v37  ;;  %v3272_v25 = vld [vmem:[%s4332_s17 + $0xc8] sm:$0xff]  ;;  %v3273_v34 = vld [vmem:[%s4332_s17 + $0xd0] sm:$0xff]  ;;  %v3274_v57 = vld [vmem:[%s4332_s17 + $0xd8] sm:$0xff] }
 0x593   : > { %v3376_v30 = vsel %vm3018_vm1, %v3328_v45, 0.0  ;;  %v3168_v14 = vmul.f32 0.6931472, %v4187_v63  ;;  %4196 = vlog2.f32 %v3116_v19  ;;  %v3205_v24 = vadd.f32 %v3164_v11, %v3077_v8  ;;  %v3082_v63 = vld [vmem:[#allocation2 + $0xd8] sm:$0xff]  ;;  %v3243_v8 = vld [vmem:[#allocation4 + $0xe0] sm:$0xff] }
 0x594   : > { %v3371_v44 = vadd.f32 %v3370_v32, %v3369_v35  ;;  %v4191_v10 = vpop.eup %4190  ;;  %v3301_v12 = vmul.f32 %v3269_v6, %v3237_v17  ;;  %v3331_v3 = vsub.f32 %v3203_v49, %v3299_v39  ;;  %v3378_v58 = vsel %vm3018_vm1, %v3329_v23, 0.0  ;;  %v3242_v11 = vld [vmem:[#allocation4 + $0xd8] sm:$0xff] }
 0x595   : > { %v3170_v50 = vmul.f32 0.6931472, %v4189_v0  ;;  %4198 = vlog2.f32 %v3117_v26  ;;  %v3206_v22 = vadd.f32 %v3166_v40, %v3078_v29  ;;  %v3302_v4 = vmul.f32 %v3270_v56, %v3238_v15  ;;  %v3275_v40 = vld [vmem:[%s4332_s17 + $0xe0] sm:$0xff] }
 0x596   : > { %v3373_v53 = vadd.f32 %v3372_v52, %v3371_v44  ;;  %v4193_v5 = vpop.eup %4192  ;;  %v3332_v47 = vsub.f32 %v3204_v41, %v3300_v46  ;;  %v3380_v1 = vsel %vm3018_vm1, %v3330_v33, 0.0  ;;  %v3172_v55 = vmul.f32 0.6931472, %v4191_v10  ;;  %v3084_v46 = vld [vmem:[#allocation2 + $0xe8] sm:$0xff] }
 0x597   : > { %v4195_v18 = vpop.eup %4194  ;;  %4200 = vlog2.f32 %v3118_v16  ;;  %v3207_v60 = vadd.f32 %v3168_v14, %v3079_v36  ;;  %v3303_v13 = vmul.f32 %v3271_v61, %v3239_v9  ;;  %v3333_v31 = vsub.f32 %v3205_v24, %v3301_v12  ;;  %v3276_v10 = vld [vmem:[%s4332_s17 + $0xe8] sm:$0xff]  ;;  %v3085_v16 = vld [vmem:[#allocation2 + $0xf0] sm:$0xff]  ;;  %v3086_v61 = vld [vmem:[#allocation2 + $0xf8] sm:$0xff] }
 0x598   : > { %v3375_v7 = vadd.f32 %v3374_v2, %v3373_v53  ;;  %v3382_v32 = vsel %vm3018_vm1, %v3331_v3, 0.0  ;;  %v3174_v54 = vmul.f32 0.6931472, %v4193_v5  ;;  %v3208_v28 = vadd.f32 %v3170_v50, %v3080_v59  ;;  %v3083_v2 = vld [vmem:[#allocation2 + $0xe0] sm:$0xff]  ;;  %v3245_v12 = vld [vmem:[#allocation4 + $0xf0] sm:$0xff] }
 0x599   : > { %v4197_v38 = vpop.eup %4196  ;;  %v3304_v48 = vmul.f32 %v3272_v25, %v3240_v43  ;;  %v3334_v37 = vsub.f32 %v3206_v22, %v3302_v4  ;;  %v3384_v45 = vsel %vm3018_vm1, %v3332_v47, 0.0  ;;  %v3176_v42 = vmul.f32 0.6931472, %v4195_v18  ;;  %v3277_v3 = vld [vmem:[%s4332_s17 + $0xf0] sm:$0xff]  ;;  %v3278_v22 = vld [vmem:[%s4332_s17 + $0xf8] sm:$0xff] }
 0x59a   : > { %v3377_v27 = vadd.f32 %v3376_v30, %v3375_v7  ;;  %v3209_v44 = vadd.f32 %v3172_v55, %v3081_v20  ;;  %v3305_v19 = vmul.f32 %v3273_v34, %v3241_v62  ;;  %v3335_v49 = vsub.f32 %v3207_v60, %v3303_v13  ;;  %v3244_v30 = vld [vmem:[#allocation4 + $0xe8] sm:$0xff] }
 0x59b   : > { %v4199_v52 = vpop.eup %4198  ;;  %v3386_v39 = vsel %vm3018_vm1, %v3333_v31, 0.0  ;;  %v3178_v0 = vmul.f32 0.6931472, %v4197_v38  ;;  %v3210_v6 = vadd.f32 %v3174_v54, %v3082_v63  ;;  %v3306_v53 = vmul.f32 %v3274_v57, %v3242_v11 }
 0x59c   : > { %v3379_v21 = vadd.f32 %v3378_v58, %v3377_v27  ;;  %v3336_v26 = vsub.f32 %v3208_v28, %v3304_v48  ;;  %v3388_v41 = vsel %vm3018_vm1, %v3334_v37, 0.0  ;;  %v3180_v33 = vmul.f32 0.6931472, %v4199_v52  ;;  %v3246_v27 = vld [vmem:[#allocation4 + $0xf8] sm:$0xff] }
 0x59d   : > { %v4201_v23 = vpop.eup %4200  ;;  %v3211_v14 = vadd.f32 %v3176_v42, %v3083_v2  ;;  %v3307_v15 = vmul.f32 %v3275_v40, %v3243_v8  ;;  %v3337_v56 = vsub.f32 %v3209_v44, %v3305_v19  ;;  %v3390_v7 = vsel %vm3018_vm1, %v3335_v49, 0.0 }
 0x59e   : > { %v3381_v35 = vadd.f32 %v3380_v1, %v3379_v21  ;;  %v3182_v24 = vmul.f32 0.6931472, %v4201_v23  ;;  %v3212_v5 = vadd.f32 %v3178_v0, %v3084_v46  ;;  %v3308_v36 = vmul.f32 %v3276_v10, %v3244_v30 }
 0x59f   : > { %v3338_v50 = vsub.f32 %v3210_v6, %v3306_v53  ;;  %v3392_v9 = vsel %vm3018_vm1, %v3336_v26, 0.0  ;;  %v3213_v47 = vadd.f32 %v3180_v33, %v3085_v16  ;;  %v3309_v1 = vmul.f32 %v3277_v3, %v3245_v12 }
 0x5a0   : > { %v3383_v51 = vadd.f32 %v3382_v32, %v3381_v35  ;;  %v3339_v18 = vsub.f32 %v3211_v14, %v3307_v15  ;;  %v3394_v59 = vsel %vm3018_vm1, %v3337_v56, 0.0  ;;  %v3214_v43 = vadd.f32 %v3182_v24, %v3086_v61 }
 0x5a1   : > { %v3310_v25 = vmul.f32 %v3278_v22, %v3246_v27  ;;  %v3340_v21 = vsub.f32 %v3212_v5, %v3308_v36  ;;  %v3396_v60 = vsel %vm3018_vm1, %v3338_v50, 0.0  ;;  %v3341_v31 = vsub.f32 %v3213_v47, %v3309_v1 }
 0x5a2   : > { %v3385_v17 = vadd.f32 %v3384_v45, %v3383_v51  ;;  %v3398_v32 = vsel %vm3018_vm1, %v3339_v18, 0.0 }
 0x5a3   : > { %v3342_v20 = vsub.f32 %v3214_v43, %v3310_v25  ;;  %v3400_v54 = vsel %vm3018_vm1, %v3340_v21, 0.0  ;;  %v3402_v34 = vsel %vm3018_vm1, %v3341_v31, 0.0 }
 0x5a4   : > { %v3387_v29 = vadd.f32 %v3386_v39, %v3385_v17 }
 0x5a5   : > { %v3404_v28 = vsel %vm3018_vm1, %v3342_v20, 0.0 }
 0x5a6   : > { %v3389_v58 = vadd.f32 %v3388_v41, %v3387_v29 }
 0x5a8   : > { %v3391_v4 = vadd.f32 %v3390_v7, %v3389_v58 }
 0x5aa   : > { %v3393_v55 = vadd.f32 %v3392_v9, %v3391_v4 }
 0x5ac   : > { %v3395_v13 = vadd.f32 %v3394_v59, %v3393_v55 }
 0x5ae   : > { %v3397_v38 = vadd.f32 %v3396_v60, %v3395_v13 }
 0x5b0   : > { %v3399_v62 = vadd.f32 %v3398_v32, %v3397_v38 }
 0x5b2   : > { %v3401_v35 = vadd.f32 %v3400_v54, %v3399_v62 }
 0x5b4   : > { %v3403_v48 = vadd.f32 %v3402_v34, %v3401_v35 }
 0x5b6   : > { %v3405_v37 = vadd.f32 %v3404_v28, %v3403_v48 }
 0x5b8   : > { %v3406_v45 = vrot.slane %v3405_v37, 4 }
 0x5ba   : > { %v3407_v52 = vadd.f32 %v3406_v45, %v3405_v37 }
 0x5bc   : > { %v3408_v63 = vrot.slane %v3407_v52, 2 }
 0x5be   : > { %v3409_v42 = vadd.f32 %v3408_v63, %v3407_v52 }
 0x5c0   : > { %v3410_v11 = vrot.slane %v3409_v42, 1 }
 0x5c2   : > { %v3411_v57 = vadd.f32 %v3410_v11, %v3409_v42 }
 0x5c4   : > { %3414 = vperm.xlu0 %4137, %v3411_v57  }
 0x636   : > { %v3415_v51 = vpop.permute.xlu0 %3414 }
 0x637   : > { %3417 = vst [vmem:[%s4344_s10] sm:$0xff] %v3415_v51 }
 0x638 PF: > { %s15_s22 = sadd.s32 1, %s4240_s22   ;;  %s7829_s18 = smov %s4232_s20 }
 0x639   : > { %p12_p13 = scmp.ge.s32.totalorder %s15_s22, 6   ;;  %s7830_s19 = smov %s4236_s21 }
 0x63a   : > { %s7831_s20 = smov %s7834_s23  ;;  %s7832_s21 = smov %s7838_s24 }
 0x63b   :  { %14 = sbr.rel (!%p12_p13) target bundleno = 3 (0x3), region = 98 }

</bundles_post_ra>
